<compile_context>
chip_gen: v7x
topology: tpu7x:2x2x1
jax: 0.10.0
libtpu: 0.0.40
codegen_flags: <defaults>
</compile_context>

<pallas_src>
import functools

import jax
import jax.numpy as jnp
from jax import lax
from jax.experimental import pallas as pl
from jax.experimental.pallas import tpu as pltpu

BN_EPS = 1e-5
LANE = 128          # lane width
SUB = 8             # f32 sublane tile
ROW_PAD = 16        # bf16 sublane tile (pad fused-kernel rows to this)
MAX_FUSED_ROWS = 4096   # single-step fused BN kernel cap (VMEM safety)
LAST_TN = 2048          # lane tile (columns of y^T) for the final layer


def _round_up(x, m):
    return -(-x // m) * m


# ---------------------------------------------------------------------------
# Pallas kernels
# ---------------------------------------------------------------------------
def _convbn_relu_kernel(a_ref, b_ref, o_ref, *, count, pad_rows):
    """Fused: y = a @ b (bf16 in, f32 acc), BatchNorm(batch stats) + ReLU, bf16 out.

    a: (Mp, Kc) bf16   b: (Kc, 128) bf16   o: (Mp, 128) bf16
    `count` is the true (unpadded) row count; padded rows of `a` are zero.
    """
    y = jnp.dot(a_ref[...], b_ref[...], preferred_element_type=jnp.float32)
    inv = 1.0 / count
    mean = jnp.sum(y, axis=0, keepdims=True) * inv
    d = y - mean
    # Centered variance.  Zero-padded rows contribute mean^2 each -> subtract.
    var = (jnp.sum(d * d, axis=0, keepdims=True) - pad_rows * mean * mean) * inv
    scale = lax.rsqrt(var + BN_EPS)           # gamma = 1 (default init)
    o_ref[...] = jnp.maximum(d * scale, 0.0).astype(o_ref.dtype)   # beta = 0


def fused_convbn_relu(a, b, count):
    mp, kc = a.shape
    _, c = b.shape
    kern = functools.partial(_convbn_relu_kernel,
                             count=float(count), pad_rows=float(mp - count))
    return pl.pallas_call(
        kern,
        out_shape=jax.ShapeDtypeStruct((mp, c), jnp.bfloat16),
        grid=(1,),
        in_specs=[pl.BlockSpec((mp, kc), lambda i: (0, 0)),
                  pl.BlockSpec((kc, c), lambda i: (0, 0))],
        out_specs=pl.BlockSpec((mp, c), lambda i: (0, 0)),
        compiler_params=pltpu.CompilerParams(dimension_semantics=("arbitrary",)),
    )(a, b)


def _convT_tanh_kernel(bT_ref, aT_ref, o_ref):
    """Final layer, transposed: y^T = tanh(B^T @ A^T).  Cout on sublanes (pad 8)."""
    y = jnp.dot(bT_ref[...], aT_ref[...], preferred_element_type=jnp.float32)
    o_ref[...] = jnp.tanh(y)


def final_conv_tanh(bT, aT, tn):
    cp, kc = bT.shape            # (8, Kc)
    _, mp = aT.shape             # (Kc, Mp)
    return pl.pallas_call(
        _convT_tanh_kernel,
        out_shape=jax.ShapeDtypeStruct((cp, mp), jnp.float32),
        grid=(mp // tn,),
        in_specs=[pl.BlockSpec((cp, kc), lambda i: (0, 0)),
                  pl.BlockSpec((kc, tn), lambda i: (0, i))],
        out_specs=pl.BlockSpec((cp, tn), lambda i: (0, i)),
        compiler_params=pltpu.CompilerParams(dimension_semantics=("parallel",)),
    )(bT, aT)


# ---------------------------------------------------------------------------
# Glue (plain JAX): conv-transpose -> dilated-conv -> im2col matmul operands
# ---------------------------------------------------------------------------
def _dilate_pad(x, stride, pad):
    # x: (N, H, W, C) NHWC
    n, h, w, c = x.shape
    if stride > 1:
        hd, wd = (h - 1) * stride + 1, (w - 1) * stride + 1
        xd = jnp.zeros((n, hd, wd, c), x.dtype).at[:, ::stride, ::stride, :].set(x)
    else:
        xd = x
    return jnp.pad(xd, ((0, 0), (pad, pad), (pad, pad), (0, 0)))


def _im2col(xp, K, Ho, Wo):
    # xp: (N, Hp, Wp, Cin) -> (N*Ho*Wo, K*K*Cin), inner order (ky, kx, ci)
    n, _, _, cin = xp.shape
    cols = [xp[:, ky:ky + Ho, kx:kx + Wo, :] for ky in range(K) for kx in range(K)]
    patches = jnp.concatenate(cols, axis=-1)
    return patches.reshape(n * Ho * Wo, K * K * cin)


def _im2col_T(xp, K, Ho, Wo):
    # xp: (N, Hp, Wp, Cin) -> (K*K*Cin, N*Ho*Wo), row order (ky, kx, ci)
    n, _, _, cin = xp.shape
    cols = [jnp.moveaxis(xp[:, ky:ky + Ho, kx:kx + Wo, :], 3, 0).reshape(cin, n * Ho * Wo)
            for ky in range(K) for kx in range(K)]
    return jnp.concatenate(cols, axis=0)


def _conv_weight(w_t):
    # PyTorch ConvTranspose2d weight (Cin, Cout, K, K) -> direct-conv matrix
    # of shape (K*K*Cin, Cout), row order (ky, kx, ci), kernel spatially flipped.
    cin, cout, K, _ = w_t.shape
    w_conv = jnp.transpose(w_t, (2, 3, 0, 1))[::-1, ::-1, :, :]   # (K, K, Cin, Cout)
    return w_conv.reshape(K * K * cin, cout)


def generator_forward(x_nchw, layers):
    x = jnp.transpose(x_nchw, (0, 2, 3, 1)).astype(jnp.bfloat16)  # NCHW -> NHWC bf16
    n_layers = len(layers)
    out = None
    for li, (w_t, stride, padding) in enumerate(layers):
        cin, cout, K, _ = w_t.shape
        n, h, w, _ = x.shape
        ho = (h - 1) * stride - 2 * padding + K
        wo = (w - 1) * stride - 2 * padding + K
        M = n * ho * wo
        xp = _dilate_pad(x, stride, K - 1 - padding)

        if li < n_layers - 1:
            # --- ConvTranspose + BatchNorm(batch stats) + ReLU, fully fused ----
            mp = _round_up(M, ROW_PAD)
            if mp > MAX_FUSED_ROWS:
                # TODO(synk): split path (per-tile partial stats + second pass)
                # for very large batches / resolutions.
                raise NotImplementedError("fused BN path sized for small M")
            cpad = _round_up(cout, LANE)
            a = _im2col(xp, K, ho, wo)                       # (M, K*K*Cin) bf16
            if mp != M:
                a = jnp.pad(a, ((0, mp - M), (0, 0)))
            b = jnp.pad(_conv_weight(w_t),
                        ((0, 0), (0, cpad - cout))).astype(jnp.bfloat16)
            y = fused_convbn_relu(a, b, M)                   # (mp, cpad) bf16
            x = y[:M, :cout].reshape(n, ho, wo, cout)        # drop padding
        else:
            # --- final ConvTranspose + Tanh, transposed (Cout on sublanes) ----
            tn = LAST_TN if M >= LAST_TN else _round_up(M, LANE)
            mp = _round_up(M, tn)
            aT = _im2col_T(xp, K, ho, wo)                    # (K*K*Cin, M) bf16
            if mp != M:
                aT = jnp.pad(aT, ((0, 0), (0, mp - M)))
            cp = _round_up(cout, SUB)
            bT = jnp.pad(_conv_weight(w_t).T,
                         ((0, cp - cout), (0, 0))).astype(jnp.bfloat16)
            yT = final_conv_tanh(bT, aT, tn)                 # (cp, mp) f32
            out = yT[:cout, :M].reshape(cout, n, ho, wo).transpose(1, 0, 2, 3)
    return out.astype(jnp.float32)                           # NCHW


# ---------------------------------------------------------------------------
# Reference forward (pure JAX/XLA) with the same bf16 matmul operands,
# used only for a numerical sanity check.
# ---------------------------------------------------------------------------
def reference_forward(x_nchw, layers):
    x = x_nchw.astype(jnp.bfloat16)
    for li, (w_t, stride, padding) in enumerate(layers):
        K = w_t.shape[-1]
        w_conv = jnp.transpose(w_t, (1, 0, 2, 3))[:, :, ::-1, ::-1]   # OIHW, flipped
        y = lax.conv_general_dilated(
            x, w_conv.astype(jnp.bfloat16), window_strides=(1, 1),
            padding=[(K - 1 - padding,) * 2] * 2,
            lhs_dilation=(stride, stride),
            dimension_numbers=("NCHW", "OIHW", "NCHW"),
            preferred_element_type=jnp.float32)
        if li < len(layers) - 1:
            mean = jnp.mean(y, axis=(0, 2, 3), keepdims=True)
            var = jnp.mean((y - mean) ** 2, axis=(0, 2, 3), keepdims=True)
            y = jnp.maximum((y - mean) * lax.rsqrt(var + BN_EPS), 0.0)
            x = y.astype(jnp.bfloat16)
        else:
            x = jnp.tanh(y)
    return x.astype(jnp.float32)


def init_layers(key, nz, ngf, nc):
    specs = [
        (nz,      ngf * 8, 1, 0),
        (ngf * 8, ngf * 4, 2, 1),
        (ngf * 4, ngf * 2, 2, 1),
        (ngf * 2, ngf,     2, 1),
        (ngf,     nc,      2, 1),
    ]
    layers = []
    for cin, cout, s, p in specs:
        key, sub = jax.random.split(key)
        w = jax.random.normal(sub, (cin, cout, 4, 4), jnp.float32) * 0.02
        layers.append((w, s, p))
    return layers


if __name__ == "__main__":
    nz, ngf, nc, batch = 16, 8, 3, 2

    key = jax.random.PRNGKey(0)
    key, wkey, xkey = jax.random.split(key, 3)
    layers = init_layers(wkey, nz, ngf, nc)
    x = jax.random.normal(xkey, (batch, nz, 1, 1), jnp.float32)  # latent z, NCHW

    fwd = jax.jit(lambda inp: generator_forward(inp, layers))
    out = jax.block_until_ready(fwd(x))
    assert out.shape == (batch, nc, 64, 64), out.shape

    ref = jax.block_until_ready(reference_forward(x, layers))
    max_diff = float(jnp.max(jnp.abs(out - ref)))
    assert max_diff < 1e-2, f"mismatch vs reference: {max_diff}"

    print("KERNEL_OK")
</pallas_src>

<mosaic_0001>
module attributes {stable_mosaic.version = 11 : i64} {
  func.func @_convbn_relu_kernel(%arg0: i32, %arg1: memref<32x256xbf16, #tpu.memory_space<vmem>>, %arg2: memref<256x128xbf16, #tpu.memory_space<vmem>>, %arg3: memref<32x128xbf16, #tpu.memory_space<vmem>>) attributes {dimension_semantics = [#tpu.dimension_semantics<arbitrary>], iteration_bounds = array<i64: 1>, scalar_prefetch = 0 : i64, scratch_operands = 0 : i64, tpu.core_type = #tpu.core_type<tc>, window_params = [{pipeline_mode = #tpu.pipeline_mode<synchronous>, transform_indices = @transform_0, window_bounds = array<i64: 32, 256>}, {pipeline_mode = #tpu.pipeline_mode<synchronous>, transform_indices = @transform_1, window_bounds = array<i64: 256, 128>}, {pipeline_mode = #tpu.pipeline_mode<synchronous>, transform_indices = @transform_2, window_bounds = array<i64: 32, 128>}]} {
    %c0 = arith.constant 0 : index
    %c0_0 = arith.constant 0 : index
    %0 = vector.load %arg1[%c0, %c0_0] : memref<32x256xbf16, #tpu.memory_space<vmem>>, vector<32x256xbf16>
    %c0_1 = arith.constant 0 : index
    %c0_2 = arith.constant 0 : index
    %1 = vector.load %arg2[%c0_1, %c0_2] : memref<256x128xbf16, #tpu.memory_space<vmem>>, vector<256x128xbf16>
    %cst = arith.constant dense<0.000000e+00> : vector<32x128xf32>
    %2 = tpu.matmul %0, %1, %cst {dimension_numbers = #tpu.dot_dimension_numbers<[1], [0], [0], [1], [0, 0, 1, 1], [], []>} : vector<32x256xbf16>, vector<256x128xbf16>, vector<32x128xf32> -> vector<32x128xf32>
    %cst_3 = arith.constant dense<0.000000e+00> : vector<128xf32>
    %3 = vector.multi_reduction <add>, %2, %cst_3 [0] : vector<32x128xf32> to vector<128xf32>
    %4 = vector.shape_cast %3 : vector<128xf32> to vector<1x128xf32>
    %cst_4 = arith.constant 3.125000e-02 : f32
    %5 = vector.broadcast %cst_4 : f32 to vector<1x128xf32>
    %6 = arith.mulf %4, %5 : vector<1x128xf32>
    %7 = vector.broadcast %6 : vector<1x128xf32> to vector<32x128xf32>
    %8 = arith.subf %2, %7 : vector<32x128xf32>
    %9 = arith.mulf %8, %8 : vector<32x128xf32>
    %cst_5 = arith.constant dense<0.000000e+00> : vector<128xf32>
    %10 = vector.multi_reduction <add>, %9, %cst_5 [0] : vector<32x128xf32> to vector<128xf32>
    %11 = vector.shape_cast %10 : vector<128xf32> to vector<1x128xf32>
    %cst_6 = arith.constant 0.000000e+00 : f32
    %12 = vector.broadcast %cst_6 : f32 to vector<1x128xf32>
    %13 = arith.mulf %12, %6 : vector<1x128xf32>
    %14 = arith.mulf %13, %6 : vector<1x128xf32>
    %15 = arith.subf %11, %14 : vector<1x128xf32>
    %cst_7 = arith.constant 3.125000e-02 : f32
    %16 = vector.broadcast %cst_7 : f32 to vector<1x128xf32>
    %17 = arith.mulf %15, %16 : vector<1x128xf32>
    %cst_8 = arith.constant 9.99999974E-6 : f32
    %18 = vector.broadcast %cst_8 : f32 to vector<1x128xf32>
    %19 = arith.addf %17, %18 : vector<1x128xf32>
    %20 = math.rsqrt %19 : vector<1x128xf32>
    %21 = vector.broadcast %20 : vector<1x128xf32> to vector<32x128xf32>
    %22 = arith.mulf %8, %21 : vector<32x128xf32>
    %cst_9 = arith.constant 0.000000e+00 : f32
    %23 = vector.broadcast %cst_9 : f32 to vector<32x128xf32>
    %24 = arith.maximumf %22, %23 : vector<32x128xf32>
    %25 = arith.truncf %24 : vector<32x128xf32> to vector<32x128xbf16>
    %c0_10 = arith.constant 0 : index
    %c0_11 = arith.constant 0 : index
    %26 = vector.load %arg3[%c0_10, %c0_11] : memref<32x128xbf16, #tpu.memory_space<vmem>>, vector<32x128xbf16>
    tpu.vector_store %arg3[%c0_10, %c0_11], %25 {strides = array<i32>} : memref<32x128xbf16, #tpu.memory_space<vmem>>, vector<32x128xbf16>,
    return
  }
  func.func @transform_0(%arg0: i32) -> (i32, i32) {
    %c0_i32 = arith.constant 0 : i32
    %c0_i32_0 = arith.constant 0 : i32
    %c0_i32_1 = arith.constant 0 : i32
    return %c0_i32, %c0_i32_0 : i32, i32
  }
  func.func @transform_1(%arg0: i32) -> (i32, i32) {
    %c0_i32 = arith.constant 0 : i32
    %c0_i32_0 = arith.constant 0 : i32
    %c0_i32_1 = arith.constant 0 : i32
    return %c0_i32, %c0_i32_0 : i32, i32
  }
  func.func @transform_2(%arg0: i32) -> (i32, i32) {
    %c0_i32 = arith.constant 0 : i32
    %c0_i32_0 = arith.constant 0 : i32
    %c0_i32_1 = arith.constant 0 : i32
    return %c0_i32, %c0_i32_0 : i32, i32
  }
}

module attributes {stable_mosaic.version = 11 : i64} {
  func.func @_convbn_relu_kernel(%arg0: i32, %arg1: memref<128x1024xbf16, #tpu.memory_space<vmem>>, %arg2: memref<1024x128xbf16, #tpu.memory_space<vmem>>, %arg3: memref<128x128xbf16, #tpu.memory_space<vmem>>) attributes {dimension_semantics = [#tpu.dimension_semantics<arbitrary>], iteration_bounds = array<i64: 1>, scalar_prefetch = 0 : i64, scratch_operands = 0 : i64, tpu.core_type = #tpu.core_type<tc>, window_params = [{pipeline_mode = #tpu.pipeline_mode<synchronous>, transform_indices = @transform_0, window_bounds = array<i64: 128, 1024>}, {pipeline_mode = #tpu.pipeline_mode<synchronous>, transform_indices = @transform_1, window_bounds = array<i64: 1024, 128>}, {pipeline_mode = #tpu.pipeline_mode<synchronous>, transform_indices = @transform_2, window_bounds = array<i64: 128, 128>}]} {
    %c0 = arith.constant 0 : index
    %c0_0 = arith.constant 0 : index
    %0 = vector.load %arg1[%c0, %c0_0] : memref<128x1024xbf16, #tpu.memory_space<vmem>>, vector<128x1024xbf16>
    %c0_1 = arith.constant 0 : index
    %c0_2 = arith.constant 0 : index
    %1 = vector.load %arg2[%c0_1, %c0_2] : memref<1024x128xbf16, #tpu.memory_space<vmem>>, vector<1024x128xbf16>
    %cst = arith.constant dense<0.000000e+00> : vector<128x128xf32>
    %2 = tpu.matmul %0, %1, %cst {dimension_numbers = #tpu.dot_dimension_numbers<[1], [0], [0], [1], [0, 0, 1, 1], [], []>} : vector<128x1024xbf16>, vector<1024x128xbf16>, vector<128x128xf32> -> vector<128x128xf32>
    %cst_3 = arith.constant dense<0.000000e+00> : vector<128xf32>
    %3 = vector.multi_reduction <add>, %2, %cst_3 [0] : vector<128x128xf32> to vector<128xf32>
    %4 = vector.shape_cast %3 : vector<128xf32> to vector<1x128xf32>
    %cst_4 = arith.constant 7.812500e-03 : f32
    %5 = vector.broadcast %cst_4 : f32 to vector<1x128xf32>
    %6 = arith.mulf %4, %5 : vector<1x128xf32>
    %7 = vector.broadcast %6 : vector<1x128xf32> to vector<128x128xf32>
    %8 = arith.subf %2, %7 : vector<128x128xf32>
    %9 = arith.mulf %8, %8 : vector<128x128xf32>
    %cst_5 = arith.constant dense<0.000000e+00> : vector<128xf32>
    %10 = vector.multi_reduction <add>, %9, %cst_5 [0] : vector<128x128xf32> to vector<128xf32>
    %11 = vector.shape_cast %10 : vector<128xf32> to vector<1x128xf32>
    %cst_6 = arith.constant 0.000000e+00 : f32
    %12 = vector.broadcast %cst_6 : f32 to vector<1x128xf32>
    %13 = arith.mulf %12, %6 : vector<1x128xf32>
    %14 = arith.mulf %13, %6 : vector<1x128xf32>
    %15 = arith.subf %11, %14 : vector<1x128xf32>
    %cst_7 = arith.constant 7.812500e-03 : f32
    %16 = vector.broadcast %cst_7 : f32 to vector<1x128xf32>
    %17 = arith.mulf %15, %16 : vector<1x128xf32>
    %cst_8 = arith.constant 9.99999974E-6 : f32
    %18 = vector.broadcast %cst_8 : f32 to vector<1x128xf32>
    %19 = arith.addf %17, %18 : vector<1x128xf32>
    %20 = math.rsqrt %19 : vector<1x128xf32>
    %21 = vector.broadcast %20 : vector<1x128xf32> to vector<128x128xf32>
    %22 = arith.mulf %8, %21 : vector<128x128xf32>
    %cst_9 = arith.constant 0.000000e+00 : f32
    %23 = vector.broadcast %cst_9 : f32 to vector<128x128xf32>
    %24 = arith.maximumf %22, %23 : vector<128x128xf32>
    %25 = arith.truncf %24 : vector<128x128xf32> to vector<128x128xbf16>
    %c0_10 = arith.constant 0 : index
    %c0_11 = arith.constant 0 : index
    %26 = vector.load %arg3[%c0_10, %c0_11] : memref<128x128xbf16, #tpu.memory_space<vmem>>, vector<128x128xbf16>
    tpu.vector_store %arg3[%c0_10, %c0_11], %25 {strides = array<i32>} : memref<128x128xbf16, #tpu.memory_space<vmem>>, vector<128x128xbf16>,
    return
  }
  func.func @transform_0(%arg0: i32) -> (i32, i32) {
    %c0_i32 = arith.constant 0 : i32
    %c0_i32_0 = arith.constant 0 : i32
    %c0_i32_1 = arith.constant 0 : i32
    return %c0_i32, %c0_i32_0 : i32, i32
  }
  func.func @transform_1(%arg0: i32) -> (i32, i32) {
    %c0_i32 = arith.constant 0 : i32
    %c0_i32_0 = arith.constant 0 : i32
    %c0_i32_1 = arith.constant 0 : i32
    return %c0_i32, %c0_i32_0 : i32, i32
  }
  func.func @transform_2(%arg0: i32) -> (i32, i32) {
    %c0_i32 = arith.constant 0 : i32
    %c0_i32_0 = arith.constant 0 : i32
    %c0_i32_1 = arith.constant 0 : i32
    return %c0_i32, %c0_i32_0 : i32, i32
  }
}

module attributes {stable_mosaic.version = 11 : i64} {
  func.func @_convbn_relu_kernel(%arg0: i32, %arg1: memref<512x512xbf16, #tpu.memory_space<vmem>>, %arg2: memref<512x128xbf16, #tpu.memory_space<vmem>>, %arg3: memref<512x128xbf16, #tpu.memory_space<vmem>>) attributes {dimension_semantics = [#tpu.dimension_semantics<arbitrary>], iteration_bounds = array<i64: 1>, scalar_prefetch = 0 : i64, scratch_operands = 0 : i64, tpu.core_type = #tpu.core_type<tc>, window_params = [{pipeline_mode = #tpu.pipeline_mode<synchronous>, transform_indices = @transform_0, window_bounds = array<i64: 512, 512>}, {pipeline_mode = #tpu.pipeline_mode<synchronous>, transform_indices = @transform_1, window_bounds = array<i64: 512, 128>}, {pipeline_mode = #tpu.pipeline_mode<synchronous>, transform_indices = @transform_2, window_bounds = array<i64: 512, 128>}]} {
    %c0 = arith.constant 0 : index
    %c0_0 = arith.constant 0 : index
    %0 = vector.load %arg1[%c0, %c0_0] : memref<512x512xbf16, #tpu.memory_space<vmem>>, vector<512x512xbf16>
    %c0_1 = arith.constant 0 : index
    %c0_2 = arith.constant 0 : index
    %1 = vector.load %arg2[%c0_1, %c0_2] : memref<512x128xbf16, #tpu.memory_space<vmem>>, vector<512x128xbf16>
    %cst = arith.constant dense<0.000000e+00> : vector<512x128xf32>
    %2 = tpu.matmul %0, %1, %cst {dimension_numbers = #tpu.dot_dimension_numbers<[1], [0], [0], [1], [0, 0, 1, 1], [], []>} : vector<512x512xbf16>, vector<512x128xbf16>, vector<512x128xf32> -> vector<512x128xf32>
    %cst_3 = arith.constant dense<0.000000e+00> : vector<128xf32>
    %3 = vector.multi_reduction <add>, %2, %cst_3 [0] : vector<512x128xf32> to vector<128xf32>
    %4 = vector.shape_cast %3 : vector<128xf32> to vector<1x128xf32>
    %cst_4 = arith.constant 0.001953125 : f32
    %5 = vector.broadcast %cst_4 : f32 to vector<1x128xf32>
    %6 = arith.mulf %4, %5 : vector<1x128xf32>
    %7 = vector.broadcast %6 : vector<1x128xf32> to vector<512x128xf32>
    %8 = arith.subf %2, %7 : vector<512x128xf32>
    %9 = arith.mulf %8, %8 : vector<512x128xf32>
    %cst_5 = arith.constant dense<0.000000e+00> : vector<128xf32>
    %10 = vector.multi_reduction <add>, %9, %cst_5 [0] : vector<512x128xf32> to vector<128xf32>
    %11 = vector.shape_cast %10 : vector<128xf32> to vector<1x128xf32>
    %cst_6 = arith.constant 0.000000e+00 : f32
    %12 = vector.broadcast %cst_6 : f32 to vector<1x128xf32>
    %13 = arith.mulf %12, %6 : vector<1x128xf32>
    %14 = arith.mulf %13, %6 : vector<1x128xf32>
    %15 = arith.subf %11, %14 : vector<1x128xf32>
    %cst_7 = arith.constant 0.001953125 : f32
    %16 = vector.broadcast %cst_7 : f32 to vector<1x128xf32>
    %17 = arith.mulf %15, %16 : vector<1x128xf32>
    %cst_8 = arith.constant 9.99999974E-6 : f32
    %18 = vector.broadcast %cst_8 : f32 to vector<1x128xf32>
    %19 = arith.addf %17, %18 : vector<1x128xf32>
    %20 = math.rsqrt %19 : vector<1x128xf32>
    %21 = vector.broadcast %20 : vector<1x128xf32> to vector<512x128xf32>
    %22 = arith.mulf %8, %21 : vector<512x128xf32>
    %cst_9 = arith.constant 0.000000e+00 : f32
    %23 = vector.broadcast %cst_9 : f32 to vector<512x128xf32>
    %24 = arith.maximumf %22, %23 : vector<512x128xf32>
    %25 = arith.truncf %24 : vector<512x128xf32> to vector<512x128xbf16>
    %c0_10 = arith.constant 0 : index
    %c0_11 = arith.constant 0 : index
    %26 = vector.load %arg3[%c0_10, %c0_11] : memref<512x128xbf16, #tpu.memory_space<vmem>>, vector<512x128xbf16>
    tpu.vector_store %arg3[%c0_10, %c0_11], %25 {strides = array<i32>} : memref<512x128xbf16, #tpu.memory_space<vmem>>, vector<512x128xbf16>,
    return
  }
  func.func @transform_0(%arg0: i32) -> (i32, i32) {
    %c0_i32 = arith.constant 0 : i32
    %c0_i32_0 = arith.constant 0 : i32
    %c0_i32_1 = arith.constant 0 : i32
    return %c0_i32, %c0_i32_0 : i32, i32
  }
  func.func @transform_1(%arg0: i32) -> (i32, i32) {
    %c0_i32 = arith.constant 0 : i32
    %c0_i32_0 = arith.constant 0 : i32
    %c0_i32_1 = arith.constant 0 : i32
    return %c0_i32, %c0_i32_0 : i32, i32
  }
  func.func @transform_2(%arg0: i32) -> (i32, i32) {
    %c0_i32 = arith.constant 0 : i32
    %c0_i32_0 = arith.constant 0 : i32
    %c0_i32_1 = arith.constant 0 : i32
    return %c0_i32, %c0_i32_0 : i32, i32
  }
}

module attributes {stable_mosaic.version = 11 : i64} {
  func.func @_convbn_relu_kernel(%arg0: i32, %arg1: memref<2048x256xbf16, #tpu.memory_space<vmem>>, %arg2: memref<256x128xbf16, #tpu.memory_space<vmem>>, %arg3: memref<2048x128xbf16, #tpu.memory_space<vmem>>) attributes {dimension_semantics = [#tpu.dimension_semantics<arbitrary>], iteration_bounds = array<i64: 1>, scalar_prefetch = 0 : i64, scratch_operands = 0 : i64, tpu.core_type = #tpu.core_type<tc>, window_params = [{pipeline_mode = #tpu.pipeline_mode<synchronous>, transform_indices = @transform_0, window_bounds = array<i64: 2048, 256>}, {pipeline_mode = #tpu.pipeline_mode<synchronous>, transform_indices = @transform_1, window_bounds = array<i64: 256, 128>}, {pipeline_mode = #tpu.pipeline_mode<synchronous>, transform_indices = @transform_2, window_bounds = array<i64: 2048, 128>}]} {
    %c0 = arith.constant 0 : index
    %c0_0 = arith.constant 0 : index
    %0 = vector.load %arg1[%c0, %c0_0] : memref<2048x256xbf16, #tpu.memory_space<vmem>>, vector<2048x256xbf16>
    %c0_1 = arith.constant 0 : index
    %c0_2 = arith.constant 0 : index
    %1 = vector.load %arg2[%c0_1, %c0_2] : memref<256x128xbf16, #tpu.memory_space<vmem>>, vector<256x128xbf16>
    %cst = arith.constant dense<0.000000e+00> : vector<2048x128xf32>
    %2 = tpu.matmul %0, %1, %cst {dimension_numbers = #tpu.dot_dimension_numbers<[1], [0], [0], [1], [0, 0, 1, 1], [], []>} : vector<2048x256xbf16>, vector<256x128xbf16>, vector<2048x128xf32> -> vector<2048x128xf32>
    %cst_3 = arith.constant dense<0.000000e+00> : vector<128xf32>
    %3 = vector.multi_reduction <add>, %2, %cst_3 [0] : vector<2048x128xf32> to vector<128xf32>
    %4 = vector.shape_cast %3 : vector<128xf32> to vector<1x128xf32>
    %cst_4 = arith.constant 4.8828125E-4 : f32
    %5 = vector.broadcast %cst_4 : f32 to vector<1x128xf32>
    %6 = arith.mulf %4, %5 : vector<1x128xf32>
    %7 = vector.broadcast %6 : vector<1x128xf32> to vector<2048x128xf32>
    %8 = arith.subf %2, %7 : vector<2048x128xf32>
    %9 = arith.mulf %8, %8 : vector<2048x128xf32>
    %cst_5 = arith.constant dense<0.000000e+00> : vector<128xf32>
    %10 = vector.multi_reduction <add>, %9, %cst_5 [0] : vector<2048x128xf32> to vector<128xf32>
    %11 = vector.shape_cast %10 : vector<128xf32> to vector<1x128xf32>
    %cst_6 = arith.constant 0.000000e+00 : f32
    %12 = vector.broadcast %cst_6 : f32 to vector<1x128xf32>
    %13 = arith.mulf %12, %6 : vector<1x128xf32>
    %14 = arith.mulf %13, %6 : vector<1x128xf32>
    %15 = arith.subf %11, %14 : vector<1x128xf32>
    %cst_7 = arith.constant 4.8828125E-4 : f32
    %16 = vector.broadcast %cst_7 : f32 to vector<1x128xf32>
    %17 = arith.mulf %15, %16 : vector<1x128xf32>
    %cst_8 = arith.constant 9.99999974E-6 : f32
    %18 = vector.broadcast %cst_8 : f32 to vector<1x128xf32>
    %19 = arith.addf %17, %18 : vector<1x128xf32>
    %20 = math.rsqrt %19 : vector<1x128xf32>
    %21 = vector.broadcast %20 : vector<1x128xf32> to vector<2048x128xf32>
    %22 = arith.mulf %8, %21 : vector<2048x128xf32>
    %cst_9 = arith.constant 0.000000e+00 : f32
    %23 = vector.broadcast %cst_9 : f32 to vector<2048x128xf32>
    %24 = arith.maximumf %22, %23 : vector<2048x128xf32>
    %25 = arith.truncf %24 : vector<2048x128xf32> to vector<2048x128xbf16>
    %c0_10 = arith.constant 0 : index
    %c0_11 = arith.constant 0 : index
    %26 = vector.load %arg3[%c0_10, %c0_11] : memref<2048x128xbf16, #tpu.memory_space<vmem>>, vector<2048x128xbf16>
    tpu.vector_store %arg3[%c0_10, %c0_11], %25 {strides = array<i32>} : memref<2048x128xbf16, #tpu.memory_space<vmem>>, vector<2048x128xbf16>,
    return
  }
  func.func @transform_0(%arg0: i32) -> (i32, i32) {
    %c0_i32 = arith.constant 0 : i32
    %c0_i32_0 = arith.constant 0 : i32
    %c0_i32_1 = arith.constant 0 : i32
    return %c0_i32, %c0_i32_0 : i32, i32
  }
  func.func @transform_1(%arg0: i32) -> (i32, i32) {
    %c0_i32 = arith.constant 0 : i32
    %c0_i32_0 = arith.constant 0 : i32
    %c0_i32_1 = arith.constant 0 : i32
    return %c0_i32, %c0_i32_0 : i32, i32
  }
  func.func @transform_2(%arg0: i32) -> (i32, i32) {
    %c0_i32 = arith.constant 0 : i32
    %c0_i32_0 = arith.constant 0 : i32
    %c0_i32_1 = arith.constant 0 : i32
    return %c0_i32, %c0_i32_0 : i32, i32
  }
}

module attributes {stable_mosaic.version = 11 : i64} {
  func.func @_convT_tanh_kernel(%arg0: i32, %arg1: memref<8x128xbf16, #tpu.memory_space<vmem>>, %arg2: memref<128x2048xbf16, #tpu.memory_space<vmem>>, %arg3: memref<8x2048xf32, #tpu.memory_space<vmem>>) attributes {dimension_semantics = [#tpu.dimension_semantics<parallel>], iteration_bounds = array<i64: 4>, scalar_prefetch = 0 : i64, scratch_operands = 0 : i64, tpu.core_type = #tpu.core_type<tc>, window_params = [{pipeline_mode = #tpu.pipeline_mode<synchronous>, transform_indices = @transform_0, window_bounds = array<i64: 8, 128>}, {transform_indices = @transform_1, window_bounds = array<i64: 128, 2048>}, {transform_indices = @transform_2, window_bounds = array<i64: 8, 2048>}]} {
    %c0 = arith.constant 0 : index
    %c0_0 = arith.constant 0 : index
    %0 = vector.load %arg1[%c0, %c0_0] : memref<8x128xbf16, #tpu.memory_space<vmem>>, vector<8x128xbf16>
    %c0_1 = arith.constant 0 : index
    %c0_2 = arith.constant 0 : index
    %1 = vector.load %arg2[%c0_1, %c0_2] : memref<128x2048xbf16, #tpu.memory_space<vmem>>, vector<128x2048xbf16>
    %cst = arith.constant dense<0.000000e+00> : vector<8x2048xf32>
    %2 = tpu.matmul %0, %1, %cst {dimension_numbers = #tpu.dot_dimension_numbers<[1], [0], [0], [1], [0, 0, 1, 1], [], []>} : vector<8x128xbf16>, vector<128x2048xbf16>, vector<8x2048xf32> -> vector<8x2048xf32>
    %3 = math.tanh %2 : vector<8x2048xf32>
    %c0_3 = arith.constant 0 : index
    %c0_4 = arith.constant 0 : index
    %4 = vector.load %arg3[%c0_3, %c0_4] : memref<8x2048xf32, #tpu.memory_space<vmem>>, vector<8x2048xf32>
    tpu.vector_store %arg3[%c0_3, %c0_4], %3 {strides = array<i32>} : memref<8x2048xf32, #tpu.memory_space<vmem>>, vector<8x2048xf32>,
    return
  }
  func.func @transform_0(%arg0: i32) -> (i32, i32) {
    %c0_i32 = arith.constant 0 : i32
    %c0_i32_0 = arith.constant 0 : i32
    %c0_i32_1 = arith.constant 0 : i32
    return %c0_i32, %c0_i32_0 : i32, i32
  }
  func.func @transform_1(%arg0: i32) -> (i32, i32) {
    %c0_i32 = arith.constant 0 : i32
    %c0_i32_0 = arith.constant 0 : i32
    return %c0_i32, %arg0 : i32, i32
  }
  func.func @transform_2(%arg0: i32) -> (i32, i32) {
    %c0_i32 = arith.constant 0 : i32
    %c0_i32_0 = arith.constant 0 : i32
    return %c0_i32, %arg0 : i32, i32
  }
}

</mosaic_0001>

<bundles_post_ra>
// kernel: _lambda_.5
= control target key start
LH: loop header
LB: loop body
LE: loop exit
PB: predicated region body
PF: predicated region fallthrough
CT: control target
= control target key end

     0   :  { %7 = vsyncpa [#allocation3], 0  ;;  %s427_s9 = smov [#allocation2]   ;;  %s475_s0 = inlined_call_operand.vmem [shape: bf16[32,256], index: 0, kind: input, shape index: {}]   ;;  %s476_s1 = inlined_call_operand.hbm [shape: bf16[256,128], index: 1, kind: input, shape index: {}]   ;;  %s477_s2 = inlined_call_operand.vmem [shape: bf16[32,128], index: 2, kind: output, shape index: {}]  }
   0x1   :  { %s15_s10 = sshll.u32 %s427_s9, 4  ;;  %s403_s13 = scalar_lea.hbm %s476_s1, 2048  ;;  %s16_s10 = int_to_ptr.vmem [resolvable:$true] %s15_s10 }
   0x2   :  { %p404_p0 = scmp.ne.s32.totalorder %s476_s1, %s403_s13  ;;  %p407_p1 = scmp.lt.u32.totalorder %s403_s13, %s476_s1 }
   0x4   :  { %p409_p2 = pnand %p407_p1, %p404_p0 }
   0x6   :  { %412 = shalt.err (!%p409_p2)
}
   0x7   :  { %s413_s18 = scalar_lea.vmem %s16_s10, 2048  ;;  %p418_p4 = scmp.lt.s32.totalorder %s16_s10, %s16_s10 }
   0x8   :  { %p414_p3 = scmp.ne.s32.totalorder %s16_s10, %s413_s18  ;;  %p419_p5 = scmp.lt.s32.totalorder %s413_s18, %s413_s18 }
   0xa   :  { %p420_p6 = por %p419_p5, %p418_p4 }
   0xc   :  { %p421_p7 = pnand %p420_p6, %p414_p3 }
   0xe   :  { %424 = shalt.err (!%p421_p7)
}
   0xf   :  { %s428_s19 = smov 64   ;;  %s429_s20 = smov 4  }
  0x10   :  { %21 = dma.hbm_to_vmem [thread:$0]  %s476_s1, 2048, %s16_s10, [#allocation3], %s428_s19, %s428_s19, %s429_s20  }
  0x11   :  { %425 = dma.done.wait [#allocation3], 2048  }
  0x12   :  { %426 = vsyncadd [#allocation3], 4294965248  ;;  %v379_v0 = vld [vmem:[#allocation2 + $0x40] sm:$0xff]   ;;  %v381_v2 = vld [vmem:[#allocation2 + $0x48] sm:$0xff]  }
  0x13   :  { %v380_v1 = vld [vmem:[#allocation2] sm:$0xff]   ;;  %332 = vmatprep.subr.bf16.mxu0 %v379_v0  ;;  %360 = vmatprep.subr.bf16.mxu1 %v379_v0  ;;  %v382_v3 = vld [vmem:[#allocation2 + $0x8] sm:$0xff]   ;;  %v383_v4 = vld [vmem:[#allocation2 + $0x50] sm:$0xff]  }
  0x14   :  { %333 = vmatpush3.bf16.msra.mxu0 %v380_v1  ;;  %368 = vmatpush3.bf16.msra.mxu1 %v380_v1  ;;  %v384_v5 = vld [vmem:[#allocation2 + $0x10] sm:$0xff]   ;;  %v385_v6 = vld [vmem:[#allocation2 + $0x58] sm:$0xff]   ;;  %v387_v8 = vld [vmem:[#allocation2 + $0x60] sm:$0xff]  }
  0x15   :  { %334 = vmatprep.subr.bf16.mxu0 %v381_v2  ;;  %361 = vmatprep.subr.bf16.mxu1 %v381_v2  ;;  %v386_v7 = vld [vmem:[#allocation2 + $0x18] sm:$0xff]   ;;  %v388_v9 = vld [vmem:[#allocation2 + $0x20] sm:$0xff]   ;;  %v389_v10 = vld [vmem:[#allocation2 + $0x68] sm:$0xff]  }
  0x16   :  { %v397_v11 = vld [vmem:[%s475_s0 + $0x4] ss:$8 sps:$4 sm:$0xff]   ;;  %v400_v12 = vld [vmem:[%s475_s0 + $0x14] ss:$8 sps:$4 sm:$0xff]   ;;  %v395_v18 = vld [vmem:[%s475_s0] ss:$8 sps:$4 sm:$0xff]  }
  0x17   :  { %v390_v13 = vld [vmem:[#allocation2 + $0x28] sm:$0xff]   ;;  %v391_v14 = vld [vmem:[#allocation2 + $0x70] sm:$0xff]   ;;  %210 = vmatprep.mubr.bf16.mxu0 %v397_v11  ;;  %218 = vmatprep.mubr.bf16.mxu1 %v400_v12  ;;  %v393_v16 = vld [vmem:[#allocation2 + $0x78] sm:$0xff]  }
  0x18   :  { %335 = vmatpush3.bf16.msra.mxu0 %v382_v3  ;;  %369 = vmatpush3.bf16.msra.mxu1 %v382_v3  ;;  %v392_v15 = vld [vmem:[#allocation2 + $0x30] sm:$0xff]   ;;  %v394_v17 = vld [vmem:[#allocation2 + $0x38] sm:$0xff]  }
  0x19   :  { %336 = vmatprep.subr.bf16.mxu0 %v383_v4  ;;  %362 = vmatprep.subr.bf16.mxu1 %v383_v4  ;;  %v398_v19 = vld [vmem:[%s475_s0 + $0x10] ss:$8 sps:$4 sm:$0xff]  }
  0x1c   :  { %337 = vmatpush3.bf16.msra.mxu0 %v384_v5  ;;  %370 = vmatpush3.bf16.msra.mxu1 %v384_v5 }
  0x1d   :  { %338 = vmatprep.subr.bf16.mxu0 %v385_v6  ;;  %363 = vmatprep.subr.bf16.mxu1 %v385_v6 }
  0x20   :  { %339 = vmatpush3.bf16.msra.mxu0 %v386_v7  ;;  %371 = vmatpush3.bf16.msra.mxu1 %v386_v7 }
  0x21   :  { %340 = vmatprep.subr.bf16.mxu0 %v387_v8  ;;  %364 = vmatprep.subr.bf16.mxu1 %v387_v8 }
  0x24   :  { %341 = vmatpush3.bf16.msra.mxu0 %v388_v9  ;;  %372 = vmatpush3.bf16.msra.mxu1 %v388_v9 }
  0x25   :  { %342 = vmatprep.subr.bf16.mxu0 %v389_v10  ;;  %365 = vmatprep.subr.bf16.mxu1 %v389_v10 }
  0x28   :  { %343 = vmatpush3.bf16.msra.mxu0 %v390_v13  ;;  %373 = vmatpush3.bf16.msra.mxu1 %v390_v13 }
  0x29   :  { %344 = vmatprep.subr.bf16.mxu0 %v391_v14  ;;  %366 = vmatprep.subr.bf16.mxu1 %v391_v14 }
  0x2c   :  { %345 = vmatpush3.bf16.msra.mxu0 %v392_v15  ;;  %374 = vmatpush3.bf16.msra.mxu1 %v392_v15 }
  0x2d   :  { %346 = vmatprep.subr.bf16.mxu0 %v393_v16  ;;  %367 = vmatprep.subr.bf16.mxu1 %v393_v16 }
  0x30   :  { %347 = vmatpush3.bf16.msra.mxu0 %v394_v17  ;;  %375 = vmatpush3.bf16.msra.mxu1 %v394_v17 }
  0x33   :  { %211 = vmatmul.mubr.bf16.vlgmr.msra.gmra.mrb[0].mxu0 %v395_v18  ;;  %219 = vmatmul.mubr.bf16.vlgmr.msra.gmra.mrb[0].mxu1 %v398_v19 }
 0x106   :  { %v348_v20 = vpop.f32.mrb[0].mxu0  ;;  %v354_v21 = vpop.f32.mrb[0].mxu1 }
 0x107   :  { %v349_v22 = vpop.f32.mrb[1].mxu0  ;;  %v355_v23 = vpop.f32.mrb[1].mxu1 }
 0x108   :  { %v350_v24 = vadd.f32 %v349_v22, %v348_v20  ;;  %v351_v25 = vpop.f32.mrb[2].mxu0  ;;  %v356_v26 = vadd.f32 %v355_v23, %v354_v21  ;;  %v357_v27 = vpop.f32.mrb[2].mxu1 }
 0x109   :  { %v352_v28 = vpop.f32.mrb[3].mxu0  ;;  %v358_v29 = vpop.f32.mrb[3].mxu1 }
 0x10a   :  { %v353_v30 = vadd.f32 %v352_v28, %v351_v25  ;;  %v359_v31 = vadd.f32 %v358_v29, %v357_v27 }
 0x10c   :  { %v227_v32 = vadd.f32 %v353_v30, %v350_v24 }
 0x10e   :  { %v228_v33 = vadd.f32 %v356_v26, %v227_v32 }
 0x110   :  { %v229_v34 = vadd.f32 %v359_v31, %v228_v33 }
 0x112   :  { %v230_v35 = vrot.slane %v229_v34, 4 }
 0x114   :  { %v231_v36 = vadd.f32 %v230_v35, %v229_v34 }
 0x116   :  { %v232_v37 = vrot.slane %v231_v36, 2 }
 0x118   :  { %v233_v38 = vadd.f32 %v232_v37, %v231_v36 }
 0x11a   :  { %v234_v39 = vrot.slane %v233_v38, 1 }
 0x11c   :  { %v235_v40 = vadd.f32 %v234_v39, %v233_v38 }
 0x11e   :  { %v236_v41 = vmul.f32 0.03125, %v235_v40 }
 0x120   :  { %v237_v42 = vsub.f32 %v350_v24, %v236_v41  ;;  %v238_v43 = vsub.f32 %v353_v30, %v236_v41  ;;  %v239_v44 = vsub.f32 %v356_v26, %v236_v41  ;;  %v240_v45 = vsub.f32 %v359_v31, %v236_v41 }
 0x121   :  { %v254_v57 = vmul.f32 0.0, %v236_v41 }
 0x122   :  { %v241_v46 = vmul.f32 %v237_v42, %v237_v42  ;;  %v242_v47 = vmul.f32 %v238_v43, %v238_v43  ;;  %v243_v48 = vmul.f32 %v239_v44, %v239_v44  ;;  %v244_v50 = vmul.f32 %v240_v45, %v240_v45 }
 0x123   :  { %v255_v60 = vmul.f32 %v254_v57, %v236_v41 }
 0x124   :  { %v245_v49 = vadd.f32 %v242_v47, %v241_v46 }
 0x126   :  { %v246_v51 = vadd.f32 %v245_v49, %v243_v48 }
 0x128   :  { %v247_v52 = vadd.f32 %v246_v51, %v244_v50 }
 0x12a   :  { %v248_v53 = vrot.slane %v247_v52, 4 }
 0x12c   :  { %v249_v54 = vadd.f32 %v248_v53, %v247_v52 }
 0x12e   :  { %v250_v55 = vrot.slane %v249_v54, 2 }
 0x130   :  { %v251_v56 = vadd.f32 %v250_v55, %v249_v54 }
 0x132   :  { %v252_v58 = vrot.slane %v251_v56, 1 }
 0x134   :  { %v253_v59 = vadd.f32 %v252_v58, %v251_v56 }
 0x136   :  { %v256_v61 = vsub.f32 %v253_v59, %v255_v60 }
 0x138   :  { %v257_v62 = vmul.f32 0.03125, %v256_v61 }
 0x13a   :  { %v258_v63 = vadd.f32 1e-05, %v257_v62 }
 0x13c   :  { %401 = vrsqrt.f32 %v258_v63 }
 0x146   :  { %v402_v0 = vpop.eup %401 }
 0x147   :  { %v260_v1 = vmul.f32 %v402_v0, %v237_v42  ;;  %v261_v2 = vmul.f32 %v402_v0, %v238_v43  ;;  %v262_v3 = vmul.f32 %v402_v0, %v239_v44  ;;  %v263_v4 = vmul.f32 %v402_v0, %v240_v45 }
 0x149   :  { %v264_v5 = vmax.f32 %v260_v1, 0.0  ;;  %v265_v6 = vmax.f32 %v261_v2, 0.0  ;;  %v266_v7 = vmax.f32 %v262_v3, 0.0  ;;  %v267_v8 = vmax.f32 %v263_v4, 0.0 }
 0x14b   :  { %v324_v9 = vpack.c.bf16 %v265_v6, %v264_v5  ;;  %v329_v10 = vpack.c.bf16 %v267_v8, %v266_v7 }
 0x14d   :  { %325 = vst [vmem:[%s477_s2] sm:$0xff] %v324_v9   ;;  %331 = vst [vmem:[%s477_s2 + $0x8] sm:$0xff] %v329_v10  }
 0x14e   :  { %292 = vsyncpa [#allocation3], 1 }

// kernel: _lambda_.6
= control target key start
LH: loop header
LB: loop body
LE: loop exit
PB: predicated region body
PF: predicated region fallthrough
CT: control target
= control target key end

     0   :  { %s2533_s1 = inlined_call_operand.vmem [shape: bf16[1024,128], index: 1, kind: input, shape index: {}]   ;;  %s2534_s0 = inlined_call_operand.vmem [shape: bf16[128,1024], index: 0, kind: input, shape index: {}]   ;;  %s2535_s2 = inlined_call_operand.vmem [shape: bf16[128,128], index: 2, kind: output, shape index: {}]  }
   0x1   :  { %v1956_v0 = vld [vmem:[%s2533_s1 + $0x40] sm:$0xff]   ;;  %v1960_v4 = vld [vmem:[%s2533_s1 + $0x48] sm:$0xff]   ;;  %v1964_v8 = vld [vmem:[%s2533_s1 + $0x50] sm:$0xff]  }
   0x2   :  { %v1957_v1 = vld [vmem:[%s2533_s1 + $0xc0] sm:$0xff]   ;;  %1700 = vmatprep.subr.bf16.mxu0 %v1956_v0  ;;  %v1961_v5 = vld [vmem:[%s2533_s1 + $0xc8] sm:$0xff]   ;;  %v1965_v9 = vld [vmem:[%s2533_s1 + $0xd0] sm:$0xff]  }
   0x3   :  { %v1958_v2 = vld [vmem:[%s2533_s1] sm:$0xff]   ;;  %1764 = vmatprep.subr.bf16.mxu1 %v1957_v1  ;;  %v1962_v6 = vld [vmem:[%s2533_s1 + $0x8] sm:$0xff]   ;;  %v1966_v10 = vld [vmem:[%s2533_s1 + $0x10] sm:$0xff]  }
   0x4   :  { %v1959_v3 = vld [vmem:[%s2533_s1 + $0x80] sm:$0xff]   ;;  %1701 = vmatpush3.bf16.msra.mxu0 %v1958_v2  ;;  %v1963_v7 = vld [vmem:[%s2533_s1 + $0x88] sm:$0xff]   ;;  %v1967_v11 = vld [vmem:[%s2533_s1 + $0x90] sm:$0xff]  }
   0x5   :  { %1765 = vmatpush3.bf16.msra.mxu1 %v1959_v3  ;;  %1702 = vmatprep.subr.bf16.mxu0 %v1960_v4  ;;  %v1968_v12 = vld [vmem:[%s2533_s1 + $0x58] sm:$0xff]   ;;  %v1972_v16 = vld [vmem:[%s2533_s1 + $0x60] sm:$0xff]   ;;  %v1976_v20 = vld [vmem:[%s2533_s1 + $0x68] sm:$0xff]  }
   0x6   :  { %1766 = vmatprep.subr.bf16.mxu1 %v1961_v5  ;;  %v1969_v13 = vld [vmem:[%s2533_s1 + $0xd8] sm:$0xff]   ;;  %v1973_v17 = vld [vmem:[%s2533_s1 + $0xe0] sm:$0xff]   ;;  %v1977_v21 = vld [vmem:[%s2533_s1 + $0xe8] sm:$0xff]  }
   0x7   :  { %v1970_v14 = vld [vmem:[%s2533_s1 + $0x18] sm:$0xff]   ;;  %v1974_v18 = vld [vmem:[%s2533_s1 + $0x20] sm:$0xff]   ;;  %v1978_v22 = vld [vmem:[%s2533_s1 + $0x28] sm:$0xff]  }
   0x8   :  { %1703 = vmatpush3.bf16.msra.mxu0 %v1962_v6  ;;  %v1971_v15 = vld [vmem:[%s2533_s1 + $0x98] sm:$0xff]   ;;  %v1975_v19 = vld [vmem:[%s2533_s1 + $0xa0] sm:$0xff]   ;;  %v1979_v23 = vld [vmem:[%s2533_s1 + $0xa8] sm:$0xff]  }
   0x9   :  { %1767 = vmatpush3.bf16.msra.mxu1 %v1963_v7  ;;  %1704 = vmatprep.subr.bf16.mxu0 %v1964_v8  ;;  %v1980_v24 = vld [vmem:[%s2533_s1 + $0x70] sm:$0xff]   ;;  %v1984_v28 = vld [vmem:[%s2533_s1 + $0x78] sm:$0xff]   ;;  %v12_v32 = vld [vmem:[%s2534_s0] sm:$0xff] }
   0xa   :  { %1768 = vmatprep.subr.bf16.mxu1 %v1965_v9  ;;  %v1981_v25 = vld [vmem:[%s2533_s1 + $0xf0] sm:$0xff]   ;;  %v1985_v29 = vld [vmem:[%s2533_s1 + $0xf8] sm:$0xff]   ;;  %v16_v33 = vld [vmem:[%s2534_s0 + $0x20] sm:$0xff] }
   0xb   :  { %v1982_v26 = vld [vmem:[%s2533_s1 + $0x30] sm:$0xff]   ;;  %v1986_v30 = vld [vmem:[%s2533_s1 + $0x38] sm:$0xff]   ;;  %v13_v34 = vld [vmem:[%s2534_s0 + $0x8] sm:$0xff]  ;;  %v1493_v35 = vcombine.low %v12_v32, %v16_v33  ;;  %v1494_v36 = vcombine.high %v12_v32, %v16_v33 }
   0xc   :  { %1705 = vmatpush3.bf16.msra.mxu0 %v1966_v10  ;;  %v1983_v27 = vld [vmem:[%s2533_s1 + $0xb0] sm:$0xff]   ;;  %v1987_v31 = vld [vmem:[%s2533_s1 + $0xb8] sm:$0xff]   ;;  %v17_v37 = vld [vmem:[%s2534_s0 + $0x28] sm:$0xff] }
   0xd   :  { %1769 = vmatpush3.bf16.msra.mxu1 %v1967_v11  ;;  %1706 = vmatprep.subr.bf16.mxu0 %v1968_v12  ;;  %v1495_v38 = vcombine.low %v13_v34, %v17_v37  ;;  %v1496_v39 = vcombine.high %v13_v34, %v17_v37  ;;  %v1988_v40 = vld [vmem:[%s2533_s1 + $0x140] sm:$0xff]   ;;  %v21_v47 = vld [vmem:[%s2534_s0 + $0x48] sm:$0xff]  ;;  %v1996_v62 = vld [vmem:[%s2533_s1 + $0x150] sm:$0xff]  }
   0xe   :  { %1770 = vmatprep.subr.bf16.mxu1 %v1969_v13  ;;  %940 = vmatprep.mubr.bf16.mxu0 %v1494_v36  ;;  %v1989_v41 = vld [vmem:[%s2533_s1 + $0x100] sm:$0xff]   ;;  %v25_v48 = vld [vmem:[%s2534_s0 + $0x68] sm:$0xff]  ;;  %v1997_v63 = vld [vmem:[%s2533_s1 + $0x110] sm:$0xff]  }
   0xf   :  { %1037 = vmatprep.mubr.bf16.mxu1 %v1496_v39  ;;  %v1990_v42 = vld [vmem:[%s2533_s1 + $0x1c0] sm:$0xff]   ;;  %v1504_v49 = vcombine.high %v21_v47, %v25_v48  ;;  %v1992_v50 = vld [vmem:[%s2533_s1 + $0x148] sm:$0xff]   ;;  %v1503_v53 = vcombine.low %v21_v47, %v25_v48  ;;  %v1998_v0 = vld [vmem:[%s2533_s1 + $0x1d0] sm:$0xff]  }
  0x10   :  { %1707 = vmatpush3.bf16.msra.mxu0 %v1970_v14  ;;  %v1991_v43 = vld [vmem:[%s2533_s1 + $0x180] sm:$0xff]   ;;  %v1993_v52 = vld [vmem:[%s2533_s1 + $0x108] sm:$0xff]   ;;  %v1999_v1 = vld [vmem:[%s2533_s1 + $0x190] sm:$0xff]  }
  0x11   :  { %1771 = vmatpush3.bf16.msra.mxu1 %v1971_v15  ;;  %1708 = vmatprep.subr.bf16.mxu0 %v1972_v16  ;;  %v20_v44 = vld [vmem:[%s2534_s0 + $0x40] sm:$0xff]  ;;  %v1994_v54 = vld [vmem:[%s2533_s1 + $0x1c8] sm:$0xff]   ;;  %v2000_v10 = vld [vmem:[%s2533_s1 + $0x158] sm:$0xff]  }
  0x12   :  { %1772 = vmatprep.subr.bf16.mxu1 %v1973_v17  ;;  %v24_v45 = vld [vmem:[%s2534_s0 + $0x60] sm:$0xff]  ;;  %v1995_v55 = vld [vmem:[%s2533_s1 + $0x188] sm:$0xff]   ;;  %v2001_v11 = vld [vmem:[%s2533_s1 + $0x118] sm:$0xff]  }
  0x13   :  { %v1502_v46 = vcombine.high %v20_v44, %v24_v45  ;;  %v1501_v51 = vcombine.low %v20_v44, %v24_v45  ;;  %v28_v56 = vld [vmem:[%s2534_s0 + $0x80] sm:$0xff]  ;;  %v29_v58 = vld [vmem:[%s2534_s0 + $0x88] sm:$0xff]  ;;  %v2002_v12 = vld [vmem:[%s2533_s1 + $0x1d8] sm:$0xff]  }
  0x14   :  { %1709 = vmatpush3.bf16.msra.mxu0 %v1974_v18  ;;  %v32_v57 = vld [vmem:[%s2534_s0 + $0xa0] sm:$0xff]  ;;  %v33_v59 = vld [vmem:[%s2534_s0 + $0xa8] sm:$0xff]  ;;  %v2003_v13 = vld [vmem:[%s2533_s1 + $0x198] sm:$0xff]  }
  0x15   :  { %1773 = vmatpush3.bf16.msra.mxu1 %v1975_v19  ;;  %1710 = vmatprep.subr.bf16.mxu0 %v1976_v20  ;;  %v1510_v60 = vcombine.high %v28_v56, %v32_v57  ;;  %v1512_v61 = vcombine.high %v29_v58, %v33_v59  ;;  %v1509_v2 = vcombine.low %v28_v56, %v32_v57  ;;  %v36_v3 = vld [vmem:[%s2534_s0 + $0xc0] sm:$0xff]  ;;  %v37_v5 = vld [vmem:[%s2534_s0 + $0xc8] sm:$0xff]  ;;  %v2013_v39 = vld [vmem:[%s2533_s1 + $0x130] sm:$0xff]  }
  0x16   :  { %1774 = vmatprep.subr.bf16.mxu1 %v1977_v21  ;;  %v40_v4 = vld [vmem:[%s2534_s0 + $0xe0] sm:$0xff]  ;;  %v1511_v6 = vcombine.low %v29_v58, %v33_v59  ;;  %v41_v8 = vld [vmem:[%s2534_s0 + $0xe8] sm:$0xff]  ;;  %v2017_v48 = vld [vmem:[%s2533_s1 + $0x138] sm:$0xff]  }
  0x17   :  { %v1518_v7 = vcombine.high %v36_v3, %v40_v4  ;;  %v1520_v9 = vcombine.high %v37_v5, %v41_v8  ;;  %v44_v14 = vld [vmem:[%s2534_s0 + $0x100] sm:$0xff]  ;;  %v45_v16 = vld [vmem:[%s2534_s0 + $0x108] sm:$0xff]  ;;  %v1517_v19 = vcombine.low %v36_v3, %v40_v4  ;;  %v1519_v21 = vcombine.low %v37_v5, %v41_v8  ;;  %v23_v8 = vld [vmem:[%s2534_s0 + $0x58] sm:$0xff] }
  0x18   :  { %1711 = vmatpush3.bf16.msra.mxu0 %v1978_v22  ;;  %v48_v15 = vld [vmem:[%s2534_s0 + $0x120] sm:$0xff]  ;;  %v49_v17 = vld [vmem:[%s2534_s0 + $0x128] sm:$0xff] }
  0x19   :  { %1775 = vmatpush3.bf16.msra.mxu1 %v1979_v23  ;;  %1712 = vmatprep.subr.bf16.mxu0 %v1980_v24  ;;  %v2004_v18 = vld [vmem:[%s2533_s1 + $0x160] sm:$0xff]   ;;  %v1526_v22 = vcombine.high %v44_v14, %v48_v15  ;;  %v1528_v24 = vcombine.high %v45_v16, %v49_v17  ;;  %v2010_v32 = vld [vmem:[%s2533_s1 + $0x1e8] sm:$0xff]   ;;  %v1525_v34 = vcombine.low %v44_v14, %v48_v15  ;;  %v30_v14 = vld [vmem:[%s2534_s0 + $0x90] sm:$0xff] }
  0x1a   :  { %1776 = vmatprep.subr.bf16.mxu1 %v1981_v25  ;;  %v2005_v20 = vld [vmem:[%s2533_s1 + $0x120] sm:$0xff]   ;;  %v2011_v33 = vld [vmem:[%s2533_s1 + $0x1a8] sm:$0xff]   ;;  %v34_v15 = vld [vmem:[%s2534_s0 + $0xb0] sm:$0xff] }
  0x1b   :  { %v2006_v23 = vld [vmem:[%s2533_s1 + $0x1e0] sm:$0xff]   ;;  %v61_v44 = vld [vmem:[%s2534_s0 + $0x188] sm:$0xff] }
  0x1c   :  { %1713 = vmatpush3.bf16.msra.mxu0 %v1982_v26  ;;  %v2007_v25 = vld [vmem:[%s2533_s1 + $0x1a0] sm:$0xff]   ;;  %v65_v45 = vld [vmem:[%s2534_s0 + $0x1a8] sm:$0xff] }
  0x1d   :  { %1777 = vmatpush3.bf16.msra.mxu1 %v1983_v27  ;;  %1714 = vmatprep.subr.bf16.mxu0 %v1984_v28  ;;  %v52_v26 = vld [vmem:[%s2534_s0 + $0x140] sm:$0xff]  ;;  %v2008_v28 = vld [vmem:[%s2533_s1 + $0x168] sm:$0xff]   ;;  %v1543_v59 = vcombine.low %v61_v44, %v65_v45 }
  0x1e   :  { %1778 = vmatprep.subr.bf16.mxu1 %v1985_v29  ;;  %v56_v27 = vld [vmem:[%s2534_s0 + $0x160] sm:$0xff]  ;;  %v53_v29 = vld [vmem:[%s2534_s0 + $0x148] sm:$0xff] }
  0x1f   :  { %v1534_v36 = vcombine.high %v52_v26, %v56_v27  ;;  %v1533_v47 = vcombine.low %v52_v26, %v56_v27  ;;  %v69_v56 = vld [vmem:[%s2534_s0 + $0x1c8] sm:$0xff]  ;;  %v1513_v26 = vcombine.low %v30_v14, %v34_v15 }
  0x20   :  { %1715 = vmatpush3.bf16.msra.mxu0 %v1986_v30  ;;  %v57_v30 = vld [vmem:[%s2534_s0 + $0x168] sm:$0xff] }
  0x21   :  { %1779 = vmatpush3.bf16.msra.mxu1 %v1987_v31  ;;  %1828 = vmatprep.subr.bf16.mxu0 %v1988_v40  ;;  %v2009_v31 = vld [vmem:[%s2533_s1 + $0x128] sm:$0xff]   ;;  %v1536_v37 = vcombine.high %v53_v29, %v57_v30  ;;  %v2014_v40 = vld [vmem:[%s2533_s1 + $0x1f0] sm:$0xff]  }
  0x22   :  { %1892 = vmatprep.subr.bf16.mxu1 %v1990_v42  ;;  %v64_v42 = vld [vmem:[%s2534_s0 + $0x1a0] sm:$0xff]  ;;  %v73_v57 = vld [vmem:[%s2534_s0 + $0x1e8] sm:$0xff] }
  0x23   :  { %941 = vmatmul.mubr.bf16.vlgmr.msra.gmra.mrb[0].mxu0 %v1493_v35  ;;  %v1527_v35 = vcombine.low %v45_v16, %v49_v17  ;;  %v1551_v3 = vcombine.low %v69_v56, %v73_v57  ;;  %v31_v16 = vld [vmem:[%s2534_s0 + $0x98] sm:$0xff] }
  0x24   :  { %1038 = vmatmul.mubr.bf16.vlgmr.msra.gmra.mrb[0].mxu1 %v1495_v38  ;;  %1829 = vmatpush3.bf16.msra.mxu0 %v1989_v41  ;;  %v2012_v38 = vld [vmem:[%s2533_s1 + $0x170] sm:$0xff]   ;;  %v60_v41 = vld [vmem:[%s2534_s0 + $0x180] sm:$0xff]  ;;  %v35_v17 = vld [vmem:[%s2534_s0 + $0xb8] sm:$0xff] }
  0x25   :  { %1893 = vmatpush3.bf16.msra.mxu1 %v1991_v43  ;;  %948 = vmatprep.mubr.bf16.mxu0 %v1502_v46  ;;  %v2015_v43 = vld [vmem:[%s2533_s1 + $0x1b0] sm:$0xff]   ;;  %v2016_v46 = vld [vmem:[%s2533_s1 + $0x178] sm:$0xff]   ;;  %v1541_v58 = vcombine.low %v60_v41, %v64_v42  ;;  %v1515_v27 = vcombine.low %v31_v16, %v35_v17 }
  0x26   :  { %1045 = vmatprep.mubr.bf16.mxu1 %v1504_v49  ;;  %1830 = vmatprep.subr.bf16.mxu0 %v1992_v50  ;;  %v1535_v49 = vcombine.low %v53_v29, %v57_v30  ;;  %v1542_v50 = vcombine.high %v60_v41, %v64_v42  ;;  %v46_v30 = vld [vmem:[%s2534_s0 + $0x110] sm:$0xff]  ;;  %v59_v41 = vld [vmem:[%s2534_s0 + $0x178] sm:$0xff] }
  0x27   :  { %1894 = vmatprep.subr.bf16.mxu1 %v1994_v54  ;;  %v68_v54 = vld [vmem:[%s2534_s0 + $0x1c0] sm:$0xff] }
  0x28   :  { %1831 = vmatpush3.bf16.msra.mxu0 %v1993_v52  ;;  %v1544_v52 = vcombine.high %v61_v44, %v65_v45 }
  0x29   :  { %1895 = vmatpush3.bf16.msra.mxu1 %v1995_v55  ;;  %1832 = vmatprep.subr.bf16.mxu0 %v1996_v62  ;;  %v72_v55 = vld [vmem:[%s2534_s0 + $0x1e0] sm:$0xff]  ;;  %v14_v62 = vld [vmem:[%s2534_s0 + $0x10] sm:$0xff] }
  0x2a   :  { %1896 = vmatprep.subr.bf16.mxu1 %v1998_v0  ;;  %v15_v0 = vld [vmem:[%s2534_s0 + $0x18] sm:$0xff] }
  0x2b   :  { %949 = vmatmul.mubr.bf16.gmra.mrb[4].mxu0 %v1501_v51  ;;  %v2018_v51 = vld [vmem:[%s2533_s1 + $0x1f8] sm:$0xff]  }
  0x2c   :  { %1046 = vmatmul.mubr.bf16.gmra.mrb[4].mxu1 %v1503_v53  ;;  %956 = vmatprep.mubr.bf16.mxu0 %v1510_v60  ;;  %v2019_v53 = vld [vmem:[%s2533_s1 + $0x1b8] sm:$0xff]   ;;  %v1550_v60 = vcombine.high %v68_v54, %v72_v55 }
  0x2d   :  { %1053 = vmatprep.mubr.bf16.mxu1 %v1512_v61  ;;  %1833 = vmatpush3.bf16.msra.mxu0 %v1997_v63  ;;  %v1552_v61 = vcombine.high %v69_v56, %v73_v57  ;;  %v18_v63 = vld [vmem:[%s2534_s0 + $0x30] sm:$0xff]  ;;  %v71_v56 = vld [vmem:[%s2534_s0 + $0x1d8] sm:$0xff] }
  0x2e   :  { %1897 = vmatpush3.bf16.msra.mxu1 %v1999_v1  ;;  %1834 = vmatprep.subr.bf16.mxu0 %v2000_v10  ;;  %v19_v1 = vld [vmem:[%s2534_s0 + $0x38] sm:$0xff]  ;;  %v1498_v4 = vcombine.high %v14_v62, %v18_v63  ;;  %v1497_v10 = vcombine.low %v14_v62, %v18_v63 }
  0x2f   :  { %1898 = vmatprep.subr.bf16.mxu1 %v2002_v12  ;;  %v1500_v5 = vcombine.high %v15_v0, %v19_v1  ;;  %v75_v57 = vld [vmem:[%s2534_s0 + $0x1f8] sm:$0xff] }
  0x30   :  { %v1555_v63 = vcombine.low %v71_v56, %v75_v57 }
  0x31   :  { %1835 = vmatpush3.bf16.msra.mxu0 %v2001_v11  ;;  %v1499_v11 = vcombine.low %v15_v0, %v19_v1 }
  0x32   :  { %1899 = vmatpush3.bf16.msra.mxu1 %v2003_v13  ;;  %1836 = vmatprep.subr.bf16.mxu0 %v2004_v18 }
  0x33   :  { %957 = vmatmul.mubr.bf16.gmra.mrb[8].mxu0 %v1509_v2  ;;  %1900 = vmatprep.subr.bf16.mxu1 %v2006_v23  ;;  %v1549_v2 = vcombine.low %v68_v54, %v72_v55  ;;  %v42_v23 = vld [vmem:[%s2534_s0 + $0xf0] sm:$0xff] }
  0x34   :  { %1054 = vmatmul.mubr.bf16.gmra.mrb[8].mxu1 %v1511_v6  ;;  %964 = vmatprep.mubr.bf16.mxu0 %v1518_v7  ;;  %v22_v6 = vld [vmem:[%s2534_s0 + $0x50] sm:$0xff] }
  0x35   :  { %1061 = vmatprep.mubr.bf16.mxu1 %v1520_v9  ;;  %1837 = vmatpush3.bf16.msra.mxu0 %v2005_v20  ;;  %v26_v7 = vld [vmem:[%s2534_s0 + $0x70] sm:$0xff]  ;;  %v27_v9 = vld [vmem:[%s2534_s0 + $0x78] sm:$0xff]  ;;  %v1514_v20 = vcombine.high %v30_v14, %v34_v15 }
  0x36   :  { %1901 = vmatpush3.bf16.msra.mxu1 %v2007_v25  ;;  %1838 = vmatprep.subr.bf16.mxu0 %v2008_v28  ;;  %v1506_v12 = vcombine.high %v22_v6, %v26_v7  ;;  %v1508_v13 = vcombine.high %v23_v8, %v27_v9  ;;  %v1505_v18 = vcombine.low %v22_v6, %v26_v7  ;;  %v43_v25 = vld [vmem:[%s2534_s0 + $0xf8] sm:$0xff]  ;;  %v70_v54 = vld [vmem:[%s2534_s0 + $0x1d0] sm:$0xff] }
  0x37   :  { %1902 = vmatprep.subr.bf16.mxu1 %v2010_v32  ;;  %v47_v32 = vld [vmem:[%s2534_s0 + $0x118] sm:$0xff]  ;;  %v74_v55 = vld [vmem:[%s2534_s0 + $0x1f0] sm:$0xff] }
  0x38   :  { %v1553_v62 = vcombine.low %v70_v54, %v74_v55 }
  0x39   :  { %1839 = vmatpush3.bf16.msra.mxu0 %v2009_v31  ;;  %v50_v31 = vld [vmem:[%s2534_s0 + $0x130] sm:$0xff] }
  0x3a   :  { %1903 = vmatpush3.bf16.msra.mxu1 %v2011_v33  ;;  %1840 = vmatprep.subr.bf16.mxu0 %v2012_v38  ;;  %v51_v33 = vld [vmem:[%s2534_s0 + $0x138] sm:$0xff]  ;;  %v54_v38 = vld [vmem:[%s2534_s0 + $0x150] sm:$0xff]  ;;  %v1529_v42 = vcombine.low %v46_v30, %v50_v31 }
  0x3b   :  { %965 = vmatmul.mubr.bf16.gmra.mrb[12].mxu0 %v1517_v19  ;;  %1904 = vmatprep.subr.bf16.mxu1 %v2014_v40  ;;  %v1507_v19 = vcombine.low %v23_v8, %v27_v9  ;;  %v55_v40 = vld [vmem:[%s2534_s0 + $0x158] sm:$0xff] }
  0x3c   :  { %1062 = vmatmul.mubr.bf16.gmra.mrb[12].mxu1 %v1519_v21  ;;  %972 = vmatprep.mubr.bf16.mxu0 %v1526_v22  ;;  %v1516_v21 = vcombine.high %v31_v16, %v35_v17  ;;  %v38_v22 = vld [vmem:[%s2534_s0 + $0xd0] sm:$0xff]  ;;  %v1540_v45 = vcombine.high %v55_v40, %v59_v41 }
  0x3d   :  { %1069 = vmatprep.mubr.bf16.mxu1 %v1528_v24  ;;  %1841 = vmatpush3.bf16.msra.mxu0 %v2013_v39  ;;  %v39_v24 = vld [vmem:[%s2534_s0 + $0xd8] sm:$0xff]  ;;  %v1522_v28 = vcombine.high %v38_v22, %v42_v23  ;;  %v58_v39 = vld [vmem:[%s2534_s0 + $0x170] sm:$0xff] }
  0x3e   :  { %1905 = vmatpush3.bf16.msra.mxu1 %v2015_v43  ;;  %1842 = vmatprep.subr.bf16.mxu0 %v2016_v46  ;;  %v1524_v29 = vcombine.high %v39_v24, %v43_v25  ;;  %v1531_v43 = vcombine.low %v47_v32, %v51_v33  ;;  %v1538_v44 = vcombine.high %v54_v38, %v58_v39  ;;  %v62_v46 = vld [vmem:[%s2534_s0 + $0x190] sm:$0xff] }
  0x3f   :  { %1906 = vmatprep.subr.bf16.mxu1 %v2018_v51  ;;  %v1539_v51 = vcombine.low %v55_v40, %v59_v41 }
  0x41   :  { %1843 = vmatpush3.bf16.msra.mxu0 %v2017_v48  ;;  %v63_v48 = vld [vmem:[%s2534_s0 + $0x198] sm:$0xff] }
  0x42   :  { %1907 = vmatpush3.bf16.msra.mxu1 %v2019_v53 }
  0x43   :  { %973 = vmatmul.mubr.bf16.gmra.mrb[16].mxu0 %v1525_v34  ;;  %v1521_v34 = vcombine.low %v38_v22, %v42_v23 }
  0x44   :  { %1070 = vmatmul.mubr.bf16.gmra.mrb[16].mxu1 %v1527_v35  ;;  %980 = vmatprep.mubr.bf16.mxu0 %v1534_v36  ;;  %v1523_v35 = vcombine.low %v39_v24, %v43_v25  ;;  %v1530_v36 = vcombine.high %v46_v30, %v50_v31 }
  0x45   :  { %1077 = vmatprep.mubr.bf16.mxu1 %v1536_v37  ;;  %v1532_v37 = vcombine.high %v47_v32, %v51_v33 }
  0x4b   :  { %981 = vmatmul.mubr.bf16.gmra.mrb[20].mxu0 %v1533_v47  ;;  %v66_v47 = vld [vmem:[%s2534_s0 + $0x1b0] sm:$0xff] }
  0x4c   :  { %1078 = vmatmul.mubr.bf16.gmra.mrb[20].mxu1 %v1535_v49  ;;  %988 = vmatprep.mubr.bf16.mxu0 %v1542_v50  ;;  %v67_v49 = vld [vmem:[%s2534_s0 + $0x1b8] sm:$0xff]  ;;  %v1537_v50 = vcombine.low %v54_v38, %v58_v39 }
  0x4d   :  { %1085 = vmatprep.mubr.bf16.mxu1 %v1544_v52  ;;  %v1546_v52 = vcombine.high %v62_v46, %v66_v47  ;;  %v1548_v53 = vcombine.high %v63_v48, %v67_v49 }
  0x53   :  { %989 = vmatmul.mubr.bf16.gmra.mrb[24].mxu0 %v1541_v58  ;;  %v1545_v58 = vcombine.low %v62_v46, %v66_v47 }
  0x54   :  { %1086 = vmatmul.mubr.bf16.gmra.mrb[24].mxu1 %v1543_v59  ;;  %996 = vmatprep.mubr.bf16.mxu0 %v1550_v60  ;;  %v1547_v59 = vcombine.low %v63_v48, %v67_v49  ;;  %v1554_v60 = vcombine.high %v70_v54, %v74_v55 }
  0x55   :  { %1093 = vmatprep.mubr.bf16.mxu1 %v1552_v61  ;;  %v1556_v61 = vcombine.high %v71_v56, %v75_v57 }
  0x5b   :  { %997 = vmatmul.mubr.bf16.gmra.mrb[28].mxu0 %v1549_v2 }
  0x5c   :  { %1094 = vmatmul.mubr.bf16.gmra.mrb[28].mxu1 %v1551_v3  ;;  %1134 = vmatprep.mubr.bf16.mxu0 %v1498_v4 }
  0x5d   :  { %1231 = vmatprep.mubr.bf16.mxu1 %v1500_v5 }
  0x63   :  { %1135 = vmatmul.mubr.bf16.vlgmr.msra.gmra.mrb[32].mxu0 %v1497_v10 }
  0x64   :  { %1232 = vmatmul.mubr.bf16.vlgmr.msra.gmra.mrb[32].mxu1 %v1499_v11  ;;  %1142 = vmatprep.mubr.bf16.mxu0 %v1506_v12 }
  0x65   :  { %1239 = vmatprep.mubr.bf16.mxu1 %v1508_v13 }
  0x6b   :  { %1143 = vmatmul.mubr.bf16.gmra.mrb[36].mxu0 %v1505_v18 }
  0x6c   :  { %1240 = vmatmul.mubr.bf16.gmra.mrb[36].mxu1 %v1507_v19  ;;  %1150 = vmatprep.mubr.bf16.mxu0 %v1514_v20 }
  0x6d   :  { %1247 = vmatprep.mubr.bf16.mxu1 %v1516_v21 }
  0x73   :  { %1151 = vmatmul.mubr.bf16.gmra.mrb[40].mxu0 %v1513_v26 }
  0x74   :  { %1248 = vmatmul.mubr.bf16.gmra.mrb[40].mxu1 %v1515_v27  ;;  %1158 = vmatprep.mubr.bf16.mxu0 %v1522_v28 }
  0x75   :  { %1255 = vmatprep.mubr.bf16.mxu1 %v1524_v29 }
  0x7b   :  { %1159 = vmatmul.mubr.bf16.gmra.mrb[44].mxu0 %v1521_v34 }
  0x7c   :  { %1256 = vmatmul.mubr.bf16.gmra.mrb[44].mxu1 %v1523_v35  ;;  %1166 = vmatprep.mubr.bf16.mxu0 %v1530_v36 }
  0x7d   :  { %1263 = vmatprep.mubr.bf16.mxu1 %v1532_v37 }
  0x83   :  { %1167 = vmatmul.mubr.bf16.gmra.mrb[48].mxu0 %v1529_v42 }
  0x84   :  { %1264 = vmatmul.mubr.bf16.gmra.mrb[48].mxu1 %v1531_v43  ;;  %1174 = vmatprep.mubr.bf16.mxu0 %v1538_v44 }
  0x85   :  { %1271 = vmatprep.mubr.bf16.mxu1 %v1540_v45 }
  0x8b   :  { %1175 = vmatmul.mubr.bf16.gmra.mrb[52].mxu0 %v1537_v50 }
  0x8c   :  { %1272 = vmatmul.mubr.bf16.gmra.mrb[52].mxu1 %v1539_v51  ;;  %1182 = vmatprep.mubr.bf16.mxu0 %v1546_v52 }
  0x8d   :  { %1279 = vmatprep.mubr.bf16.mxu1 %v1548_v53 }
  0x93   :  { %1183 = vmatmul.mubr.bf16.gmra.mrb[56].mxu0 %v1545_v58 }
  0x94   :  { %1280 = vmatmul.mubr.bf16.gmra.mrb[56].mxu1 %v1547_v59  ;;  %1190 = vmatprep.mubr.bf16.mxu0 %v1554_v60 }
  0x95   :  { %1287 = vmatprep.mubr.bf16.mxu1 %v1556_v61 }
  0x9b   :  { %1191 = vmatmul.mubr.bf16.gmra.mrb[60].mxu0 %v1553_v62 }
  0x9c   :  { %1288 = vmatmul.mubr.bf16.gmra.mrb[60].mxu1 %v1555_v63 }
  0xf6   :  { %v1716_v0 = vpop.f32.mrb[0].mxu0 }
  0xf7   :  { %v1780_v1 = vpop.f32.mrb[0].mxu1  ;;  %v1717_v2 = vpop.f32.mrb[1].mxu0 }
  0xf8   :  { %v1718_v3 = vadd.f32 %v1717_v2, %v1716_v0  ;;  %v1781_v4 = vpop.f32.mrb[1].mxu1  ;;  %v1719_v5 = vpop.f32.mrb[2].mxu0 }
  0xf9   :  { %v1782_v6 = vadd.f32 %v1781_v4, %v1780_v1  ;;  %v1783_v7 = vpop.f32.mrb[2].mxu1  ;;  %v1720_v8 = vpop.f32.mrb[3].mxu0 }
  0xfa   :  { %v1721_v9 = vadd.f32 %v1720_v8, %v1719_v5  ;;  %v1784_v10 = vpop.f32.mrb[3].mxu1 }
  0xfb   :  { %v2421_v11 = vadd.f32 %v1782_v6, %v1718_v3  ;;  %v1785_v12 = vadd.f32 %v1784_v10, %v1783_v7 }
  0xfd   :  { %v2423_v13 = vadd.f32 %v1785_v12, %v1721_v9 }
  0xfe   :  { %v1722_v14 = vpop.f32.mrb[4].mxu0 }
  0xff   :  { %v1786_v15 = vpop.f32.mrb[4].mxu1  ;;  %v1723_v16 = vpop.f32.mrb[5].mxu0 }
 0x100   :  { %v1724_v17 = vadd.f32 %v1723_v16, %v1722_v14  ;;  %v1787_v18 = vpop.f32.mrb[5].mxu1  ;;  %v1725_v19 = vpop.f32.mrb[6].mxu0 }
 0x101   :  { %v1788_v20 = vadd.f32 %v1787_v18, %v1786_v15  ;;  %v1789_v21 = vpop.f32.mrb[6].mxu1  ;;  %v1726_v22 = vpop.f32.mrb[7].mxu0 }
 0x102   :  { %v1727_v23 = vadd.f32 %v1726_v22, %v1725_v19  ;;  %v1790_v24 = vpop.f32.mrb[7].mxu1 }
 0x103   :  { %v2425_v25 = vadd.f32 %v1788_v20, %v1724_v17  ;;  %v1791_v26 = vadd.f32 %v1790_v24, %v1789_v21 }
 0x105   :  { %v2427_v27 = vadd.f32 %v1791_v26, %v1727_v23 }
 0x106   :  { %v1728_v28 = vpop.f32.mrb[8].mxu0 }
 0x107   :  { %v1792_v29 = vpop.f32.mrb[8].mxu1  ;;  %v1729_v30 = vpop.f32.mrb[9].mxu0 }
 0x108   :  { %v1730_v31 = vadd.f32 %v1729_v30, %v1728_v28  ;;  %v1793_v32 = vpop.f32.mrb[9].mxu1  ;;  %v1731_v33 = vpop.f32.mrb[10].mxu0 }
 0x109   :  { %v1794_v34 = vadd.f32 %v1793_v32, %v1792_v29  ;;  %v1795_v35 = vpop.f32.mrb[10].mxu1  ;;  %v1732_v36 = vpop.f32.mrb[11].mxu0 }
 0x10a   :  { %v1733_v37 = vadd.f32 %v1732_v36, %v1731_v33  ;;  %v1796_v38 = vpop.f32.mrb[11].mxu1 }
 0x10b   :  { %v2429_v39 = vadd.f32 %v1794_v34, %v1730_v31  ;;  %v1797_v40 = vadd.f32 %v1796_v38, %v1795_v35 }
 0x10d   :  { %v2431_v41 = vadd.f32 %v1797_v40, %v1733_v37 }
 0x10e   :  { %v1734_v42 = vpop.f32.mrb[12].mxu0 }
 0x10f   :  { %v1798_v43 = vpop.f32.mrb[12].mxu1  ;;  %v1735_v44 = vpop.f32.mrb[13].mxu0 }
 0x110   :  { %v1736_v45 = vadd.f32 %v1735_v44, %v1734_v42  ;;  %v1799_v46 = vpop.f32.mrb[13].mxu1  ;;  %v1737_v47 = vpop.f32.mrb[14].mxu0 }
 0x111   :  { %v1800_v48 = vadd.f32 %v1799_v46, %v1798_v43  ;;  %v1801_v49 = vpop.f32.mrb[14].mxu1  ;;  %v1738_v50 = vpop.f32.mrb[15].mxu0 }
 0x112   :  { %v1739_v51 = vadd.f32 %v1738_v50, %v1737_v47  ;;  %v1802_v52 = vpop.f32.mrb[15].mxu1 }
 0x113   :  { %v2433_v53 = vadd.f32 %v1800_v48, %v1736_v45  ;;  %v1803_v54 = vadd.f32 %v1802_v52, %v1801_v49 }
 0x115   :  { %v2435_v55 = vadd.f32 %v1803_v54, %v1739_v51 }
 0x116   :  { %v1740_v56 = vpop.f32.mrb[16].mxu0 }
 0x117   :  { %v1804_v57 = vpop.f32.mrb[16].mxu1  ;;  %v1741_v58 = vpop.f32.mrb[17].mxu0 }
 0x118   :  { %v1742_v59 = vadd.f32 %v1741_v58, %v1740_v56  ;;  %v1805_v60 = vpop.f32.mrb[17].mxu1  ;;  %v1743_v61 = vpop.f32.mrb[18].mxu0 }
 0x119   :  { %v1806_v62 = vadd.f32 %v1805_v60, %v1804_v57  ;;  %v1807_v63 = vpop.f32.mrb[18].mxu1  ;;  %v1744_v0 = vpop.f32.mrb[19].mxu0 }
 0x11a   :  { %v1745_v1 = vadd.f32 %v1744_v0, %v1743_v61  ;;  %v1808_v2 = vpop.f32.mrb[19].mxu1 }
 0x11b   :  { %v2437_v3 = vadd.f32 %v1806_v62, %v1742_v59  ;;  %v1809_v4 = vadd.f32 %v1808_v2, %v1807_v63 }
 0x11d   :  { %v2439_v5 = vadd.f32 %v1809_v4, %v1745_v1 }
 0x11e   :  { %v1746_v6 = vpop.f32.mrb[20].mxu0 }
 0x11f   :  { %v1810_v7 = vpop.f32.mrb[20].mxu1  ;;  %v1747_v8 = vpop.f32.mrb[21].mxu0 }
 0x120   :  { %v1748_v9 = vadd.f32 %v1747_v8, %v1746_v6  ;;  %v1811_v10 = vpop.f32.mrb[21].mxu1  ;;  %v1749_v12 = vpop.f32.mrb[22].mxu0 }
 0x121   :  { %v1812_v14 = vadd.f32 %v1811_v10, %v1810_v7  ;;  %v1813_v15 = vpop.f32.mrb[22].mxu1  ;;  %v1750_v16 = vpop.f32.mrb[23].mxu0 }
 0x122   :  { %v1751_v17 = vadd.f32 %v1750_v16, %v1749_v12  ;;  %v1814_v18 = vpop.f32.mrb[23].mxu1 }
 0x123   :  { %v2441_v19 = vadd.f32 %v1812_v14, %v1748_v9  ;;  %v1815_v20 = vadd.f32 %v1814_v18, %v1813_v15 }
 0x125   :  { %v2443_v21 = vadd.f32 %v1815_v20, %v1751_v17 }
 0x126   :  { %v1752_v22 = vpop.f32.mrb[24].mxu0 }
 0x127   :  { %v1816_v23 = vpop.f32.mrb[24].mxu1  ;;  %v1753_v24 = vpop.f32.mrb[25].mxu0 }
 0x128   :  { %v1754_v26 = vadd.f32 %v1753_v24, %v1752_v22  ;;  %v1817_v28 = vpop.f32.mrb[25].mxu1  ;;  %v1755_v29 = vpop.f32.mrb[26].mxu0 }
 0x129   :  { %v1818_v30 = vadd.f32 %v1817_v28, %v1816_v23  ;;  %v1819_v31 = vpop.f32.mrb[26].mxu1  ;;  %v1756_v32 = vpop.f32.mrb[27].mxu0 }
 0x12a   :  { %v1757_v33 = vadd.f32 %v1756_v32, %v1755_v29  ;;  %v1820_v34 = vpop.f32.mrb[27].mxu1 }
 0x12b   :  { %v2445_v35 = vadd.f32 %v1818_v30, %v1754_v26  ;;  %v1821_v36 = vadd.f32 %v1820_v34, %v1819_v31 }
 0x12d   :  { %v2447_v37 = vadd.f32 %v1821_v36, %v1757_v33 }
 0x12e   :  { %v1758_v38 = vpop.f32.mrb[28].mxu0 }
 0x12f   :  { %v1822_v40 = vpop.f32.mrb[28].mxu1  ;;  %v1759_v42 = vpop.f32.mrb[29].mxu0 }
 0x130   :  { %v1760_v43 = vadd.f32 %v1759_v42, %v1758_v38  ;;  %v1823_v44 = vpop.f32.mrb[29].mxu1  ;;  %v1761_v45 = vpop.f32.mrb[30].mxu0 }
 0x131   :  { %v1824_v46 = vadd.f32 %v1823_v44, %v1822_v40  ;;  %v1825_v47 = vpop.f32.mrb[30].mxu1  ;;  %v1762_v48 = vpop.f32.mrb[31].mxu0 }
 0x132   :  { %v1763_v49 = vadd.f32 %v1762_v48, %v1761_v45  ;;  %v1826_v50 = vpop.f32.mrb[31].mxu1 }
 0x133   :  { %v2449_v51 = vadd.f32 %v1824_v46, %v1760_v43  ;;  %v1827_v52 = vadd.f32 %v1826_v50, %v1825_v47 }
 0x135   :  { %v2451_v54 = vadd.f32 %v1827_v52, %v1763_v49 }
 0x136   :  { %v1844_v56 = vpop.f32.mrb[32].mxu0 }
 0x137   :  { %v1908_v57 = vpop.f32.mrb[32].mxu1  ;;  %v1845_v58 = vpop.f32.mrb[33].mxu0 }
 0x138   :  { %v1846_v59 = vadd.f32 %v1845_v58, %v1844_v56  ;;  %v1909_v60 = vpop.f32.mrb[33].mxu1  ;;  %v1847_v61 = vpop.f32.mrb[34].mxu0 }
 0x139   :  { %v1910_v62 = vadd.f32 %v1909_v60, %v1908_v57  ;;  %v1911_v63 = vpop.f32.mrb[34].mxu1  ;;  %v1848_v0 = vpop.f32.mrb[35].mxu0 }
 0x13a   :  { %v1137_v1 = vadd.f32 %v1846_v59, %v2421_v11  ;;  %v1849_v2 = vadd.f32 %v1848_v0, %v1847_v61  ;;  %v1912_v4 = vpop.f32.mrb[35].mxu1 }
 0x13b   :  { %v1913_v6 = vadd.f32 %v1912_v4, %v1911_v63 }
 0x13c   :  { %v2454_v7 = vadd.f32 %v1910_v62, %v1137_v1  ;;  %v1140_v8 = vadd.f32 %v1849_v2, %v2423_v13 }
 0x13e   :  { %v2457_v9 = vadd.f32 %v1913_v6, %v1140_v8  ;;  %v1850_v10 = vpop.f32.mrb[36].mxu0 }
 0x13f   :  { %v1914_v12 = vpop.f32.mrb[36].mxu1  ;;  %v1851_v14 = vpop.f32.mrb[37].mxu0 }
 0x140   :  { %v1296_v15 = vadd.f32 %v2457_v9, %v2454_v7  ;;  %v1852_v16 = vadd.f32 %v1851_v14, %v1850_v10  ;;  %v1915_v17 = vpop.f32.mrb[37].mxu1  ;;  %v1853_v18 = vpop.f32.mrb[38].mxu0 }
 0x141   :  { %v1916_v20 = vadd.f32 %v1915_v17, %v1914_v12  ;;  %v1917_v11 = vpop.f32.mrb[38].mxu1  ;;  %v1854_v22 = vpop.f32.mrb[39].mxu0 }
 0x142   :  { %v1145_v23 = vadd.f32 %v1852_v16, %v2425_v25  ;;  %v1855_v24 = vadd.f32 %v1854_v22, %v1853_v18  ;;  %v1918_v26 = vpop.f32.mrb[39].mxu1 }
 0x143   :  { %v1919_v28 = vadd.f32 %v1918_v26, %v1917_v11 }
 0x144   :  { %v2462_v13 = vadd.f32 %v1916_v20, %v1145_v23  ;;  %v1148_v29 = vadd.f32 %v1855_v24, %v2427_v27 }
 0x146   :  { %v1297_v30 = vadd.f32 %v1296_v15, %v2462_v13  ;;  %v2466_v31 = vadd.f32 %v1919_v28, %v1148_v29  ;;  %v1856_v32 = vpop.f32.mrb[40].mxu0 }
 0x147   :  { %v1920_v33 = vpop.f32.mrb[40].mxu1  ;;  %v1857_v34 = vpop.f32.mrb[41].mxu0 }
 0x148   :  { %v1298_v36 = vadd.f32 %v1297_v30, %v2466_v31  ;;  %v1858_v38 = vadd.f32 %v1857_v34, %v1856_v32  ;;  %v1921_v40 = vpop.f32.mrb[41].mxu1  ;;  %v1859_v42 = vpop.f32.mrb[42].mxu0 }
 0x149   :  { %v1922_v25 = vadd.f32 %v1921_v40, %v1920_v33  ;;  %v1923_v43 = vpop.f32.mrb[42].mxu1  ;;  %v1860_v44 = vpop.f32.mrb[43].mxu0 }
 0x14a   :  { %v1153_v45 = vadd.f32 %v1858_v38, %v2429_v39  ;;  %v1861_v46 = vadd.f32 %v1860_v44, %v1859_v42  ;;  %v1924_v47 = vpop.f32.mrb[43].mxu1 }
 0x14b   :  { %v1925_v27 = vadd.f32 %v1924_v47, %v1923_v43 }
 0x14c   :  { %v2470_v48 = vadd.f32 %v1922_v25, %v1153_v45  ;;  %v1156_v49 = vadd.f32 %v1861_v46, %v2431_v41 }
 0x14e   :  { %v1299_v50 = vadd.f32 %v1298_v36, %v2470_v48  ;;  %v2474_v52 = vadd.f32 %v1925_v27, %v1156_v49  ;;  %v1862_v56 = vpop.f32.mrb[44].mxu0 }
 0x14f   :  { %v1926_v57 = vpop.f32.mrb[44].mxu1  ;;  %v1863_v58 = vpop.f32.mrb[45].mxu0 }
 0x150   :  { %v1300_v59 = vadd.f32 %v1299_v50, %v2474_v52  ;;  %v1864_v60 = vadd.f32 %v1863_v58, %v1862_v56  ;;  %v1927_v61 = vpop.f32.mrb[45].mxu1  ;;  %v1865_v62 = vpop.f32.mrb[46].mxu0 }
 0x151   :  { %v1928_v39 = vadd.f32 %v1927_v61, %v1926_v57  ;;  %v1929_v63 = vpop.f32.mrb[46].mxu1  ;;  %v1866_v0 = vpop.f32.mrb[47].mxu0 }
 0x152   :  { %v1161_v1 = vadd.f32 %v1864_v60, %v2433_v53  ;;  %v1867_v2 = vadd.f32 %v1866_v0, %v1865_v62  ;;  %v1930_v4 = vpop.f32.mrb[47].mxu1 }
 0x153   :  { %v1931_v41 = vadd.f32 %v1930_v4, %v1929_v63 }
 0x154   :  { %v2478_v6 = vadd.f32 %v1928_v39, %v1161_v1  ;;  %v1164_v8 = vadd.f32 %v1867_v2, %v2435_v55 }
 0x156   :  { %v1301_v10 = vadd.f32 %v1300_v59, %v2478_v6  ;;  %v2482_v12 = vadd.f32 %v1931_v41, %v1164_v8  ;;  %v1868_v14 = vpop.f32.mrb[48].mxu0 }
 0x157   :  { %v1932_v15 = vpop.f32.mrb[48].mxu1  ;;  %v1869_v16 = vpop.f32.mrb[49].mxu0 }
 0x158   :  { %v1302_v17 = vadd.f32 %v1301_v10, %v2482_v12  ;;  %v1870_v18 = vadd.f32 %v1869_v16, %v1868_v14  ;;  %v1933_v20 = vpop.f32.mrb[49].mxu1  ;;  %v1871_v11 = vpop.f32.mrb[50].mxu0 }
 0x159   :  { %v1934_v53 = vadd.f32 %v1933_v20, %v1932_v15  ;;  %v1935_v22 = vpop.f32.mrb[50].mxu1  ;;  %v1872_v23 = vpop.f32.mrb[51].mxu0 }
 0x15a   :  { %v1169_v24 = vadd.f32 %v1870_v18, %v2437_v3  ;;  %v1873_v26 = vadd.f32 %v1872_v23, %v1871_v11  ;;  %v1936_v28 = vpop.f32.mrb[51].mxu1 }
 0x15b   :  { %v1937_v55 = vadd.f32 %v1936_v28, %v1935_v22 }
 0x15c   :  { %v2486_v29 = vadd.f32 %v1934_v53, %v1169_v24  ;;  %v1172_v30 = vadd.f32 %v1873_v26, %v2439_v5 }
 0x15e   :  { %v1303_v32 = vadd.f32 %v1302_v17, %v2486_v29  ;;  %v2490_v33 = vadd.f32 %v1937_v55, %v1172_v30  ;;  %v1874_v34 = vpop.f32.mrb[52].mxu0 }
 0x15f   :  { %v1938_v36 = vpop.f32.mrb[52].mxu1  ;;  %v1875_v38 = vpop.f32.mrb[53].mxu0 }
 0x160   :  { %v1304_v40 = vadd.f32 %v1303_v32, %v2490_v33  ;;  %v1876_v42 = vadd.f32 %v1875_v38, %v1874_v34  ;;  %v1939_v25 = vpop.f32.mrb[53].mxu1  ;;  %v1877_v43 = vpop.f32.mrb[54].mxu0 }
 0x161   :  { %v1940_v3 = vadd.f32 %v1939_v25, %v1938_v36  ;;  %v1941_v44 = vpop.f32.mrb[54].mxu1  ;;  %v1878_v45 = vpop.f32.mrb[55].mxu0 }
 0x162   :  { %v1177_v46 = vadd.f32 %v1876_v42, %v2441_v19  ;;  %v1879_v47 = vadd.f32 %v1878_v45, %v1877_v43  ;;  %v1942_v27 = vpop.f32.mrb[55].mxu1 }
 0x163   :  { %v1943_v5 = vadd.f32 %v1942_v27, %v1941_v44 }
 0x164   :  { %v1274_v49 = vadd.f32 %v1940_v3, %v1177_v46  ;;  %v1180_v50 = vadd.f32 %v1879_v47, %v2443_v21 }
 0x166   :  { %v1305_v56 = vadd.f32 %v1304_v40, %v1274_v49  ;;  %v1277_v57 = vadd.f32 %v1943_v5, %v1180_v50  ;;  %v1880_v58 = vpop.f32.mrb[56].mxu0 }
 0x167   :  { %v1944_v59 = vpop.f32.mrb[56].mxu1  ;;  %v1881_v60 = vpop.f32.mrb[57].mxu0 }
 0x168   :  { %v1306_v61 = vadd.f32 %v1305_v56, %v1277_v57  ;;  %v1882_v62 = vadd.f32 %v1881_v60, %v1880_v58  ;;  %v1945_v39 = vpop.f32.mrb[57].mxu1  ;;  %v1883_v63 = vpop.f32.mrb[58].mxu0 }
 0x169   :  { %v1946_v0 = vadd.f32 %v1945_v39, %v1944_v59  ;;  %v1947_v1 = vpop.f32.mrb[58].mxu1  ;;  %v1884_v2 = vpop.f32.mrb[59].mxu0 }
 0x16a   :  { %v1185_v19 = vadd.f32 %v1882_v62, %v2445_v35  ;;  %v1885_v4 = vadd.f32 %v1884_v2, %v1883_v63  ;;  %v1948_v41 = vpop.f32.mrb[59].mxu1 }
 0x16b   :  { %v1949_v8 = vadd.f32 %v1948_v41, %v1947_v1 }
 0x16c   :  { %v1282_v10 = vadd.f32 %v1946_v0, %v1185_v19  ;;  %v1188_v21 = vadd.f32 %v1885_v4, %v2447_v37 }
 0x16e   :  { %v1307_v14 = vadd.f32 %v1306_v61, %v1282_v10  ;;  %v1285_v15 = vadd.f32 %v1949_v8, %v1188_v21  ;;  %v1886_v16 = vpop.f32.mrb[60].mxu0 }
 0x16f   :  { %v1950_v17 = vpop.f32.mrb[60].mxu1  ;;  %v1887_v18 = vpop.f32.mrb[61].mxu0 }
 0x170   :  { %v1308_v20 = vadd.f32 %v1307_v14, %v1285_v15  ;;  %v1888_v11 = vadd.f32 %v1887_v18, %v1886_v16  ;;  %v1951_v53 = vpop.f32.mrb[61].mxu1  ;;  %v1889_v22 = vpop.f32.mrb[62].mxu0 }
 0x171   :  { %v1952_v23 = vadd.f32 %v1951_v53, %v1950_v17  ;;  %v1953_v24 = vpop.f32.mrb[62].mxu1  ;;  %v1890_v26 = vpop.f32.mrb[63].mxu0 }
 0x172   :  { %v1193_v35 = vadd.f32 %v1888_v11, %v2449_v51  ;;  %v1891_v28 = vadd.f32 %v1890_v26, %v1889_v22  ;;  %v1954_v55 = vpop.f32.mrb[63].mxu1 }
 0x173   :  { %v1955_v30 = vadd.f32 %v1954_v55, %v1953_v24 }
 0x174   :  { %v1290_v32 = vadd.f32 %v1952_v23, %v1193_v35  ;;  %v1196_v37 = vadd.f32 %v1891_v28, %v2451_v54 }
 0x176   :  { %v1309_v34 = vadd.f32 %v1308_v20, %v1290_v32  ;;  %v1293_v36 = vadd.f32 %v1955_v30, %v1196_v37 }
 0x178   :  { %v1310_v38 = vadd.f32 %v1309_v34, %v1293_v36 }
 0x17a   :  { %v1311_v40 = vrot.slane %v1310_v38, 4 }
 0x17c   :  { %v1312_v42 = vadd.f32 %v1311_v40, %v1310_v38 }
 0x17e   :  { %v1313_v25 = vrot.slane %v1312_v42, 2 }
 0x180   :  { %v1314_v43 = vadd.f32 %v1313_v25, %v1312_v42 }
 0x182   :  { %v1315_v3 = vrot.slane %v1314_v43, 1 }
 0x184   :  { %v1316_v44 = vadd.f32 %v1315_v3, %v1314_v43 }
 0x186   :  { %v1317_v45 = vmul.f32 0.0078125, %v1316_v44 }
 0x188   :  { %v1318_v46 = vsub.f32 %v2454_v7, %v1317_v45  ;;  %v1319_v51 = vsub.f32 %v2457_v9, %v1317_v45  ;;  %v1320_v47 = vsub.f32 %v2462_v13, %v1317_v45  ;;  %v1321_v27 = vsub.f32 %v2466_v31, %v1317_v45 }
 0x189   :  { %v1322_v54 = vsub.f32 %v2470_v48, %v1317_v45  ;;  %v1323_v5 = vsub.f32 %v2474_v52, %v1317_v45  ;;  %v1324_v50 = vsub.f32 %v2478_v6, %v1317_v45  ;;  %v1325_v56 = vsub.f32 %v2482_v12, %v1317_v45 }
 0x18a   :  { %v1326_v58 = vsub.f32 %v2486_v29, %v1317_v45  ;;  %v1327_v59 = vsub.f32 %v2490_v33, %v1317_v45  ;;  %v1328_v60 = vsub.f32 %v1274_v49, %v1317_v45  ;;  %v1329_v7 = vsub.f32 %v1277_v57, %v1317_v45 }
 0x18b   :  { %v1330_v61 = vsub.f32 %v1282_v10, %v1317_v45  ;;  %v1331_v9 = vsub.f32 %v1285_v15, %v1317_v45  ;;  %v1332_v62 = vsub.f32 %v1290_v32, %v1317_v45  ;;  %v1333_v13 = vsub.f32 %v1293_v36, %v1317_v45 }
 0x18c   :  { %v1334_v39 = vmul.f32 %v1318_v46, %v1318_v46  ;;  %v1335_v31 = vmul.f32 %v1319_v51, %v1319_v51  ;;  %v1336_v63 = vmul.f32 %v1320_v47, %v1320_v47  ;;  %v1337_v0 = vmul.f32 %v1321_v27, %v1321_v27 }
 0x18d   :  { %v1338_v1 = vmul.f32 %v1322_v54, %v1322_v54  ;;  %v1339_v2 = vmul.f32 %v1323_v5, %v1323_v5  ;;  %v1340_v19 = vmul.f32 %v1324_v50, %v1324_v50  ;;  %v1341_v4 = vmul.f32 %v1325_v56, %v1325_v56 }
 0x18e   :  { %v1350_v48 = vadd.f32 %v1335_v31, %v1334_v39  ;;  %v1342_v49 = vmul.f32 %v1326_v58, %v1326_v58  ;;  %v1343_v41 = vmul.f32 %v1327_v59, %v1327_v59  ;;  %v1344_v10 = vmul.f32 %v1328_v60, %v1328_v60 }
 0x18f   :  { %v1345_v14 = vmul.f32 %v1329_v7, %v1329_v7  ;;  %v1346_v16 = vmul.f32 %v1330_v61, %v1330_v61  ;;  %v1347_v18 = vmul.f32 %v1331_v9, %v1331_v9  ;;  %v1348_v11 = vmul.f32 %v1332_v62, %v1332_v62 }
 0x190   :  { %v1351_v52 = vadd.f32 %v1350_v48, %v1336_v63  ;;  %v1349_v22 = vmul.f32 %v1333_v13, %v1333_v13  ;;  %v1371_v30 = vmul.f32 0.0, %v1317_v45 }
 0x192   :  { %v1352_v6 = vadd.f32 %v1351_v52, %v1337_v0  ;;  %v1372_v34 = vmul.f32 %v1371_v30, %v1317_v45 }
 0x194   :  { %v1353_v12 = vadd.f32 %v1352_v6, %v1338_v1 }
 0x196   :  { %v1354_v29 = vadd.f32 %v1353_v12, %v1339_v2 }
 0x198   :  { %v1355_v33 = vadd.f32 %v1354_v29, %v1340_v19 }
 0x19a   :  { %v1356_v57 = vadd.f32 %v1355_v33, %v1341_v4 }
 0x19c   :  { %v1357_v8 = vadd.f32 %v1356_v57, %v1342_v49 }
 0x19e   :  { %v1358_v21 = vadd.f32 %v1357_v8, %v1343_v41 }
 0x1a0   :  { %v1359_v15 = vadd.f32 %v1358_v21, %v1344_v10 }
 0x1a2   :  { %v1360_v17 = vadd.f32 %v1359_v15, %v1345_v14 }
 0x1a4   :  { %v1361_v20 = vadd.f32 %v1360_v17, %v1346_v16 }
 0x1a6   :  { %v1362_v53 = vadd.f32 %v1361_v20, %v1347_v18 }
 0x1a8   :  { %v1363_v23 = vadd.f32 %v1362_v53, %v1348_v11 }
 0x1aa   :  { %v1364_v24 = vadd.f32 %v1363_v23, %v1349_v22 }
 0x1ac   :  { %v1365_v26 = vrot.slane %v1364_v24, 4 }
 0x1ae   :  { %v1366_v35 = vadd.f32 %v1365_v26, %v1364_v24 }
 0x1b0   :  { %v1367_v28 = vrot.slane %v1366_v35, 2 }
 0x1b2   :  { %v1368_v55 = vadd.f32 %v1367_v28, %v1366_v35 }
 0x1b4   :  { %v1369_v32 = vrot.slane %v1368_v55, 1 }
 0x1b6   :  { %v1370_v37 = vadd.f32 %v1369_v32, %v1368_v55 }
 0x1b8   :  { %v1373_v36 = vsub.f32 %v1370_v37, %v1372_v34 }
 0x1ba   :  { %v1374_v38 = vmul.f32 0.0078125, %v1373_v36 }
 0x1bc   :  { %v1375_v40 = vadd.f32 1e-05, %v1374_v38 }
 0x1be   :  { %2020 = vrsqrt.f32 %v1375_v40 }
 0x1c8   :  { %v2021_v42 = vpop.eup %2020 }
 0x1c9   :  { %v1377_v25 = vmul.f32 %v2021_v42, %v1318_v46  ;;  %v1378_v43 = vmul.f32 %v2021_v42, %v1319_v51  ;;  %v1379_v3 = vmul.f32 %v2021_v42, %v1320_v47  ;;  %v1380_v44 = vmul.f32 %v2021_v42, %v1321_v27 }
 0x1ca   :  { %v1381_v39 = vmul.f32 %v2021_v42, %v1322_v54  ;;  %v1382_v31 = vmul.f32 %v2021_v42, %v1323_v5  ;;  %v1383_v63 = vmul.f32 %v2021_v42, %v1324_v50  ;;  %v1384_v48 = vmul.f32 %v2021_v42, %v1325_v56 }
 0x1cb   :  { %v1385_v0 = vmul.f32 %v2021_v42, %v1326_v58  ;;  %v1386_v52 = vmul.f32 %v2021_v42, %v1327_v59  ;;  %v1387_v1 = vmul.f32 %v2021_v42, %v1328_v60  ;;  %v1388_v6 = vmul.f32 %v2021_v42, %v1329_v7 }
 0x1cc   :  { %v1389_v2 = vmul.f32 %v2021_v42, %v1330_v61  ;;  %v1390_v12 = vmul.f32 %v2021_v42, %v1331_v9  ;;  %v1391_v45 = vmul.f32 %v2021_v42, %v1332_v62  ;;  %v1392_v19 = vmul.f32 %v2021_v42, %v1333_v13 }
 0x1cd   :  { %v1393_v29 = vmax.f32 %v1377_v25, 0.0  ;;  %v1394_v4 = vmax.f32 %v1378_v43, 0.0  ;;  %v1395_v33 = vmax.f32 %v1379_v3, 0.0  ;;  %v1396_v49 = vmax.f32 %v1380_v44, 0.0 }
 0x1ce   :  { %v1397_v46 = vmax.f32 %v1381_v39, 0.0  ;;  %v1398_v51 = vmax.f32 %v1382_v31, 0.0  ;;  %v1399_v47 = vmax.f32 %v1383_v63, 0.0  ;;  %v1400_v27 = vmax.f32 %v1384_v48, 0.0 }
 0x1cf   :  { %v1401_v54 = vmax.f32 %v1385_v0, 0.0  ;;  %v1402_v5 = vmax.f32 %v1386_v52, 0.0  ;;  %v1403_v50 = vmax.f32 %v1387_v1, 0.0  ;;  %v1404_v56 = vmax.f32 %v1388_v6, 0.0 }
 0x1d0   :  { %v1405_v58 = vmax.f32 %v1389_v2, 0.0  ;;  %v1406_v59 = vmax.f32 %v1390_v12, 0.0  ;;  %v1407_v60 = vmax.f32 %v1391_v45, 0.0  ;;  %v1408_v7 = vmax.f32 %v1392_v19, 0.0 }
 0x1d1   :  { %v1656_v61 = vpack.c.bf16 %v1394_v4, %v1393_v29  ;;  %v1661_v9 = vpack.c.bf16 %v1396_v49, %v1395_v33  ;;  %v1666_v62 = vpack.c.bf16 %v1398_v51, %v1397_v46  ;;  %v1671_v13 = vpack.c.bf16 %v1400_v27, %v1399_v47 }
 0x1d2   :  { %v1676_v57 = vpack.c.bf16 %v1402_v5, %v1401_v54  ;;  %v1681_v41 = vpack.c.bf16 %v1404_v56, %v1403_v50  ;;  %v1686_v8 = vpack.c.bf16 %v1406_v59, %v1405_v58  ;;  %v1691_v10 = vpack.c.bf16 %v1408_v7, %v1407_v60 }
 0x1d3   :  { %1657 = vst [vmem:[%s2535_s2] sm:$0xff] %v1656_v61   ;;  %1693 = vst [vmem:[%s2535_s2 + $0x8] sm:$0xff] %v1661_v9  }
 0x1d4   :  { %1694 = vst [vmem:[%s2535_s2 + $0x10] sm:$0xff] %v1666_v62   ;;  %1695 = vst [vmem:[%s2535_s2 + $0x18] sm:$0xff] %v1671_v13  }
 0x1d5   :  { %1696 = vst [vmem:[%s2535_s2 + $0x20] sm:$0xff] %v1676_v57   ;;  %1697 = vst [vmem:[%s2535_s2 + $0x28] sm:$0xff] %v1681_v41  }
 0x1d6   :  { %1698 = vst [vmem:[%s2535_s2 + $0x30] sm:$0xff] %v1686_v8   ;;  %1699 = vst [vmem:[%s2535_s2 + $0x38] sm:$0xff] %v1691_v10  }

// kernel: _lambda_.7
= control target key start
LH: loop header
LB: loop body
LE: loop exit
PB: predicated region body
PF: predicated region fallthrough
CT: control target
= control target key end

     0   :  { %v3109_v0 = vmov 0   ;;  %s4609_s1 = inlined_call_operand.vmem [shape: bf16[512,128], index: 1, kind: input, shape index: {}]   ;;  %s4610_s0 = inlined_call_operand.vmem [shape: bf16[512,512], index: 0, kind: input, shape index: {}]   ;;  %s4611_s2 = inlined_call_operand.vmem [shape: bf16[512,128], index: 2, kind: output, shape index: {}]  }
   0x1   :  { %1036 = vmatprep.subr.bf16.mxu1 %v3109_v0  ;;  %1325 = vmatprep.subr.bf16.mxu0 %v3109_v0  ;;  %v2883_v1 = vld [vmem:[%s4609_s1] sm:$0xff]   ;;  %v2885_v3 = vld [vmem:[%s4609_s1 + $0x8] sm:$0xff]   ;;  %v2887_v5 = vld [vmem:[%s4609_s1 + $0x10] sm:$0xff]  }
   0x2   :  { %v2884_v2 = vld [vmem:[%s4609_s1 + $0x80] sm:$0xff]   ;;  %1037 = vmatpush1.bf16.msra.mxu1 %v2883_v1  ;;  %v2886_v4 = vld [vmem:[%s4609_s1 + $0x88] sm:$0xff]   ;;  %v2888_v6 = vld [vmem:[%s4609_s1 + $0x90] sm:$0xff]  }
   0x3   :  { %1326 = vmatpush1.bf16.msra.mxu0 %v2884_v2  ;;  %1038 = vmatprep.subr.bf16.mxu1 %v3109_v0  ;;  %v2889_v7 = vld [vmem:[%s4609_s1 + $0x18] sm:$0xff]   ;;  %v2891_v9 = vld [vmem:[%s4609_s1 + $0x20] sm:$0xff]   ;;  %v2893_v11 = vld [vmem:[%s4609_s1 + $0x28] sm:$0xff]  }
   0x4   :  { %1327 = vmatprep.subr.bf16.mxu0 %v3109_v0  ;;  %v2890_v8 = vld [vmem:[%s4609_s1 + $0x98] sm:$0xff]   ;;  %v2892_v10 = vld [vmem:[%s4609_s1 + $0xa0] sm:$0xff]   ;;  %v2894_v12 = vld [vmem:[%s4609_s1 + $0xa8] sm:$0xff]  }
   0x5   :  { %v2895_v13 = vld [vmem:[%s4609_s1 + $0x30] sm:$0xff]   ;;  %v2897_v15 = vld [vmem:[%s4609_s1 + $0x38] sm:$0xff]   ;;  %v2899_v17 = vld [vmem:[%s4609_s1 + $0x40] sm:$0xff]  }
   0x6   :  { %1039 = vmatpush1.bf16.msra.mxu1 %v2885_v3  ;;  %v2896_v14 = vld [vmem:[%s4609_s1 + $0xb0] sm:$0xff]   ;;  %v2898_v16 = vld [vmem:[%s4609_s1 + $0xb8] sm:$0xff]   ;;  %v2900_v18 = vld [vmem:[%s4609_s1 + $0xc0] sm:$0xff]  }
   0x7   :  { %1328 = vmatpush1.bf16.msra.mxu0 %v2886_v4  ;;  %1040 = vmatprep.subr.bf16.mxu1 %v3109_v0  ;;  %v2917_v19 = vld [vmem:[%s4610_s0 + $0x4] ss:$16 sps:$4 sm:$0xff]   ;;  %v2901_v20 = vld [vmem:[%s4609_s1 + $0x48] sm:$0xff]   ;;  %v2905_v25 = vld [vmem:[%s4609_s1 + $0x58] sm:$0xff]  }
   0x8   :  { %1329 = vmatprep.subr.bf16.mxu0 %v3109_v0  ;;  %v2920_v21 = vld [vmem:[%s4610_s0 + $0xc] ss:$16 sps:$4 sm:$0xff]   ;;  %1068 = vmatprep.mubr.bf16.mxu1 %v2917_v19  ;;  %v2903_v23 = vld [vmem:[%s4609_s1 + $0x50] sm:$0xff]   ;;  %v2907_v27 = vld [vmem:[%s4609_s1 + $0x60] sm:$0xff]  }
   0x9   :  { %v2902_v22 = vld [vmem:[%s4609_s1 + $0xc8] sm:$0xff]   ;;  %1357 = vmatprep.mubr.bf16.mxu0 %v2920_v21  ;;  %v2904_v24 = vld [vmem:[%s4609_s1 + $0xd0] sm:$0xff]   ;;  %v2906_v26 = vld [vmem:[%s4609_s1 + $0xd8] sm:$0xff]  }
   0xa   :  { %1041 = vmatpush1.bf16.msra.mxu1 %v2887_v5  ;;  %v2908_v28 = vld [vmem:[%s4609_s1 + $0xe0] sm:$0xff]   ;;  %v2909_v29 = vld [vmem:[%s4609_s1 + $0x68] sm:$0xff]   ;;  %v2911_v31 = vld [vmem:[%s4609_s1 + $0x70] sm:$0xff]  }
   0xb   :  { %1330 = vmatpush1.bf16.msra.mxu0 %v2888_v6  ;;  %1042 = vmatprep.subr.bf16.mxu1 %v3109_v0  ;;  %v2910_v30 = vld [vmem:[%s4609_s1 + $0xe8] sm:$0xff]   ;;  %v2912_v32 = vld [vmem:[%s4609_s1 + $0xf0] sm:$0xff]   ;;  %v2913_v33 = vld [vmem:[%s4609_s1 + $0x78] sm:$0xff]  }
   0xc   :  { %1331 = vmatprep.subr.bf16.mxu0 %v3109_v0  ;;  %v2914_v34 = vld [vmem:[%s4609_s1 + $0xf8] sm:$0xff]   ;;  %v2915_v35 = vld [vmem:[%s4610_s0] ss:$16 sps:$4 sm:$0xff]   ;;  %v2921_v37 = vld [vmem:[%s4610_s0 + $0x24] ss:$16 sps:$4 sm:$0xff]  }
   0xd   :  { %v2918_v36 = vld [vmem:[%s4610_s0 + $0x8] ss:$16 sps:$4 sm:$0xff]   ;;  %v2923_v38 = vld [vmem:[%s4610_s0 + $0x2c] ss:$16 sps:$4 sm:$0xff]   ;;  %v2925_v39 = vld [vmem:[%s4610_s0 + $0x20] ss:$16 sps:$4 sm:$0xff]  }
   0xe   :  { %1043 = vmatpush1.bf16.msra.mxu1 %v2889_v7  ;;  %v2926_v40 = vld [vmem:[%s4610_s0 + $0x28] ss:$16 sps:$4 sm:$0xff]   ;;  %v2927_v41 = vld [vmem:[%s4610_s0 + $0x44] ss:$16 sps:$4 sm:$0xff]   ;;  %v2929_v42 = vld [vmem:[%s4610_s0 + $0x4c] ss:$16 sps:$4 sm:$0xff]  }
   0xf   :  { %1332 = vmatpush1.bf16.msra.mxu0 %v2890_v8  ;;  %1044 = vmatprep.subr.bf16.mxu1 %v3109_v0  ;;  %v2931_v43 = vld [vmem:[%s4610_s0 + $0x40] ss:$16 sps:$4 sm:$0xff]   ;;  %v2932_v44 = vld [vmem:[%s4610_s0 + $0x48] ss:$16 sps:$4 sm:$0xff]   ;;  %v2933_v45 = vld [vmem:[%s4610_s0 + $0x64] ss:$16 sps:$4 sm:$0xff]  }
  0x10   :  { %1333 = vmatprep.subr.bf16.mxu0 %v3109_v0  ;;  %v2935_v46 = vld [vmem:[%s4610_s0 + $0x6c] ss:$16 sps:$4 sm:$0xff]   ;;  %v2937_v47 = vld [vmem:[%s4610_s0 + $0x60] ss:$16 sps:$4 sm:$0xff]   ;;  %v2938_v48 = vld [vmem:[%s4610_s0 + $0x68] ss:$16 sps:$4 sm:$0xff]  }
  0x11   :  { %v2939_v49 = vld [vmem:[%s4610_s0 + $0x84] ss:$16 sps:$4 sm:$0xff]   ;;  %v2941_v50 = vld [vmem:[%s4610_s0 + $0x8c] ss:$16 sps:$4 sm:$0xff]   ;;  %v2943_v51 = vld [vmem:[%s4610_s0 + $0x80] ss:$16 sps:$4 sm:$0xff]  }
  0x12   :  { %1045 = vmatpush1.bf16.msra.mxu1 %v2891_v9  ;;  %v2944_v52 = vld [vmem:[%s4610_s0 + $0x88] ss:$16 sps:$4 sm:$0xff]   ;;  %v2945_v53 = vld [vmem:[%s4610_s0 + $0xa4] ss:$16 sps:$4 sm:$0xff]   ;;  %v2947_v54 = vld [vmem:[%s4610_s0 + $0xac] ss:$16 sps:$4 sm:$0xff]  }
  0x13   :  { %1334 = vmatpush1.bf16.msra.mxu0 %v2892_v10  ;;  %1046 = vmatprep.subr.bf16.mxu1 %v3109_v0  ;;  %v2949_v55 = vld [vmem:[%s4610_s0 + $0xa0] ss:$16 sps:$4 sm:$0xff]   ;;  %v2950_v56 = vld [vmem:[%s4610_s0 + $0xa8] ss:$16 sps:$4 sm:$0xff]   ;;  %v2951_v57 = vld [vmem:[%s4610_s0 + $0xc4] ss:$16 sps:$4 sm:$0xff]  }
  0x14   :  { %1335 = vmatprep.subr.bf16.mxu0 %v3109_v0  ;;  %v2953_v58 = vld [vmem:[%s4610_s0 + $0xcc] ss:$16 sps:$4 sm:$0xff]   ;;  %v2955_v59 = vld [vmem:[%s4610_s0 + $0xc0] ss:$16 sps:$4 sm:$0xff]   ;;  %v2956_v60 = vld [vmem:[%s4610_s0 + $0xc8] ss:$16 sps:$4 sm:$0xff]  }
  0x15   :  { %v2957_v61 = vld [vmem:[%s4610_s0 + $0xe4] ss:$16 sps:$4 sm:$0xff]   ;;  %v2959_v62 = vld [vmem:[%s4610_s0 + $0xec] ss:$16 sps:$4 sm:$0xff]   ;;  %v2961_v63 = vld [vmem:[%s4610_s0 + $0xe0] ss:$16 sps:$4 sm:$0xff]  }
  0x16   :  { %1047 = vmatpush1.bf16.msra.mxu1 %v2893_v11  ;;  %v2963_v1 = vld [vmem:[%s4610_s0 + $0x104] ss:$16 sps:$4 sm:$0xff]   ;;  %v2965_v2 = vld [vmem:[%s4610_s0 + $0x10c] ss:$16 sps:$4 sm:$0xff]   ;;  %v2967_v3 = vld [vmem:[%s4610_s0 + $0x100] ss:$16 sps:$4 sm:$0xff]  }
  0x17   :  { %1336 = vmatpush1.bf16.msra.mxu0 %v2894_v12  ;;  %1048 = vmatprep.subr.bf16.mxu1 %v3109_v0  ;;  %v2968_v4 = vld [vmem:[%s4610_s0 + $0x108] ss:$16 sps:$4 sm:$0xff]   ;;  %v2969_v5 = vld [vmem:[%s4610_s0 + $0x124] ss:$16 sps:$4 sm:$0xff]   ;;  %v2971_v6 = vld [vmem:[%s4610_s0 + $0x12c] ss:$16 sps:$4 sm:$0xff]  }
  0x18   :  { %1337 = vmatprep.subr.bf16.mxu0 %v3109_v0  ;;  %v2973_v7 = vld [vmem:[%s4610_s0 + $0x120] ss:$16 sps:$4 sm:$0xff]   ;;  %v2974_v8 = vld [vmem:[%s4610_s0 + $0x128] ss:$16 sps:$4 sm:$0xff]   ;;  %v2975_v9 = vld [vmem:[%s4610_s0 + $0x144] ss:$16 sps:$4 sm:$0xff]  }
  0x19   :  { %v2977_v10 = vld [vmem:[%s4610_s0 + $0x14c] ss:$16 sps:$4 sm:$0xff]   ;;  %v2979_v11 = vld [vmem:[%s4610_s0 + $0x140] ss:$16 sps:$4 sm:$0xff]   ;;  %v2980_v12 = vld [vmem:[%s4610_s0 + $0x148] ss:$16 sps:$4 sm:$0xff]  }
  0x1a   :  { %1049 = vmatpush1.bf16.msra.mxu1 %v2895_v13  ;;  %v2981_v13 = vld [vmem:[%s4610_s0 + $0x164] ss:$16 sps:$4 sm:$0xff]   ;;  %v2991_v19 = vld [vmem:[%s4610_s0 + $0x180] ss:$16 sps:$4 sm:$0xff]  }
  0x1b   :  { %1338 = vmatpush1.bf16.msra.mxu0 %v2896_v14  ;;  %1050 = vmatprep.subr.bf16.mxu1 %v3109_v0  ;;  %v2983_v14 = vld [vmem:[%s4610_s0 + $0x16c] ss:$16 sps:$4 sm:$0xff]   ;;  %v2993_v21 = vld [vmem:[%s4610_s0 + $0x1a4] ss:$16 sps:$4 sm:$0xff]  }
  0x1c   :  { %1339 = vmatprep.subr.bf16.mxu0 %v3109_v0 }
  0x1e   :  { %1051 = vmatpush1.bf16.msra.mxu1 %v2897_v15  ;;  %v2985_v15 = vld [vmem:[%s4610_s0 + $0x160] ss:$16 sps:$4 sm:$0xff]  }
  0x1f   :  { %1340 = vmatpush1.bf16.msra.mxu0 %v2898_v16  ;;  %1052 = vmatprep.subr.bf16.mxu1 %v3109_v0  ;;  %v2986_v16 = vld [vmem:[%s4610_s0 + $0x168] ss:$16 sps:$4 sm:$0xff]  }
  0x20   :  { %1341 = vmatprep.subr.bf16.mxu0 %v3109_v0 }
  0x22   :  { %1053 = vmatpush1.bf16.msra.mxu1 %v2899_v17  ;;  %v2987_v17 = vld [vmem:[%s4610_s0 + $0x184] ss:$16 sps:$4 sm:$0xff]  }
  0x23   :  { %1342 = vmatpush1.bf16.msra.mxu0 %v2900_v18  ;;  %1054 = vmatprep.subr.bf16.mxu1 %v3109_v0  ;;  %v2989_v18 = vld [vmem:[%s4610_s0 + $0x18c] ss:$16 sps:$4 sm:$0xff]  }
  0x24   :  { %1343 = vmatprep.subr.bf16.mxu0 %v3109_v0 }
  0x26   :  { %1055 = vmatpush1.bf16.msra.mxu1 %v2901_v20  ;;  %v2992_v20 = vld [vmem:[%s4610_s0 + $0x188] ss:$16 sps:$4 sm:$0xff]  }
  0x27   :  { %1344 = vmatpush1.bf16.msra.mxu0 %v2902_v22  ;;  %1056 = vmatprep.subr.bf16.mxu1 %v3109_v0  ;;  %v2995_v22 = vld [vmem:[%s4610_s0 + $0x1ac] ss:$16 sps:$4 sm:$0xff]  }
  0x28   :  { %1345 = vmatprep.subr.bf16.mxu0 %v3109_v0 }
  0x2a   :  { %1057 = vmatpush1.bf16.msra.mxu1 %v2903_v23  ;;  %v2997_v23 = vld [vmem:[%s4610_s0 + $0x1a0] ss:$16 sps:$4 sm:$0xff]  }
  0x2b   :  { %1346 = vmatpush1.bf16.msra.mxu0 %v2904_v24  ;;  %1058 = vmatprep.subr.bf16.mxu1 %v3109_v0  ;;  %v2998_v24 = vld [vmem:[%s4610_s0 + $0x1a8] ss:$16 sps:$4 sm:$0xff]  }
  0x2c   :  { %1347 = vmatprep.subr.bf16.mxu0 %v3109_v0 }
  0x2e   :  { %1059 = vmatpush1.bf16.msra.mxu1 %v2905_v25  ;;  %v2999_v25 = vld [vmem:[%s4610_s0 + $0x1c4] ss:$16 sps:$4 sm:$0xff]  }
  0x2f   :  { %1348 = vmatpush1.bf16.msra.mxu0 %v2906_v26  ;;  %1060 = vmatprep.subr.bf16.mxu1 %v3109_v0  ;;  %v3001_v26 = vld [vmem:[%s4610_s0 + $0x1cc] ss:$16 sps:$4 sm:$0xff]  }
  0x30   :  { %1349 = vmatprep.subr.bf16.mxu0 %v3109_v0 }
  0x32   :  { %1061 = vmatpush1.bf16.msra.mxu1 %v2907_v27  ;;  %v3003_v27 = vld [vmem:[%s4610_s0 + $0x1c0] ss:$16 sps:$4 sm:$0xff]  }
  0x33   :  { %1350 = vmatpush1.bf16.msra.mxu0 %v2908_v28  ;;  %1062 = vmatprep.subr.bf16.mxu1 %v3109_v0  ;;  %v3004_v28 = vld [vmem:[%s4610_s0 + $0x1c8] ss:$16 sps:$4 sm:$0xff]  }
  0x34   :  { %1351 = vmatprep.subr.bf16.mxu0 %v3109_v0 }
  0x36   :  { %1063 = vmatpush1.bf16.msra.mxu1 %v2909_v29  ;;  %v3005_v29 = vld [vmem:[%s4610_s0 + $0x1e4] ss:$16 sps:$4 sm:$0xff]  }
  0x37   :  { %1352 = vmatpush1.bf16.msra.mxu0 %v2910_v30  ;;  %1064 = vmatprep.subr.bf16.mxu1 %v3109_v0  ;;  %v3007_v30 = vld [vmem:[%s4610_s0 + $0x1ec] ss:$16 sps:$4 sm:$0xff]  }
  0x38   :  { %1353 = vmatprep.subr.bf16.mxu0 %v3109_v0 }
  0x3a   :  { %1065 = vmatpush1.bf16.msra.mxu1 %v2911_v31  ;;  %v3009_v31 = vld [vmem:[%s4610_s0 + $0x1e0] ss:$16 sps:$4 sm:$0xff]  }
  0x3b   :  { %1354 = vmatpush1.bf16.msra.mxu0 %v2912_v32  ;;  %1066 = vmatprep.subr.bf16.mxu1 %v3109_v0  ;;  %v3010_v32 = vld [vmem:[%s4610_s0 + $0x1e8] ss:$16 sps:$4 sm:$0xff]  }
  0x3c   :  { %1355 = vmatprep.subr.bf16.mxu0 %v3109_v0  ;;  %v2962_v0 = vld [vmem:[%s4610_s0 + $0xe8] ss:$16 sps:$4 sm:$0xff]  }
  0x3e   :  { %1067 = vmatpush1.bf16.msra.mxu1 %v2913_v33  ;;  %v3011_v33 = vld [vmem:[%s4610_s0 + $0x204] ss:$16 sps:$4 sm:$0xff]  }
  0x3f   :  { %1356 = vmatpush1.bf16.msra.mxu0 %v2914_v34  ;;  %v3013_v34 = vld [vmem:[%s4610_s0 + $0x20c] ss:$16 sps:$4 sm:$0xff]  }
  0x41   :  { %1069 = vmatmul.mubr.bf16.vlgmr.msra.gmra.mrb[0].mxu1 %v2915_v35  ;;  %v3015_v35 = vld [vmem:[%s4610_s0 + $0x200] ss:$16 sps:$4 sm:$0xff]  }
  0x42   :  { %1358 = vmatmul.mubr.bf16.vlgmr.msra.gmra.mrb[0].mxu0 %v2918_v36  ;;  %1076 = vmatprep.mubr.bf16.mxu1 %v2921_v37  ;;  %v3016_v36 = vld [vmem:[%s4610_s0 + $0x208] ss:$16 sps:$4 sm:$0xff]   ;;  %v3017_v37 = vld [vmem:[%s4610_s0 + $0x224] ss:$16 sps:$4 sm:$0xff]  }
  0x43   :  { %1365 = vmatprep.mubr.bf16.mxu0 %v2923_v38  ;;  %v3019_v38 = vld [vmem:[%s4610_s0 + $0x22c] ss:$16 sps:$4 sm:$0xff]  }
  0x49   :  { %1077 = vmatmul.mubr.bf16.gmra.mrb[4].mxu1 %v2925_v39  ;;  %v3021_v39 = vld [vmem:[%s4610_s0 + $0x220] ss:$16 sps:$4 sm:$0xff]  }
  0x4a   :  { %1366 = vmatmul.mubr.bf16.gmra.mrb[4].mxu0 %v2926_v40  ;;  %1084 = vmatprep.mubr.bf16.mxu1 %v2927_v41  ;;  %v3022_v40 = vld [vmem:[%s4610_s0 + $0x228] ss:$16 sps:$4 sm:$0xff]   ;;  %v3023_v41 = vld [vmem:[%s4610_s0 + $0x244] ss:$16 sps:$4 sm:$0xff]  }
  0x4b   :  { %1373 = vmatprep.mubr.bf16.mxu0 %v2929_v42  ;;  %v3025_v42 = vld [vmem:[%s4610_s0 + $0x24c] ss:$16 sps:$4 sm:$0xff]  }
  0x51   :  { %1085 = vmatmul.mubr.bf16.gmra.mrb[8].mxu1 %v2931_v43  ;;  %v3027_v43 = vld [vmem:[%s4610_s0 + $0x240] ss:$16 sps:$4 sm:$0xff]  }
  0x52   :  { %1374 = vmatmul.mubr.bf16.gmra.mrb[8].mxu0 %v2932_v44  ;;  %1092 = vmatprep.mubr.bf16.mxu1 %v2933_v45  ;;  %v3028_v44 = vld [vmem:[%s4610_s0 + $0x248] ss:$16 sps:$4 sm:$0xff]   ;;  %v3029_v45 = vld [vmem:[%s4610_s0 + $0x264] ss:$16 sps:$4 sm:$0xff]  }
  0x53   :  { %1381 = vmatprep.mubr.bf16.mxu0 %v2935_v46  ;;  %v3031_v46 = vld [vmem:[%s4610_s0 + $0x26c] ss:$16 sps:$4 sm:$0xff]  }
  0x59   :  { %1093 = vmatmul.mubr.bf16.gmra.mrb[12].mxu1 %v2937_v47  ;;  %v3033_v47 = vld [vmem:[%s4610_s0 + $0x260] ss:$16 sps:$4 sm:$0xff]  }
  0x5a   :  { %1382 = vmatmul.mubr.bf16.gmra.mrb[12].mxu0 %v2938_v48  ;;  %1100 = vmatprep.mubr.bf16.mxu1 %v2939_v49  ;;  %v3034_v48 = vld [vmem:[%s4610_s0 + $0x268] ss:$16 sps:$4 sm:$0xff]   ;;  %v3035_v49 = vld [vmem:[%s4610_s0 + $0x284] ss:$16 sps:$4 sm:$0xff]  }
  0x5b   :  { %1389 = vmatprep.mubr.bf16.mxu0 %v2941_v50  ;;  %v3037_v50 = vld [vmem:[%s4610_s0 + $0x28c] ss:$16 sps:$4 sm:$0xff]  }
  0x61   :  { %1101 = vmatmul.mubr.bf16.gmra.mrb[16].mxu1 %v2943_v51  ;;  %v3039_v51 = vld [vmem:[%s4610_s0 + $0x280] ss:$16 sps:$4 sm:$0xff]  }
  0x62   :  { %1390 = vmatmul.mubr.bf16.gmra.mrb[16].mxu0 %v2944_v52  ;;  %1108 = vmatprep.mubr.bf16.mxu1 %v2945_v53  ;;  %v3040_v52 = vld [vmem:[%s4610_s0 + $0x288] ss:$16 sps:$4 sm:$0xff]   ;;  %v3041_v53 = vld [vmem:[%s4610_s0 + $0x2a4] ss:$16 sps:$4 sm:$0xff]  }
  0x63   :  { %1397 = vmatprep.mubr.bf16.mxu0 %v2947_v54  ;;  %v3043_v54 = vld [vmem:[%s4610_s0 + $0x2ac] ss:$16 sps:$4 sm:$0xff]  }
  0x69   :  { %1109 = vmatmul.mubr.bf16.gmra.mrb[20].mxu1 %v2949_v55  ;;  %v3045_v55 = vld [vmem:[%s4610_s0 + $0x2a0] ss:$16 sps:$4 sm:$0xff]  }
  0x6a   :  { %1398 = vmatmul.mubr.bf16.gmra.mrb[20].mxu0 %v2950_v56  ;;  %1116 = vmatprep.mubr.bf16.mxu1 %v2951_v57  ;;  %v3046_v56 = vld [vmem:[%s4610_s0 + $0x2a8] ss:$16 sps:$4 sm:$0xff]   ;;  %v3047_v57 = vld [vmem:[%s4610_s0 + $0x2c4] ss:$16 sps:$4 sm:$0xff]  }
  0x6b   :  { %1405 = vmatprep.mubr.bf16.mxu0 %v2953_v58  ;;  %v3049_v58 = vld [vmem:[%s4610_s0 + $0x2cc] ss:$16 sps:$4 sm:$0xff]  }
  0x71   :  { %1117 = vmatmul.mubr.bf16.gmra.mrb[24].mxu1 %v2955_v59  ;;  %v3051_v59 = vld [vmem:[%s4610_s0 + $0x2c0] ss:$16 sps:$4 sm:$0xff]  }
  0x72   :  { %1406 = vmatmul.mubr.bf16.gmra.mrb[24].mxu0 %v2956_v60  ;;  %1124 = vmatprep.mubr.bf16.mxu1 %v2957_v61  ;;  %v3052_v60 = vld [vmem:[%s4610_s0 + $0x2c8] ss:$16 sps:$4 sm:$0xff]   ;;  %v3053_v61 = vld [vmem:[%s4610_s0 + $0x2e4] ss:$16 sps:$4 sm:$0xff]  }
  0x73   :  { %1413 = vmatprep.mubr.bf16.mxu0 %v2959_v62  ;;  %v3055_v62 = vld [vmem:[%s4610_s0 + $0x2ec] ss:$16 sps:$4 sm:$0xff]  }
  0x79   :  { %1125 = vmatmul.mubr.bf16.gmra.mrb[28].mxu1 %v2961_v63  ;;  %v3057_v63 = vld [vmem:[%s4610_s0 + $0x2e0] ss:$16 sps:$4 sm:$0xff]  }
  0x7a   :  { %1414 = vmatmul.mubr.bf16.gmra.mrb[28].mxu0 %v2962_v0  ;;  %1132 = vmatprep.mubr.bf16.mxu1 %v2963_v1  ;;  %v3058_v0 = vld [vmem:[%s4610_s0 + $0x2e8] ss:$16 sps:$4 sm:$0xff]   ;;  %v3059_v1 = vld [vmem:[%s4610_s0 + $0x304] ss:$16 sps:$4 sm:$0xff]  }
  0x7b   :  { %1421 = vmatprep.mubr.bf16.mxu0 %v2965_v2  ;;  %v3061_v2 = vld [vmem:[%s4610_s0 + $0x30c] ss:$16 sps:$4 sm:$0xff]  }
  0x81   :  { %1133 = vmatmul.mubr.bf16.gmra.mrb[32].mxu1 %v2967_v3  ;;  %v3063_v3 = vld [vmem:[%s4610_s0 + $0x300] ss:$16 sps:$4 sm:$0xff]  }
  0x82   :  { %1422 = vmatmul.mubr.bf16.gmra.mrb[32].mxu0 %v2968_v4  ;;  %1140 = vmatprep.mubr.bf16.mxu1 %v2969_v5  ;;  %v3064_v4 = vld [vmem:[%s4610_s0 + $0x308] ss:$16 sps:$4 sm:$0xff]   ;;  %v3065_v5 = vld [vmem:[%s4610_s0 + $0x324] ss:$16 sps:$4 sm:$0xff]  }
  0x83   :  { %1429 = vmatprep.mubr.bf16.mxu0 %v2971_v6  ;;  %v3067_v6 = vld [vmem:[%s4610_s0 + $0x32c] ss:$16 sps:$4 sm:$0xff]  }
  0x89   :  { %1141 = vmatmul.mubr.bf16.gmra.mrb[36].mxu1 %v2973_v7  ;;  %v3069_v7 = vld [vmem:[%s4610_s0 + $0x320] ss:$16 sps:$4 sm:$0xff]  }
  0x8a   :  { %1430 = vmatmul.mubr.bf16.gmra.mrb[36].mxu0 %v2974_v8  ;;  %1148 = vmatprep.mubr.bf16.mxu1 %v2975_v9  ;;  %v3070_v8 = vld [vmem:[%s4610_s0 + $0x328] ss:$16 sps:$4 sm:$0xff]   ;;  %v3071_v9 = vld [vmem:[%s4610_s0 + $0x344] ss:$16 sps:$4 sm:$0xff]  }
  0x8b   :  { %1437 = vmatprep.mubr.bf16.mxu0 %v2977_v10  ;;  %v3073_v10 = vld [vmem:[%s4610_s0 + $0x34c] ss:$16 sps:$4 sm:$0xff]  }
  0x91   :  { %1149 = vmatmul.mubr.bf16.gmra.mrb[40].mxu1 %v2979_v11  ;;  %v3075_v11 = vld [vmem:[%s4610_s0 + $0x340] ss:$16 sps:$4 sm:$0xff]  }
  0x92   :  { %1438 = vmatmul.mubr.bf16.gmra.mrb[40].mxu0 %v2980_v12  ;;  %1156 = vmatprep.mubr.bf16.mxu1 %v2981_v13  ;;  %v3076_v12 = vld [vmem:[%s4610_s0 + $0x348] ss:$16 sps:$4 sm:$0xff]   ;;  %v3077_v13 = vld [vmem:[%s4610_s0 + $0x364] ss:$16 sps:$4 sm:$0xff]  }
  0x93   :  { %1445 = vmatprep.mubr.bf16.mxu0 %v2983_v14  ;;  %v3079_v14 = vld [vmem:[%s4610_s0 + $0x36c] ss:$16 sps:$4 sm:$0xff]  }
  0x99   :  { %1157 = vmatmul.mubr.bf16.gmra.mrb[44].mxu1 %v2985_v15 }
  0x9a   :  { %1446 = vmatmul.mubr.bf16.gmra.mrb[44].mxu0 %v2986_v16  ;;  %1164 = vmatprep.mubr.bf16.mxu1 %v2987_v17 }
  0x9b   :  { %1453 = vmatprep.mubr.bf16.mxu0 %v2989_v18  ;;  %v3081_v18 = vld [vmem:[%s4610_s0 + $0x360] ss:$16 sps:$4 sm:$0xff]  }
  0xa1   :  { %1165 = vmatmul.mubr.bf16.gmra.mrb[48].mxu1 %v2991_v19 }
  0xa2   :  { %1454 = vmatmul.mubr.bf16.gmra.mrb[48].mxu0 %v2992_v20  ;;  %1172 = vmatprep.mubr.bf16.mxu1 %v2993_v21 }
  0xa3   :  { %1461 = vmatprep.mubr.bf16.mxu0 %v2995_v22  ;;  %v3082_v22 = vld [vmem:[%s4610_s0 + $0x368] ss:$16 sps:$4 sm:$0xff]  }
  0xa9   :  { %1173 = vmatmul.mubr.bf16.gmra.mrb[52].mxu1 %v2997_v23  ;;  %v3083_v23 = vld [vmem:[%s4610_s0 + $0x384] ss:$16 sps:$4 sm:$0xff]  }
  0xaa   :  { %1462 = vmatmul.mubr.bf16.gmra.mrb[52].mxu0 %v2998_v24  ;;  %1180 = vmatprep.mubr.bf16.mxu1 %v2999_v25 }
  0xab   :  { %1469 = vmatprep.mubr.bf16.mxu0 %v3001_v26  ;;  %v3085_v26 = vld [vmem:[%s4610_s0 + $0x38c] ss:$16 sps:$4 sm:$0xff]  }
  0xb1   :  { %1181 = vmatmul.mubr.bf16.gmra.mrb[56].mxu1 %v3003_v27 }
  0xb2   :  { %1470 = vmatmul.mubr.bf16.gmra.mrb[56].mxu0 %v3004_v28  ;;  %1188 = vmatprep.mubr.bf16.mxu1 %v3005_v29 }
  0xb3   :  { %1477 = vmatprep.mubr.bf16.mxu0 %v3007_v30 }
  0xb9   :  { %1189 = vmatmul.mubr.bf16.gmra.mrb[60].mxu1 %v3009_v31 }
  0xba   :  { %1478 = vmatmul.mubr.bf16.gmra.mrb[60].mxu0 %v3010_v32  ;;  %1196 = vmatprep.mubr.bf16.mxu1 %v3011_v33  ;;  %v3087_v32 = vld [vmem:[%s4610_s0 + $0x380] ss:$16 sps:$4 sm:$0xff]  }
  0xbb   :  { %1485 = vmatprep.mubr.bf16.mxu0 %v3013_v34 }
  0xc1   :  { %1197 = vmatmul.mubr.bf16.gmra.mrb[64].mxu1 %v3015_v35 }
  0xc2   :  { %1486 = vmatmul.mubr.bf16.gmra.mrb[64].mxu0 %v3016_v36  ;;  %1204 = vmatprep.mubr.bf16.mxu1 %v3017_v37  ;;  %v3088_v36 = vld [vmem:[%s4610_s0 + $0x388] ss:$16 sps:$4 sm:$0xff]   ;;  %v3089_v37 = vld [vmem:[%s4610_s0 + $0x3a4] ss:$16 sps:$4 sm:$0xff]  }
  0xc3   :  { %1493 = vmatprep.mubr.bf16.mxu0 %v3019_v38 }
  0xc9   :  { %1205 = vmatmul.mubr.bf16.gmra.mrb[68].mxu1 %v3021_v39 }
  0xca   :  { %1494 = vmatmul.mubr.bf16.gmra.mrb[68].mxu0 %v3022_v40  ;;  %1212 = vmatprep.mubr.bf16.mxu1 %v3023_v41  ;;  %v3091_v40 = vld [vmem:[%s4610_s0 + $0x3ac] ss:$16 sps:$4 sm:$0xff]  }
  0xcb   :  { %1501 = vmatprep.mubr.bf16.mxu0 %v3025_v42 }
  0xd1   :  { %1213 = vmatmul.mubr.bf16.gmra.mrb[72].mxu1 %v3027_v43 }
  0xd2   :  { %1502 = vmatmul.mubr.bf16.gmra.mrb[72].mxu0 %v3028_v44  ;;  %1220 = vmatprep.mubr.bf16.mxu1 %v3029_v45 }
  0xd3   :  { %1509 = vmatprep.mubr.bf16.mxu0 %v3031_v46  ;;  %v3093_v46 = vld [vmem:[%s4610_s0 + $0x3a0] ss:$16 sps:$4 sm:$0xff]  }
  0xd9   :  { %1221 = vmatmul.mubr.bf16.gmra.mrb[76].mxu1 %v3033_v47 }
  0xda   :  { %1510 = vmatmul.mubr.bf16.gmra.mrb[76].mxu0 %v3034_v48  ;;  %1228 = vmatprep.mubr.bf16.mxu1 %v3035_v49 }
  0xdb   :  { %1517 = vmatprep.mubr.bf16.mxu0 %v3037_v50  ;;  %v3094_v50 = vld [vmem:[%s4610_s0 + $0x3a8] ss:$16 sps:$4 sm:$0xff]  }
  0xe1   :  { %1229 = vmatmul.mubr.bf16.gmra.mrb[80].mxu1 %v3039_v51  ;;  %v3095_v51 = vld [vmem:[%s4610_s0 + $0x3c4] ss:$16 sps:$4 sm:$0xff]  }
  0xe2   :  { %1518 = vmatmul.mubr.bf16.gmra.mrb[80].mxu0 %v3040_v52  ;;  %1236 = vmatprep.mubr.bf16.mxu1 %v3041_v53 }
  0xe3   :  { %1525 = vmatprep.mubr.bf16.mxu0 %v3043_v54  ;;  %v3097_v54 = vld [vmem:[%s4610_s0 + $0x3cc] ss:$16 sps:$4 sm:$0xff]  }
  0xe9   :  { %1237 = vmatmul.mubr.bf16.gmra.mrb[84].mxu1 %v3045_v55 }
  0xea   :  { %1526 = vmatmul.mubr.bf16.gmra.mrb[84].mxu0 %v3046_v56  ;;  %1244 = vmatprep.mubr.bf16.mxu1 %v3047_v57 }
  0xeb   :  { %1533 = vmatprep.mubr.bf16.mxu0 %v3049_v58 }
  0xf1   :  { %1245 = vmatmul.mubr.bf16.gmra.mrb[88].mxu1 %v3051_v59 }
  0xf2   :  { %1534 = vmatmul.mubr.bf16.gmra.mrb[88].mxu0 %v3052_v60  ;;  %1252 = vmatprep.mubr.bf16.mxu1 %v3053_v61  ;;  %v3099_v60 = vld [vmem:[%s4610_s0 + $0x3c0] ss:$16 sps:$4 sm:$0xff]  }
  0xf3   :  { %1541 = vmatprep.mubr.bf16.mxu0 %v3055_v62 }
  0xf9   :  { %1253 = vmatmul.mubr.bf16.gmra.mrb[92].mxu1 %v3057_v63 }
  0xfa   :  { %1542 = vmatmul.mubr.bf16.gmra.mrb[92].mxu0 %v3058_v0  ;;  %1260 = vmatprep.mubr.bf16.mxu1 %v3059_v1  ;;  %v3100_v0 = vld [vmem:[%s4610_s0 + $0x3c8] ss:$16 sps:$4 sm:$0xff]   ;;  %v3101_v1 = vld [vmem:[%s4610_s0 + $0x3e4] ss:$16 sps:$4 sm:$0xff]  }
  0xfb   :  { %1549 = vmatprep.mubr.bf16.mxu0 %v3061_v2 }
 0x101   :  { %1261 = vmatmul.mubr.bf16.gmra.mrb[96].mxu1 %v3063_v3 }
 0x102   :  { %1550 = vmatmul.mubr.bf16.gmra.mrb[96].mxu0 %v3064_v4  ;;  %1268 = vmatprep.mubr.bf16.mxu1 %v3065_v5  ;;  %v3103_v4 = vld [vmem:[%s4610_s0 + $0x3ec] ss:$16 sps:$4 sm:$0xff]  }
 0x103   :  { %1557 = vmatprep.mubr.bf16.mxu0 %v3067_v6 }
 0x109   :  { %1269 = vmatmul.mubr.bf16.gmra.mrb[100].mxu1 %v3069_v7 }
 0x10a   :  { %1558 = vmatmul.mubr.bf16.gmra.mrb[100].mxu0 %v3070_v8  ;;  %1276 = vmatprep.mubr.bf16.mxu1 %v3071_v9 }
 0x10b   :  { %1565 = vmatprep.mubr.bf16.mxu0 %v3073_v10  ;;  %v3105_v10 = vld [vmem:[%s4610_s0 + $0x3e0] ss:$16 sps:$4 sm:$0xff]  }
 0x111   :  { %1277 = vmatmul.mubr.bf16.gmra.mrb[104].mxu1 %v3075_v11 }
 0x112   :  { %1566 = vmatmul.mubr.bf16.gmra.mrb[104].mxu0 %v3076_v12  ;;  %1284 = vmatprep.mubr.bf16.mxu1 %v3077_v13 }
 0x113   :  { %1573 = vmatprep.mubr.bf16.mxu0 %v3079_v14  ;;  %v3106_v14 = vld [vmem:[%s4610_s0 + $0x3e8] ss:$16 sps:$4 sm:$0xff]  }
 0x114   :  { %v1070_v15 = vpop.f32.mrb[0].mxu1 }
 0x115   :  { %v1359_v16 = vpop.f32.mrb[0].mxu0  ;;  %v1072_v17 = vpop.f32.mrb[1].mxu1 }
 0x116   :  { %v3586_v19 = vadd.f32 %v1359_v16, %v1070_v15  ;;  %v1361_v20 = vpop.f32.mrb[1].mxu0  ;;  %v1073_v21 = vpop.f32.mrb[2].mxu1 }
 0x117   :  { %v1362_v24 = vpop.f32.mrb[2].mxu0  ;;  %v1075_v25 = vpop.f32.mrb[3].mxu1 }
 0x118   :  { %v3597_v27 = vadd.f32 %v1362_v24, %v1073_v21  ;;  %v1364_v28 = vpop.f32.mrb[3].mxu0 }
 0x119   :  { %1285 = vmatmul.mubr.bf16.gmra.mrb[108].mxu1 %v3081_v18 }
 0x11a   :  { %1574 = vmatmul.mubr.bf16.gmra.mrb[108].mxu0 %v3082_v22  ;;  %1292 = vmatprep.mubr.bf16.mxu1 %v3083_v23 }
 0x11b   :  { %1581 = vmatprep.mubr.bf16.mxu0 %v3085_v26 }
 0x11c   :  { %v1078_v29 = vpop.f32.mrb[4].mxu1 }
 0x11d   :  { %v1367_v30 = vpop.f32.mrb[4].mxu0  ;;  %v1080_v31 = vpop.f32.mrb[5].mxu1 }
 0x11e   :  { %v3602_v33 = vadd.f32 %v1367_v30, %v1078_v29  ;;  %v1369_v34 = vpop.f32.mrb[5].mxu0  ;;  %v1081_v35 = vpop.f32.mrb[6].mxu1 }
 0x11f   :  { %v1370_v38 = vpop.f32.mrb[6].mxu0  ;;  %v1083_v39 = vpop.f32.mrb[7].mxu1 }
 0x120   :  { %v3613_v41 = vadd.f32 %v1370_v38, %v1081_v35  ;;  %v1372_v42 = vpop.f32.mrb[7].mxu0 }
 0x121   :  { %1293 = vmatmul.mubr.bf16.gmra.mrb[112].mxu1 %v3087_v32 }
 0x122   :  { %1582 = vmatmul.mubr.bf16.gmra.mrb[112].mxu0 %v3088_v36  ;;  %1300 = vmatprep.mubr.bf16.mxu1 %v3089_v37 }
 0x123   :  { %1589 = vmatprep.mubr.bf16.mxu0 %v3091_v40 }
 0x124   :  { %v1086_v43 = vpop.f32.mrb[8].mxu1 }
 0x125   :  { %v1375_v44 = vpop.f32.mrb[8].mxu0  ;;  %v1088_v45 = vpop.f32.mrb[9].mxu1 }
 0x126   :  { %v3618_v47 = vadd.f32 %v1375_v44, %v1086_v43  ;;  %v1377_v48 = vpop.f32.mrb[9].mxu0  ;;  %v1089_v49 = vpop.f32.mrb[10].mxu1 }
 0x127   :  { %v1378_v52 = vpop.f32.mrb[10].mxu0  ;;  %v1091_v53 = vpop.f32.mrb[11].mxu1 }
 0x128   :  { %v3629_v55 = vadd.f32 %v1378_v52, %v1089_v49  ;;  %v1380_v56 = vpop.f32.mrb[11].mxu0 }
 0x129   :  { %1301 = vmatmul.mubr.bf16.gmra.mrb[116].mxu1 %v3093_v46 }
 0x12a   :  { %1590 = vmatmul.mubr.bf16.gmra.mrb[116].mxu0 %v3094_v50  ;;  %1308 = vmatprep.mubr.bf16.mxu1 %v3095_v51 }
 0x12b   :  { %1597 = vmatprep.mubr.bf16.mxu0 %v3097_v54  ;;  %v1614_v54 = vadd.f32 %v3597_v27, %v3586_v19 }
 0x12c   :  { %v1094_v57 = vpop.f32.mrb[12].mxu1 }
 0x12d   :  { %v1383_v58 = vpop.f32.mrb[12].mxu0  ;;  %v1096_v59 = vpop.f32.mrb[13].mxu1  ;;  %v1615_v56 = vadd.f32 %v1614_v54, %v3602_v33 }
 0x12e   :  { %v3634_v61 = vadd.f32 %v1383_v58, %v1094_v57  ;;  %v1385_v62 = vpop.f32.mrb[13].mxu0  ;;  %v1097_v63 = vpop.f32.mrb[14].mxu1 }
 0x12f   :  { %v1386_v2 = vpop.f32.mrb[14].mxu0  ;;  %v1099_v3 = vpop.f32.mrb[15].mxu1 }
 0x130   :  { %v3645_v5 = vadd.f32 %v1386_v2, %v1097_v63  ;;  %v1388_v6 = vpop.f32.mrb[15].mxu0  ;;  %v1616_v2 = vadd.f32 %v1615_v56, %v3613_v41 }
 0x131   :  { %1309 = vmatmul.mubr.bf16.gmra.mrb[120].mxu1 %v3099_v60 }
 0x132   :  { %1598 = vmatmul.mubr.bf16.gmra.mrb[120].mxu0 %v3100_v0  ;;  %1316 = vmatprep.mubr.bf16.mxu1 %v3101_v1  ;;  %v1617_v6 = vadd.f32 %v1616_v2, %v3618_v47 }
 0x133   :  { %1605 = vmatprep.mubr.bf16.mxu0 %v3103_v4 }
 0x134   :  { %v1102_v7 = vpop.f32.mrb[16].mxu1 }
 0x135   :  { %v1391_v8 = vpop.f32.mrb[16].mxu0  ;;  %v1104_v9 = vpop.f32.mrb[17].mxu1 }
 0x136   :  { %v3650_v11 = vadd.f32 %v1391_v8, %v1102_v7  ;;  %v1393_v12 = vpop.f32.mrb[17].mxu0  ;;  %v1105_v13 = vpop.f32.mrb[18].mxu1 }
 0x137   :  { %v1394_v15 = vpop.f32.mrb[18].mxu0  ;;  %v1107_v16 = vpop.f32.mrb[19].mxu1 }
 0x138   :  { %v3655_v17 = vadd.f32 %v1394_v15, %v1105_v13  ;;  %v1396_v18 = vpop.f32.mrb[19].mxu0 }
 0x139   :  { %1317 = vmatmul.mubr.bf16.gmra.mrb[124].mxu1 %v3105_v10  ;;  %v1618_v10 = vadd.f32 %v1617_v6, %v3629_v55 }
 0x13a   :  { %1606 = vmatmul.mubr.bf16.gmra.mrb[124].mxu0 %v3106_v14 }
 0x13b   :  { %v1619_v18 = vadd.f32 %v1618_v10, %v3634_v61 }
 0x13c   :  { %v1110_v20 = vpop.f32.mrb[20].mxu1 }
 0x13d   :  { %v1399_v21 = vpop.f32.mrb[20].mxu0  ;;  %v1112_v22 = vpop.f32.mrb[21].mxu1 }
 0x13e   :  { %v3657_v23 = vadd.f32 %v1399_v21, %v1110_v20  ;;  %v1401_v24 = vpop.f32.mrb[21].mxu0  ;;  %v1113_v25 = vpop.f32.mrb[22].mxu1  ;;  %v1620_v22 = vadd.f32 %v1619_v18, %v3645_v5 }
 0x13f   :  { %v1402_v26 = vpop.f32.mrb[22].mxu0  ;;  %v1115_v28 = vpop.f32.mrb[23].mxu1 }
 0x140   :  { %v3659_v29 = vadd.f32 %v1402_v26, %v1113_v25  ;;  %v1404_v30 = vpop.f32.mrb[23].mxu0  ;;  %v1621_v28 = vadd.f32 %v1620_v22, %v3650_v11 }
 0x144   :  { %v1118_v31 = vpop.f32.mrb[24].mxu1 }
 0x145   :  { %v1407_v32 = vpop.f32.mrb[24].mxu0  ;;  %v1120_v34 = vpop.f32.mrb[25].mxu1 }
 0x146   :  { %v3661_v35 = vadd.f32 %v1407_v32, %v1118_v31  ;;  %v1409_v36 = vpop.f32.mrb[25].mxu0  ;;  %v1121_v37 = vpop.f32.mrb[26].mxu1 }
 0x147   :  { %v1410_v38 = vpop.f32.mrb[26].mxu0  ;;  %v1123_v39 = vpop.f32.mrb[27].mxu1 }
 0x148   :  { %v3663_v40 = vadd.f32 %v1410_v38, %v1121_v37  ;;  %v1412_v42 = vpop.f32.mrb[27].mxu0  ;;  %v1622_v39 = vadd.f32 %v1621_v28, %v3655_v17 }
 0x14a   :  { %v1623_v42 = vadd.f32 %v1622_v39, %v3657_v23 }
 0x14c   :  { %v1126_v43 = vpop.f32.mrb[28].mxu1  ;;  %v1624_v54 = vadd.f32 %v1623_v42, %v3659_v29 }
 0x14d   :  { %v1415_v44 = vpop.f32.mrb[28].mxu0  ;;  %v1128_v45 = vpop.f32.mrb[29].mxu1 }
 0x14e   :  { %v3665_v46 = vadd.f32 %v1415_v44, %v1126_v43  ;;  %v1417_v48 = vpop.f32.mrb[29].mxu0  ;;  %v1129_v49 = vpop.f32.mrb[30].mxu1 }
 0x14f   :  { %v1418_v50 = vpop.f32.mrb[30].mxu0  ;;  %v1131_v51 = vpop.f32.mrb[31].mxu1 }
 0x150   :  { %v3667_v52 = vadd.f32 %v1418_v50, %v1129_v49  ;;  %v1420_v53 = vpop.f32.mrb[31].mxu0 }
 0x154   :  { %v1134_v57 = vpop.f32.mrb[32].mxu1 }
 0x155   :  { %v1423_v58 = vpop.f32.mrb[32].mxu0  ;;  %v1136_v59 = vpop.f32.mrb[33].mxu1 }
 0x156   :  { %v3672_v60 = vadd.f32 %v1423_v58, %v1134_v57  ;;  %v1425_v62 = vpop.f32.mrb[33].mxu0  ;;  %v1137_v63 = vpop.f32.mrb[34].mxu1  ;;  %v1625_v58 = vadd.f32 %v1624_v54, %v3661_v35 }
 0x157   :  { %v1426_v0 = vpop.f32.mrb[34].mxu0  ;;  %v1139_v1 = vpop.f32.mrb[35].mxu1 }
 0x158   :  { %v3675_v3 = vadd.f32 %v1426_v0, %v1137_v63  ;;  %v1428_v4 = vpop.f32.mrb[35].mxu0  ;;  %v1626_v0 = vadd.f32 %v1625_v58, %v3663_v40 }
 0x15c   :  { %v1142_v7 = vpop.f32.mrb[36].mxu1 }
 0x15d   :  { %v1431_v8 = vpop.f32.mrb[36].mxu0  ;;  %v1144_v9 = vpop.f32.mrb[37].mxu1 }
 0x15e   :  { %v3679_v12 = vadd.f32 %v1431_v8, %v1142_v7  ;;  %v1433_v13 = vpop.f32.mrb[37].mxu0  ;;  %v1145_v14 = vpop.f32.mrb[38].mxu1  ;;  %v1627_v8 = vadd.f32 %v1626_v0, %v3665_v46 }
 0x15f   :  { %v1434_v15 = vpop.f32.mrb[38].mxu0  ;;  %v1147_v16 = vpop.f32.mrb[39].mxu1 }
 0x160   :  { %v3682_v20 = vadd.f32 %v1434_v15, %v1145_v14  ;;  %v1436_v21 = vpop.f32.mrb[39].mxu0  ;;  %v1628_v13 = vadd.f32 %v1627_v8, %v3667_v52 }
 0x162   :  { %v1629_v18 = vadd.f32 %v1628_v13, %v3672_v60 }
 0x164   :  { %v1150_v24 = vpop.f32.mrb[40].mxu1 }
 0x165   :  { %v1439_v25 = vpop.f32.mrb[40].mxu0  ;;  %v1152_v26 = vpop.f32.mrb[41].mxu1 }
 0x166   :  { %v3686_v30 = vadd.f32 %v1439_v25, %v1150_v24  ;;  %v1441_v31 = vpop.f32.mrb[41].mxu0  ;;  %v1153_v32 = vpop.f32.mrb[42].mxu1 }
 0x167   :  { %v1442_v34 = vpop.f32.mrb[42].mxu0  ;;  %v1155_v36 = vpop.f32.mrb[43].mxu1 }
 0x168   :  { %v3688_v37 = vadd.f32 %v1442_v34, %v1153_v32  ;;  %v1444_v38 = vpop.f32.mrb[43].mxu0  ;;  %v1630_v32 = vadd.f32 %v1629_v18, %v3675_v3 }
 0x16a   :  { %v1631_v34 = vadd.f32 %v1630_v32, %v3679_v12 }
 0x16c   :  { %v1158_v43 = vpop.f32.mrb[44].mxu1 }
 0x16d   :  { %v1447_v44 = vpop.f32.mrb[44].mxu0  ;;  %v1160_v45 = vpop.f32.mrb[45].mxu1 }
 0x16e   :  { %v3692_v48 = vadd.f32 %v1447_v44, %v1158_v43  ;;  %v1449_v49 = vpop.f32.mrb[45].mxu0  ;;  %v1161_v50 = vpop.f32.mrb[46].mxu1 }
 0x16f   :  { %v1450_v51 = vpop.f32.mrb[46].mxu0  ;;  %v1163_v53 = vpop.f32.mrb[47].mxu1 }
 0x170   :  { %v3695_v56 = vadd.f32 %v1450_v51, %v1161_v50  ;;  %v1452_v57 = vpop.f32.mrb[47].mxu0  ;;  %v1632_v50 = vadd.f32 %v1631_v34, %v3682_v20 }
 0x172   :  { %v1633_v54 = vadd.f32 %v1632_v50, %v3686_v30 }
 0x174   :  { %v1166_v59 = vpop.f32.mrb[48].mxu1 }
 0x175   :  { %v1455_v62 = vpop.f32.mrb[48].mxu0  ;;  %v1168_v63 = vpop.f32.mrb[49].mxu1 }
 0x176   :  { %v3699_v1 = vadd.f32 %v1455_v62, %v1166_v59  ;;  %v1457_v2 = vpop.f32.mrb[49].mxu0  ;;  %v1169_v4 = vpop.f32.mrb[50].mxu1  ;;  %v1634_v62 = vadd.f32 %v1633_v54, %v3688_v37 }
 0x177   :  { %v1458_v6 = vpop.f32.mrb[50].mxu0  ;;  %v1171_v7 = vpop.f32.mrb[51].mxu1 }
 0x178   :  { %v3702_v9 = vadd.f32 %v1458_v6, %v1169_v4  ;;  %v1460_v10 = vpop.f32.mrb[51].mxu0  ;;  %v1635_v7 = vadd.f32 %v1634_v62, %v3692_v48 }
 0x17a   :  { %v1636_v13 = vadd.f32 %v1635_v7, %v3695_v56 }
 0x17c   :  { %v1174_v14 = vpop.f32.mrb[52].mxu1  ;;  %v1637_v18 = vadd.f32 %v1636_v13, %v3699_v1 }
 0x17d   :  { %v1463_v15 = vpop.f32.mrb[52].mxu0  ;;  %v1176_v16 = vpop.f32.mrb[53].mxu1 }
 0x17e   :  { %v3706_v21 = vadd.f32 %v1463_v15, %v1174_v14  ;;  %v1465_v22 = vpop.f32.mrb[53].mxu0  ;;  %v1177_v24 = vpop.f32.mrb[54].mxu1 }
 0x17f   :  { %v1466_v25 = vpop.f32.mrb[54].mxu0  ;;  %v1179_v26 = vpop.f32.mrb[55].mxu1 }
 0x180   :  { %v3708_v28 = vadd.f32 %v1466_v25, %v1177_v24  ;;  %v1468_v31 = vpop.f32.mrb[55].mxu0 }
 0x184   :  { %v1182_v36 = vpop.f32.mrb[56].mxu1 }
 0x185   :  { %v1471_v38 = vpop.f32.mrb[56].mxu0  ;;  %v1184_v39 = vpop.f32.mrb[57].mxu1 }
 0x186   :  { %v3712_v42 = vadd.f32 %v1471_v38, %v1182_v36  ;;  %v1473_v43 = vpop.f32.mrb[57].mxu0  ;;  %v1185_v44 = vpop.f32.mrb[58].mxu1  ;;  %v1638_v36 = vadd.f32 %v1637_v18, %v3702_v9 }
 0x187   :  { %v1474_v45 = vpop.f32.mrb[58].mxu0  ;;  %v1187_v49 = vpop.f32.mrb[59].mxu1 }
 0x188   :  { %v3715_v51 = vadd.f32 %v1474_v45, %v1185_v44  ;;  %v1476_v53 = vpop.f32.mrb[59].mxu0  ;;  %v1639_v38 = vadd.f32 %v1638_v36, %v3706_v21 }
 0x18c   :  { %v1190_v57 = vpop.f32.mrb[60].mxu1 }
 0x18d   :  { %v1479_v58 = vpop.f32.mrb[60].mxu0  ;;  %v1192_v59 = vpop.f32.mrb[61].mxu1 }
 0x18e   :  { %v3719_v63 = vadd.f32 %v1479_v58, %v1190_v57  ;;  %v1481_v0 = vpop.f32.mrb[61].mxu0  ;;  %v1193_v2 = vpop.f32.mrb[62].mxu1  ;;  %v1640_v57 = vadd.f32 %v1639_v38, %v3708_v28 }
 0x18f   :  { %v1482_v4 = vpop.f32.mrb[62].mxu0  ;;  %v1195_v6 = vpop.f32.mrb[63].mxu1 }
 0x190   :  { %v3722_v8 = vadd.f32 %v1482_v4, %v1193_v2  ;;  %v1484_v10 = vpop.f32.mrb[63].mxu0  ;;  %v1641_v62 = vadd.f32 %v1640_v57, %v3712_v42 }
 0x192   :  { %v1642_v6 = vadd.f32 %v1641_v62, %v3715_v51 }
 0x194   :  { %v1198_v14 = vpop.f32.mrb[64].mxu1 }
 0x195   :  { %v1487_v15 = vpop.f32.mrb[64].mxu0  ;;  %v1200_v16 = vpop.f32.mrb[65].mxu1 }
 0x196   :  { %v3726_v22 = vadd.f32 %v1487_v15, %v1198_v14  ;;  %v1489_v24 = vpop.f32.mrb[65].mxu0  ;;  %v1201_v25 = vpop.f32.mrb[66].mxu1  ;;  %v1643_v16 = vadd.f32 %v1642_v6, %v3719_v63 }
 0x197   :  { %v1490_v26 = vpop.f32.mrb[66].mxu0  ;;  %v1203_v31 = vpop.f32.mrb[67].mxu1 }
 0x198   :  { %v3728_v32 = vadd.f32 %v1490_v26, %v1201_v25  ;;  %v1492_v34 = vpop.f32.mrb[67].mxu0  ;;  %v1644_v25 = vadd.f32 %v1643_v16, %v3722_v8 }
 0x19a   :  { %v1645_v36 = vadd.f32 %v1644_v25, %v3726_v22 }
 0x19c   :  { %v1206_v39 = vpop.f32.mrb[68].mxu1 }
 0x19d   :  { %v1495_v43 = vpop.f32.mrb[68].mxu0  ;;  %v1208_v44 = vpop.f32.mrb[69].mxu1 }
 0x19e   :  { %v3732_v45 = vadd.f32 %v1495_v43, %v1206_v39  ;;  %v1497_v49 = vpop.f32.mrb[69].mxu0  ;;  %v1209_v50 = vpop.f32.mrb[70].mxu1 }
 0x19f   :  { %v1498_v53 = vpop.f32.mrb[70].mxu0  ;;  %v1211_v54 = vpop.f32.mrb[71].mxu1 }
 0x1a0   :  { %4656 = vst [vmem:[#allocation2_spill] sm:$0xff] %v3732_v45  ;;  %v3735_v58 = vadd.f32 %v1498_v53, %v1209_v50  ;;  %v1500_v59 = vpop.f32.mrb[71].mxu0  ;;  %v1646_v54 = vadd.f32 %v1645_v36, %v3728_v32 }
 0x1a2   :  { %4657 = vst [vmem:[#allocation3_spill] sm:$0xff] %v3735_v58  ;;  %v1647_v57 = vadd.f32 %v1646_v54, %v3732_v45 }
 0x1a4   :  { %v1214_v0 = vpop.f32.mrb[72].mxu1 }
 0x1a5   :  { %v1503_v2 = vpop.f32.mrb[72].mxu0  ;;  %v1216_v4 = vpop.f32.mrb[73].mxu1 }
 0x1a6   :  { %v3739_v7 = vadd.f32 %v1503_v2, %v1214_v0  ;;  %v1505_v10 = vpop.f32.mrb[73].mxu0  ;;  %v1217_v13 = vpop.f32.mrb[74].mxu1 }
 0x1a7   :  { %v1506_v14 = vpop.f32.mrb[74].mxu0  ;;  %v1219_v15 = vpop.f32.mrb[75].mxu1 }
 0x1a8   :  { %4658 = vst [vmem:[#allocation4_spill] sm:$0xff] %v3739_v7  ;;  %v3742_v18 = vadd.f32 %v1506_v14, %v1217_v13  ;;  %v1508_v24 = vpop.f32.mrb[75].mxu0  ;;  %v1648_v14 = vadd.f32 %v1647_v57, %v3735_v58 }
 0x1aa   :  { %4659 = vst [vmem:[#allocation5_spill] sm:$0xff] %v3742_v18  ;;  %v1649_v24 = vadd.f32 %v1648_v14, %v3739_v7 }
 0x1ac   :  { %v1222_v26 = vpop.f32.mrb[76].mxu1 }
 0x1ad   :  { %v1511_v31 = vpop.f32.mrb[76].mxu0  ;;  %v1224_v34 = vpop.f32.mrb[77].mxu1 }
 0x1ae   :  { %v3746_v38 = vadd.f32 %v1511_v31, %v1222_v26  ;;  %v1513_v39 = vpop.f32.mrb[77].mxu0  ;;  %v1225_v43 = vpop.f32.mrb[78].mxu1  ;;  %v1650_v34 = vadd.f32 %v1649_v24, %v3742_v18 }
 0x1af   :  { %v1514_v44 = vpop.f32.mrb[78].mxu0  ;;  %v1227_v49 = vpop.f32.mrb[79].mxu1 }
 0x1b0   :  { %4660 = vst [vmem:[#allocation6_spill] sm:$0xff] %v3746_v38  ;;  %v3748_v50 = vadd.f32 %v1514_v44, %v1225_v43  ;;  %v1516_v53 = vpop.f32.mrb[79].mxu0 }
 0x1b1   :  { %v1651_v53 = vadd.f32 %v1650_v34, %v3746_v38 }
 0x1b2   :  { %4661 = vst [vmem:[#allocation7_spill] sm:$0xff] %v3748_v50 }
 0x1b4   :  { %v1230_v59 = vpop.f32.mrb[80].mxu1 }
 0x1b5   :  { %v1519_v62 = vpop.f32.mrb[80].mxu0  ;;  %v1232_v0 = vpop.f32.mrb[81].mxu1 }
 0x1b6   :  { %v3752_v2 = vadd.f32 %v1519_v62, %v1230_v59  ;;  %v1521_v4 = vpop.f32.mrb[81].mxu0  ;;  %v1233_v6 = vpop.f32.mrb[82].mxu1  ;;  %v1652_v59 = vadd.f32 %v1651_v53, %v3748_v50 }
 0x1b7   :  { %v1522_v10 = vpop.f32.mrb[82].mxu0  ;;  %v1235_v13 = vpop.f32.mrb[83].mxu1 }
 0x1b8   :  { %4662 = vst [vmem:[#allocation8_spill] sm:$0xff] %v3752_v2  ;;  %v3755_v15 = vadd.f32 %v1522_v10, %v1233_v6  ;;  %v1524_v16 = vpop.f32.mrb[83].mxu0  ;;  %v1653_v6 = vadd.f32 %v1652_v59, %v3752_v2 }
 0x1ba   :  { %4663 = vst [vmem:[#allocation9_spill] sm:$0xff] %v3755_v15 }
 0x1bc   :  { %v1238_v25 = vpop.f32.mrb[84].mxu1 }
 0x1bd   :  { %v1527_v26 = vpop.f32.mrb[84].mxu0  ;;  %v1240_v31 = vpop.f32.mrb[85].mxu1 }
 0x1be   :  { %v3759_v36 = vadd.f32 %v1527_v26, %v1238_v25  ;;  %v1529_v39 = vpop.f32.mrb[85].mxu0  ;;  %v1241_v43 = vpop.f32.mrb[86].mxu1  ;;  %v1654_v31 = vadd.f32 %v1653_v6, %v3755_v15 }
 0x1bf   :  { %v1530_v44 = vpop.f32.mrb[86].mxu0  ;;  %v1243_v49 = vpop.f32.mrb[87].mxu1 }
 0x1c0   :  { %4664 = vst [vmem:[#allocation10_spill] sm:$0xff] %v3759_v36  ;;  %v3762_v54 = vadd.f32 %v1530_v44, %v1241_v43  ;;  %v1532_v57 = vpop.f32.mrb[87].mxu0  ;;  %v1655_v34 = vadd.f32 %v1654_v31, %v3759_v36 }
 0x1c2   :  { %4665 = vst [vmem:[#allocation11_spill] sm:$0xff] %v3762_v54 }
 0x1c4   :  { %v1246_v62 = vpop.f32.mrb[88].mxu1 }
 0x1c5   :  { %v1535_v0 = vpop.f32.mrb[88].mxu0  ;;  %v1248_v4 = vpop.f32.mrb[89].mxu1 }
 0x1c6   :  { %v3766_v10 = vadd.f32 %v1535_v0, %v1246_v62  ;;  %v1537_v13 = vpop.f32.mrb[89].mxu0  ;;  %v1249_v14 = vpop.f32.mrb[90].mxu1  ;;  %v1656_v0 = vadd.f32 %v1655_v34, %v3762_v54 }
 0x1c7   :  { %v1538_v16 = vpop.f32.mrb[90].mxu0  ;;  %v1251_v24 = vpop.f32.mrb[91].mxu1 }
 0x1c8   :  { %4666 = vst [vmem:[#allocation12_spill] sm:$0xff] %v3766_v10  ;;  %v3768_v25 = vadd.f32 %v1538_v16, %v1249_v14  ;;  %v1540_v26 = vpop.f32.mrb[91].mxu0  ;;  %v1657_v14 = vadd.f32 %v1656_v0, %v3766_v10 }
 0x1ca   :  { %4667 = vst [vmem:[#allocation13_spill] sm:$0xff] %v3768_v25  ;;  %v1658_v26 = vadd.f32 %v1657_v14, %v3768_v25 }
 0x1cc   :  { %v1254_v39 = vpop.f32.mrb[92].mxu1 }
 0x1cd   :  { %v1543_v43 = vpop.f32.mrb[92].mxu0  ;;  %v1256_v44 = vpop.f32.mrb[93].mxu1 }
 0x1ce   :  { %v3772_v49 = vadd.f32 %v1543_v43, %v1254_v39  ;;  %v1545_v53 = vpop.f32.mrb[93].mxu0  ;;  %v1257_v57 = vpop.f32.mrb[94].mxu1 }
 0x1cf   :  { %v1546_v59 = vpop.f32.mrb[94].mxu0  ;;  %v1259_v62 = vpop.f32.mrb[95].mxu1 }
 0x1d0   :  { %4668 = vst [vmem:[#allocation14_spill] sm:$0xff] %v3772_v49  ;;  %v3775_v4 = vadd.f32 %v1546_v59, %v1257_v57  ;;  %v1548_v13 = vpop.f32.mrb[95].mxu0  ;;  %v1659_v62 = vadd.f32 %v1658_v26, %v3772_v49 }
 0x1d2   :  { %4669 = vst [vmem:[#allocation15_spill] sm:$0xff] %v3775_v4  ;;  %v1660_v57 = vadd.f32 %v1659_v62, %v3775_v4 }
 0x1d4   :  { %v1262_v16 = vpop.f32.mrb[96].mxu1 }
 0x1d5   :  { %v1551_v6 = vpop.f32.mrb[96].mxu0  ;;  %v1264_v24 = vpop.f32.mrb[97].mxu1 }
 0x1d6   :  { %v3779_v31 = vadd.f32 %v1551_v6, %v1262_v16  ;;  %v1553_v39 = vpop.f32.mrb[97].mxu0  ;;  %v1265_v43 = vpop.f32.mrb[98].mxu1 }
 0x1d7   :  { %v1554_v44 = vpop.f32.mrb[98].mxu0  ;;  %v1267_v53 = vpop.f32.mrb[99].mxu1 }
 0x1d8   :  { %4670 = vst [vmem:[#allocation16_spill] sm:$0xff] %v3779_v31  ;;  %v3782_v36 = vadd.f32 %v1554_v44, %v1265_v43  ;;  %v1556_v34 = vpop.f32.mrb[99].mxu0  ;;  %v1661_v24 = vadd.f32 %v1660_v57, %v3779_v31 }
 0x1da   :  { %4671 = vst [vmem:[#allocation17_spill] sm:$0xff] %v3782_v36  ;;  %v1662_v26 = vadd.f32 %v1661_v24, %v3782_v36 }
 0x1dc   :  { %v1270_v59 = vpop.f32.mrb[100].mxu1 }
 0x1dd   :  { %v1559_v0 = vpop.f32.mrb[100].mxu0  ;;  %v1272_v13 = vpop.f32.mrb[101].mxu1 }
 0x1de   :  { %v3786_v10 = vadd.f32 %v1559_v0, %v1270_v59  ;;  %v1561_v14 = vpop.f32.mrb[101].mxu0  ;;  %v1273_v16 = vpop.f32.mrb[102].mxu1 }
 0x1df   :  { %v1562_v6 = vpop.f32.mrb[102].mxu0  ;;  %v1275_v39 = vpop.f32.mrb[103].mxu1 }
 0x1e0   :  { %4672 = vst [vmem:[#allocation18_spill] sm:$0xff] %v3786_v10  ;;  %v3788_v25 = vadd.f32 %v1562_v6, %v1273_v16  ;;  %v1564_v53 = vpop.f32.mrb[103].mxu0  ;;  %v1663_v43 = vadd.f32 %v1662_v26, %v3786_v10 }
 0x1e2   :  { %4673 = vst [vmem:[#allocation19_spill] sm:$0xff] %v3788_v25  ;;  %v1664_v14 = vadd.f32 %v1663_v43, %v3788_v25 }
 0x1e4   :  { %v1278_v44 = vpop.f32.mrb[104].mxu1 }
 0x1e5   :  { %v1567_v62 = vpop.f32.mrb[104].mxu0  ;;  %v1280_v34 = vpop.f32.mrb[105].mxu1 }
 0x1e6   :  { %v3792_v4 = vadd.f32 %v1567_v62, %v1278_v44  ;;  %v1569_v13 = vpop.f32.mrb[105].mxu0  ;;  %v1281_v57 = vpop.f32.mrb[106].mxu1 }
 0x1e7   :  { %v1570_v59 = vpop.f32.mrb[106].mxu0  ;;  %v1283_v0 = vpop.f32.mrb[107].mxu1 }
 0x1e8   :  { %4674 = vst [vmem:[#allocation20_spill] sm:$0xff] %v3792_v4  ;;  %v3795_v31 = vadd.f32 %v1570_v59, %v1281_v57  ;;  %v1572_v16 = vpop.f32.mrb[107].mxu0  ;;  %v1665_v6 = vadd.f32 %v1664_v14, %v3792_v4 }
 0x1ea   :  { %4675 = vst [vmem:[#allocation21_spill] sm:$0xff] %v3795_v31  ;;  %v1666_v26 = vadd.f32 %v1665_v6, %v3795_v31 }
 0x1ec   :  { %v1286_v39 = vpop.f32.mrb[108].mxu1 }
 0x1ed   :  { %v1575_v24 = vpop.f32.mrb[108].mxu0  ;;  %v1288_v53 = vpop.f32.mrb[109].mxu1 }
 0x1ee   :  { %v3799_v10 = vadd.f32 %v1575_v24, %v1286_v39  ;;  %v1577_v44 = vpop.f32.mrb[109].mxu0  ;;  %v1289_v62 = vpop.f32.mrb[110].mxu1 }
 0x1ef   :  { %v1578_v34 = vpop.f32.mrb[110].mxu0  ;;  %v1291_v13 = vpop.f32.mrb[111].mxu1 }
 0x1f0   :  { %v1667_v0 = vadd.f32 %v1666_v26, %v3799_v10  ;;  %v1579_v36 = vadd.f32 %v1578_v34, %v1289_v62  ;;  %v1580_v43 = vpop.f32.mrb[111].mxu0 }
 0x1f2   :  { %v1668_v57 = vadd.f32 %v1667_v0, %v1579_v36 }
 0x1f4   :  { %v1294_v59 = vpop.f32.mrb[112].mxu1 }
 0x1f5   :  { %v1583_v16 = vpop.f32.mrb[112].mxu0  ;;  %v1296_v25 = vpop.f32.mrb[113].mxu1 }
 0x1f6   :  { %v1584_v14 = vadd.f32 %v1583_v16, %v1294_v59  ;;  %v1585_v4 = vpop.f32.mrb[113].mxu0  ;;  %v1297_v49 = vpop.f32.mrb[114].mxu1 }
 0x1f7   :  { %v1586_v53 = vpop.f32.mrb[114].mxu0  ;;  %v1299_v54 = vpop.f32.mrb[115].mxu1 }
 0x1f8   :  { %v1669_v6 = vadd.f32 %v1668_v57, %v1584_v14  ;;  %v1587_v39 = vadd.f32 %v1586_v53, %v1297_v49  ;;  %v1588_v24 = vpop.f32.mrb[115].mxu0 }
 0x1fa   :  { %v1670_v44 = vadd.f32 %v1669_v6, %v1587_v39 }
 0x1fc   :  { %v1302_v31 = vpop.f32.mrb[116].mxu1 }
 0x1fd   :  { %v1591_v15 = vpop.f32.mrb[116].mxu0  ;;  %v1304_v13 = vpop.f32.mrb[117].mxu1 }
 0x1fe   :  { %v1592_v2 = vadd.f32 %v1591_v15, %v1302_v31  ;;  %v1593_v26 = vpop.f32.mrb[117].mxu0  ;;  %v1305_v62 = vpop.f32.mrb[118].mxu1 }
 0x1ff   :  { %v1594_v34 = vpop.f32.mrb[118].mxu0  ;;  %v1307_v0 = vpop.f32.mrb[119].mxu1 }
 0x200   :  { %v1671_v43 = vadd.f32 %v1670_v44, %v1592_v2  ;;  %v1595_v50 = vadd.f32 %v1594_v34, %v1305_v62  ;;  %v1596_v25 = vpop.f32.mrb[119].mxu0 }
 0x202   :  { %v1672_v59 = vadd.f32 %v1671_v43, %v1595_v50 }
 0x204   :  { %v1310_v4 = vpop.f32.mrb[120].mxu1 }
 0x205   :  { %v1599_v16 = vpop.f32.mrb[120].mxu0  ;;  %v1312_v38 = vpop.f32.mrb[121].mxu1 }
 0x206   :  { %v1600_v54 = vadd.f32 %v1599_v16, %v1310_v4  ;;  %v1601_v57 = vpop.f32.mrb[121].mxu0  ;;  %v1313_v49 = vpop.f32.mrb[122].mxu1 }
 0x207   :  { %v1602_v53 = vpop.f32.mrb[122].mxu0  ;;  %v1315_v6 = vpop.f32.mrb[123].mxu1 }
 0x208   :  { %v1673_v24 = vadd.f32 %v1672_v59, %v1600_v54  ;;  %v1603_v18 = vadd.f32 %v1602_v53, %v1313_v49  ;;  %v1604_v13 = vpop.f32.mrb[123].mxu0 }
 0x20a   :  { %v1674_v15 = vadd.f32 %v1673_v24, %v1603_v18 }
 0x20c   :  { %v1318_v31 = vpop.f32.mrb[124].mxu1 }
 0x20d   :  { %v1607_v26 = vpop.f32.mrb[124].mxu0  ;;  %v1320_v7 = vpop.f32.mrb[125].mxu1 }
 0x20e   :  { %v1608_v0 = vadd.f32 %v1607_v26, %v1318_v31  ;;  %v1609_v44 = vpop.f32.mrb[125].mxu0  ;;  %v1321_v62 = vpop.f32.mrb[126].mxu1 }
 0x20f   :  { %v1610_v34 = vpop.f32.mrb[126].mxu0  ;;  %v1323_v43 = vpop.f32.mrb[127].mxu1 }
 0x210   :  { %v1675_v25 = vadd.f32 %v1674_v15, %v1608_v0  ;;  %v1611_v58 = vadd.f32 %v1610_v34, %v1321_v62  ;;  %v1612_v38 = vpop.f32.mrb[127].mxu0 }
 0x212   :  { %v1676_v4 = vadd.f32 %v1675_v25, %v1611_v58 }
 0x214   :  { %v1677_v16 = vrot.slane %v1676_v4, 4 }
 0x216   :  { %v1678_v57 = vadd.f32 %v1677_v16, %v1676_v4 }
 0x218   :  { %v1679_v45 = vrot.slane %v1678_v57, 2 }
 0x21a   :  { %v1680_v6 = vadd.f32 %v1679_v45, %v1678_v57 }
 0x21c   :  { %v1681_v59 = vrot.slane %v1680_v6, 1 }
 0x21e   :  { %v1682_v49 = vadd.f32 %v1681_v59, %v1680_v6 }
 0x220   :  { %v3802_v53 = vmul.f32 0.001953125, %v1682_v49 }
 0x222   :  { %v3806_v7 = vsub.f32 %v3799_v10, %v3802_v53  ;;  %v3809_v24 = vsub.f32 %v1579_v36, %v3802_v53  ;;  %v3812_v13 = vsub.f32 %v1584_v14, %v3802_v53  ;;  %v3815_v15 = vsub.f32 %v1587_v39, %v3802_v53 }
 0x223   :  { %v3818_v31 = vsub.f32 %v1592_v2, %v3802_v53  ;;  %v3821_v45 = vsub.f32 %v1595_v50, %v3802_v53  ;;  %v3824_v26 = vsub.f32 %v1600_v54, %v3802_v53  ;;  %v3827_v10 = vsub.f32 %v1603_v18, %v3802_v53 }
 0x224   :  { %4676 = vst [vmem:[#allocation22_spill] sm:$0xff] %v3815_v15  ;;  %v3830_v36 = vsub.f32 %v1608_v0, %v3802_v53  ;;  %v3833_v14 = vsub.f32 %v1611_v58, %v3802_v53  ;;  %v3837_v39 = vsub.f32 %v3586_v19, %v3802_v53  ;;  %v3841_v50 = vsub.f32 %v3597_v27, %v3802_v53 }
 0x225   :  { %4677 = vst [vmem:[#allocation23_spill] sm:$0xff] %v3818_v31  ;;  %4678 = vst [vmem:[#allocation24_spill] sm:$0xff] %v3821_v45  ;;  %v3845_v2 = vsub.f32 %v3602_v33, %v3802_v53  ;;  %v3853_v58 = vsub.f32 %v3613_v41, %v3802_v53  ;;  %v3857_v19 = vsub.f32 %v3618_v47, %v3802_v53 }
 0x226   :  { %4679 = vst [vmem:[#allocation25_spill] sm:$0xff] %v3824_v26  ;;  %4680 = vst [vmem:[#allocation26_spill] sm:$0xff] %v3827_v10  ;;  %v1748_v18 = vmul.f32 %v3837_v39, %v3837_v39  ;;  %v1749_v54 = vmul.f32 %v3841_v50, %v3841_v50  ;;  %v3863_v33 = vsub.f32 %v3629_v55, %v3802_v53 }
 0x227   :  { %v1750_v27 = vmul.f32 %v3845_v2, %v3845_v2  ;;  %v1751_v44 = vmul.f32 %v3853_v58, %v3853_v58  ;;  %v3869_v41 = vsub.f32 %v3634_v61, %v3802_v53  ;;  %v1752_v47 = vmul.f32 %v3857_v19, %v3857_v19 }
 0x228   :  { %v1812_v0 = vadd.f32 %v1749_v54, %v1748_v18  ;;  %v3875_v43 = vsub.f32 %v3645_v5, %v3802_v53  ;;  %v1753_v55 = vmul.f32 %v3863_v33, %v3863_v33  ;;  %v3881_v38 = vsub.f32 %v3650_v11, %v3802_v53 }
 0x229   :  { %v1754_v61 = vmul.f32 %v3869_v41, %v3869_v41  ;;  %v3887_v16 = vsub.f32 %v3655_v17, %v3802_v53  ;;  %v3893_v6 = vsub.f32 %v3657_v23, %v3802_v53  ;;  %v3899_v49 = vsub.f32 %v3659_v29, %v3802_v53 }
 0x22a   :  { %v1813_v62 = vadd.f32 %v1812_v0, %v1750_v27  ;;  %v1755_v5 = vmul.f32 %v3875_v43, %v3875_v43  ;;  %v1756_v11 = vmul.f32 %v3881_v38, %v3881_v38  ;;  %v3905_v54 = vsub.f32 %v3661_v35, %v3802_v53 }
 0x22b   :  { %v1757_v17 = vmul.f32 %v3887_v16, %v3887_v16  ;;  %v1758_v23 = vmul.f32 %v3893_v6, %v3893_v6  ;;  %v3911_v0 = vsub.f32 %v3663_v40, %v3802_v53  ;;  %v1759_v29 = vmul.f32 %v3899_v49, %v3899_v49 }
 0x22c   :  { %v1814_v34 = vadd.f32 %v1813_v62, %v1751_v44  ;;  %v3917_v62 = vsub.f32 %v3665_v46, %v3802_v53  ;;  %v1760_v35 = vmul.f32 %v3905_v54, %v3905_v54 }
 0x22d   :  { %v1761_v40 = vmul.f32 %v3911_v0, %v3911_v0 }
 0x22e   :  { %v1815_v25 = vadd.f32 %v1814_v34, %v1752_v47  ;;  %v3923_v34 = vsub.f32 %v3667_v52, %v3802_v53  ;;  %v1762_v46 = vmul.f32 %v3917_v62, %v3917_v62 }
 0x230   :  { %v1816_v4 = vadd.f32 %v1815_v25, %v1753_v55  ;;  %v3929_v25 = vsub.f32 %v3672_v60, %v3802_v53  ;;  %v1763_v52 = vmul.f32 %v3923_v34, %v3923_v34 }
 0x232   :  { %v1817_v57 = vadd.f32 %v1816_v4, %v1754_v61  ;;  %v3935_v4 = vsub.f32 %v3675_v3, %v3802_v53  ;;  %v1764_v60 = vmul.f32 %v3929_v25, %v3929_v25 }
 0x234   :  { %v1818_v59 = vadd.f32 %v1817_v57, %v1755_v5  ;;  %v3941_v57 = vsub.f32 %v3679_v12, %v3802_v53  ;;  %v1765_v3 = vmul.f32 %v3935_v4, %v3935_v4 }
 0x236   :  { %v1819_v18 = vadd.f32 %v1818_v59, %v1756_v11  ;;  %v3947_v59 = vsub.f32 %v3682_v20, %v3802_v53  ;;  %v1766_v12 = vmul.f32 %v3941_v57, %v3941_v57 }
 0x238   :  { %v1820_v27 = vadd.f32 %v1819_v18, %v1757_v17  ;;  %v3953_v18 = vsub.f32 %v3686_v30, %v3802_v53  ;;  %v1767_v20 = vmul.f32 %v3947_v59, %v3947_v59 }
 0x23a   :  { %v1821_v44 = vadd.f32 %v1820_v27, %v1758_v23  ;;  %v3959_v27 = vsub.f32 %v3688_v37, %v3802_v53  ;;  %v1768_v30 = vmul.f32 %v3953_v18, %v3953_v18 }
 0x23c   :  { %v1822_v47 = vadd.f32 %v1821_v44, %v1759_v29  ;;  %v3965_v44 = vsub.f32 %v3692_v48, %v3802_v53  ;;  %v1769_v37 = vmul.f32 %v3959_v27, %v3959_v27 }
 0x23e   :  { %v1823_v55 = vadd.f32 %v1822_v47, %v1760_v35  ;;  %v3971_v47 = vsub.f32 %v3695_v56, %v3802_v53  ;;  %v1770_v48 = vmul.f32 %v3965_v44, %v3965_v44 }
 0x240   :  { %v1824_v61 = vadd.f32 %v1823_v55, %v1761_v40  ;;  %v3977_v55 = vsub.f32 %v3699_v1, %v3802_v53  ;;  %v1771_v56 = vmul.f32 %v3971_v47, %v3971_v47 }
 0x242   :  { %v1825_v5 = vadd.f32 %v1824_v61, %v1762_v46  ;;  %v3983_v61 = vsub.f32 %v3702_v9, %v3802_v53  ;;  %v1772_v1 = vmul.f32 %v3977_v55, %v3977_v55 }
 0x244   :  { %v1826_v11 = vadd.f32 %v1825_v5, %v1763_v52  ;;  %v3989_v5 = vsub.f32 %v3706_v21, %v3802_v53  ;;  %v1773_v9 = vmul.f32 %v3983_v61, %v3983_v61 }
 0x246   :  { %v1827_v17 = vadd.f32 %v1826_v11, %v1764_v60  ;;  %v3995_v11 = vsub.f32 %v3708_v28, %v3802_v53  ;;  %v1774_v21 = vmul.f32 %v3989_v5, %v3989_v5 }
 0x248   :  { %v1828_v23 = vadd.f32 %v1827_v17, %v1765_v3  ;;  %v4001_v17 = vsub.f32 %v3712_v42, %v3802_v53  ;;  %v1775_v28 = vmul.f32 %v3995_v11, %v3995_v11 }
 0x24a   :  { %v1829_v29 = vadd.f32 %v1828_v23, %v1766_v12  ;;  %v4007_v23 = vsub.f32 %v3715_v51, %v3802_v53  ;;  %v1776_v42 = vmul.f32 %v4001_v17, %v4001_v17 }
 0x24c   :  { %v1830_v35 = vadd.f32 %v1829_v29, %v1767_v20  ;;  %v4013_v29 = vsub.f32 %v3719_v63, %v3802_v53  ;;  %v1777_v51 = vmul.f32 %v4007_v23, %v4007_v23 }
 0x24e   :  { %v1831_v40 = vadd.f32 %v1830_v35, %v1768_v30  ;;  %v4019_v35 = vsub.f32 %v3722_v8, %v3802_v53  ;;  %v1778_v63 = vmul.f32 %v4013_v29, %v4013_v29 }
 0x250   :  { %v1832_v46 = vadd.f32 %v1831_v40, %v1769_v37  ;;  %v4025_v40 = vsub.f32 %v3726_v22, %v3802_v53  ;;  %v1779_v8 = vmul.f32 %v4019_v35, %v4019_v35 }
 0x252   :  { %v1833_v52 = vadd.f32 %v1832_v46, %v1770_v48  ;;  %v4031_v46 = vsub.f32 %v3728_v32, %v3802_v53  ;;  %v1780_v22 = vmul.f32 %v4025_v40, %v4025_v40 }
 0x254   :  { %v1834_v60 = vadd.f32 %v1833_v52, %v1771_v56  ;;  %v4681_v52 = vld [vmem:[#allocation2_spill] sm:$0xff]  ;;  %v1781_v32 = vmul.f32 %v4031_v46, %v4031_v46 }
 0x256   :  { %v1835_v3 = vadd.f32 %v1834_v60, %v1772_v1  ;;  %v4037_v1 = vsub.f32 %v4681_v52, %v3802_v53 }
 0x258   :  { %v1836_v12 = vadd.f32 %v1835_v3, %v1773_v9  ;;  %v4682_v9 = vld [vmem:[#allocation3_spill] sm:$0xff] }
 0x259   :  { %v4043_v3 = vsub.f32 %v4682_v9, %v3802_v53 }
 0x25a   :  { %v1837_v20 = vadd.f32 %v1836_v12, %v1774_v21  ;;  %v4683_v12 = vld [vmem:[#allocation4_spill] sm:$0xff] }
 0x25c   :  { %v1838_v30 = vadd.f32 %v1837_v20, %v1775_v28  ;;  %v4049_v28 = vsub.f32 %v4683_v12, %v3802_v53  ;;  %v1782_v20 = vmul.f32 %v4037_v1, %v4037_v1 }
 0x25e   :  { %v1839_v37 = vadd.f32 %v1838_v30, %v1776_v42  ;;  %v4684_v30 = vld [vmem:[#allocation5_spill] sm:$0xff] }
 0x260   :  { %v1840_v48 = vadd.f32 %v1839_v37, %v1777_v51  ;;  %v4055_v51 = vsub.f32 %v4684_v30, %v3802_v53  ;;  %v1783_v37 = vmul.f32 %v4043_v3, %v4043_v3  ;;  %v4692_v30 = vld [vmem:[#allocation9_spill] sm:$0xff] }
 0x262   :  { %v1841_v56 = vadd.f32 %v1840_v48, %v1778_v63  ;;  %4685 = vst [vmem:[#allocation2_spill] sm:$0xff] %v4055_v51  ;;  %v4686_v48 = vld [vmem:[#allocation6_spill] sm:$0xff]  ;;  %v1785_v9 = vmul.f32 %v4055_v51, %v4055_v51 }
 0x264   :  { %v1842_v60 = vadd.f32 %v1841_v56, %v1779_v8  ;;  %v4061_v8 = vsub.f32 %v4686_v48, %v3802_v53  ;;  %v1784_v56 = vmul.f32 %v4049_v28, %v4049_v28  ;;  %v4079_v48 = vsub.f32 %v4692_v30, %v3802_v53  ;;  %v4698_v30 = vld [vmem:[#allocation12_spill] sm:$0xff] }
 0x266   :  { %v1843_v21 = vadd.f32 %v1842_v60, %v1780_v22  ;;  %4687 = vst [vmem:[#allocation3_spill] sm:$0xff] %v4061_v8  ;;  %v4688_v22 = vld [vmem:[#allocation7_spill] sm:$0xff]  ;;  %4693 = vst [vmem:[#allocation6_spill] sm:$0xff] %v4079_v48 }
 0x267   :  { %v4067_v60 = vsub.f32 %v4688_v22, %v3802_v53  ;;  %v4694_v22 = vld [vmem:[#allocation10_spill] sm:$0xff] }
 0x268   :  { %v1844_v42 = vadd.f32 %v1843_v21, %v1781_v32  ;;  %v4690_v21 = vld [vmem:[#allocation8_spill] sm:$0xff]  ;;  %v4085_v51 = vsub.f32 %v4694_v22, %v3802_v53  ;;  %v4700_v22 = vld [vmem:[#allocation13_spill] sm:$0xff] }
 0x269   :  { %4689 = vst [vmem:[#allocation4_spill] sm:$0xff] %v4067_v60  ;;  %v4073_v12 = vsub.f32 %v4690_v21, %v3802_v53  ;;  %v4696_v21 = vld [vmem:[#allocation11_spill] sm:$0xff] }
 0x26a   :  { %v1845_v63 = vadd.f32 %v1844_v42, %v1782_v20  ;;  %v1786_v20 = vmul.f32 %v4061_v8, %v4061_v8  ;;  %4695 = vst [vmem:[#allocation7_spill] sm:$0xff] %v4085_v51  ;;  %v4091_v8 = vsub.f32 %v4696_v21, %v3802_v53  ;;  %v4702_v21 = vld [vmem:[#allocation14_spill] sm:$0xff] }
 0x26b   :  { %4691 = vst [vmem:[#allocation5_spill] sm:$0xff] %v4073_v12 }
 0x26c   :  { %v1846_v52 = vadd.f32 %v1845_v63, %v1783_v37  ;;  %v1787_v37 = vmul.f32 %v4067_v60, %v4067_v60  ;;  %4697 = vst [vmem:[#allocation8_spill] sm:$0xff] %v4091_v8  ;;  %v4097_v60 = vsub.f32 %v4698_v30, %v3802_v53  ;;  %v4704_v30 = vld [vmem:[#allocation15_spill] sm:$0xff] }
 0x26e   :  { %v1847_v32 = vadd.f32 %v1846_v52, %v1784_v56  ;;  %v1788_v56 = vmul.f32 %v4073_v12, %v4073_v12  ;;  %4699 = vst [vmem:[#allocation9_spill] sm:$0xff] %v4097_v60  ;;  %v4103_v12 = vsub.f32 %v4700_v22, %v3802_v53  ;;  %v4706_v22 = vld [vmem:[#allocation16_spill] sm:$0xff] }
 0x270   :  { %v1848_v42 = vadd.f32 %v1847_v32, %v1785_v9  ;;  %v1789_v9 = vmul.f32 %v4079_v48, %v4079_v48  ;;  %4701 = vst [vmem:[#allocation10_spill] sm:$0xff] %v4103_v12  ;;  %v4109_v48 = vsub.f32 %v4702_v21, %v3802_v53  ;;  %v4708_v21 = vld [vmem:[#allocation17_spill] sm:$0xff] }
 0x272   :  { %v1849_v63 = vadd.f32 %v1848_v42, %v1786_v20  ;;  %v1790_v20 = vmul.f32 %v4085_v51, %v4085_v51  ;;  %4703 = vst [vmem:[#allocation11_spill] sm:$0xff] %v4109_v48  ;;  %v4115_v51 = vsub.f32 %v4704_v30, %v3802_v53  ;;  %v4709_v30 = vld [vmem:[#allocation18_spill] sm:$0xff] }
 0x274   :  { %v1850_v52 = vadd.f32 %v1849_v63, %v1787_v37  ;;  %v1791_v37 = vmul.f32 %v4091_v8, %v4091_v8  ;;  %4705 = vst [vmem:[#allocation12_spill] sm:$0xff] %v4115_v51  ;;  %v4121_v8 = vsub.f32 %v4706_v22, %v3802_v53  ;;  %v4711_v22 = vld [vmem:[#allocation19_spill] sm:$0xff] }
 0x276   :  { %v1851_v32 = vadd.f32 %v1850_v52, %v1788_v56  ;;  %v1792_v56 = vmul.f32 %v4097_v60, %v4097_v60  ;;  %4707 = vst [vmem:[#allocation13_spill] sm:$0xff] %v4121_v8  ;;  %v4127_v60 = vsub.f32 %v4708_v21, %v3802_v53  ;;  %v4713_v21 = vld [vmem:[#allocation20_spill] sm:$0xff] }
 0x278   :  { %v1852_v42 = vadd.f32 %v1851_v32, %v1789_v9  ;;  %v1793_v9 = vmul.f32 %v4103_v12, %v4103_v12  ;;  %v4133_v12 = vsub.f32 %v4709_v30, %v3802_v53  ;;  %v4714_v30 = vld [vmem:[#allocation21_spill] sm:$0xff] }
 0x27a   :  { %v1853_v63 = vadd.f32 %v1852_v42, %v1790_v20  ;;  %v1794_v20 = vmul.f32 %v4109_v48, %v4109_v48  ;;  %4710 = vst [vmem:[#allocation14_spill] sm:$0xff] %v4133_v12  ;;  %v4139_v48 = vsub.f32 %v4711_v22, %v3802_v53 }
 0x27c   :  { %v1854_v52 = vadd.f32 %v1853_v63, %v1791_v37  ;;  %v1795_v37 = vmul.f32 %v4115_v51, %v4115_v51  ;;  %4712 = vst [vmem:[#allocation15_spill] sm:$0xff] %v4139_v48  ;;  %v4145_v51 = vsub.f32 %v4713_v21, %v3802_v53 }
 0x27e   :  { %v1855_v32 = vadd.f32 %v1854_v52, %v1792_v56  ;;  %v1796_v56 = vmul.f32 %v4121_v8, %v4121_v8  ;;  %v4151_v8 = vsub.f32 %v4714_v30, %v3802_v53  ;;  %v1800_v22 = vmul.f32 %v4145_v51, %v4145_v51 }
 0x280   :  { %v1856_v42 = vadd.f32 %v1855_v32, %v1793_v9  ;;  %v1797_v9 = vmul.f32 %v4127_v60, %v4127_v60 }
 0x282   :  { %v1857_v63 = vadd.f32 %v1856_v42, %v1794_v20  ;;  %v1798_v20 = vmul.f32 %v4133_v12, %v4133_v12  ;;  %v1802_v12 = vmul.f32 %v3806_v7, %v3806_v7 }
 0x284   :  { %v1858_v52 = vadd.f32 %v1857_v63, %v1795_v37  ;;  %v1799_v37 = vmul.f32 %v4139_v48, %v4139_v48  ;;  %v1804_v48 = vmul.f32 %v3812_v13, %v3812_v13 }
 0x286   :  { %v1859_v32 = vadd.f32 %v1858_v52, %v1796_v56  ;;  %v1801_v52 = vmul.f32 %v4151_v8, %v4151_v8 }
 0x288   :  { %v1860_v42 = vadd.f32 %v1859_v32, %v1797_v9  ;;  %v1803_v32 = vmul.f32 %v3809_v24, %v3809_v24 }
 0x28a   :  { %v1861_v63 = vadd.f32 %v1860_v42, %v1798_v20  ;;  %v1805_v42 = vmul.f32 %v3815_v15, %v3815_v15 }
 0x28c   :  { %v1862_v56 = vadd.f32 %v1861_v63, %v1799_v37  ;;  %v1806_v63 = vmul.f32 %v3818_v31, %v3818_v31 }
 0x28e   :  { %v1863_v21 = vadd.f32 %v1862_v56, %v1800_v22  ;;  %v1807_v56 = vmul.f32 %v3821_v45, %v3821_v45 }
 0x290   :  { %v1864_v9 = vadd.f32 %v1863_v21, %v1801_v52  ;;  %v1808_v21 = vmul.f32 %v3824_v26, %v3824_v26  ;;  %v1881_v26 = vmul.f32 0.0, %v3802_v53 }
 0x292   :  { %v1865_v30 = vadd.f32 %v1864_v9, %v1802_v12  ;;  %v1809_v9 = vmul.f32 %v3827_v10, %v3827_v10  ;;  %v1882_v10 = vmul.f32 %v1881_v26, %v3802_v53 }
 0x294   :  { %v1866_v20 = vadd.f32 %v1865_v30, %v1803_v32  ;;  %v1810_v30 = vmul.f32 %v3830_v36, %v3830_v36 }
 0x296   :  { %v1867_v37 = vadd.f32 %v1866_v20, %v1804_v48  ;;  %v1811_v20 = vmul.f32 %v3833_v14, %v3833_v14 }
 0x298   :  { %v1868_v22 = vadd.f32 %v1867_v37, %v1805_v42 }
 0x29a   :  { %v1869_v52 = vadd.f32 %v1868_v22, %v1806_v63 }
 0x29c   :  { %v1870_v12 = vadd.f32 %v1869_v52, %v1807_v56 }
 0x29e   :  { %v1871_v32 = vadd.f32 %v1870_v12, %v1808_v21 }
 0x2a0   :  { %v1872_v48 = vadd.f32 %v1871_v32, %v1809_v9 }
 0x2a2   :  { %v1873_v42 = vadd.f32 %v1872_v48, %v1810_v30  ;;  %v4722_v30 = vld [vmem:[#allocation4_spill] sm:$0xff]  ;;  %v4723_v48 = vld [vmem:[#allocation5_spill] sm:$0xff] }
 0x2a4   :  { %v1874_v37 = vadd.f32 %v1873_v42, %v1811_v20  ;;  %v4724_v20 = vld [vmem:[#allocation6_spill] sm:$0xff]  ;;  %v4725_v42 = vld [vmem:[#allocation7_spill] sm:$0xff] }
 0x2a6   :  { %v1875_v31 = vrot.slane %v1874_v37, 4 }
 0x2a8   :  { %v1876_v45 = vadd.f32 %v1875_v31, %v1874_v37 }
 0x2aa   :  { %v1877_v63 = vrot.slane %v1876_v45, 2 }
 0x2ac   :  { %v1878_v22 = vadd.f32 %v1877_v63, %v1876_v45  ;;  %v4726_v63 = vld [vmem:[#allocation8_spill] sm:$0xff] }
 0x2ae   :  { %v1879_v56 = vrot.slane %v1878_v22, 1 }
 0x2b0   :  { %v1880_v52 = vadd.f32 %v1879_v56, %v1878_v22  ;;  %v4727_v56 = vld [vmem:[#allocation9_spill] sm:$0xff] }
 0x2b2   :  { %v1883_v21 = vsub.f32 %v1880_v52, %v1882_v10 }
 0x2b4   :  { %v1884_v12 = vmul.f32 0.001953125, %v1883_v21  ;;  %v4728_v21 = vld [vmem:[#allocation10_spill] sm:$0xff] }
 0x2b6   :  { %v1885_v15 = vadd.f32 1e-05, %v1884_v12 }
 0x2b8   :  { %3107 = vrsqrt.f32 %v1885_v15 }
 0x2c2   :  { %v4181_v9 = vpop.eup %3107 }
 0x2c3   :  { %v4185_v32 = vmul.f32 %v4181_v9, %v3837_v39  ;;  %v4189_v31 = vmul.f32 %v4181_v9, %v3841_v50  ;;  %v4193_v45 = vmul.f32 %v4181_v9, %v3845_v2  ;;  %v4197_v53 = vmul.f32 %v4181_v9, %v3853_v58 }
 0x2c4   :  { %v4201_v15 = vmul.f32 %v4181_v9, %v3857_v19  ;;  %v4205_v26 = vmul.f32 %v4181_v9, %v3863_v33  ;;  %v4209_v10 = vmul.f32 %v4181_v9, %v3869_v41  ;;  %v4213_v39 = vmul.f32 %v4181_v9, %v3875_v43 }
 0x2c5   :  { %4715 = vst [vmem:[#allocation16_spill] sm:$0xff] %v4185_v32  ;;  %4716 = vst [vmem:[#allocation17_spill] sm:$0xff] %v4189_v31  ;;  %v4217_v50 = vmul.f32 %v4181_v9, %v3881_v38  ;;  %v4221_v2 = vmul.f32 %v4181_v9, %v3887_v16  ;;  %v4225_v58 = vmul.f32 %v4181_v9, %v3893_v6 }
 0x2c6   :  { %4717 = vst [vmem:[#allocation18_spill] sm:$0xff] %v4193_v45  ;;  %4718 = vst [vmem:[#allocation19_spill] sm:$0xff] %v4197_v53  ;;  %v4229_v19 = vmul.f32 %v4181_v9, %v3899_v49  ;;  %v4233_v33 = vmul.f32 %v4181_v9, %v3905_v54  ;;  %v4237_v41 = vmul.f32 %v4181_v9, %v3911_v0 }
 0x2c7   :  { %4719 = vst [vmem:[#allocation20_spill] sm:$0xff] %v4201_v15  ;;  %v4241_v43 = vmul.f32 %v4181_v9, %v3917_v62  ;;  %v4245_v38 = vmul.f32 %v4181_v9, %v3923_v34  ;;  %v4249_v16 = vmul.f32 %v4181_v9, %v3929_v25  ;;  %v4253_v6 = vmul.f32 %v4181_v9, %v3935_v4 }
 0x2c8   :  { %v4257_v49 = vmul.f32 %v4181_v9, %v3941_v57  ;;  %v4261_v54 = vmul.f32 %v4181_v9, %v3947_v59  ;;  %v4265_v0 = vmul.f32 %v4181_v9, %v3953_v18  ;;  %v4269_v62 = vmul.f32 %v4181_v9, %v3959_v27 }
 0x2c9   :  { %v4273_v34 = vmul.f32 %v4181_v9, %v3965_v44  ;;  %v4277_v25 = vmul.f32 %v4181_v9, %v3971_v47  ;;  %v4281_v4 = vmul.f32 %v4181_v9, %v3977_v55  ;;  %v4285_v57 = vmul.f32 %v4181_v9, %v3983_v61 }
 0x2ca   :  { %v4289_v59 = vmul.f32 %v4181_v9, %v3989_v5  ;;  %v4293_v18 = vmul.f32 %v4181_v9, %v3995_v11  ;;  %v4297_v27 = vmul.f32 %v4181_v9, %v4001_v17  ;;  %v4301_v44 = vmul.f32 %v4181_v9, %v4007_v23 }
 0x2cb   :  { %v4305_v47 = vmul.f32 %v4181_v9, %v4013_v29  ;;  %v4309_v55 = vmul.f32 %v4181_v9, %v4019_v35  ;;  %v4313_v61 = vmul.f32 %v4181_v9, %v4025_v40  ;;  %v4317_v5 = vmul.f32 %v4181_v9, %v4031_v46  ;;  %v4720_v29 = vld [vmem:[#allocation2_spill] sm:$0xff]  ;;  %v4721_v40 = vld [vmem:[#allocation3_spill] sm:$0xff] }
 0x2cc   :  { %v4321_v11 = vmul.f32 %v4181_v9, %v4037_v1  ;;  %v4325_v17 = vmul.f32 %v4181_v9, %v4043_v3  ;;  %v4329_v23 = vmul.f32 %v4181_v9, %v4049_v28  ;;  %v4333_v35 = vmul.f32 %v4181_v9, %v4720_v29  ;;  %v4730_v29 = vld [vmem:[#allocation11_spill] sm:$0xff] }
 0x2cd   :  { %v4337_v46 = vmul.f32 %v4181_v9, %v4721_v40  ;;  %v4341_v1 = vmul.f32 %v4181_v9, %v4722_v30  ;;  %v4345_v3 = vmul.f32 %v4181_v9, %v4723_v48  ;;  %v4349_v28 = vmul.f32 %v4181_v9, %v4724_v20  ;;  %v4731_v30 = vld [vmem:[#allocation12_spill] sm:$0xff]  ;;  %v4732_v20 = vld [vmem:[#allocation13_spill] sm:$0xff] }
 0x2ce   :  { %v4353_v37 = vmul.f32 %v4181_v9, %v4725_v42  ;;  %v4357_v22 = vmul.f32 %v4181_v9, %v4726_v63  ;;  %v4361_v52 = vmul.f32 %v4181_v9, %v4727_v56  ;;  %v4365_v12 = vmul.f32 %v4181_v9, %v4728_v21  ;;  %v4733_v56 = vld [vmem:[#allocation14_spill] sm:$0xff] }
 0x2cf   :  { %v4369_v40 = vmul.f32 %v4181_v9, %v4730_v29  ;;  %v4373_v48 = vmul.f32 %v4181_v9, %v4731_v30  ;;  %v4377_v42 = vmul.f32 %v4181_v9, %v4732_v20  ;;  %v4381_v63 = vmul.f32 %v4181_v9, %v4127_v60 }
 0x2d0   :  { %4729 = vst [vmem:[#allocation21_spill] sm:$0xff] %v4365_v12  ;;  %v4385_v21 = vmul.f32 %v4181_v9, %v4733_v56  ;;  %v4734_v12 = vld [vmem:[#allocation15_spill] sm:$0xff]  ;;  %v4393_v30 = vmul.f32 %v4181_v9, %v4145_v51  ;;  %v4397_v20 = vmul.f32 %v4181_v9, %v4151_v8  ;;  %v4401_v60 = vmul.f32 %v4181_v9, %v3806_v7 }
 0x2d1   :  { %v4389_v29 = vmul.f32 %v4181_v9, %v4734_v12  ;;  %v4405_v56 = vmul.f32 %v4181_v9, %v3809_v24  ;;  %v4409_v12 = vmul.f32 %v4181_v9, %v3812_v13 }
 0x2d2   :  { %4736 = vst [vmem:[#allocation3_spill] sm:$0xff] %v4393_v30  ;;  %4737 = vst [vmem:[#allocation4_spill] sm:$0xff] %v4397_v20  ;;  %v4741_v30 = vld [vmem:[#allocation23_spill] sm:$0xff]  ;;  %v4743_v20 = vld [vmem:[#allocation24_spill] sm:$0xff] }
 0x2d3   :  { %4735 = vst [vmem:[#allocation2_spill] sm:$0xff] %v4389_v29  ;;  %4738 = vst [vmem:[#allocation5_spill] sm:$0xff] %v4401_v60  ;;  %v4740_v29 = vld [vmem:[#allocation22_spill] sm:$0xff]  ;;  %v4417_v8 = vmul.f32 %v4181_v9, %v4741_v30  ;;  %v4421_v7 = vmul.f32 %v4181_v9, %v4743_v20  ;;  %v4745_v60 = vld [vmem:[#allocation25_spill] sm:$0xff]  ;;  %v4437_v30 = vmul.f32 %v4181_v9, %v3833_v14  ;;  %v1960_v14 = vmax.f32 %v4221_v2, 0.0 }
 0x2d4   :  { %4739 = vst [vmem:[#allocation6_spill] sm:$0xff] %v4405_v56  ;;  %v4413_v51 = vmul.f32 %v4181_v9, %v4740_v29  ;;  %v4425_v24 = vmul.f32 %v4181_v9, %v4745_v60  ;;  %v4747_v56 = vld [vmem:[#allocation26_spill] sm:$0xff]  ;;  %v4433_v29 = vmul.f32 %v4181_v9, %v3830_v36  ;;  %v1958_v36 = vmax.f32 %v4213_v39, 0.0 }
 0x2d5   :  { %4742 = vst [vmem:[#allocation7_spill] sm:$0xff] %v4417_v8  ;;  %4744 = vst [vmem:[#allocation8_spill] sm:$0xff] %v4421_v7  ;;  %v4429_v13 = vmul.f32 %v4181_v9, %v4747_v56  ;;  %v1956_v56 = vmax.f32 %v4205_v26, 0.0  ;;  %v1961_v9 = vmax.f32 %v4225_v58, 0.0  ;;  %v1962_v20 = vmax.f32 %v4229_v19, 0.0 }
 0x2d6   :  { %4746 = vst [vmem:[#allocation9_spill] sm:$0xff] %v4425_v24  ;;  %4749 = vst [vmem:[#allocation11_spill] sm:$0xff] %v4433_v29  ;;  %v1959_v29 = vmax.f32 %v4217_v50, 0.0  ;;  %v1963_v7 = vmax.f32 %v4233_v33, 0.0  ;;  %v1964_v60 = vmax.f32 %v4237_v41, 0.0  ;;  %v1965_v24 = vmax.f32 %v4241_v43, 0.0 }
 0x2d7   :  { %4748 = vst [vmem:[#allocation10_spill] sm:$0xff] %v4429_v13  ;;  %4750 = vst [vmem:[#allocation12_spill] sm:$0xff] %v4437_v30  ;;  %v1957_v13 = vmax.f32 %v4209_v10, 0.0  ;;  %v1966_v26 = vmax.f32 %v4245_v38, 0.0  ;;  %v1967_v10 = vmax.f32 %v4249_v16, 0.0  ;;  %v1968_v39 = vmax.f32 %v4253_v6, 0.0 }
 0x2d8   :  { %v1969_v50 = vmax.f32 %v4257_v49, 0.0  ;;  %v1970_v2 = vmax.f32 %v4261_v54, 0.0  ;;  %v1971_v58 = vmax.f32 %v4265_v0, 0.0  ;;  %v1972_v19 = vmax.f32 %v4269_v62, 0.0  ;;  %v4751_v8 = vld [vmem:[#allocation21_spill] sm:$0xff] }
 0x2d9   :  { %v1973_v33 = vmax.f32 %v4273_v34, 0.0  ;;  %v1974_v41 = vmax.f32 %v4277_v25, 0.0  ;;  %v1975_v43 = vmax.f32 %v4281_v4, 0.0  ;;  %v1976_v38 = vmax.f32 %v4285_v57, 0.0  ;;  %v4753_v53 = vld [vmem:[#allocation3_spill] sm:$0xff]  ;;  %v4754_v45 = vld [vmem:[#allocation4_spill] sm:$0xff] }
 0x2da   :  { %v1977_v16 = vmax.f32 %v4289_v59, 0.0  ;;  %v1978_v6 = vmax.f32 %v4293_v18, 0.0  ;;  %v1979_v49 = vmax.f32 %v4297_v27, 0.0  ;;  %v1980_v54 = vmax.f32 %v4301_v44, 0.0  ;;  %v4752_v15 = vld [vmem:[#allocation2_spill] sm:$0xff]  ;;  %v4755_v31 = vld [vmem:[#allocation5_spill] sm:$0xff] }
 0x2db   :  { %v1981_v0 = vmax.f32 %v4305_v47, 0.0  ;;  %v1982_v62 = vmax.f32 %v4309_v55, 0.0  ;;  %v1983_v34 = vmax.f32 %v4313_v61, 0.0  ;;  %v1984_v25 = vmax.f32 %v4317_v5, 0.0  ;;  %v4756_v32 = vld [vmem:[#allocation6_spill] sm:$0xff] }
 0x2dc   :  { %v1985_v4 = vmax.f32 %v4321_v11, 0.0  ;;  %v1986_v57 = vmax.f32 %v4325_v17, 0.0  ;;  %v1987_v59 = vmax.f32 %v4329_v23, 0.0  ;;  %v1988_v18 = vmax.f32 %v4333_v35, 0.0  ;;  %v4757_v30 = vld [vmem:[#allocation7_spill] sm:$0xff] }
 0x2dd   :  { %v1989_v27 = vmax.f32 %v4337_v46, 0.0  ;;  %v1990_v44 = vmax.f32 %v4341_v1, 0.0  ;;  %v1991_v47 = vmax.f32 %v4345_v3, 0.0  ;;  %v1992_v55 = vmax.f32 %v4349_v28, 0.0 }
 0x2de   :  { %v1993_v61 = vmax.f32 %v4353_v37, 0.0  ;;  %v1994_v5 = vmax.f32 %v4357_v22, 0.0  ;;  %v1995_v11 = vmax.f32 %v4361_v52, 0.0  ;;  %v1996_v17 = vmax.f32 %v4751_v8, 0.0 }
 0x2df   :  { %v1997_v23 = vmax.f32 %v4369_v40, 0.0  ;;  %v1998_v35 = vmax.f32 %v4373_v48, 0.0  ;;  %v1999_v46 = vmax.f32 %v4377_v42, 0.0  ;;  %v2000_v1 = vmax.f32 %v4381_v63, 0.0  ;;  %v4758_v63 = vld [vmem:[#allocation8_spill] sm:$0xff] }
 0x2e0   :  { %v2001_v3 = vmax.f32 %v4385_v21, 0.0  ;;  %v2002_v28 = vmax.f32 %v4752_v15, 0.0  ;;  %v2003_v37 = vmax.f32 %v4753_v53, 0.0  ;;  %v2004_v22 = vmax.f32 %v4754_v45, 0.0  ;;  %v4759_v15 = vld [vmem:[#allocation9_spill] sm:$0xff]  ;;  %v4760_v45 = vld [vmem:[#allocation10_spill] sm:$0xff] }
 0x2e1   :  { %v2005_v52 = vmax.f32 %v4755_v31, 0.0  ;;  %v2006_v8 = vmax.f32 %v4756_v32, 0.0  ;;  %v2007_v40 = vmax.f32 %v4409_v12, 0.0  ;;  %v2008_v48 = vmax.f32 %v4413_v51, 0.0  ;;  %v4761_v32 = vld [vmem:[#allocation11_spill] sm:$0xff]  ;;  %v4762_v51 = vld [vmem:[#allocation12_spill] sm:$0xff] }
 0x2e2   :  { %v2009_v42 = vmax.f32 %v4757_v30, 0.0  ;;  %v2010_v21 = vmax.f32 %v4758_v63, 0.0  ;;  %v2011_v53 = vmax.f32 %v4759_v15, 0.0  ;;  %v2012_v31 = vmax.f32 %v4760_v45, 0.0  ;;  %v4763_v63 = vld [vmem:[#allocation16_spill] sm:$0xff]  ;;  %v4765_v45 = vld [vmem:[#allocation17_spill] sm:$0xff] }
 0x2e3   :  { %v2013_v12 = vmax.f32 %v4761_v32, 0.0  ;;  %v2014_v30 = vmax.f32 %v4762_v51, 0.0  ;;  %v4764_v15 = vmax.f32 %v4763_v63, 0.0  ;;  %v4766_v32 = vmax.f32 %v4765_v45, 0.0  ;;  %v4767_v63 = vld [vmem:[#allocation18_spill] sm:$0xff] }
 0x2e4   :  { %v4768_v45 = vmax.f32 %v4767_v63, 0.0 }
 0x2e5   :  { %v2630_v51 = vpack.c.bf16 %v4766_v32, %v4764_v15  ;;  %v4769_v15 = vld [vmem:[#allocation19_spill] sm:$0xff] }
 0x2e6   :  { %v4770_v32 = vmax.f32 %v4769_v15, 0.0  ;;  %v4771_v15 = vld [vmem:[#allocation20_spill] sm:$0xff] }
 0x2e7   :  { %2631 = vst [vmem:[%s4611_s2] sm:$0xff] %v2630_v51  }
 0x2e8   :  { %v2635_v63 = vpack.c.bf16 %v4770_v32, %v4768_v45  ;;  %v4772_v32 = vmax.f32 %v4771_v15, 0.0  ;;  %v2645_v15 = vpack.c.bf16 %v1958_v36, %v1957_v13  ;;  %v2660_v13 = vpack.c.bf16 %v1964_v60, %v1963_v7 }
 0x2e9   :  { %v2665_v36 = vpack.c.bf16 %v1966_v26, %v1965_v24  ;;  %v2680_v7 = vpack.c.bf16 %v1972_v19, %v1971_v58  ;;  %v2685_v24 = vpack.c.bf16 %v1974_v41, %v1973_v33  ;;  %v2690_v60 = vpack.c.bf16 %v1976_v38, %v1975_v43 }
 0x2ea   :  { %v2640_v45 = vpack.c.bf16 %v1956_v56, %v4772_v32  ;;  %v2650_v32 = vpack.c.bf16 %v1960_v14, %v1959_v29  ;;  %v2655_v56 = vpack.c.bf16 %v1962_v20, %v1961_v9  ;;  %2787 = vst [vmem:[%s4611_s2 + $0x8] sm:$0xff] %v2635_v63   ;;  %2789 = vst [vmem:[%s4611_s2 + $0x18] sm:$0xff] %v2645_v15  }
 0x2eb   :  { %v2670_v29 = vpack.c.bf16 %v1968_v39, %v1967_v10  ;;  %v2675_v20 = vpack.c.bf16 %v1970_v2, %v1969_v50  ;;  %2792 = vst [vmem:[%s4611_s2 + $0x30] sm:$0xff] %v2660_v13   ;;  %2793 = vst [vmem:[%s4611_s2 + $0x38] sm:$0xff] %v2665_v36   ;;  %v2695_v14 = vpack.c.bf16 %v1978_v6, %v1977_v16 }
 0x2ec   :  { %2788 = vst [vmem:[%s4611_s2 + $0x10] sm:$0xff] %v2640_v45   ;;  %2790 = vst [vmem:[%s4611_s2 + $0x20] sm:$0xff] %v2650_v32   ;;  %v2700_v9 = vpack.c.bf16 %v1980_v54, %v1979_v49  ;;  %v2705_v26 = vpack.c.bf16 %v1982_v62, %v1981_v0  ;;  %v2710_v10 = vpack.c.bf16 %v1984_v25, %v1983_v34 }
 0x2ed   :  { %2791 = vst [vmem:[%s4611_s2 + $0x28] sm:$0xff] %v2655_v56   ;;  %2794 = vst [vmem:[%s4611_s2 + $0x40] sm:$0xff] %v2670_v29   ;;  %v2715_v39 = vpack.c.bf16 %v1986_v57, %v1985_v4  ;;  %v2720_v50 = vpack.c.bf16 %v1988_v18, %v1987_v59  ;;  %v2725_v2 = vpack.c.bf16 %v1990_v44, %v1989_v27 }
 0x2ee   :  { %2795 = vst [vmem:[%s4611_s2 + $0x48] sm:$0xff] %v2675_v20   ;;  %2796 = vst [vmem:[%s4611_s2 + $0x50] sm:$0xff] %v2680_v7   ;;  %v2730_v58 = vpack.c.bf16 %v1992_v55, %v1991_v47  ;;  %v2735_v19 = vpack.c.bf16 %v1994_v5, %v1993_v61  ;;  %v2740_v33 = vpack.c.bf16 %v1996_v17, %v1995_v11 }
 0x2ef   :  { %2797 = vst [vmem:[%s4611_s2 + $0x58] sm:$0xff] %v2685_v24   ;;  %2798 = vst [vmem:[%s4611_s2 + $0x60] sm:$0xff] %v2690_v60   ;;  %v2745_v41 = vpack.c.bf16 %v1998_v35, %v1997_v23  ;;  %v2750_v43 = vpack.c.bf16 %v2000_v1, %v1999_v46  ;;  %v2755_v38 = vpack.c.bf16 %v2002_v28, %v2001_v3 }
 0x2f0   :  { %2799 = vst [vmem:[%s4611_s2 + $0x68] sm:$0xff] %v2695_v14   ;;  %2800 = vst [vmem:[%s4611_s2 + $0x70] sm:$0xff] %v2700_v9   ;;  %v2760_v16 = vpack.c.bf16 %v2004_v22, %v2003_v37  ;;  %v2765_v6 = vpack.c.bf16 %v2006_v8, %v2005_v52  ;;  %v2770_v49 = vpack.c.bf16 %v2008_v48, %v2007_v40 }
 0x2f1   :  { %2801 = vst [vmem:[%s4611_s2 + $0x78] sm:$0xff] %v2705_v26   ;;  %2802 = vst [vmem:[%s4611_s2 + $0x80] sm:$0xff] %v2710_v10   ;;  %v2775_v54 = vpack.c.bf16 %v2010_v21, %v2009_v42  ;;  %v2780_v0 = vpack.c.bf16 %v2012_v31, %v2011_v53  ;;  %v2785_v62 = vpack.c.bf16 %v2014_v30, %v2013_v12 }
 0x2f2   :  { %2803 = vst [vmem:[%s4611_s2 + $0x88] sm:$0xff] %v2715_v39   ;;  %2804 = vst [vmem:[%s4611_s2 + $0x90] sm:$0xff] %v2720_v50  }
 0x2f3   :  { %2805 = vst [vmem:[%s4611_s2 + $0x98] sm:$0xff] %v2725_v2   ;;  %2806 = vst [vmem:[%s4611_s2 + $0xa0] sm:$0xff] %v2730_v58  }
 0x2f4   :  { %2807 = vst [vmem:[%s4611_s2 + $0xa8] sm:$0xff] %v2735_v19   ;;  %2808 = vst [vmem:[%s4611_s2 + $0xb0] sm:$0xff] %v2740_v33  }
 0x2f5   :  { %2809 = vst [vmem:[%s4611_s2 + $0xb8] sm:$0xff] %v2745_v41   ;;  %2810 = vst [vmem:[%s4611_s2 + $0xc0] sm:$0xff] %v2750_v43  }
 0x2f6   :  { %2811 = vst [vmem:[%s4611_s2 + $0xc8] sm:$0xff] %v2755_v38   ;;  %2812 = vst [vmem:[%s4611_s2 + $0xd0] sm:$0xff] %v2760_v16  }
 0x2f7   :  { %2813 = vst [vmem:[%s4611_s2 + $0xd8] sm:$0xff] %v2765_v6   ;;  %2814 = vst [vmem:[%s4611_s2 + $0xe0] sm:$0xff] %v2770_v49  }
 0x2f8   :  { %2815 = vst [vmem:[%s4611_s2 + $0xe8] sm:$0xff] %v2775_v54   ;;  %2816 = vst [vmem:[%s4611_s2 + $0xf0] sm:$0xff] %v2780_v0  }
 0x2f9   :  { %2817 = vst [vmem:[%s4611_s2 + $0xf8] sm:$0xff] %v2785_v62  }

// kernel: _lambda_.8
= control target key start
LH: loop header
LB: loop body
LE: loop exit
PB: predicated region body
PF: predicated region fallthrough
CT: control target
= control target key end

     0   :  { %v7556_v0 = vmov 0   ;;  %s12906_s1 = inlined_call_operand.vmem [shape: bf16[256,128], index: 1, kind: input, shape index: {}]   ;;  %s12907_s0 = inlined_call_operand.vmem [shape: bf16[2048,256], index: 0, kind: input, shape index: {}]   ;;  %s12908_s2 = inlined_call_operand.vmem [shape: bf16[2048,128], index: 2, kind: output, shape index: {}]  }
   0x1   :  { %1676 = vmatprep.subr.bf16.mxu0 %v7556_v0  ;;  %v7154_v1 = vld [vmem:[%s12906_s1] sm:$0xff]   ;;  %7121 = vmatprep.subr.bf16.mxu1 %v7556_v0  ;;  %v7155_v2 = vld [vmem:[%s12906_s1 + $0x8] sm:$0xff]   ;;  %v7156_v3 = vld [vmem:[%s12906_s1 + $0x10] sm:$0xff]  }
   0x2   :  { %1677 = vmatpush1.bf16.msra.mxu0 %v7154_v1  ;;  %7137 = vmatpush1.bf16.msra.mxu1 %v7154_v1  ;;  %v7157_v4 = vld [vmem:[%s12906_s1 + $0x18] sm:$0xff]   ;;  %v7158_v5 = vld [vmem:[%s12906_s1 + $0x20] sm:$0xff]   ;;  %v7159_v7 = vld [vmem:[%s12906_s1 + $0x28] sm:$0xff]  }
   0x3   :  { %1678 = vmatprep.subr.bf16.mxu0 %v7556_v0  ;;  %7122 = vmatprep.subr.bf16.mxu1 %v7556_v0  ;;  %v7172_v6 = vld [vmem:[%s12907_s0 + $0x4] ss:$8 sps:$4 sm:$0xff]   ;;  %v7160_v8 = vld [vmem:[%s12906_s1 + $0x30] sm:$0xff]   ;;  %v7161_v9 = vld [vmem:[%s12906_s1 + $0x38] sm:$0xff]  }
   0x4   :  { %1708 = vmatprep.mubr.bf16.mxu0 %v7172_v6  ;;  %v7162_v10 = vld [vmem:[%s12906_s1 + $0x40] sm:$0xff]   ;;  %v7163_v11 = vld [vmem:[%s12906_s1 + $0x48] sm:$0xff]   ;;  %v7164_v12 = vld [vmem:[%s12906_s1 + $0x50] sm:$0xff]  }
   0x5   :  { %v7165_v13 = vld [vmem:[%s12906_s1 + $0x58] sm:$0xff]   ;;  %v7166_v14 = vld [vmem:[%s12906_s1 + $0x60] sm:$0xff]   ;;  %v7167_v15 = vld [vmem:[%s12906_s1 + $0x68] sm:$0xff]  }
   0x6   :  { %1679 = vmatpush1.bf16.msra.mxu0 %v7155_v2  ;;  %7138 = vmatpush1.bf16.msra.mxu1 %v7155_v2  ;;  %v7168_v16 = vld [vmem:[%s12906_s1 + $0x70] sm:$0xff]   ;;  %v7169_v17 = vld [vmem:[%s12906_s1 + $0x78] sm:$0xff]   ;;  %v7170_v18 = vld [vmem:[%s12907_s0] ss:$8 sps:$4 sm:$0xff]  }
   0x7   :  { %1680 = vmatprep.subr.bf16.mxu0 %v7556_v0  ;;  %7123 = vmatprep.subr.bf16.mxu1 %v7556_v0  ;;  %v7173_v19 = vld [vmem:[%s12907_s0 + $0x14] ss:$8 sps:$4 sm:$0xff]   ;;  %v7175_v20 = vld [vmem:[%s12907_s0 + $0x10] ss:$8 sps:$4 sm:$0xff]   ;;  %v7176_v21 = vld [vmem:[%s12907_s0 + $0x24] ss:$8 sps:$4 sm:$0xff]  }
   0x8   :  { %v7178_v22 = vld [vmem:[%s12907_s0 + $0x20] ss:$8 sps:$4 sm:$0xff]   ;;  %v7179_v23 = vld [vmem:[%s12907_s0 + $0x34] ss:$8 sps:$4 sm:$0xff]   ;;  %v7181_v24 = vld [vmem:[%s12907_s0 + $0x30] ss:$8 sps:$4 sm:$0xff]  }
   0x9   :  { %v7182_v25 = vld [vmem:[%s12907_s0 + $0x44] ss:$8 sps:$4 sm:$0xff]   ;;  %v7184_v26 = vld [vmem:[%s12907_s0 + $0x40] ss:$8 sps:$4 sm:$0xff]   ;;  %v7185_v27 = vld [vmem:[%s12907_s0 + $0x54] ss:$8 sps:$4 sm:$0xff]  }
   0xa   :  { %1681 = vmatpush1.bf16.msra.mxu0 %v7156_v3  ;;  %7139 = vmatpush1.bf16.msra.mxu1 %v7156_v3  ;;  %v7187_v28 = vld [vmem:[%s12907_s0 + $0x50] ss:$8 sps:$4 sm:$0xff]   ;;  %v7188_v29 = vld [vmem:[%s12907_s0 + $0x64] ss:$8 sps:$4 sm:$0xff]   ;;  %v7190_v30 = vld [vmem:[%s12907_s0 + $0x60] ss:$8 sps:$4 sm:$0xff]  }
   0xb   :  { %1682 = vmatprep.subr.bf16.mxu0 %v7556_v0  ;;  %7124 = vmatprep.subr.bf16.mxu1 %v7556_v0  ;;  %v7191_v31 = vld [vmem:[%s12907_s0 + $0x74] ss:$8 sps:$4 sm:$0xff]   ;;  %v7193_v32 = vld [vmem:[%s12907_s0 + $0x70] ss:$8 sps:$4 sm:$0xff]   ;;  %v7194_v33 = vld [vmem:[%s12907_s0 + $0x84] ss:$8 sps:$4 sm:$0xff]  }
   0xc   :  { %v7196_v34 = vld [vmem:[%s12907_s0 + $0x80] ss:$8 sps:$4 sm:$0xff]   ;;  %v7197_v35 = vld [vmem:[%s12907_s0 + $0x94] ss:$8 sps:$4 sm:$0xff]   ;;  %v7199_v36 = vld [vmem:[%s12907_s0 + $0x90] ss:$8 sps:$4 sm:$0xff]  }
   0xd   :  { %v7200_v37 = vld [vmem:[%s12907_s0 + $0xa4] ss:$8 sps:$4 sm:$0xff]   ;;  %v7202_v38 = vld [vmem:[%s12907_s0 + $0xa0] ss:$8 sps:$4 sm:$0xff]   ;;  %v7203_v39 = vld [vmem:[%s12907_s0 + $0xb4] ss:$8 sps:$4 sm:$0xff]  }
   0xe   :  { %1683 = vmatpush1.bf16.msra.mxu0 %v7157_v4  ;;  %7140 = vmatpush1.bf16.msra.mxu1 %v7157_v4  ;;  %v7205_v40 = vld [vmem:[%s12907_s0 + $0xb0] ss:$8 sps:$4 sm:$0xff]   ;;  %v7206_v41 = vld [vmem:[%s12907_s0 + $0xc4] ss:$8 sps:$4 sm:$0xff]   ;;  %v7208_v42 = vld [vmem:[%s12907_s0 + $0xc0] ss:$8 sps:$4 sm:$0xff]  }
   0xf   :  { %1684 = vmatprep.subr.bf16.mxu0 %v7556_v0  ;;  %7125 = vmatprep.subr.bf16.mxu1 %v7556_v0  ;;  %v7209_v43 = vld [vmem:[%s12907_s0 + $0xd4] ss:$8 sps:$4 sm:$0xff]   ;;  %v7211_v44 = vld [vmem:[%s12907_s0 + $0xd0] ss:$8 sps:$4 sm:$0xff]   ;;  %v7212_v45 = vld [vmem:[%s12907_s0 + $0xe4] ss:$8 sps:$4 sm:$0xff]  }
  0x10   :  { %v7214_v46 = vld [vmem:[%s12907_s0 + $0xe0] ss:$8 sps:$4 sm:$0xff]   ;;  %v7215_v47 = vld [vmem:[%s12907_s0 + $0xf4] ss:$8 sps:$4 sm:$0xff]   ;;  %v7217_v48 = vld [vmem:[%s12907_s0 + $0xf0] ss:$8 sps:$4 sm:$0xff]  }
  0x11   :  { %v7218_v49 = vld [vmem:[%s12907_s0 + $0x104] ss:$8 sps:$4 sm:$0xff]   ;;  %v7266_v51 = vld [vmem:[%s12907_s0 + $0x400] ss:$8 sps:$4 sm:$0xff]   ;;  %v7221_v53 = vld [vmem:[%s12907_s0 + $0x114] ss:$8 sps:$4 sm:$0xff]  }
  0x12   :  { %1685 = vmatpush1.bf16.msra.mxu0 %v7158_v5  ;;  %7141 = vmatpush1.bf16.msra.mxu1 %v7158_v5  ;;  %v7268_v50 = vld [vmem:[%s12907_s0 + $0x404] ss:$8 sps:$4 sm:$0xff]   ;;  %v7220_v52 = vld [vmem:[%s12907_s0 + $0x100] ss:$8 sps:$4 sm:$0xff]   ;;  %v7272_v54 = vld [vmem:[%s12907_s0 + $0x414] ss:$8 sps:$4 sm:$0xff]  }
  0x13   :  { %1686 = vmatprep.subr.bf16.mxu0 %v7556_v0  ;;  %7126 = vmatprep.subr.bf16.mxu1 %v7556_v0  ;;  %v7274_v55 = vld [vmem:[%s12907_s0 + $0x410] ss:$8 sps:$4 sm:$0xff]   ;;  %v7224_v57 = vld [vmem:[%s12907_s0 + $0x124] ss:$8 sps:$4 sm:$0xff]   ;;  %v7280_v59 = vld [vmem:[%s12907_s0 + $0x420] ss:$8 sps:$4 sm:$0xff]  }
  0x14   :  { %2220 = vmatprep.mubr.bf16.mxu1 %v7268_v50  ;;  %v7223_v56 = vld [vmem:[%s12907_s0 + $0x110] ss:$8 sps:$4 sm:$0xff]   ;;  %v7278_v58 = vld [vmem:[%s12907_s0 + $0x424] ss:$8 sps:$4 sm:$0xff]   ;;  %v7226_v60 = vld [vmem:[%s12907_s0 + $0x120] ss:$8 sps:$4 sm:$0xff]  }
  0x15   :  { %v7227_v61 = vld [vmem:[%s12907_s0 + $0x134] ss:$8 sps:$4 sm:$0xff]   ;;  %v7286_v63 = vld [vmem:[%s12907_s0 + $0x430] ss:$8 sps:$4 sm:$0xff]   ;;  %v7230_v1 = vld [vmem:[%s12907_s0 + $0x144] ss:$8 sps:$4 sm:$0xff]  }
  0x16   :  { %1687 = vmatpush1.bf16.msra.mxu0 %v7159_v7  ;;  %7142 = vmatpush1.bf16.msra.mxu1 %v7159_v7  ;;  %v7284_v62 = vld [vmem:[%s12907_s0 + $0x434] ss:$8 sps:$4 sm:$0xff]   ;;  %v7290_v2 = vld [vmem:[%s12907_s0 + $0x444] ss:$8 sps:$4 sm:$0xff]   ;;  %v7292_v3 = vld [vmem:[%s12907_s0 + $0x440] ss:$8 sps:$4 sm:$0xff]  }
  0x17   :  { %1688 = vmatprep.subr.bf16.mxu0 %v7556_v0  ;;  %7127 = vmatprep.subr.bf16.mxu1 %v7556_v0  ;;  %v7232_v4 = vld [vmem:[%s12907_s0 + $0x140] ss:$8 sps:$4 sm:$0xff]   ;;  %v7233_v5 = vld [vmem:[%s12907_s0 + $0x154] ss:$8 sps:$4 sm:$0xff]   ;;  %v7298_v7 = vld [vmem:[%s12907_s0 + $0x450] ss:$8 sps:$4 sm:$0xff]  }
  0x18   :  { %v7296_v6 = vld [vmem:[%s12907_s0 + $0x454] ss:$8 sps:$4 sm:$0xff]  }
  0x1a   :  { %1689 = vmatpush1.bf16.msra.mxu0 %v7160_v8  ;;  %7143 = vmatpush1.bf16.msra.mxu1 %v7160_v8  ;;  %v7235_v8 = vld [vmem:[%s12907_s0 + $0x150] ss:$8 sps:$4 sm:$0xff]  }
  0x1b   :  { %1690 = vmatprep.subr.bf16.mxu0 %v7556_v0  ;;  %7128 = vmatprep.subr.bf16.mxu1 %v7556_v0 }
  0x1e   :  { %1691 = vmatpush1.bf16.msra.mxu0 %v7161_v9  ;;  %7144 = vmatpush1.bf16.msra.mxu1 %v7161_v9  ;;  %v7236_v9 = vld [vmem:[%s12907_s0 + $0x164] ss:$8 sps:$4 sm:$0xff]  }
  0x1f   :  { %1692 = vmatprep.subr.bf16.mxu0 %v7556_v0  ;;  %7129 = vmatprep.subr.bf16.mxu1 %v7556_v0 }
  0x22   :  { %1693 = vmatpush1.bf16.msra.mxu0 %v7162_v10  ;;  %7145 = vmatpush1.bf16.msra.mxu1 %v7162_v10  ;;  %v7302_v10 = vld [vmem:[%s12907_s0 + $0x464] ss:$8 sps:$4 sm:$0xff]  }
  0x23   :  { %1694 = vmatprep.subr.bf16.mxu0 %v7556_v0  ;;  %7130 = vmatprep.subr.bf16.mxu1 %v7556_v0 }
  0x26   :  { %1695 = vmatpush1.bf16.msra.mxu0 %v7163_v11  ;;  %7146 = vmatpush1.bf16.msra.mxu1 %v7163_v11  ;;  %v7304_v11 = vld [vmem:[%s12907_s0 + $0x460] ss:$8 sps:$4 sm:$0xff]  }
  0x27   :  { %1696 = vmatprep.subr.bf16.mxu0 %v7556_v0  ;;  %7131 = vmatprep.subr.bf16.mxu1 %v7556_v0 }
  0x2a   :  { %1697 = vmatpush1.bf16.msra.mxu0 %v7164_v12  ;;  %7147 = vmatpush1.bf16.msra.mxu1 %v7164_v12  ;;  %v7238_v12 = vld [vmem:[%s12907_s0 + $0x160] ss:$8 sps:$4 sm:$0xff]  }
  0x2b   :  { %1698 = vmatprep.subr.bf16.mxu0 %v7556_v0  ;;  %7132 = vmatprep.subr.bf16.mxu1 %v7556_v0 }
  0x2e   :  { %1699 = vmatpush1.bf16.msra.mxu0 %v7165_v13  ;;  %7148 = vmatpush1.bf16.msra.mxu1 %v7165_v13  ;;  %v7239_v13 = vld [vmem:[%s12907_s0 + $0x174] ss:$8 sps:$4 sm:$0xff]  }
  0x2f   :  { %1700 = vmatprep.subr.bf16.mxu0 %v7556_v0  ;;  %7133 = vmatprep.subr.bf16.mxu1 %v7556_v0 }
  0x32   :  { %1701 = vmatpush1.bf16.msra.mxu0 %v7166_v14  ;;  %7149 = vmatpush1.bf16.msra.mxu1 %v7166_v14  ;;  %v7308_v14 = vld [vmem:[%s12907_s0 + $0x474] ss:$8 sps:$4 sm:$0xff]  }
  0x33   :  { %1702 = vmatprep.subr.bf16.mxu0 %v7556_v0  ;;  %7134 = vmatprep.subr.bf16.mxu1 %v7556_v0 }
  0x36   :  { %1703 = vmatpush1.bf16.msra.mxu0 %v7167_v15  ;;  %7150 = vmatpush1.bf16.msra.mxu1 %v7167_v15  ;;  %v7310_v15 = vld [vmem:[%s12907_s0 + $0x470] ss:$8 sps:$4 sm:$0xff]  }
  0x37   :  { %1704 = vmatprep.subr.bf16.mxu0 %v7556_v0  ;;  %7135 = vmatprep.subr.bf16.mxu1 %v7556_v0 }
  0x3a   :  { %1705 = vmatpush1.bf16.msra.mxu0 %v7168_v16  ;;  %7151 = vmatpush1.bf16.msra.mxu1 %v7168_v16  ;;  %v7241_v16 = vld [vmem:[%s12907_s0 + $0x170] ss:$8 sps:$4 sm:$0xff]  }
  0x3b   :  { %1706 = vmatprep.subr.bf16.mxu0 %v7556_v0  ;;  %7136 = vmatprep.subr.bf16.mxu1 %v7556_v0  ;;  %v7229_v0 = vld [vmem:[%s12907_s0 + $0x130] ss:$8 sps:$4 sm:$0xff]  }
  0x3e   :  { %1707 = vmatpush1.bf16.msra.mxu0 %v7169_v17  ;;  %7152 = vmatpush1.bf16.msra.mxu1 %v7169_v17  ;;  %v7242_v17 = vld [vmem:[%s12907_s0 + $0x184] ss:$8 sps:$4 sm:$0xff]  }
  0x41   :  { %1709 = vmatmul.mubr.bf16.vlgmr.msra.gmra.mrb[0].mxu0 %v7170_v18  ;;  %2221 = vmatmul.mubr.bf16.vlgmr.msra.gmra.mrb[0].mxu1 %v7266_v51  ;;  %v7314_v18 = vld [vmem:[%s12907_s0 + $0x484] ss:$8 sps:$4 sm:$0xff]   ;;  %v7346_v51 = vld [vmem:[%s12907_s0 + $0x4d0] ss:$8 sps:$4 sm:$0xff]  }
  0x42   :  { %1716 = vmatprep.mubr.bf16.mxu0 %v7173_v19  ;;  %2228 = vmatprep.mubr.bf16.mxu1 %v7272_v54  ;;  %v7316_v19 = vld [vmem:[%s12907_s0 + $0x480] ss:$8 sps:$4 sm:$0xff]   ;;  %v7259_v54 = vld [vmem:[%s12907_s0 + $0x1d0] ss:$8 sps:$4 sm:$0xff]  }
  0x49   :  { %1717 = vmatmul.mubr.bf16.gmra.mrb[4].mxu0 %v7175_v20  ;;  %2229 = vmatmul.mubr.bf16.gmra.mrb[4].mxu1 %v7274_v55  ;;  %v7244_v20 = vld [vmem:[%s12907_s0 + $0x180] ss:$8 sps:$4 sm:$0xff]  }
  0x4a   :  { %1724 = vmatprep.mubr.bf16.mxu0 %v7176_v21  ;;  %2236 = vmatprep.mubr.bf16.mxu1 %v7278_v58  ;;  %v7245_v21 = vld [vmem:[%s12907_s0 + $0x194] ss:$8 sps:$4 sm:$0xff]  }
  0x51   :  { %1725 = vmatmul.mubr.bf16.gmra.mrb[8].mxu0 %v7178_v22  ;;  %2237 = vmatmul.mubr.bf16.gmra.mrb[8].mxu1 %v7280_v59  ;;  %v7320_v22 = vld [vmem:[%s12907_s0 + $0x494] ss:$8 sps:$4 sm:$0xff]   ;;  %v7350_v59 = vld [vmem:[%s12907_s0 + $0x4e4] ss:$8 sps:$4 sm:$0xff]  }
  0x52   :  { %1732 = vmatprep.mubr.bf16.mxu0 %v7179_v23  ;;  %2244 = vmatprep.mubr.bf16.mxu1 %v7284_v62  ;;  %v7322_v23 = vld [vmem:[%s12907_s0 + $0x490] ss:$8 sps:$4 sm:$0xff]  }
  0x59   :  { %1733 = vmatmul.mubr.bf16.gmra.mrb[12].mxu0 %v7181_v24  ;;  %2245 = vmatmul.mubr.bf16.gmra.mrb[12].mxu1 %v7286_v63  ;;  %v7247_v24 = vld [vmem:[%s12907_s0 + $0x190] ss:$8 sps:$4 sm:$0xff]  }
  0x5a   :  { %1740 = vmatprep.mubr.bf16.mxu0 %v7182_v25  ;;  %2252 = vmatprep.mubr.bf16.mxu1 %v7290_v2  ;;  %v7248_v25 = vld [vmem:[%s12907_s0 + $0x1a4] ss:$8 sps:$4 sm:$0xff]   ;;  %v7263_v2 = vld [vmem:[%s12907_s0 + $0x1f4] ss:$8 sps:$4 sm:$0xff]  }
  0x61   :  { %1741 = vmatmul.mubr.bf16.gmra.mrb[16].mxu0 %v7184_v26  ;;  %2253 = vmatmul.mubr.bf16.gmra.mrb[16].mxu1 %v7292_v3  ;;  %v7326_v26 = vld [vmem:[%s12907_s0 + $0x4a4] ss:$8 sps:$4 sm:$0xff]  }
  0x62   :  { %1748 = vmatprep.mubr.bf16.mxu0 %v7185_v27  ;;  %2260 = vmatprep.mubr.bf16.mxu1 %v7296_v6  ;;  %v7328_v27 = vld [vmem:[%s12907_s0 + $0x4a0] ss:$8 sps:$4 sm:$0xff]  }
  0x69   :  { %1749 = vmatmul.mubr.bf16.gmra.mrb[20].mxu0 %v7187_v28  ;;  %2261 = vmatmul.mubr.bf16.gmra.mrb[20].mxu1 %v7298_v7  ;;  %v7250_v28 = vld [vmem:[%s12907_s0 + $0x1a0] ss:$8 sps:$4 sm:$0xff]   ;;  %v7358_v7 = vld [vmem:[%s12907_s0 + $0x4f0] ss:$8 sps:$4 sm:$0xff]  }
  0x6a   :  { %1756 = vmatprep.mubr.bf16.mxu0 %v7188_v29  ;;  %2268 = vmatprep.mubr.bf16.mxu1 %v7302_v10  ;;  %v7251_v29 = vld [vmem:[%s12907_s0 + $0x1b4] ss:$8 sps:$4 sm:$0xff]   ;;  %v7265_v10 = vld [vmem:[%s12907_s0 + $0x1f0] ss:$8 sps:$4 sm:$0xff]  }
  0x71   :  { %1757 = vmatmul.mubr.bf16.gmra.mrb[24].mxu0 %v7190_v30  ;;  %2269 = vmatmul.mubr.bf16.gmra.mrb[24].mxu1 %v7304_v11  ;;  %v7332_v30 = vld [vmem:[%s12907_s0 + $0x4b4] ss:$8 sps:$4 sm:$0xff]  }
  0x72   :  { %1764 = vmatprep.mubr.bf16.mxu0 %v7191_v31  ;;  %2276 = vmatprep.mubr.bf16.mxu1 %v7308_v14 }
  0x79   :  { %1765 = vmatmul.mubr.bf16.gmra.mrb[28].mxu0 %v7193_v32  ;;  %2277 = vmatmul.mubr.bf16.gmra.mrb[28].mxu1 %v7310_v15  ;;  %v7334_v32 = vld [vmem:[%s12907_s0 + $0x4b0] ss:$8 sps:$4 sm:$0xff]   ;;  %v7362_v15 = vld [vmem:[%s12907_s0 + $0x504] ss:$8 sps:$4 sm:$0xff]  }
  0x7a   :  { %1772 = vmatprep.mubr.bf16.mxu0 %v7194_v33  ;;  %2284 = vmatprep.mubr.bf16.mxu1 %v7314_v18 }
  0x81   :  { %1773 = vmatmul.mubr.bf16.gmra.mrb[32].mxu0 %v7196_v34  ;;  %2285 = vmatmul.mubr.bf16.gmra.mrb[32].mxu1 %v7316_v19  ;;  %v7253_v34 = vld [vmem:[%s12907_s0 + $0x1b0] ss:$8 sps:$4 sm:$0xff]  }
  0x82   :  { %1780 = vmatprep.mubr.bf16.mxu0 %v7197_v35  ;;  %2292 = vmatprep.mubr.bf16.mxu1 %v7320_v22  ;;  %v7275_v22 = vld [vmem:[%s12907_s0 + $0x214] ss:$8 sps:$4 sm:$0xff]  }
  0x89   :  { %1781 = vmatmul.mubr.bf16.gmra.mrb[36].mxu0 %v7199_v36  ;;  %2293 = vmatmul.mubr.bf16.gmra.mrb[36].mxu1 %v7322_v23  ;;  %v7254_v36 = vld [vmem:[%s12907_s0 + $0x1c4] ss:$8 sps:$4 sm:$0xff]  }
  0x8a   :  { %1788 = vmatprep.mubr.bf16.mxu0 %v7200_v37  ;;  %2300 = vmatprep.mubr.bf16.mxu1 %v7326_v26 }
  0x91   :  { %1789 = vmatmul.mubr.bf16.gmra.mrb[40].mxu0 %v7202_v38  ;;  %2301 = vmatmul.mubr.bf16.gmra.mrb[40].mxu1 %v7328_v27  ;;  %v7370_v27 = vld [vmem:[%s12907_s0 + $0x510] ss:$8 sps:$4 sm:$0xff]  }
  0x92   :  { %1796 = vmatprep.mubr.bf16.mxu0 %v7203_v39  ;;  %2308 = vmatprep.mubr.bf16.mxu1 %v7332_v30  ;;  %v7338_v39 = vld [vmem:[%s12907_s0 + $0x4c4] ss:$8 sps:$4 sm:$0xff]   ;;  %v7277_v30 = vld [vmem:[%s12907_s0 + $0x210] ss:$8 sps:$4 sm:$0xff]  }
  0x99   :  { %1797 = vmatmul.mubr.bf16.gmra.mrb[44].mxu0 %v7205_v40  ;;  %2309 = vmatmul.mubr.bf16.gmra.mrb[44].mxu1 %v7334_v32 }
  0x9a   :  { %1804 = vmatprep.mubr.bf16.mxu0 %v7206_v41  ;;  %v7340_v41 = vld [vmem:[%s12907_s0 + $0x4c0] ss:$8 sps:$4 sm:$0xff]   ;;  %2316 = vmatprep.mubr.bf16.mxu1 %v7338_v39 }
  0x9b   :  { %v7376_v39 = vld [vmem:[%s12907_s0 + $0x520] ss:$8 sps:$4 sm:$0xff]  }
  0xa1   :  { %1805 = vmatmul.mubr.bf16.gmra.mrb[48].mxu0 %v7208_v42  ;;  %2317 = vmatmul.mubr.bf16.gmra.mrb[48].mxu1 %v7340_v41 }
  0xa2   :  { %1812 = vmatprep.mubr.bf16.mxu0 %v7209_v43 }
  0xa9   :  { %1813 = vmatmul.mubr.bf16.gmra.mrb[52].mxu0 %v7211_v44  ;;  %v7256_v44 = vld [vmem:[%s12907_s0 + $0x1c0] ss:$8 sps:$4 sm:$0xff]  }
  0xaa   :  { %1820 = vmatprep.mubr.bf16.mxu0 %v7212_v45 }
  0xb1   :  { %1821 = vmatmul.mubr.bf16.gmra.mrb[56].mxu0 %v7214_v46  ;;  %v7257_v46 = vld [vmem:[%s12907_s0 + $0x1d4] ss:$8 sps:$4 sm:$0xff]  }
  0xb2   :  { %1828 = vmatprep.mubr.bf16.mxu0 %v7215_v47 }
  0xb9   :  { %1829 = vmatmul.mubr.bf16.gmra.mrb[60].mxu0 %v7217_v48 }
  0xba   :  { %1836 = vmatprep.mubr.bf16.mxu0 %v7218_v49  ;;  %v7344_v49 = vld [vmem:[%s12907_s0 + $0x4d4] ss:$8 sps:$4 sm:$0xff]  }
  0xbb   :  { %2324 = vmatprep.mubr.bf16.mxu1 %v7344_v49  ;;  %v7380_v49 = vld [vmem:[%s12907_s0 + $0x534] ss:$8 sps:$4 sm:$0xff]  }
  0xbc   :  { %2325 = vmatmul.mubr.bf16.gmra.mrb[52].mxu1 %v7346_v51 }
  0xbd   :  { %2332 = vmatprep.mubr.bf16.mxu1 %v7350_v59 }
  0xc1   :  { %1837 = vmatmul.mubr.bf16.gmra.mrb[64].mxu0 %v7220_v52 }
  0xc2   :  { %1844 = vmatprep.mubr.bf16.mxu0 %v7221_v53 }
  0xc9   :  { %1845 = vmatmul.mubr.bf16.gmra.mrb[68].mxu0 %v7223_v56  ;;  %v7260_v56 = vld [vmem:[%s12907_s0 + $0x1e4] ss:$8 sps:$4 sm:$0xff]  }
  0xca   :  { %1852 = vmatprep.mubr.bf16.mxu0 %v7224_v57 }
  0xd1   :  { %1853 = vmatmul.mubr.bf16.gmra.mrb[72].mxu0 %v7226_v60 }
  0xd2   :  { %1860 = vmatprep.mubr.bf16.mxu0 %v7227_v61  ;;  %v7352_v61 = vld [vmem:[%s12907_s0 + $0x4e0] ss:$8 sps:$4 sm:$0xff]  }
  0xd3   :  { %2333 = vmatmul.mubr.bf16.gmra.mrb[56].mxu1 %v7352_v61 }
  0xd9   :  { %1861 = vmatmul.mubr.bf16.gmra.mrb[76].mxu0 %v7229_v0  ;;  %v7262_v0 = vld [vmem:[%s12907_s0 + $0x1e0] ss:$8 sps:$4 sm:$0xff]  }
  0xda   :  { %1868 = vmatprep.mubr.bf16.mxu0 %v7230_v1 }
  0xe1   :  { %1869 = vmatmul.mubr.bf16.gmra.mrb[80].mxu0 %v7232_v4 }
  0xe2   :  { %1876 = vmatprep.mubr.bf16.mxu0 %v7233_v5  ;;  %v7356_v5 = vld [vmem:[%s12907_s0 + $0x4f4] ss:$8 sps:$4 sm:$0xff]  }
  0xe3   :  { %2340 = vmatprep.mubr.bf16.mxu1 %v7356_v5 }
  0xe4   :  { %2341 = vmatmul.mubr.bf16.gmra.mrb[60].mxu1 %v7358_v7  ;;  %v7299_v7 = vld [vmem:[%s12907_s0 + $0x254] ss:$8 sps:$4 sm:$0xff]  }
  0xe5   :  { %2348 = vmatprep.mubr.bf16.mxu1 %v7362_v15 }
  0xe9   :  { %1877 = vmatmul.mubr.bf16.gmra.mrb[84].mxu0 %v7235_v8 }
  0xea   :  { %1884 = vmatprep.mubr.bf16.mxu0 %v7236_v9 }
  0xf1   :  { %1885 = vmatmul.mubr.bf16.gmra.mrb[88].mxu0 %v7238_v12  ;;  %v7269_v12 = vld [vmem:[%s12907_s0 + $0x204] ss:$8 sps:$4 sm:$0xff]  }
  0xf2   :  { %1892 = vmatprep.mubr.bf16.mxu0 %v7239_v13 }
  0xf9   :  { %1893 = vmatmul.mubr.bf16.gmra.mrb[92].mxu0 %v7241_v16 }
  0xfa   :  { %1900 = vmatprep.mubr.bf16.mxu0 %v7242_v17  ;;  %v7364_v17 = vld [vmem:[%s12907_s0 + $0x500] ss:$8 sps:$4 sm:$0xff]  }
  0xfb   :  { %2349 = vmatmul.mubr.bf16.gmra.mrb[64].mxu1 %v7364_v17  ;;  %v7301_v17 = vld [vmem:[%s12907_s0 + $0x250] ss:$8 sps:$4 sm:$0xff]  }
 0x101   :  { %1901 = vmatmul.mubr.bf16.gmra.mrb[96].mxu0 %v7244_v20  ;;  %v7271_v20 = vld [vmem:[%s12907_s0 + $0x200] ss:$8 sps:$4 sm:$0xff]  }
 0x102   :  { %1908 = vmatprep.mubr.bf16.mxu0 %v7245_v21 }
 0x109   :  { %1909 = vmatmul.mubr.bf16.gmra.mrb[100].mxu0 %v7247_v24 }
 0x10a   :  { %1916 = vmatprep.mubr.bf16.mxu0 %v7248_v25  ;;  %v7368_v25 = vld [vmem:[%s12907_s0 + $0x514] ss:$8 sps:$4 sm:$0xff]  }
 0x10b   :  { %2356 = vmatprep.mubr.bf16.mxu1 %v7368_v25  ;;  %v7400_v25 = vld [vmem:[%s12907_s0 + $0x560] ss:$8 sps:$4 sm:$0xff]  }
 0x10c   :  { %2357 = vmatmul.mubr.bf16.gmra.mrb[68].mxu1 %v7370_v27 }
 0x111   :  { %1917 = vmatmul.mubr.bf16.gmra.mrb[104].mxu0 %v7250_v28 }
 0x112   :  { %1924 = vmatprep.mubr.bf16.mxu0 %v7251_v29 }
 0x114   :  { %v7886_v31 = vpop.f32.mrb[0].mxu0 }
 0x115   :  { %13576 = vst [vmem:[#allocation2_spill] sm:$0xff] %v7886_v31  ;;  %v1712_v33 = vpop.f32.mrb[1].mxu0 }
 0x116   :  { %v7894_v35 = vpop.f32.mrb[2].mxu0  ;;  %v7281_v33 = vld [vmem:[%s12907_s0 + $0x224] ss:$8 sps:$4 sm:$0xff]  }
 0x117   :  { %13577 = vst [vmem:[#allocation3_spill] sm:$0xff] %v7894_v35  ;;  %v2733_v37 = vadd.f32 %v7894_v35, %v7886_v31  ;;  %v1715_v38 = vpop.f32.mrb[3].mxu0 }
 0x119   :  { %1925 = vmatmul.mubr.bf16.gmra.mrb[108].mxu0 %v7253_v34 }
 0x11a   :  { %1932 = vmatprep.mubr.bf16.mxu0 %v7254_v36 }
 0x11c   :  { %v7904_v40 = vpop.f32.mrb[4].mxu0 }
 0x11d   :  { %13578 = vst [vmem:[#allocation4_spill] sm:$0xff] %v7904_v40  ;;  %v2734_v42 = vadd.f32 %v2733_v37, %v7904_v40  ;;  %v1720_v43 = vpop.f32.mrb[5].mxu0  ;;  %v7374_v37 = vld [vmem:[%s12907_s0 + $0x524] ss:$8 sps:$4 sm:$0xff]  }
 0x11e   :  { %v7913_v45 = vpop.f32.mrb[6].mxu0  ;;  %v7283_v43 = vld [vmem:[%s12907_s0 + $0x220] ss:$8 sps:$4 sm:$0xff]   ;;  %2364 = vmatprep.mubr.bf16.mxu1 %v7374_v37  ;;  %v7404_v37 = vld [vmem:[%s12907_s0 + $0x574] ss:$8 sps:$4 sm:$0xff]  }
 0x11f   :  { %13579 = vst [vmem:[#allocation5_spill] sm:$0xff] %v7913_v45  ;;  %v2735_v47 = vadd.f32 %v2734_v42, %v7913_v45  ;;  %v1723_v48 = vpop.f32.mrb[7].mxu0  ;;  %2365 = vmatmul.mubr.bf16.gmra.mrb[72].mxu1 %v7376_v39 }
 0x120   :  { %2372 = vmatprep.mubr.bf16.mxu1 %v7380_v49 }
 0x121   :  { %1933 = vmatmul.mubr.bf16.gmra.mrb[112].mxu0 %v7256_v44 }
 0x122   :  { %1940 = vmatprep.mubr.bf16.mxu0 %v7257_v46  ;;  %v7287_v46 = vld [vmem:[%s12907_s0 + $0x234] ss:$8 sps:$4 sm:$0xff]  }
 0x124   :  { %v7922_v50 = vpop.f32.mrb[8].mxu0 }
 0x125   :  { %13580 = vst [vmem:[#allocation6_spill] sm:$0xff] %v7922_v50  ;;  %v2736_v52 = vadd.f32 %v2735_v47, %v7922_v50  ;;  %v1728_v53 = vpop.f32.mrb[9].mxu0 }
 0x126   :  { %v7931_v55 = vpop.f32.mrb[10].mxu0 }
 0x127   :  { %13581 = vst [vmem:[#allocation7_spill] sm:$0xff] %v7931_v55  ;;  %v2737_v57 = vadd.f32 %v2736_v52, %v7931_v55  ;;  %v1731_v58 = vpop.f32.mrb[11].mxu0  ;;  %v7382_v52 = vld [vmem:[%s12907_s0 + $0x530] ss:$8 sps:$4 sm:$0xff]  }
 0x128   :  { %v7293_v58 = vld [vmem:[%s12907_s0 + $0x244] ss:$8 sps:$4 sm:$0xff]   ;;  %2373 = vmatmul.mubr.bf16.gmra.mrb[76].mxu1 %v7382_v52 }
 0x129   :  { %1941 = vmatmul.mubr.bf16.gmra.mrb[116].mxu0 %v7259_v54 }
 0x12a   :  { %1948 = vmatprep.mubr.bf16.mxu0 %v7260_v56  ;;  %v7289_v56 = vld [vmem:[%s12907_s0 + $0x230] ss:$8 sps:$4 sm:$0xff]  }
 0x12c   :  { %v7940_v60 = vpop.f32.mrb[12].mxu0 }
 0x12d   :  { %13582 = vst [vmem:[#allocation8_spill] sm:$0xff] %v7940_v60  ;;  %v2738_v62 = vadd.f32 %v2737_v57, %v7940_v60  ;;  %v1736_v63 = vpop.f32.mrb[13].mxu0 }
 0x12e   :  { %v7949_v1 = vpop.f32.mrb[14].mxu0 }
 0x12f   :  { %13583 = vst [vmem:[#allocation9_spill] sm:$0xff] %v7949_v1  ;;  %v2739_v3 = vadd.f32 %v2738_v62, %v7949_v1  ;;  %v1739_v4 = vpop.f32.mrb[15].mxu0  ;;  %v7386_v62 = vld [vmem:[%s12907_s0 + $0x544] ss:$8 sps:$4 sm:$0xff]  }
 0x130   :  { %v7295_v4 = vld [vmem:[%s12907_s0 + $0x240] ss:$8 sps:$4 sm:$0xff]   ;;  %2380 = vmatprep.mubr.bf16.mxu1 %v7386_v62 }
 0x131   :  { %1949 = vmatmul.mubr.bf16.gmra.mrb[120].mxu0 %v7262_v0  ;;  %v7388_v0 = vld [vmem:[%s12907_s0 + $0x540] ss:$8 sps:$4 sm:$0xff]  }
 0x132   :  { %1956 = vmatprep.mubr.bf16.mxu0 %v7263_v2  ;;  %2381 = vmatmul.mubr.bf16.gmra.mrb[80].mxu1 %v7388_v0  ;;  %v7323_v0 = vld [vmem:[%s12907_s0 + $0x294] ss:$8 sps:$4 sm:$0xff]  }
 0x134   :  { %v7958_v6 = vpop.f32.mrb[16].mxu0 }
 0x135   :  { %13584 = vst [vmem:[#allocation10_spill] sm:$0xff] %v7958_v6  ;;  %v2740_v8 = vadd.f32 %v2739_v3, %v7958_v6  ;;  %v1744_v9 = vpop.f32.mrb[17].mxu0 }
 0x136   :  { %v7967_v11 = vpop.f32.mrb[18].mxu0 }
 0x137   :  { %13585 = vst [vmem:[#allocation11_spill] sm:$0xff] %v7967_v11  ;;  %v2741_v13 = vadd.f32 %v2740_v8, %v7967_v11  ;;  %v1747_v14 = vpop.f32.mrb[19].mxu0 }
 0x139   :  { %1957 = vmatmul.mubr.bf16.gmra.mrb[124].mxu0 %v7265_v10  ;;  %v7392_v10 = vld [vmem:[%s12907_s0 + $0x554] ss:$8 sps:$4 sm:$0xff]  }
 0x13a   :  { %1964 = vmatprep.mubr.bf16.mxu0 %v7269_v12  ;;  %2388 = vmatprep.mubr.bf16.mxu1 %v7392_v10 }
 0x13c   :  { %v7976_v16 = vpop.f32.mrb[20].mxu0 }
 0x13d   :  { %13586 = vst [vmem:[#allocation12_spill] sm:$0xff] %v7976_v16  ;;  %v2742_v18 = vadd.f32 %v2741_v13, %v7976_v16  ;;  %v1752_v19 = vpop.f32.mrb[21].mxu0  ;;  %v7394_v13 = vld [vmem:[%s12907_s0 + $0x550] ss:$8 sps:$4 sm:$0xff]  }
 0x13e   :  { %v7985_v21 = vpop.f32.mrb[22].mxu0  ;;  %v7305_v19 = vld [vmem:[%s12907_s0 + $0x264] ss:$8 sps:$4 sm:$0xff]   ;;  %2389 = vmatmul.mubr.bf16.gmra.mrb[84].mxu1 %v7394_v13  ;;  %v7325_v13 = vld [vmem:[%s12907_s0 + $0x290] ss:$8 sps:$4 sm:$0xff]  }
 0x13f   :  { %13587 = vst [vmem:[#allocation13_spill] sm:$0xff] %v7985_v21  ;;  %v2743_v23 = vadd.f32 %v2742_v18, %v7985_v21  ;;  %v1755_v24 = vpop.f32.mrb[23].mxu0 }
 0x141   :  { %1965 = vmatmul.mubr.bf16.gmra.mrb[128].mxu0 %v7271_v20 }
 0x142   :  { %1972 = vmatprep.mubr.bf16.mxu0 %v7275_v22 }
 0x144   :  { %v7994_v26 = vpop.f32.mrb[24].mxu0 }
 0x145   :  { %13588 = vst [vmem:[#allocation14_spill] sm:$0xff] %v7994_v26  ;;  %v2744_v28 = vadd.f32 %v2743_v23, %v7994_v26  ;;  %v1760_v29 = vpop.f32.mrb[25].mxu0  ;;  %v7398_v23 = vld [vmem:[%s12907_s0 + $0x564] ss:$8 sps:$4 sm:$0xff]  }
 0x146   :  { %v8003_v32 = vpop.f32.mrb[26].mxu0  ;;  %v7307_v29 = vld [vmem:[%s12907_s0 + $0x260] ss:$8 sps:$4 sm:$0xff]   ;;  %2396 = vmatprep.mubr.bf16.mxu1 %v7398_v23 }
 0x147   :  { %13589 = vst [vmem:[#allocation15_spill] sm:$0xff] %v8003_v32  ;;  %v2745_v34 = vadd.f32 %v2744_v28, %v8003_v32  ;;  %v1763_v36 = vpop.f32.mrb[27].mxu0  ;;  %2397 = vmatmul.mubr.bf16.gmra.mrb[88].mxu1 %v7400_v25  ;;  %v7424_v23 = vld [vmem:[%s12907_s0 + $0x5a0] ss:$8 sps:$4 sm:$0xff]  }
 0x148   :  { %2404 = vmatprep.mubr.bf16.mxu1 %v7404_v37  ;;  %v8171_v37 = vpop.f32.mrb[0].mxu1 }
 0x149   :  { %1973 = vmatmul.mubr.bf16.gmra.mrb[132].mxu0 %v7277_v30  ;;  %13608 = vst [vmem:[#allocation34_spill] sm:$0xff] %v8171_v37 }
 0x14a   :  { %1980 = vmatprep.mubr.bf16.mxu0 %v7281_v33  ;;  %v7311_v33 = vld [vmem:[%s12907_s0 + $0x274] ss:$8 sps:$4 sm:$0xff]  }
 0x14c   :  { %v8012_v38 = vpop.f32.mrb[28].mxu0 }
 0x14d   :  { %13590 = vst [vmem:[#allocation16_spill] sm:$0xff] %v8012_v38  ;;  %v2746_v41 = vadd.f32 %v2745_v34, %v8012_v38  ;;  %v1768_v42 = vpop.f32.mrb[29].mxu0 }
 0x14e   :  { %v8021_v44 = vpop.f32.mrb[30].mxu0 }
 0x14f   :  { %13591 = vst [vmem:[#allocation17_spill] sm:$0xff] %v8021_v44  ;;  %v2747_v47 = vadd.f32 %v2746_v41, %v8021_v44  ;;  %v1771_v48 = vpop.f32.mrb[31].mxu0  ;;  %v7406_v41 = vld [vmem:[%s12907_s0 + $0x570] ss:$8 sps:$4 sm:$0xff]  }
 0x150   :  { %v7317_v48 = vld [vmem:[%s12907_s0 + $0x284] ss:$8 sps:$4 sm:$0xff]   ;;  %2405 = vmatmul.mubr.bf16.gmra.mrb[92].mxu1 %v7406_v41  ;;  %v2224_v41 = vpop.f32.mrb[1].mxu1 }
 0x151   :  { %1981 = vmatmul.mubr.bf16.gmra.mrb[136].mxu0 %v7283_v43 }
 0x152   :  { %1988 = vmatprep.mubr.bf16.mxu0 %v7287_v46  ;;  %v7313_v46 = vld [vmem:[%s12907_s0 + $0x270] ss:$8 sps:$4 sm:$0xff]  }
 0x154   :  { %v8030_v51 = vpop.f32.mrb[32].mxu0 }
 0x155   :  { %13592 = vst [vmem:[#allocation18_spill] sm:$0xff] %v8030_v51  ;;  %v2748_v53 = vadd.f32 %v2747_v47, %v8030_v51  ;;  %v1776_v54 = vpop.f32.mrb[33].mxu0 }
 0x156   :  { %v8039_v57 = vpop.f32.mrb[34].mxu0 }
 0x157   :  { %13593 = vst [vmem:[#allocation19_spill] sm:$0xff] %v8039_v57  ;;  %v2749_v59 = vadd.f32 %v2748_v53, %v8039_v57  ;;  %v1779_v61 = vpop.f32.mrb[35].mxu0  ;;  %v7410_v53 = vld [vmem:[%s12907_s0 + $0x584] ss:$8 sps:$4 sm:$0xff]  }
 0x158   :  { %v7319_v61 = vld [vmem:[%s12907_s0 + $0x280] ss:$8 sps:$4 sm:$0xff]   ;;  %2412 = vmatprep.mubr.bf16.mxu1 %v7410_v53 }
 0x159   :  { %1989 = vmatmul.mubr.bf16.gmra.mrb[140].mxu0 %v7289_v56  ;;  %v7412_v56 = vld [vmem:[%s12907_s0 + $0x580] ss:$8 sps:$4 sm:$0xff]  }
 0x15a   :  { %1996 = vmatprep.mubr.bf16.mxu0 %v7293_v58  ;;  %2413 = vmatmul.mubr.bf16.gmra.mrb[96].mxu1 %v7412_v56  ;;  %v7337_v56 = vld [vmem:[%s12907_s0 + $0x2b0] ss:$8 sps:$4 sm:$0xff]  }
 0x15c   :  { %v8048_v63 = vpop.f32.mrb[36].mxu0 }
 0x15d   :  { %13594 = vst [vmem:[#allocation20_spill] sm:$0xff] %v8048_v63  ;;  %v2750_v2 = vadd.f32 %v2749_v59, %v8048_v63  ;;  %v1784_v3 = vpop.f32.mrb[37].mxu0 }
 0x15e   :  { %v8057_v5 = vpop.f32.mrb[38].mxu0 }
 0x15f   :  { %13595 = vst [vmem:[#allocation21_spill] sm:$0xff] %v8057_v5  ;;  %v2751_v8 = vadd.f32 %v2750_v2, %v8057_v5  ;;  %v1787_v9 = vpop.f32.mrb[39].mxu0 }
 0x161   :  { %1997 = vmatmul.mubr.bf16.gmra.mrb[144].mxu0 %v7295_v4  ;;  %v7416_v4 = vld [vmem:[%s12907_s0 + $0x594] ss:$8 sps:$4 sm:$0xff]  }
 0x162   :  { %2004 = vmatprep.mubr.bf16.mxu0 %v7299_v7  ;;  %2420 = vmatprep.mubr.bf16.mxu1 %v7416_v4 }
 0x164   :  { %v8066_v12 = vpop.f32.mrb[40].mxu0 }
 0x165   :  { %13596 = vst [vmem:[#allocation22_spill] sm:$0xff] %v8066_v12  ;;  %v2752_v14 = vadd.f32 %v2751_v8, %v8066_v12  ;;  %v1792_v15 = vpop.f32.mrb[41].mxu0  ;;  %v7418_v8 = vld [vmem:[%s12907_s0 + $0x590] ss:$8 sps:$4 sm:$0xff]  }
 0x166   :  { %v8075_v18 = vpop.f32.mrb[42].mxu0  ;;  %v7329_v15 = vld [vmem:[%s12907_s0 + $0x2a4] ss:$8 sps:$4 sm:$0xff]   ;;  %2421 = vmatmul.mubr.bf16.gmra.mrb[100].mxu1 %v7418_v8 }
 0x167   :  { %13597 = vst [vmem:[#allocation23_spill] sm:$0xff] %v8075_v18  ;;  %v2753_v20 = vadd.f32 %v2752_v14, %v8075_v18  ;;  %v1795_v22 = vpop.f32.mrb[43].mxu0  ;;  %v7434_v8 = vld [vmem:[%s12907_s0 + $0x5c4] ss:$8 sps:$4 sm:$0xff]  }
 0x169   :  { %2005 = vmatmul.mubr.bf16.gmra.mrb[148].mxu0 %v7301_v17 }
 0x16a   :  { %2012 = vmatprep.mubr.bf16.mxu0 %v7305_v19 }
 0x16c   :  { %v8084_v24 = vpop.f32.mrb[44].mxu0 }
 0x16d   :  { %13598 = vst [vmem:[#allocation24_spill] sm:$0xff] %v8084_v24  ;;  %v2754_v27 = vadd.f32 %v2753_v20, %v8084_v24  ;;  %v1800_v28 = vpop.f32.mrb[45].mxu0  ;;  %v7422_v20 = vld [vmem:[%s12907_s0 + $0x5a4] ss:$8 sps:$4 sm:$0xff]  }
 0x16e   :  { %v8093_v30 = vpop.f32.mrb[46].mxu0  ;;  %v7331_v28 = vld [vmem:[%s12907_s0 + $0x2a0] ss:$8 sps:$4 sm:$0xff]   ;;  %2428 = vmatprep.mubr.bf16.mxu1 %v7422_v20 }
 0x16f   :  { %13599 = vst [vmem:[#allocation25_spill] sm:$0xff] %v8093_v30  ;;  %v2755_v34 = vadd.f32 %v2754_v27, %v8093_v30  ;;  %v1803_v36 = vpop.f32.mrb[47].mxu0  ;;  %2429 = vmatmul.mubr.bf16.gmra.mrb[104].mxu1 %v7424_v23  ;;  %v7347_v23 = vld [vmem:[%s12907_s0 + $0x2d4] ss:$8 sps:$4 sm:$0xff]  }
 0x171   :  { %2013 = vmatmul.mubr.bf16.gmra.mrb[152].mxu0 %v7307_v29 }
 0x172   :  { %2020 = vmatprep.mubr.bf16.mxu0 %v7311_v33  ;;  %v7335_v33 = vld [vmem:[%s12907_s0 + $0x2b4] ss:$8 sps:$4 sm:$0xff]  }
 0x174   :  { %v8102_v39 = vpop.f32.mrb[48].mxu0 }
 0x175   :  { %13600 = vst [vmem:[#allocation26_spill] sm:$0xff] %v8102_v39  ;;  %v2756_v42 = vadd.f32 %v2755_v34, %v8102_v39  ;;  %v1808_v43 = vpop.f32.mrb[49].mxu0 }
 0x176   :  { %v8111_v47 = vpop.f32.mrb[50].mxu0  ;;  %v7428_v43 = vld [vmem:[%s12907_s0 + $0x5b4] ss:$8 sps:$4 sm:$0xff]  }
 0x177   :  { %13601 = vst [vmem:[#allocation27_spill] sm:$0xff] %v8111_v47  ;;  %v2757_v49 = vadd.f32 %v2756_v42, %v8111_v47  ;;  %v1811_v52 = vpop.f32.mrb[51].mxu0  ;;  %v8173_v42 = vpop.f32.mrb[2].mxu1  ;;  %2436 = vmatprep.mubr.bf16.mxu1 %v7428_v43 }
 0x178   :  { %13609 = vst [vmem:[#allocation35_spill] sm:$0xff] %v8173_v42 }
 0x179   :  { %2021 = vmatmul.mubr.bf16.gmra.mrb[156].mxu0 %v7313_v46 }
 0x17a   :  { %2028 = vmatprep.mubr.bf16.mxu0 %v7317_v48  ;;  %v2227_v48 = vpop.f32.mrb[3].mxu1 }
 0x17b   :  { %v7442_v48 = vld [vmem:[%s12907_s0 + $0x5d0] ss:$8 sps:$4 sm:$0xff]  }
 0x17c   :  { %v8120_v54 = vpop.f32.mrb[52].mxu0 }
 0x17d   :  { %13602 = vst [vmem:[#allocation28_spill] sm:$0xff] %v8120_v54  ;;  %v2758_v58 = vadd.f32 %v2757_v49, %v8120_v54  ;;  %v1816_v59 = vpop.f32.mrb[53].mxu0  ;;  %v7430_v49 = vld [vmem:[%s12907_s0 + $0x5b0] ss:$8 sps:$4 sm:$0xff]  }
 0x17e   :  { %v8129_v62 = vpop.f32.mrb[54].mxu0  ;;  %v7341_v59 = vld [vmem:[%s12907_s0 + $0x2c4] ss:$8 sps:$4 sm:$0xff]   ;;  %2437 = vmatmul.mubr.bf16.gmra.mrb[108].mxu1 %v7430_v49 }
 0x17f   :  { %13603 = vst [vmem:[#allocation29_spill] sm:$0xff] %v8129_v62  ;;  %v2759_v2 = vadd.f32 %v2758_v58, %v8129_v62  ;;  %v1819_v3 = vpop.f32.mrb[55].mxu0  ;;  %2444 = vmatprep.mubr.bf16.mxu1 %v7434_v8 }
 0x181   :  { %2029 = vmatmul.mubr.bf16.gmra.mrb[160].mxu0 %v7319_v61 }
 0x182   :  { %2036 = vmatprep.mubr.bf16.mxu0 %v7323_v0 }
 0x184   :  { %v8138_v7 = vpop.f32.mrb[56].mxu0 }
 0x185   :  { %13604 = vst [vmem:[#allocation30_spill] sm:$0xff] %v8138_v7  ;;  %v2760_v9 = vadd.f32 %v2759_v2, %v8138_v7  ;;  %v1824_v10 = vpop.f32.mrb[57].mxu0  ;;  %v8193_v2 = vpop.f32.mrb[4].mxu1 }
 0x186   :  { %v8147_v14 = vpop.f32.mrb[58].mxu0  ;;  %v2232_v3 = vpop.f32.mrb[5].mxu1 }
 0x187   :  { %13605 = vst [vmem:[#allocation31_spill] sm:$0xff] %v8147_v14  ;;  %v2761_v17 = vadd.f32 %v2760_v9, %v8147_v14  ;;  %v1827_v19 = vpop.f32.mrb[59].mxu0  ;;  %v8195_v4 = vpop.f32.mrb[6].mxu1 }
 0x188   :  { %v2235_v10 = vpop.f32.mrb[7].mxu1  ;;  %v7343_v19 = vld [vmem:[%s12907_s0 + $0x2c0] ss:$8 sps:$4 sm:$0xff]  }
 0x189   :  { %2037 = vmatmul.mubr.bf16.gmra.mrb[164].mxu0 %v7325_v13  ;;  %v7436_v13 = vld [vmem:[%s12907_s0 + $0x5c0] ss:$8 sps:$4 sm:$0xff]  }
 0x18a   :  { %2044 = vmatprep.mubr.bf16.mxu0 %v7329_v15  ;;  %2445 = vmatmul.mubr.bf16.gmra.mrb[112].mxu1 %v7436_v13  ;;  %v7446_v13 = vld [vmem:[%s12907_s0 + $0x5e4] ss:$8 sps:$4 sm:$0xff]  }
 0x18c   :  { %v8156_v22 = vpop.f32.mrb[60].mxu0 }
 0x18d   :  { %13606 = vst [vmem:[#allocation32_spill] sm:$0xff] %v8156_v22  ;;  %v2762_v25 = vadd.f32 %v2761_v17, %v8156_v22  ;;  %v1832_v27 = vpop.f32.mrb[61].mxu0 }
 0x18e   :  { %v8165_v29 = vpop.f32.mrb[62].mxu0 }
 0x18f   :  { %13607 = vst [vmem:[#allocation33_spill] sm:$0xff] %v8165_v29  ;;  %v2763_v34 = vadd.f32 %v2762_v25, %v8165_v29  ;;  %v1835_v36 = vpop.f32.mrb[63].mxu0 }
 0x190   :  { %v7440_v36 = vld [vmem:[%s12907_s0 + $0x5d4] ss:$8 sps:$4 sm:$0xff]  }
 0x191   :  { %2045 = vmatmul.mubr.bf16.gmra.mrb[168].mxu0 %v7331_v28  ;;  %v8215_v28 = vpop.f32.mrb[8].mxu1  ;;  %2452 = vmatprep.mubr.bf16.mxu1 %v7440_v36  ;;  %v7359_v36 = vld [vmem:[%s12907_s0 + $0x2f4] ss:$8 sps:$4 sm:$0xff]  }
 0x192   :  { %2052 = vmatprep.mubr.bf16.mxu0 %v7335_v33  ;;  %13614 = vst [vmem:[#allocation40_spill] sm:$0xff] %v8215_v28  ;;  %v2240_v33 = vpop.f32.mrb[9].mxu1  ;;  %2453 = vmatmul.mubr.bf16.gmra.mrb[116].mxu1 %v7442_v48 }
 0x193   :  { %2460 = vmatprep.mubr.bf16.mxu1 %v7446_v13 }
 0x194   :  { %v8178_v46 = vpop.f32.mrb[64].mxu0 }
 0x195   :  { %13610 = vst [vmem:[#allocation36_spill] sm:$0xff] %v8178_v46  ;;  %v2764_v52 = vadd.f32 %v2763_v34, %v8178_v46  ;;  %v1840_v53 = vpop.f32.mrb[65].mxu0  ;;  %v8217_v34 = vpop.f32.mrb[10].mxu1 }
 0x196   :  { %v8187_v58 = vpop.f32.mrb[66].mxu0  ;;  %13615 = vst [vmem:[#allocation41_spill] sm:$0xff] %v8217_v34  ;;  %v2243_v43 = vpop.f32.mrb[11].mxu1  ;;  %v7349_v53 = vld [vmem:[%s12907_s0 + $0x2d0] ss:$8 sps:$4 sm:$0xff]  }
 0x197   :  { %13611 = vst [vmem:[#allocation37_spill] sm:$0xff] %v8187_v58  ;;  %v2765_v61 = vadd.f32 %v2764_v52, %v8187_v58  ;;  %v1843_v0 = vpop.f32.mrb[67].mxu0  ;;  %v8237_v3 = vpop.f32.mrb[12].mxu1 }
 0x198   :  { %v2248_v8 = vpop.f32.mrb[13].mxu1 }
 0x199   :  { %2053 = vmatmul.mubr.bf16.gmra.mrb[172].mxu0 %v7337_v56  ;;  %v8239_v10 = vpop.f32.mrb[14].mxu1  ;;  %v7454_v8 = vld [vmem:[%s12907_s0 + $0x5f0] ss:$8 sps:$4 sm:$0xff]  }
 0x19a   :  { %2060 = vmatprep.mubr.bf16.mxu0 %v7341_v59  ;;  %v7353_v59 = vld [vmem:[%s12907_s0 + $0x2e4] ss:$8 sps:$4 sm:$0xff]  }
 0x19c   :  { %v8200_v9 = vpop.f32.mrb[68].mxu0 }
 0x19d   :  { %13612 = vst [vmem:[#allocation38_spill] sm:$0xff] %v8200_v9  ;;  %v2766_v15 = vadd.f32 %v2765_v61, %v8200_v9  ;;  %v1848_v17 = vpop.f32.mrb[69].mxu0 }
 0x19e   :  { %v8209_v20 = vpop.f32.mrb[70].mxu0  ;;  %v2251_v17 = vpop.f32.mrb[15].mxu1 }
 0x19f   :  { %13613 = vst [vmem:[#allocation39_spill] sm:$0xff] %v8209_v20  ;;  %v2767_v25 = vadd.f32 %v2766_v15, %v8209_v20  ;;  %v1851_v27 = vpop.f32.mrb[71].mxu0 }
 0x1a0   :  { %v7355_v27 = vld [vmem:[%s12907_s0 + $0x2e0] ss:$8 sps:$4 sm:$0xff]  }
 0x1a1   :  { %2061 = vmatmul.mubr.bf16.gmra.mrb[176].mxu0 %v7343_v19  ;;  %v7448_v19 = vld [vmem:[%s12907_s0 + $0x5e0] ss:$8 sps:$4 sm:$0xff]  }
 0x1a2   :  { %2068 = vmatprep.mubr.bf16.mxu0 %v7347_v23  ;;  %2461 = vmatmul.mubr.bf16.gmra.mrb[120].mxu1 %v7448_v19  ;;  %v7361_v19 = vld [vmem:[%s12907_s0 + $0x2f0] ss:$8 sps:$4 sm:$0xff]  }
 0x1a4   :  { %v8222_v41 = vpop.f32.mrb[72].mxu0 }
 0x1a5   :  { %13616 = vst [vmem:[#allocation42_spill] sm:$0xff] %v8222_v41  ;;  %v2768_v49 = vadd.f32 %v2767_v25, %v8222_v41  ;;  %v1856_v52 = vpop.f32.mrb[73].mxu0 }
 0x1a6   :  { %v8231_v56 = vpop.f32.mrb[74].mxu0 }
 0x1a7   :  { %13617 = vst [vmem:[#allocation43_spill] sm:$0xff] %v8231_v56  ;;  %v2769_v61 = vadd.f32 %v2768_v49, %v8231_v56  ;;  %v1859_v0 = vpop.f32.mrb[75].mxu0  ;;  %v8259_v49 = vpop.f32.mrb[16].mxu1 }
 0x1a8   :  { %13620 = vst [vmem:[#allocation46_spill] sm:$0xff] %v8259_v49  ;;  %v2256_v52 = vpop.f32.mrb[17].mxu1 }
 0x1a9   :  { %2069 = vmatmul.mubr.bf16.gmra.mrb[180].mxu0 %v7349_v53  ;;  %v8261_v53 = vpop.f32.mrb[18].mxu1 }
 0x1aa   :  { %2076 = vmatprep.mubr.bf16.mxu0 %v7353_v59  ;;  %13621 = vst [vmem:[#allocation47_spill] sm:$0xff] %v8261_v53  ;;  %v7452_v59 = vld [vmem:[%s12907_s0 + $0x5f4] ss:$8 sps:$4 sm:$0xff]   ;;  %v2259_v0 = vpop.f32.mrb[19].mxu1 }
 0x1ab   :  { %2468 = vmatprep.mubr.bf16.mxu1 %v7452_v59  ;;  %v7458_v59 = vld [vmem:[%s12907_s0 + $0x604] ss:$8 sps:$4 sm:$0xff]  }
 0x1ac   :  { %v8244_v15 = vpop.f32.mrb[76].mxu0  ;;  %2469 = vmatmul.mubr.bf16.gmra.mrb[124].mxu1 %v7454_v8  ;;  %v7460_v8 = vld [vmem:[%s12907_s0 + $0x600] ss:$8 sps:$4 sm:$0xff]  }
 0x1ad   :  { %13618 = vst [vmem:[#allocation44_spill] sm:$0xff] %v8244_v15  ;;  %v2770_v23 = vadd.f32 %v2769_v61, %v8244_v15  ;;  %v1864_v25 = vpop.f32.mrb[77].mxu0  ;;  %2476 = vmatprep.mubr.bf16.mxu1 %v7458_v59  ;;  %v7461_v59 = vld [vmem:[%s12907_s0 + $0x614] ss:$8 sps:$4 sm:$0xff]  }
 0x1ae   :  { %v8253_v33 = vpop.f32.mrb[78].mxu0  ;;  %v7365_v25 = vld [vmem:[%s12907_s0 + $0x304] ss:$8 sps:$4 sm:$0xff]  }
 0x1af   :  { %13619 = vst [vmem:[#allocation45_spill] sm:$0xff] %v8253_v33  ;;  %v2771_v43 = vadd.f32 %v2770_v23, %v8253_v33  ;;  %v1867_v48 = vpop.f32.mrb[79].mxu0 }
 0x1b0   :  { %v8281_v48 = vpop.f32.mrb[20].mxu1 }
 0x1b1   :  { %2077 = vmatmul.mubr.bf16.gmra.mrb[184].mxu0 %v7355_v27 }
 0x1b2   :  { %2084 = vmatprep.mubr.bf16.mxu0 %v7359_v36 }
 0x1b4   :  { %v8266_v61 = vpop.f32.mrb[80].mxu0  ;;  %2477 = vmatmul.mubr.bf16.gmra.mrb[128].mxu1 %v7460_v8  ;;  %v7463_v8 = vld [vmem:[%s12907_s0 + $0x610] ss:$8 sps:$4 sm:$0xff]  }
 0x1b5   :  { %13622 = vst [vmem:[#allocation48_spill] sm:$0xff] %v8266_v61  ;;  %v2772_v13 = vadd.f32 %v2771_v43, %v8266_v61  ;;  %v1872_v17 = vpop.f32.mrb[81].mxu0  ;;  %v2264_v43 = vpop.f32.mrb[21].mxu1  ;;  %2484 = vmatprep.mubr.bf16.mxu1 %v7461_v59  ;;  %v7464_v59 = vld [vmem:[%s12907_s0 + $0x624] ss:$8 sps:$4 sm:$0xff]  }
 0x1b6   :  { %v8275_v23 = vpop.f32.mrb[82].mxu0  ;;  %v8283_v52 = vpop.f32.mrb[22].mxu1  ;;  %v7371_v43 = vld [vmem:[%s12907_s0 + $0x314] ss:$8 sps:$4 sm:$0xff]  }
 0x1b7   :  { %13623 = vst [vmem:[#allocation49_spill] sm:$0xff] %v8275_v23  ;;  %v2773_v27 = vadd.f32 %v2772_v13, %v8275_v23  ;;  %v1875_v36 = vpop.f32.mrb[83].mxu0  ;;  %v2267_v17 = vpop.f32.mrb[23].mxu1 }
 0x1b8   :  { %v8303_v61 = vpop.f32.mrb[24].mxu1 }
 0x1b9   :  { %2085 = vmatmul.mubr.bf16.gmra.mrb[188].mxu0 %v7361_v19  ;;  %13626 = vst [vmem:[#allocation52_spill] sm:$0xff] %v8303_v61 }
 0x1ba   :  { %2092 = vmatprep.mubr.bf16.mxu0 %v7365_v25  ;;  %v7367_v25 = vld [vmem:[%s12907_s0 + $0x300] ss:$8 sps:$4 sm:$0xff]  }
 0x1bc   :  { %v8288_v0 = vpop.f32.mrb[84].mxu0  ;;  %2485 = vmatmul.mubr.bf16.gmra.mrb[132].mxu1 %v7463_v8  ;;  %v7466_v8 = vld [vmem:[%s12907_s0 + $0x620] ss:$8 sps:$4 sm:$0xff]  }
 0x1bd   :  { %13624 = vst [vmem:[#allocation50_spill] sm:$0xff] %v8288_v0  ;;  %v2774_v13 = vadd.f32 %v2773_v27, %v8288_v0  ;;  %v1880_v19 = vpop.f32.mrb[85].mxu0  ;;  %v2272_v27 = vpop.f32.mrb[25].mxu1  ;;  %2492 = vmatprep.mubr.bf16.mxu1 %v7464_v59  ;;  %v7467_v59 = vld [vmem:[%s12907_s0 + $0x634] ss:$8 sps:$4 sm:$0xff]  }
 0x1be   :  { %v8297_v36 = vpop.f32.mrb[86].mxu0  ;;  %v8305_v19 = vpop.f32.mrb[26].mxu1  ;;  %v7377_v27 = vld [vmem:[%s12907_s0 + $0x324] ss:$8 sps:$4 sm:$0xff]  }
 0x1bf   :  { %13625 = vst [vmem:[#allocation51_spill] sm:$0xff] %v8297_v36  ;;  %v2775_v17 = vadd.f32 %v2774_v13, %v8297_v36  ;;  %v1883_v23 = vpop.f32.mrb[87].mxu0  ;;  %13627 = vst [vmem:[#allocation53_spill] sm:$0xff] %v8305_v19  ;;  %v2275_v33 = vpop.f32.mrb[27].mxu1 }
 0x1c0   :  { %v8325_v15 = vpop.f32.mrb[28].mxu1 }
 0x1c1   :  { %2093 = vmatmul.mubr.bf16.gmra.mrb[192].mxu0 %v7367_v25  ;;  %v7373_v25 = vld [vmem:[%s12907_s0 + $0x310] ss:$8 sps:$4 sm:$0xff]  }
 0x1c2   :  { %2100 = vmatprep.mubr.bf16.mxu0 %v7371_v43 }
 0x1c4   :  { %v8310_v0 = vpop.f32.mrb[88].mxu0  ;;  %2493 = vmatmul.mubr.bf16.gmra.mrb[136].mxu1 %v7466_v8  ;;  %v7469_v8 = vld [vmem:[%s12907_s0 + $0x630] ss:$8 sps:$4 sm:$0xff]  }
 0x1c5   :  { %13628 = vst [vmem:[#allocation54_spill] sm:$0xff] %v8310_v0  ;;  %v2776_v23 = vadd.f32 %v2775_v17, %v8310_v0  ;;  %v1888_v13 = vpop.f32.mrb[89].mxu0  ;;  %v2280_v17 = vpop.f32.mrb[29].mxu1  ;;  %2500 = vmatprep.mubr.bf16.mxu1 %v7467_v59  ;;  %v7470_v59 = vld [vmem:[%s12907_s0 + $0x644] ss:$8 sps:$4 sm:$0xff]  }
 0x1c6   :  { %v8319_v43 = vpop.f32.mrb[90].mxu0  ;;  %v8327_v13 = vpop.f32.mrb[30].mxu1  ;;  %v7383_v17 = vld [vmem:[%s12907_s0 + $0x334] ss:$8 sps:$4 sm:$0xff]  }
 0x1c7   :  { %13629 = vst [vmem:[#allocation55_spill] sm:$0xff] %v8319_v43  ;;  %v2777_v33 = vadd.f32 %v2776_v23, %v8319_v43  ;;  %v1891_v36 = vpop.f32.mrb[91].mxu0  ;;  %13630 = vst [vmem:[#allocation56_spill] sm:$0xff] %v8327_v13  ;;  %v2283_v56 = vpop.f32.mrb[31].mxu1 }
 0x1c8   :  { %v8347_v41 = vpop.f32.mrb[32].mxu1 }
 0x1c9   :  { %2101 = vmatmul.mubr.bf16.gmra.mrb[196].mxu0 %v7373_v25  ;;  %v7379_v25 = vld [vmem:[%s12907_s0 + $0x320] ss:$8 sps:$4 sm:$0xff]   ;;  %13633 = vst [vmem:[#allocation59_spill] sm:$0xff] %v8347_v41 }
 0x1ca   :  { %2108 = vmatprep.mubr.bf16.mxu0 %v7377_v27 }
 0x1cc   :  { %v8332_v0 = vpop.f32.mrb[92].mxu0  ;;  %2501 = vmatmul.mubr.bf16.gmra.mrb[140].mxu1 %v7469_v8  ;;  %v7472_v8 = vld [vmem:[%s12907_s0 + $0x640] ss:$8 sps:$4 sm:$0xff]  }
 0x1cd   :  { %13631 = vst [vmem:[#allocation57_spill] sm:$0xff] %v8332_v0  ;;  %v2778_v36 = vadd.f32 %v2777_v33, %v8332_v0  ;;  %v1896_v23 = vpop.f32.mrb[93].mxu0  ;;  %v2288_v33 = vpop.f32.mrb[33].mxu1  ;;  %2508 = vmatprep.mubr.bf16.mxu1 %v7470_v59  ;;  %v7473_v59 = vld [vmem:[%s12907_s0 + $0x654] ss:$8 sps:$4 sm:$0xff]  }
 0x1ce   :  { %v8341_v27 = vpop.f32.mrb[94].mxu0  ;;  %v8349_v23 = vpop.f32.mrb[34].mxu1  ;;  %v7389_v33 = vld [vmem:[%s12907_s0 + $0x344] ss:$8 sps:$4 sm:$0xff]  }
 0x1cf   :  { %13632 = vst [vmem:[#allocation58_spill] sm:$0xff] %v8341_v27  ;;  %v2779_v56 = vadd.f32 %v2778_v36, %v8341_v27  ;;  %v1899_v43 = vpop.f32.mrb[95].mxu0  ;;  %13634 = vst [vmem:[#allocation60_spill] sm:$0xff] %v8349_v23  ;;  %v2291_v20 = vpop.f32.mrb[35].mxu1 }
 0x1d0   :  { %v8369_v9 = vpop.f32.mrb[36].mxu1 }
 0x1d1   :  { %2109 = vmatmul.mubr.bf16.gmra.mrb[200].mxu0 %v7379_v25  ;;  %v7385_v25 = vld [vmem:[%s12907_s0 + $0x330] ss:$8 sps:$4 sm:$0xff]   ;;  %13637 = vst [vmem:[#allocation63_spill] sm:$0xff] %v8369_v9 }
 0x1d2   :  { %2116 = vmatprep.mubr.bf16.mxu0 %v7383_v17 }
 0x1d4   :  { %v8354_v0 = vpop.f32.mrb[96].mxu0  ;;  %2509 = vmatmul.mubr.bf16.gmra.mrb[144].mxu1 %v7472_v8  ;;  %v7475_v8 = vld [vmem:[%s12907_s0 + $0x650] ss:$8 sps:$4 sm:$0xff]  }
 0x1d5   :  { %13635 = vst [vmem:[#allocation61_spill] sm:$0xff] %v8354_v0  ;;  %v2780_v43 = vadd.f32 %v2779_v56, %v8354_v0  ;;  %v1904_v36 = vpop.f32.mrb[97].mxu0  ;;  %v2296_v56 = vpop.f32.mrb[37].mxu1  ;;  %2516 = vmatprep.mubr.bf16.mxu1 %v7473_v59  ;;  %v7476_v59 = vld [vmem:[%s12907_s0 + $0x664] ss:$8 sps:$4 sm:$0xff]  }
 0x1d6   :  { %v8363_v17 = vpop.f32.mrb[98].mxu0  ;;  %v8371_v36 = vpop.f32.mrb[38].mxu1  ;;  %v7395_v56 = vld [vmem:[%s12907_s0 + $0x354] ss:$8 sps:$4 sm:$0xff]  }
 0x1d7   :  { %13636 = vst [vmem:[#allocation62_spill] sm:$0xff] %v8363_v17  ;;  %v2781_v20 = vadd.f32 %v2780_v43, %v8363_v17  ;;  %v1907_v27 = vpop.f32.mrb[99].mxu0  ;;  %13638 = vst [vmem:[#allocation64_spill] sm:$0xff] %v8371_v36  ;;  %v2299_v58 = vpop.f32.mrb[39].mxu1 }
 0x1d8   :  { %v8391_v46 = vpop.f32.mrb[40].mxu1 }
 0x1d9   :  { %2117 = vmatmul.mubr.bf16.gmra.mrb[204].mxu0 %v7385_v25  ;;  %v7391_v25 = vld [vmem:[%s12907_s0 + $0x340] ss:$8 sps:$4 sm:$0xff]   ;;  %13641 = vst [vmem:[#allocation67_spill] sm:$0xff] %v8391_v46 }
 0x1da   :  { %2124 = vmatprep.mubr.bf16.mxu0 %v7389_v33 }
 0x1dc   :  { %v8376_v0 = vpop.f32.mrb[100].mxu0  ;;  %2517 = vmatmul.mubr.bf16.gmra.mrb[148].mxu1 %v7475_v8  ;;  %v7478_v8 = vld [vmem:[%s12907_s0 + $0x660] ss:$8 sps:$4 sm:$0xff]  }
 0x1dd   :  { %13639 = vst [vmem:[#allocation65_spill] sm:$0xff] %v8376_v0  ;;  %v2782_v27 = vadd.f32 %v2781_v20, %v8376_v0  ;;  %v1912_v43 = vpop.f32.mrb[101].mxu0  ;;  %v2304_v20 = vpop.f32.mrb[41].mxu1  ;;  %2524 = vmatprep.mubr.bf16.mxu1 %v7476_v59  ;;  %v7479_v59 = vld [vmem:[%s12907_s0 + $0x674] ss:$8 sps:$4 sm:$0xff]  }
 0x1de   :  { %v8385_v33 = vpop.f32.mrb[102].mxu0  ;;  %v8393_v43 = vpop.f32.mrb[42].mxu1  ;;  %v7401_v20 = vld [vmem:[%s12907_s0 + $0x364] ss:$8 sps:$4 sm:$0xff]  }
 0x1df   :  { %13640 = vst [vmem:[#allocation66_spill] sm:$0xff] %v8385_v33  ;;  %v2783_v58 = vadd.f32 %v2782_v27, %v8385_v33  ;;  %v1915_v17 = vpop.f32.mrb[103].mxu0  ;;  %13642 = vst [vmem:[#allocation68_spill] sm:$0xff] %v8393_v43  ;;  %v2307_v29 = vpop.f32.mrb[43].mxu1 }
 0x1e0   :  { %v8413_v22 = vpop.f32.mrb[44].mxu1 }
 0x1e1   :  { %2125 = vmatmul.mubr.bf16.gmra.mrb[208].mxu0 %v7391_v25  ;;  %v7397_v25 = vld [vmem:[%s12907_s0 + $0x350] ss:$8 sps:$4 sm:$0xff]   ;;  %13645 = vst [vmem:[#allocation71_spill] sm:$0xff] %v8413_v22 }
 0x1e2   :  { %2132 = vmatprep.mubr.bf16.mxu0 %v7395_v56 }
 0x1e4   :  { %v8398_v0 = vpop.f32.mrb[104].mxu0  ;;  %2525 = vmatmul.mubr.bf16.gmra.mrb[152].mxu1 %v7478_v8  ;;  %v7481_v8 = vld [vmem:[%s12907_s0 + $0x670] ss:$8 sps:$4 sm:$0xff]  }
 0x1e5   :  { %13643 = vst [vmem:[#allocation69_spill] sm:$0xff] %v8398_v0  ;;  %v2784_v17 = vadd.f32 %v2783_v58, %v8398_v0  ;;  %v1920_v27 = vpop.f32.mrb[105].mxu0  ;;  %v2312_v58 = vpop.f32.mrb[45].mxu1  ;;  %2532 = vmatprep.mubr.bf16.mxu1 %v7479_v59  ;;  %v7482_v59 = vld [vmem:[%s12907_s0 + $0x684] ss:$8 sps:$4 sm:$0xff]  }
 0x1e6   :  { %v8407_v56 = vpop.f32.mrb[106].mxu0  ;;  %v8415_v27 = vpop.f32.mrb[46].mxu1  ;;  %v7407_v58 = vld [vmem:[%s12907_s0 + $0x374] ss:$8 sps:$4 sm:$0xff]  }
 0x1e7   :  { %13644 = vst [vmem:[#allocation70_spill] sm:$0xff] %v8407_v56  ;;  %v2785_v29 = vadd.f32 %v2784_v17, %v8407_v56  ;;  %v1923_v33 = vpop.f32.mrb[107].mxu0  ;;  %13646 = vst [vmem:[#allocation72_spill] sm:$0xff] %v8415_v27  ;;  %v2315_v14 = vpop.f32.mrb[47].mxu1 }
 0x1e8   :  { %v8435_v7 = vpop.f32.mrb[48].mxu1 }
 0x1e9   :  { %2133 = vmatmul.mubr.bf16.gmra.mrb[212].mxu0 %v7397_v25  ;;  %v7403_v25 = vld [vmem:[%s12907_s0 + $0x360] ss:$8 sps:$4 sm:$0xff]   ;;  %13649 = vst [vmem:[#allocation75_spill] sm:$0xff] %v8435_v7 }
 0x1ea   :  { %2140 = vmatprep.mubr.bf16.mxu0 %v7401_v20 }
 0x1ec   :  { %v8420_v0 = vpop.f32.mrb[108].mxu0  ;;  %2533 = vmatmul.mubr.bf16.gmra.mrb[156].mxu1 %v7481_v8  ;;  %v7484_v8 = vld [vmem:[%s12907_s0 + $0x680] ss:$8 sps:$4 sm:$0xff]  }
 0x1ed   :  { %13647 = vst [vmem:[#allocation73_spill] sm:$0xff] %v8420_v0  ;;  %v2786_v33 = vadd.f32 %v2785_v29, %v8420_v0  ;;  %v1928_v17 = vpop.f32.mrb[109].mxu0  ;;  %v2320_v29 = vpop.f32.mrb[49].mxu1  ;;  %2540 = vmatprep.mubr.bf16.mxu1 %v7482_v59  ;;  %v7485_v59 = vld [vmem:[%s12907_s0 + $0x694] ss:$8 sps:$4 sm:$0xff]  }
 0x1ee   :  { %v8429_v20 = vpop.f32.mrb[110].mxu0  ;;  %v8437_v17 = vpop.f32.mrb[50].mxu1  ;;  %v7413_v29 = vld [vmem:[%s12907_s0 + $0x384] ss:$8 sps:$4 sm:$0xff]  }
 0x1ef   :  { %13648 = vst [vmem:[#allocation74_spill] sm:$0xff] %v8429_v20  ;;  %v2787_v14 = vadd.f32 %v2786_v33, %v8429_v20  ;;  %v1931_v56 = vpop.f32.mrb[111].mxu0  ;;  %13650 = vst [vmem:[#allocation76_spill] sm:$0xff] %v8437_v17  ;;  %v2323_v62 = vpop.f32.mrb[51].mxu1 }
 0x1f0   :  { %v8457_v54 = vpop.f32.mrb[52].mxu1 }
 0x1f1   :  { %2141 = vmatmul.mubr.bf16.gmra.mrb[216].mxu0 %v7403_v25  ;;  %v7409_v25 = vld [vmem:[%s12907_s0 + $0x370] ss:$8 sps:$4 sm:$0xff]   ;;  %13653 = vst [vmem:[#allocation79_spill] sm:$0xff] %v8457_v54 }
 0x1f2   :  { %2148 = vmatprep.mubr.bf16.mxu0 %v7407_v58 }
 0x1f4   :  { %v8442_v0 = vpop.f32.mrb[112].mxu0  ;;  %2541 = vmatmul.mubr.bf16.gmra.mrb[160].mxu1 %v7484_v8  ;;  %v7487_v8 = vld [vmem:[%s12907_s0 + $0x690] ss:$8 sps:$4 sm:$0xff]  }
 0x1f5   :  { %13651 = vst [vmem:[#allocation77_spill] sm:$0xff] %v8442_v0  ;;  %v2788_v56 = vadd.f32 %v2787_v14, %v8442_v0  ;;  %v1936_v33 = vpop.f32.mrb[113].mxu0  ;;  %v2328_v14 = vpop.f32.mrb[53].mxu1  ;;  %2548 = vmatprep.mubr.bf16.mxu1 %v7485_v59  ;;  %v7488_v59 = vld [vmem:[%s12907_s0 + $0x6a4] ss:$8 sps:$4 sm:$0xff]  }
 0x1f6   :  { %v8451_v58 = vpop.f32.mrb[114].mxu0  ;;  %v8459_v33 = vpop.f32.mrb[54].mxu1  ;;  %v7419_v14 = vld [vmem:[%s12907_s0 + $0x394] ss:$8 sps:$4 sm:$0xff]  }
 0x1f7   :  { %13652 = vst [vmem:[#allocation78_spill] sm:$0xff] %v8451_v58  ;;  %v2789_v62 = vadd.f32 %v2788_v56, %v8451_v58  ;;  %v1939_v20 = vpop.f32.mrb[115].mxu0  ;;  %13654 = vst [vmem:[#allocation80_spill] sm:$0xff] %v8459_v33  ;;  %v2331_v47 = vpop.f32.mrb[55].mxu1 }
 0x1f8   :  { %v8479_v39 = vpop.f32.mrb[56].mxu1 }
 0x1f9   :  { %2149 = vmatmul.mubr.bf16.gmra.mrb[220].mxu0 %v7409_v25  ;;  %v7415_v25 = vld [vmem:[%s12907_s0 + $0x380] ss:$8 sps:$4 sm:$0xff]   ;;  %13657 = vst [vmem:[#allocation83_spill] sm:$0xff] %v8479_v39 }
 0x1fa   :  { %2156 = vmatprep.mubr.bf16.mxu0 %v7413_v29 }
 0x1fc   :  { %v8464_v0 = vpop.f32.mrb[116].mxu0  ;;  %2549 = vmatmul.mubr.bf16.gmra.mrb[164].mxu1 %v7487_v8  ;;  %v7490_v8 = vld [vmem:[%s12907_s0 + $0x6a0] ss:$8 sps:$4 sm:$0xff]  }
 0x1fd   :  { %13655 = vst [vmem:[#allocation81_spill] sm:$0xff] %v8464_v0  ;;  %v2790_v20 = vadd.f32 %v2789_v62, %v8464_v0  ;;  %v1944_v56 = vpop.f32.mrb[117].mxu0  ;;  %v2336_v62 = vpop.f32.mrb[57].mxu1  ;;  %2556 = vmatprep.mubr.bf16.mxu1 %v7488_v59  ;;  %v7491_v59 = vld [vmem:[%s12907_s0 + $0x6b4] ss:$8 sps:$4 sm:$0xff]  }
 0x1fe   :  { %v8473_v29 = vpop.f32.mrb[118].mxu0  ;;  %v8481_v56 = vpop.f32.mrb[58].mxu1  ;;  %v7425_v62 = vld [vmem:[%s12907_s0 + $0x3a4] ss:$8 sps:$4 sm:$0xff]  }
 0x1ff   :  { %13656 = vst [vmem:[#allocation82_spill] sm:$0xff] %v8473_v29  ;;  %v2791_v47 = vadd.f32 %v2790_v20, %v8473_v29  ;;  %v1947_v58 = vpop.f32.mrb[119].mxu0  ;;  %13658 = vst [vmem:[#allocation84_spill] sm:$0xff] %v8481_v56  ;;  %v2339_v30 = vpop.f32.mrb[59].mxu1 }
 0x200   :  { %v8501_v24 = vpop.f32.mrb[60].mxu1 }
 0x201   :  { %2157 = vmatmul.mubr.bf16.gmra.mrb[224].mxu0 %v7415_v25  ;;  %v7421_v25 = vld [vmem:[%s12907_s0 + $0x390] ss:$8 sps:$4 sm:$0xff]   ;;  %13661 = vst [vmem:[#allocation87_spill] sm:$0xff] %v8501_v24 }
 0x202   :  { %2164 = vmatprep.mubr.bf16.mxu0 %v7419_v14 }
 0x204   :  { %v8486_v0 = vpop.f32.mrb[120].mxu0  ;;  %2557 = vmatmul.mubr.bf16.gmra.mrb[168].mxu1 %v7490_v8  ;;  %v7493_v8 = vld [vmem:[%s12907_s0 + $0x6b0] ss:$8 sps:$4 sm:$0xff]  }
 0x205   :  { %13659 = vst [vmem:[#allocation85_spill] sm:$0xff] %v8486_v0  ;;  %v2792_v58 = vadd.f32 %v2791_v47, %v8486_v0  ;;  %v1952_v20 = vpop.f32.mrb[121].mxu0  ;;  %v2344_v47 = vpop.f32.mrb[61].mxu1  ;;  %2564 = vmatprep.mubr.bf16.mxu1 %v7491_v59  ;;  %v7494_v59 = vld [vmem:[%s12907_s0 + $0x6c4] ss:$8 sps:$4 sm:$0xff]  }
 0x206   :  { %v8495_v14 = vpop.f32.mrb[122].mxu0  ;;  %v8503_v20 = vpop.f32.mrb[62].mxu1  ;;  %v7431_v47 = vld [vmem:[%s12907_s0 + $0x3b4] ss:$8 sps:$4 sm:$0xff]  }
 0x207   :  { %13660 = vst [vmem:[#allocation86_spill] sm:$0xff] %v8495_v14  ;;  %v2793_v30 = vadd.f32 %v2792_v58, %v8495_v14  ;;  %v1955_v29 = vpop.f32.mrb[123].mxu0  ;;  %13662 = vst [vmem:[#allocation88_spill] sm:$0xff] %v8503_v20  ;;  %v2347_v18 = vpop.f32.mrb[63].mxu1 }
 0x208   :  { %v8523_v12 = vpop.f32.mrb[64].mxu1 }
 0x209   :  { %2165 = vmatmul.mubr.bf16.gmra.mrb[228].mxu0 %v7421_v25  ;;  %v7427_v25 = vld [vmem:[%s12907_s0 + $0x3a0] ss:$8 sps:$4 sm:$0xff]   ;;  %13665 = vst [vmem:[#allocation91_spill] sm:$0xff] %v8523_v12 }
 0x20a   :  { %2172 = vmatprep.mubr.bf16.mxu0 %v7425_v62 }
 0x20c   :  { %v8508_v0 = vpop.f32.mrb[124].mxu0  ;;  %2565 = vmatmul.mubr.bf16.gmra.mrb[172].mxu1 %v7493_v8  ;;  %v7496_v8 = vld [vmem:[%s12907_s0 + $0x6c0] ss:$8 sps:$4 sm:$0xff]  }
 0x20d   :  { %13663 = vst [vmem:[#allocation89_spill] sm:$0xff] %v8508_v0  ;;  %v2794_v29 = vadd.f32 %v2793_v30, %v8508_v0  ;;  %v1960_v58 = vpop.f32.mrb[125].mxu0  ;;  %v2352_v30 = vpop.f32.mrb[65].mxu1  ;;  %2572 = vmatprep.mubr.bf16.mxu1 %v7494_v59  ;;  %v7497_v59 = vld [vmem:[%s12907_s0 + $0x6d4] ss:$8 sps:$4 sm:$0xff]  }
 0x20e   :  { %v8517_v62 = vpop.f32.mrb[126].mxu0  ;;  %v8525_v58 = vpop.f32.mrb[66].mxu1  ;;  %v7437_v30 = vld [vmem:[%s12907_s0 + $0x3c4] ss:$8 sps:$4 sm:$0xff]  }
 0x20f   :  { %13664 = vst [vmem:[#allocation90_spill] sm:$0xff] %v8517_v62  ;;  %v2795_v18 = vadd.f32 %v2794_v29, %v8517_v62  ;;  %v1963_v14 = vpop.f32.mrb[127].mxu0  ;;  %13666 = vst [vmem:[#allocation92_spill] sm:$0xff] %v8525_v58  ;;  %v2355_v5 = vpop.f32.mrb[67].mxu1 }
 0x210   :  { %v8545_v63 = vpop.f32.mrb[68].mxu1 }
 0x211   :  { %2173 = vmatmul.mubr.bf16.gmra.mrb[232].mxu0 %v7427_v25  ;;  %v7433_v25 = vld [vmem:[%s12907_s0 + $0x3b0] ss:$8 sps:$4 sm:$0xff]   ;;  %13669 = vst [vmem:[#allocation95_spill] sm:$0xff] %v8545_v63 }
 0x212   :  { %2180 = vmatprep.mubr.bf16.mxu0 %v7431_v47 }
 0x214   :  { %v8530_v0 = vpop.f32.mrb[128].mxu0  ;;  %2573 = vmatmul.mubr.bf16.gmra.mrb[176].mxu1 %v7496_v8  ;;  %v7499_v8 = vld [vmem:[%s12907_s0 + $0x6d0] ss:$8 sps:$4 sm:$0xff]  }
 0x215   :  { %13667 = vst [vmem:[#allocation93_spill] sm:$0xff] %v8530_v0  ;;  %v2796_v14 = vadd.f32 %v2795_v18, %v8530_v0  ;;  %v1968_v29 = vpop.f32.mrb[129].mxu0  ;;  %v2360_v18 = vpop.f32.mrb[69].mxu1  ;;  %2580 = vmatprep.mubr.bf16.mxu1 %v7497_v59  ;;  %v7500_v59 = vld [vmem:[%s12907_s0 + $0x6e4] ss:$8 sps:$4 sm:$0xff]  }
 0x216   :  { %v8539_v47 = vpop.f32.mrb[130].mxu0  ;;  %v8547_v29 = vpop.f32.mrb[70].mxu1  ;;  %v7443_v18 = vld [vmem:[%s12907_s0 + $0x3d4] ss:$8 sps:$4 sm:$0xff]  }
 0x217   :  { %13668 = vst [vmem:[#allocation94_spill] sm:$0xff] %v8539_v47  ;;  %v2797_v5 = vadd.f32 %v2796_v14, %v8539_v47  ;;  %v1971_v62 = vpop.f32.mrb[131].mxu0  ;;  %13670 = vst [vmem:[#allocation96_spill] sm:$0xff] %v8547_v29  ;;  %v2363_v57 = vpop.f32.mrb[71].mxu1 }
 0x218   :  { %v8567_v51 = vpop.f32.mrb[72].mxu1 }
 0x219   :  { %2181 = vmatmul.mubr.bf16.gmra.mrb[236].mxu0 %v7433_v25  ;;  %v7439_v25 = vld [vmem:[%s12907_s0 + $0x3c0] ss:$8 sps:$4 sm:$0xff]   ;;  %13673 = vst [vmem:[#allocation99_spill] sm:$0xff] %v8567_v51 }
 0x21a   :  { %2188 = vmatprep.mubr.bf16.mxu0 %v7437_v30 }
 0x21c   :  { %v8552_v0 = vpop.f32.mrb[132].mxu0  ;;  %2581 = vmatmul.mubr.bf16.gmra.mrb[180].mxu1 %v7499_v8  ;;  %v7502_v8 = vld [vmem:[%s12907_s0 + $0x6e0] ss:$8 sps:$4 sm:$0xff]  }
 0x21d   :  { %13671 = vst [vmem:[#allocation97_spill] sm:$0xff] %v8552_v0  ;;  %v2798_v62 = vadd.f32 %v2797_v5, %v8552_v0  ;;  %v1976_v14 = vpop.f32.mrb[133].mxu0  ;;  %v2368_v5 = vpop.f32.mrb[73].mxu1  ;;  %2588 = vmatprep.mubr.bf16.mxu1 %v7500_v59  ;;  %v7503_v59 = vld [vmem:[%s12907_s0 + $0x6f4] ss:$8 sps:$4 sm:$0xff]  }
 0x21e   :  { %v8561_v30 = vpop.f32.mrb[134].mxu0  ;;  %v8569_v14 = vpop.f32.mrb[74].mxu1  ;;  %v7449_v5 = vld [vmem:[%s12907_s0 + $0x3e4] ss:$8 sps:$4 sm:$0xff]  }
 0x21f   :  { %13672 = vst [vmem:[#allocation98_spill] sm:$0xff] %v8561_v30  ;;  %v2799_v57 = vadd.f32 %v2798_v62, %v8561_v30  ;;  %v1979_v47 = vpop.f32.mrb[135].mxu0  ;;  %13674 = vst [vmem:[#allocation100_spill] sm:$0xff] %v8569_v14  ;;  %v2371_v44 = vpop.f32.mrb[75].mxu1 }
 0x220   :  { %v8589_v38 = vpop.f32.mrb[76].mxu1 }
 0x221   :  { %2189 = vmatmul.mubr.bf16.gmra.mrb[240].mxu0 %v7439_v25  ;;  %v7445_v25 = vld [vmem:[%s12907_s0 + $0x3d0] ss:$8 sps:$4 sm:$0xff]   ;;  %13677 = vst [vmem:[#allocation103_spill] sm:$0xff] %v8589_v38 }
 0x222   :  { %2196 = vmatprep.mubr.bf16.mxu0 %v7443_v18 }
 0x224   :  { %v8574_v0 = vpop.f32.mrb[136].mxu0  ;;  %2589 = vmatmul.mubr.bf16.gmra.mrb[184].mxu1 %v7502_v8  ;;  %v7505_v8 = vld [vmem:[%s12907_s0 + $0x6f0] ss:$8 sps:$4 sm:$0xff]  }
 0x225   :  { %13675 = vst [vmem:[#allocation101_spill] sm:$0xff] %v8574_v0  ;;  %v2800_v47 = vadd.f32 %v2799_v57, %v8574_v0  ;;  %v1984_v62 = vpop.f32.mrb[137].mxu0  ;;  %v2376_v57 = vpop.f32.mrb[77].mxu1  ;;  %2596 = vmatprep.mubr.bf16.mxu1 %v7503_v59  ;;  %v7508_v59 = vld [vmem:[%s12907_s0 + $0x700] ss:$8 sps:$4 sm:$0xff]  }
 0x226   :  { %v8583_v18 = vpop.f32.mrb[138].mxu0  ;;  %v8591_v62 = vpop.f32.mrb[78].mxu1  ;;  %v7455_v57 = vld [vmem:[%s12907_s0 + $0x3f4] ss:$8 sps:$4 sm:$0xff]  }
 0x227   :  { %13676 = vst [vmem:[#allocation102_spill] sm:$0xff] %v8583_v18  ;;  %v2801_v44 = vadd.f32 %v2800_v47, %v8583_v18  ;;  %v1987_v30 = vpop.f32.mrb[139].mxu0  ;;  %13678 = vst [vmem:[#allocation104_spill] sm:$0xff] %v8591_v62  ;;  %v2379_v32 = vpop.f32.mrb[79].mxu1 }
 0x228   :  { %v8611_v26 = vpop.f32.mrb[80].mxu1 }
 0x229   :  { %2197 = vmatmul.mubr.bf16.gmra.mrb[244].mxu0 %v7445_v25  ;;  %v7451_v25 = vld [vmem:[%s12907_s0 + $0x3e0] ss:$8 sps:$4 sm:$0xff]   ;;  %13681 = vst [vmem:[#allocation107_spill] sm:$0xff] %v8611_v26 }
 0x22a   :  { %2204 = vmatprep.mubr.bf16.mxu0 %v7449_v5 }
 0x22c   :  { %v8596_v0 = vpop.f32.mrb[140].mxu0  ;;  %2597 = vmatmul.mubr.bf16.gmra.mrb[188].mxu1 %v7505_v8 }
 0x22d   :  { %13679 = vst [vmem:[#allocation105_spill] sm:$0xff] %v8596_v0  ;;  %v2802_v30 = vadd.f32 %v2801_v44, %v8596_v0  ;;  %v1992_v47 = vpop.f32.mrb[141].mxu0  ;;  %v2384_v44 = vpop.f32.mrb[81].mxu1 }
 0x22e   :  { %v8605_v5 = vpop.f32.mrb[142].mxu0  ;;  %v8613_v47 = vpop.f32.mrb[82].mxu1 }
 0x22f   :  { %13680 = vst [vmem:[#allocation106_spill] sm:$0xff] %v8605_v5  ;;  %v2803_v32 = vadd.f32 %v2802_v30, %v8605_v5  ;;  %v1995_v18 = vpop.f32.mrb[143].mxu0  ;;  %13682 = vst [vmem:[#allocation108_spill] sm:$0xff] %v8613_v47  ;;  %v2387_v21 = vpop.f32.mrb[83].mxu1 }
 0x230   :  { %v8630_v21 = vpop.f32.mrb[84].mxu1 }
 0x231   :  { %2205 = vmatmul.mubr.bf16.gmra.mrb[248].mxu0 %v7451_v25  ;;  %v7457_v25 = vld [vmem:[%s12907_s0 + $0x3f0] ss:$8 sps:$4 sm:$0xff]   ;;  %13685 = vst [vmem:[#allocation111_spill] sm:$0xff] %v8630_v21  ;;  %v2392_v16 = vpop.f32.mrb[85].mxu1 }
 0x232   :  { %2212 = vmatprep.mubr.bf16.mxu0 %v7455_v57  ;;  %v8632_v11 = vpop.f32.mrb[86].mxu1 }
 0x233   :  { %13686 = vst [vmem:[#allocation112_spill] sm:$0xff] %v8632_v11 }
 0x234   :  { %v8618_v0 = vpop.f32.mrb[144].mxu0 }
 0x235   :  { %13683 = vst [vmem:[#allocation109_spill] sm:$0xff] %v8618_v0  ;;  %v2804_v18 = vadd.f32 %v2803_v32, %v8618_v0  ;;  %v2000_v30 = vpop.f32.mrb[145].mxu0  ;;  %v7506_v32 = vld [vmem:[%s12907_s0 + $0x704] ss:$8 sps:$4 sm:$0xff]   ;;  %v2395_v0 = vpop.f32.mrb[87].mxu1 }
 0x236   :  { %v8627_v57 = vpop.f32.mrb[146].mxu0  ;;  %2604 = vmatprep.mubr.bf16.mxu1 %v7506_v32  ;;  %v7509_v0 = vld [vmem:[%s12907_s0 + $0x714] ss:$8 sps:$4 sm:$0xff]   ;;  %v7511_v32 = vld [vmem:[%s12907_s0 + $0x710] ss:$8 sps:$4 sm:$0xff]  }
 0x237   :  { %13684 = vst [vmem:[#allocation110_spill] sm:$0xff] %v8627_v57  ;;  %v2805_v44 = vadd.f32 %v2804_v18, %v8627_v57  ;;  %v2003_v5 = vpop.f32.mrb[147].mxu0  ;;  %2605 = vmatmul.mubr.bf16.gmra.mrb[192].mxu1 %v7508_v59  ;;  %v8646_v57 = vpop.f32.mrb[88].mxu1 }
 0x238   :  { %13689 = vst [vmem:[#allocation115_spill] sm:$0xff] %v8646_v57  ;;  %v2400_v6 = vpop.f32.mrb[89].mxu1  ;;  %2612 = vmatprep.mubr.bf16.mxu1 %v7509_v0  ;;  %v7514_v0 = vld [vmem:[%s12907_s0 + $0x720] ss:$8 sps:$4 sm:$0xff]  }
 0x239   :  { %2213 = vmatmul.mubr.bf16.gmra.mrb[252].mxu0 %v7457_v25  ;;  %v8648_v1 = vpop.f32.mrb[90].mxu1 }
 0x23a   :  { %13690 = vst [vmem:[#allocation116_spill] sm:$0xff] %v8648_v1 }
 0x23c   :  { %v8637_v30 = vpop.f32.mrb[148].mxu0 }
 0x23d   :  { %13687 = vst [vmem:[#allocation113_spill] sm:$0xff] %v8637_v30  ;;  %v2806_v8 = vadd.f32 %v2805_v44, %v8637_v30  ;;  %v2008_v5 = vpop.f32.mrb[149].mxu0  ;;  %v2403_v44 = vpop.f32.mrb[91].mxu1 }
 0x23e   :  { %v8643_v18 = vpop.f32.mrb[150].mxu0  ;;  %v7512_v44 = vld [vmem:[%s12907_s0 + $0x724] ss:$8 sps:$4 sm:$0xff]  }
 0x23f   :  { %13688 = vst [vmem:[#allocation114_spill] sm:$0xff] %v8643_v18  ;;  %v2807_v16 = vadd.f32 %v2806_v8, %v8643_v18  ;;  %v2011_v25 = vpop.f32.mrb[151].mxu0  ;;  %2613 = vmatmul.mubr.bf16.gmra.mrb[196].mxu1 %v7511_v32  ;;  %v8662_v18 = vpop.f32.mrb[92].mxu1 }
 0x240   :  { %13693 = vst [vmem:[#allocation119_spill] sm:$0xff] %v8662_v18  ;;  %v2408_v30 = vpop.f32.mrb[93].mxu1  ;;  %2620 = vmatprep.mubr.bf16.mxu1 %v7512_v44  ;;  %v7517_v44 = vld [vmem:[%s12907_s0 + $0x730] ss:$8 sps:$4 sm:$0xff]  }
 0x241   :  { %v8664_v55 = vpop.f32.mrb[94].mxu1 }
 0x242   :  { %13694 = vst [vmem:[#allocation120_spill] sm:$0xff] %v8664_v55 }
 0x244   :  { %v8653_v60 = vpop.f32.mrb[152].mxu0 }
 0x245   :  { %13691 = vst [vmem:[#allocation117_spill] sm:$0xff] %v8653_v60  ;;  %v2808_v59 = vadd.f32 %v2807_v16, %v8653_v60  ;;  %v2016_v8 = vpop.f32.mrb[153].mxu0  ;;  %v2411_v16 = vpop.f32.mrb[95].mxu1 }
 0x246   :  { %v8659_v5 = vpop.f32.mrb[154].mxu0  ;;  %v7515_v16 = vld [vmem:[%s12907_s0 + $0x734] ss:$8 sps:$4 sm:$0xff]  }
 0x247   :  { %13692 = vst [vmem:[#allocation118_spill] sm:$0xff] %v8659_v5  ;;  %v2809_v6 = vadd.f32 %v2808_v59, %v8659_v5  ;;  %v2019_v25 = vpop.f32.mrb[155].mxu0  ;;  %2621 = vmatmul.mubr.bf16.gmra.mrb[200].mxu1 %v7514_v0  ;;  %v8678_v5 = vpop.f32.mrb[96].mxu1 }
 0x248   :  { %13697 = vst [vmem:[#allocation123_spill] sm:$0xff] %v8678_v5  ;;  %v2416_v60 = vpop.f32.mrb[97].mxu1  ;;  %2628 = vmatprep.mubr.bf16.mxu1 %v7515_v16  ;;  %v7520_v16 = vld [vmem:[%s12907_s0 + $0x740] ss:$8 sps:$4 sm:$0xff]  }
 0x249   :  { %v8680_v45 = vpop.f32.mrb[98].mxu1 }
 0x24a   :  { %13698 = vst [vmem:[#allocation124_spill] sm:$0xff] %v8680_v45 }
 0x24c   :  { %v8669_v50 = vpop.f32.mrb[156].mxu0 }
 0x24d   :  { %13695 = vst [vmem:[#allocation121_spill] sm:$0xff] %v8669_v50  ;;  %v2810_v32 = vadd.f32 %v2809_v6, %v8669_v50  ;;  %v2024_v59 = vpop.f32.mrb[157].mxu0  ;;  %v2419_v6 = vpop.f32.mrb[99].mxu1 }
 0x24e   :  { %v8675_v8 = vpop.f32.mrb[158].mxu0  ;;  %v7518_v6 = vld [vmem:[%s12907_s0 + $0x744] ss:$8 sps:$4 sm:$0xff]  }
 0x24f   :  { %13696 = vst [vmem:[#allocation122_spill] sm:$0xff] %v8675_v8  ;;  %v2811_v30 = vadd.f32 %v2810_v32, %v8675_v8  ;;  %v2027_v25 = vpop.f32.mrb[159].mxu0  ;;  %2629 = vmatmul.mubr.bf16.gmra.mrb[204].mxu1 %v7517_v44  ;;  %v8694_v8 = vpop.f32.mrb[100].mxu1 }
 0x250   :  { %13701 = vst [vmem:[#allocation127_spill] sm:$0xff] %v8694_v8  ;;  %v2424_v50 = vpop.f32.mrb[101].mxu1  ;;  %2636 = vmatprep.mubr.bf16.mxu1 %v7518_v6  ;;  %v7523_v6 = vld [vmem:[%s12907_s0 + $0x750] ss:$8 sps:$4 sm:$0xff]  }
 0x251   :  { %v8696_v35 = vpop.f32.mrb[102].mxu1 }
 0x252   :  { %13702 = vst [vmem:[#allocation128_spill] sm:$0xff] %v8696_v35 }
 0x254   :  { %v8685_v40 = vpop.f32.mrb[160].mxu0 }
 0x255   :  { %13699 = vst [vmem:[#allocation125_spill] sm:$0xff] %v8685_v40  ;;  %v2812_v0 = vadd.f32 %v2811_v30, %v8685_v40  ;;  %v2032_v32 = vpop.f32.mrb[161].mxu0  ;;  %v2427_v30 = vpop.f32.mrb[103].mxu1 }
 0x256   :  { %v8691_v59 = vpop.f32.mrb[162].mxu0  ;;  %v7521_v30 = vld [vmem:[%s12907_s0 + $0x754] ss:$8 sps:$4 sm:$0xff]  }
 0x257   :  { %13700 = vst [vmem:[#allocation126_spill] sm:$0xff] %v8691_v59  ;;  %v2813_v60 = vadd.f32 %v2812_v0, %v8691_v59  ;;  %v2035_v25 = vpop.f32.mrb[163].mxu0  ;;  %2637 = vmatmul.mubr.bf16.gmra.mrb[208].mxu1 %v7520_v16  ;;  %v8710_v59 = vpop.f32.mrb[104].mxu1 }
 0x258   :  { %13705 = vst [vmem:[#allocation131_spill] sm:$0xff] %v8710_v59  ;;  %v2432_v40 = vpop.f32.mrb[105].mxu1  ;;  %2644 = vmatprep.mubr.bf16.mxu1 %v7521_v30  ;;  %v7526_v30 = vld [vmem:[%s12907_s0 + $0x760] ss:$8 sps:$4 sm:$0xff]  }
 0x259   :  { %v8712_v35 = vpop.f32.mrb[106].mxu1 }
 0x25a   :  { %13706 = vst [vmem:[#allocation132_spill] sm:$0xff] %v8712_v35 }
 0x25c   :  { %v8701_v31 = vpop.f32.mrb[164].mxu0 }
 0x25d   :  { %13703 = vst [vmem:[#allocation129_spill] sm:$0xff] %v8701_v31  ;;  %v2814_v44 = vadd.f32 %v2813_v60, %v8701_v31  ;;  %v2040_v0 = vpop.f32.mrb[165].mxu0  ;;  %v2435_v60 = vpop.f32.mrb[107].mxu1 }
 0x25e   :  { %v8707_v32 = vpop.f32.mrb[166].mxu0  ;;  %v7524_v60 = vld [vmem:[%s12907_s0 + $0x764] ss:$8 sps:$4 sm:$0xff]  }
 0x25f   :  { %13704 = vst [vmem:[#allocation130_spill] sm:$0xff] %v8707_v32  ;;  %v2815_v50 = vadd.f32 %v2814_v44, %v8707_v32  ;;  %v2043_v25 = vpop.f32.mrb[167].mxu0  ;;  %2645 = vmatmul.mubr.bf16.gmra.mrb[212].mxu1 %v7523_v6  ;;  %v8726_v32 = vpop.f32.mrb[108].mxu1 }
 0x260   :  { %13709 = vst [vmem:[#allocation135_spill] sm:$0xff] %v8726_v32  ;;  %v2440_v31 = vpop.f32.mrb[109].mxu1  ;;  %2652 = vmatprep.mubr.bf16.mxu1 %v7524_v60  ;;  %v7529_v60 = vld [vmem:[%s12907_s0 + $0x770] ss:$8 sps:$4 sm:$0xff]  }
 0x261   :  { %v8728_v35 = vpop.f32.mrb[110].mxu1 }
 0x262   :  { %13710 = vst [vmem:[#allocation136_spill] sm:$0xff] %v8728_v35 }
 0x264   :  { %v8717_v8 = vpop.f32.mrb[168].mxu0 }
 0x265   :  { %13707 = vst [vmem:[#allocation133_spill] sm:$0xff] %v8717_v8  ;;  %v2816_v16 = vadd.f32 %v2815_v50, %v8717_v8  ;;  %v2048_v44 = vpop.f32.mrb[169].mxu0  ;;  %v2443_v50 = vpop.f32.mrb[111].mxu1 }
 0x266   :  { %v8723_v0 = vpop.f32.mrb[170].mxu0  ;;  %v7527_v50 = vld [vmem:[%s12907_s0 + $0x774] ss:$8 sps:$4 sm:$0xff]  }
 0x267   :  { %13708 = vst [vmem:[#allocation134_spill] sm:$0xff] %v8723_v0  ;;  %v2817_v40 = vadd.f32 %v2816_v16, %v8723_v0  ;;  %v2051_v25 = vpop.f32.mrb[171].mxu0  ;;  %2653 = vmatmul.mubr.bf16.gmra.mrb[216].mxu1 %v7526_v30  ;;  %v8742_v0 = vpop.f32.mrb[112].mxu1 }
 0x268   :  { %13713 = vst [vmem:[#allocation139_spill] sm:$0xff] %v8742_v0  ;;  %v2448_v8 = vpop.f32.mrb[113].mxu1  ;;  %2660 = vmatprep.mubr.bf16.mxu1 %v7527_v50  ;;  %v7532_v50 = vld [vmem:[%s12907_s0 + $0x780] ss:$8 sps:$4 sm:$0xff]  }
 0x269   :  { %v8744_v35 = vpop.f32.mrb[114].mxu1 }
 0x26a   :  { %13714 = vst [vmem:[#allocation140_spill] sm:$0xff] %v8744_v35 }
 0x26c   :  { %v8733_v59 = vpop.f32.mrb[172].mxu0 }
 0x26d   :  { %13711 = vst [vmem:[#allocation137_spill] sm:$0xff] %v8733_v59  ;;  %v2818_v6 = vadd.f32 %v2817_v40, %v8733_v59  ;;  %v2056_v16 = vpop.f32.mrb[173].mxu0  ;;  %v2451_v40 = vpop.f32.mrb[115].mxu1 }
 0x26e   :  { %v8739_v44 = vpop.f32.mrb[174].mxu0  ;;  %v7530_v40 = vld [vmem:[%s12907_s0 + $0x784] ss:$8 sps:$4 sm:$0xff]  }
 0x26f   :  { %13712 = vst [vmem:[#allocation138_spill] sm:$0xff] %v8739_v44  ;;  %v2819_v31 = vadd.f32 %v2818_v6, %v8739_v44  ;;  %v2059_v25 = vpop.f32.mrb[175].mxu0  ;;  %2661 = vmatmul.mubr.bf16.gmra.mrb[220].mxu1 %v7529_v60  ;;  %v8758_v44 = vpop.f32.mrb[116].mxu1 }
 0x270   :  { %13717 = vst [vmem:[#allocation143_spill] sm:$0xff] %v8758_v44  ;;  %v2456_v59 = vpop.f32.mrb[117].mxu1  ;;  %2668 = vmatprep.mubr.bf16.mxu1 %v7530_v40  ;;  %v7535_v40 = vld [vmem:[%s12907_s0 + $0x790] ss:$8 sps:$4 sm:$0xff]  }
 0x271   :  { %v8760_v35 = vpop.f32.mrb[118].mxu1 }
 0x272   :  { %13718 = vst [vmem:[#allocation144_spill] sm:$0xff] %v8760_v35 }
 0x274   :  { %v8749_v32 = vpop.f32.mrb[176].mxu0 }
 0x275   :  { %13715 = vst [vmem:[#allocation141_spill] sm:$0xff] %v8749_v32  ;;  %v2820_v30 = vadd.f32 %v2819_v31, %v8749_v32  ;;  %v2064_v6 = vpop.f32.mrb[177].mxu0  ;;  %v2459_v31 = vpop.f32.mrb[119].mxu1 }
 0x276   :  { %v8755_v16 = vpop.f32.mrb[178].mxu0  ;;  %v7533_v31 = vld [vmem:[%s12907_s0 + $0x794] ss:$8 sps:$4 sm:$0xff]  }
 0x277   :  { %13716 = vst [vmem:[#allocation142_spill] sm:$0xff] %v8755_v16  ;;  %v2821_v8 = vadd.f32 %v2820_v30, %v8755_v16  ;;  %v2067_v25 = vpop.f32.mrb[179].mxu0  ;;  %2669 = vmatmul.mubr.bf16.gmra.mrb[224].mxu1 %v7532_v50  ;;  %v8774_v16 = vpop.f32.mrb[120].mxu1 }
 0x278   :  { %13721 = vst [vmem:[#allocation147_spill] sm:$0xff] %v8774_v16  ;;  %v2464_v32 = vpop.f32.mrb[121].mxu1  ;;  %2676 = vmatprep.mubr.bf16.mxu1 %v7533_v31  ;;  %v7538_v31 = vld [vmem:[%s12907_s0 + $0x7a0] ss:$8 sps:$4 sm:$0xff]  }
 0x279   :  { %v8776_v35 = vpop.f32.mrb[122].mxu1 }
 0x27a   :  { %13722 = vst [vmem:[#allocation148_spill] sm:$0xff] %v8776_v35 }
 0x27c   :  { %v8765_v0 = vpop.f32.mrb[180].mxu0 }
 0x27d   :  { %13719 = vst [vmem:[#allocation145_spill] sm:$0xff] %v8765_v0  ;;  %v2822_v60 = vadd.f32 %v2821_v8, %v8765_v0  ;;  %v2072_v30 = vpop.f32.mrb[181].mxu0  ;;  %v2467_v8 = vpop.f32.mrb[123].mxu1 }
 0x27e   :  { %v8771_v6 = vpop.f32.mrb[182].mxu0  ;;  %v7536_v8 = vld [vmem:[%s12907_s0 + $0x7a4] ss:$8 sps:$4 sm:$0xff]  }
 0x27f   :  { %13720 = vst [vmem:[#allocation146_spill] sm:$0xff] %v8771_v6  ;;  %v2823_v59 = vadd.f32 %v2822_v60, %v8771_v6  ;;  %v2075_v25 = vpop.f32.mrb[183].mxu0  ;;  %2677 = vmatmul.mubr.bf16.gmra.mrb[228].mxu1 %v7535_v40  ;;  %v8790_v6 = vpop.f32.mrb[124].mxu1 }
 0x280   :  { %13725 = vst [vmem:[#allocation151_spill] sm:$0xff] %v8790_v6  ;;  %v2472_v0 = vpop.f32.mrb[125].mxu1  ;;  %2684 = vmatprep.mubr.bf16.mxu1 %v7536_v8  ;;  %v7541_v8 = vld [vmem:[%s12907_s0 + $0x7b0] ss:$8 sps:$4 sm:$0xff]  }
 0x281   :  { %v8792_v35 = vpop.f32.mrb[126].mxu1 }
 0x282   :  { %13726 = vst [vmem:[#allocation152_spill] sm:$0xff] %v8792_v35 }
 0x284   :  { %v8781_v44 = vpop.f32.mrb[184].mxu0 }
 0x285   :  { %13723 = vst [vmem:[#allocation149_spill] sm:$0xff] %v8781_v44  ;;  %v2824_v50 = vadd.f32 %v2823_v59, %v8781_v44  ;;  %v2080_v60 = vpop.f32.mrb[185].mxu0  ;;  %v2475_v59 = vpop.f32.mrb[127].mxu1 }
 0x286   :  { %v8787_v30 = vpop.f32.mrb[186].mxu0  ;;  %v7539_v59 = vld [vmem:[%s12907_s0 + $0x7b4] ss:$8 sps:$4 sm:$0xff]  }
 0x287   :  { %13724 = vst [vmem:[#allocation150_spill] sm:$0xff] %v8787_v30  ;;  %v2825_v32 = vadd.f32 %v2824_v50, %v8787_v30  ;;  %v2083_v25 = vpop.f32.mrb[187].mxu0  ;;  %2685 = vmatmul.mubr.bf16.gmra.mrb[232].mxu1 %v7538_v31  ;;  %v8806_v30 = vpop.f32.mrb[128].mxu1 }
 0x288   :  { %13729 = vst [vmem:[#allocation155_spill] sm:$0xff] %v8806_v30  ;;  %v2480_v44 = vpop.f32.mrb[129].mxu1  ;;  %2692 = vmatprep.mubr.bf16.mxu1 %v7539_v59  ;;  %v7544_v59 = vld [vmem:[%s12907_s0 + $0x7c0] ss:$8 sps:$4 sm:$0xff]  }
 0x289   :  { %v8808_v35 = vpop.f32.mrb[130].mxu1 }
 0x28a   :  { %13730 = vst [vmem:[#allocation156_spill] sm:$0xff] %v8808_v35 }
 0x28c   :  { %v8797_v16 = vpop.f32.mrb[188].mxu0 }
 0x28d   :  { %13727 = vst [vmem:[#allocation153_spill] sm:$0xff] %v8797_v16  ;;  %v2826_v40 = vadd.f32 %v2825_v32, %v8797_v16  ;;  %v2088_v50 = vpop.f32.mrb[189].mxu0  ;;  %v2483_v32 = vpop.f32.mrb[131].mxu1 }
 0x28e   :  { %v8803_v60 = vpop.f32.mrb[190].mxu0  ;;  %v7542_v32 = vld [vmem:[%s12907_s0 + $0x7c4] ss:$8 sps:$4 sm:$0xff]  }
 0x28f   :  { %13728 = vst [vmem:[#allocation154_spill] sm:$0xff] %v8803_v60  ;;  %v2827_v0 = vadd.f32 %v2826_v40, %v8803_v60  ;;  %v2091_v25 = vpop.f32.mrb[191].mxu0  ;;  %2693 = vmatmul.mubr.bf16.gmra.mrb[236].mxu1 %v7541_v8  ;;  %v8822_v60 = vpop.f32.mrb[132].mxu1 }
 0x290   :  { %13733 = vst [vmem:[#allocation159_spill] sm:$0xff] %v8822_v60  ;;  %v2488_v16 = vpop.f32.mrb[133].mxu1  ;;  %2700 = vmatprep.mubr.bf16.mxu1 %v7542_v32  ;;  %v7547_v32 = vld [vmem:[%s12907_s0 + $0x7d0] ss:$8 sps:$4 sm:$0xff]  }
 0x291   :  { %v8824_v35 = vpop.f32.mrb[134].mxu1 }
 0x292   :  { %13734 = vst [vmem:[#allocation160_spill] sm:$0xff] %v8824_v35 }
 0x294   :  { %v8813_v6 = vpop.f32.mrb[192].mxu0 }
 0x295   :  { %13731 = vst [vmem:[#allocation157_spill] sm:$0xff] %v8813_v6  ;;  %v2828_v31 = vadd.f32 %v2827_v0, %v8813_v6  ;;  %v2096_v40 = vpop.f32.mrb[193].mxu0  ;;  %v2491_v0 = vpop.f32.mrb[135].mxu1 }
 0x296   :  { %v8819_v50 = vpop.f32.mrb[194].mxu0  ;;  %v7545_v0 = vld [vmem:[%s12907_s0 + $0x7d4] ss:$8 sps:$4 sm:$0xff]  }
 0x297   :  { %13732 = vst [vmem:[#allocation158_spill] sm:$0xff] %v8819_v50  ;;  %v2829_v44 = vadd.f32 %v2828_v31, %v8819_v50  ;;  %v2099_v25 = vpop.f32.mrb[195].mxu0  ;;  %2701 = vmatmul.mubr.bf16.gmra.mrb[240].mxu1 %v7544_v59  ;;  %v8838_v50 = vpop.f32.mrb[136].mxu1 }
 0x298   :  { %13737 = vst [vmem:[#allocation163_spill] sm:$0xff] %v8838_v50  ;;  %v2496_v6 = vpop.f32.mrb[137].mxu1  ;;  %2708 = vmatprep.mubr.bf16.mxu1 %v7545_v0  ;;  %v7550_v0 = vld [vmem:[%s12907_s0 + $0x7e0] ss:$8 sps:$4 sm:$0xff]  }
 0x299   :  { %v8840_v35 = vpop.f32.mrb[138].mxu1 }
 0x29a   :  { %13738 = vst [vmem:[#allocation164_spill] sm:$0xff] %v8840_v35 }
 0x29c   :  { %v8829_v30 = vpop.f32.mrb[196].mxu0 }
 0x29d   :  { %13735 = vst [vmem:[#allocation161_spill] sm:$0xff] %v8829_v30  ;;  %v2830_v8 = vadd.f32 %v2829_v44, %v8829_v30  ;;  %v2104_v31 = vpop.f32.mrb[197].mxu0  ;;  %v2499_v44 = vpop.f32.mrb[139].mxu1 }
 0x29e   :  { %v8835_v40 = vpop.f32.mrb[198].mxu0  ;;  %v7548_v44 = vld [vmem:[%s12907_s0 + $0x7e4] ss:$8 sps:$4 sm:$0xff]  }
 0x29f   :  { %13736 = vst [vmem:[#allocation162_spill] sm:$0xff] %v8835_v40  ;;  %v2831_v16 = vadd.f32 %v2830_v8, %v8835_v40  ;;  %v2107_v25 = vpop.f32.mrb[199].mxu0  ;;  %2709 = vmatmul.mubr.bf16.gmra.mrb[244].mxu1 %v7547_v32  ;;  %v8854_v40 = vpop.f32.mrb[140].mxu1 }
 0x2a0   :  { %13741 = vst [vmem:[#allocation167_spill] sm:$0xff] %v8854_v40  ;;  %v2504_v30 = vpop.f32.mrb[141].mxu1  ;;  %2716 = vmatprep.mubr.bf16.mxu1 %v7548_v44  ;;  %v7553_v44 = vld [vmem:[%s12907_s0 + $0x7f0] ss:$8 sps:$4 sm:$0xff]  }
 0x2a1   :  { %v8856_v35 = vpop.f32.mrb[142].mxu1 }
 0x2a2   :  { %13742 = vst [vmem:[#allocation168_spill] sm:$0xff] %v8856_v35 }
 0x2a4   :  { %v8845_v60 = vpop.f32.mrb[200].mxu0 }
 0x2a5   :  { %13739 = vst [vmem:[#allocation165_spill] sm:$0xff] %v8845_v60  ;;  %v2832_v59 = vadd.f32 %v2831_v16, %v8845_v60  ;;  %v2112_v8 = vpop.f32.mrb[201].mxu0  ;;  %v2507_v16 = vpop.f32.mrb[143].mxu1 }
 0x2a6   :  { %v8851_v31 = vpop.f32.mrb[202].mxu0  ;;  %v7551_v16 = vld [vmem:[%s12907_s0 + $0x7f4] ss:$8 sps:$4 sm:$0xff]  }
 0x2a7   :  { %13740 = vst [vmem:[#allocation166_spill] sm:$0xff] %v8851_v31  ;;  %v2833_v6 = vadd.f32 %v2832_v59, %v8851_v31  ;;  %v2115_v25 = vpop.f32.mrb[203].mxu0  ;;  %2717 = vmatmul.mubr.bf16.gmra.mrb[248].mxu1 %v7550_v0  ;;  %v8870_v31 = vpop.f32.mrb[144].mxu1 }
 0x2a8   :  { %13745 = vst [vmem:[#allocation171_spill] sm:$0xff] %v8870_v31  ;;  %v2512_v60 = vpop.f32.mrb[145].mxu1  ;;  %2724 = vmatprep.mubr.bf16.mxu1 %v7551_v16 }
 0x2a9   :  { %v8872_v35 = vpop.f32.mrb[146].mxu1 }
 0x2aa   :  { %13746 = vst [vmem:[#allocation172_spill] sm:$0xff] %v8872_v35 }
 0x2ac   :  { %v8861_v50 = vpop.f32.mrb[204].mxu0 }
 0x2ad   :  { %13743 = vst [vmem:[#allocation169_spill] sm:$0xff] %v8861_v50  ;;  %v2834_v32 = vadd.f32 %v2833_v6, %v8861_v50  ;;  %v2120_v59 = vpop.f32.mrb[205].mxu0  ;;  %v2515_v6 = vpop.f32.mrb[147].mxu1 }
 0x2ae   :  { %v8867_v8 = vpop.f32.mrb[206].mxu0 }
 0x2af   :  { %13744 = vst [vmem:[#allocation170_spill] sm:$0xff] %v8867_v8  ;;  %v2835_v30 = vadd.f32 %v2834_v32, %v8867_v8  ;;  %v2123_v25 = vpop.f32.mrb[207].mxu0  ;;  %2725 = vmatmul.mubr.bf16.gmra.mrb[252].mxu1 %v7553_v44  ;;  %v8886_v8 = vpop.f32.mrb[148].mxu1 }
 0x2b0   :  { %13749 = vst [vmem:[#allocation175_spill] sm:$0xff] %v8886_v8  ;;  %v2520_v50 = vpop.f32.mrb[149].mxu1 }
 0x2b1   :  { %v8888_v35 = vpop.f32.mrb[150].mxu1 }
 0x2b2   :  { %13750 = vst [vmem:[#allocation176_spill] sm:$0xff] %v8888_v35  ;;  %v2523_v31 = vpop.f32.mrb[151].mxu1 }
 0x2b4   :  { %v8877_v40 = vpop.f32.mrb[208].mxu0 }
 0x2b5   :  { %13747 = vst [vmem:[#allocation173_spill] sm:$0xff] %v8877_v40  ;;  %v2836_v0 = vadd.f32 %v2835_v30, %v8877_v40  ;;  %v2128_v32 = vpop.f32.mrb[209].mxu0 }
 0x2b6   :  { %v8883_v59 = vpop.f32.mrb[210].mxu0 }
 0x2b7   :  { %13748 = vst [vmem:[#allocation174_spill] sm:$0xff] %v8883_v59  ;;  %v2837_v60 = vadd.f32 %v2836_v0, %v8883_v59  ;;  %v2131_v25 = vpop.f32.mrb[211].mxu0  ;;  %v8896_v44 = vpop.f32.mrb[152].mxu1 }
 0x2b8   :  { %13753 = vst [vmem:[#allocation179_spill] sm:$0xff] %v8896_v44  ;;  %v2528_v0 = vpop.f32.mrb[153].mxu1 }
 0x2b9   :  { %v8898_v25 = vpop.f32.mrb[154].mxu1 }
 0x2ba   :  { %13754 = vst [vmem:[#allocation180_spill] sm:$0xff] %v8898_v25  ;;  %v2531_v50 = vpop.f32.mrb[155].mxu1 }
 0x2bc   :  { %v8890_v6 = vpop.f32.mrb[212].mxu0 }
 0x2bd   :  { %13751 = vst [vmem:[#allocation177_spill] sm:$0xff] %v8890_v6  ;;  %v2838_v45 = vadd.f32 %v2837_v60, %v8890_v6  ;;  %v2136_v5 = vpop.f32.mrb[213].mxu0 }
 0x2be   :  { %v8893_v30 = vpop.f32.mrb[214].mxu0 }
 0x2bf   :  { %13752 = vst [vmem:[#allocation178_spill] sm:$0xff] %v8893_v30  ;;  %v2839_v16 = vadd.f32 %v2838_v45, %v8893_v30  ;;  %v2139_v32 = vpop.f32.mrb[215].mxu0  ;;  %v8906_v6 = vpop.f32.mrb[156].mxu1 }
 0x2c0   :  { %13757 = vst [vmem:[#allocation183_spill] sm:$0xff] %v8906_v6  ;;  %v2536_v45 = vpop.f32.mrb[157].mxu1 }
 0x2c1   :  { %v8908_v32 = vpop.f32.mrb[158].mxu1 }
 0x2c2   :  { %13758 = vst [vmem:[#allocation184_spill] sm:$0xff] %v8908_v32  ;;  %v2539_v0 = vpop.f32.mrb[159].mxu1 }
 0x2c4   :  { %v8900_v59 = vpop.f32.mrb[216].mxu0 }
 0x2c5   :  { %13755 = vst [vmem:[#allocation181_spill] sm:$0xff] %v8900_v59  ;;  %v2840_v40 = vadd.f32 %v2839_v16, %v8900_v59  ;;  %v2144_v35 = vpop.f32.mrb[217].mxu0 }
 0x2c6   :  { %v8903_v31 = vpop.f32.mrb[218].mxu0 }
 0x2c7   :  { %13756 = vst [vmem:[#allocation182_spill] sm:$0xff] %v8903_v31  ;;  %v2841_v5 = vadd.f32 %v2840_v40, %v8903_v31  ;;  %v2147_v60 = vpop.f32.mrb[219].mxu0  ;;  %v8916_v59 = vpop.f32.mrb[160].mxu1 }
 0x2c8   :  { %13761 = vst [vmem:[#allocation187_spill] sm:$0xff] %v8916_v59  ;;  %v2544_v40 = vpop.f32.mrb[161].mxu1 }
 0x2c9   :  { %v8918_v60 = vpop.f32.mrb[162].mxu1 }
 0x2ca   :  { %13762 = vst [vmem:[#allocation188_spill] sm:$0xff] %v8918_v60  ;;  %v2547_v45 = vpop.f32.mrb[163].mxu1 }
 0x2cc   :  { %v8910_v30 = vpop.f32.mrb[220].mxu0 }
 0x2cd   :  { %13759 = vst [vmem:[#allocation185_spill] sm:$0xff] %v8910_v30  ;;  %v2842_v25 = vadd.f32 %v2841_v5, %v8910_v30  ;;  %v2152_v44 = vpop.f32.mrb[221].mxu0 }
 0x2ce   :  { %v8913_v50 = vpop.f32.mrb[222].mxu0 }
 0x2cf   :  { %13760 = vst [vmem:[#allocation186_spill] sm:$0xff] %v8913_v50  ;;  %v2843_v35 = vadd.f32 %v2842_v25, %v8913_v50  ;;  %v2155_v16 = vpop.f32.mrb[223].mxu0  ;;  %v8926_v30 = vpop.f32.mrb[164].mxu1 }
 0x2d0   :  { %13765 = vst [vmem:[#allocation191_spill] sm:$0xff] %v8926_v30  ;;  %v2552_v25 = vpop.f32.mrb[165].mxu1 }
 0x2d1   :  { %v8928_v16 = vpop.f32.mrb[166].mxu1 }
 0x2d2   :  { %13766 = vst [vmem:[#allocation192_spill] sm:$0xff] %v8928_v16  ;;  %v2555_v40 = vpop.f32.mrb[167].mxu1 }
 0x2d4   :  { %v8920_v31 = vpop.f32.mrb[224].mxu0 }
 0x2d5   :  { %13763 = vst [vmem:[#allocation189_spill] sm:$0xff] %v8920_v31  ;;  %v2844_v32 = vadd.f32 %v2843_v35, %v8920_v31  ;;  %v2160_v6 = vpop.f32.mrb[225].mxu0 }
 0x2d6   :  { %v8923_v0 = vpop.f32.mrb[226].mxu0 }
 0x2d7   :  { %13764 = vst [vmem:[#allocation190_spill] sm:$0xff] %v8923_v0  ;;  %v2845_v44 = vadd.f32 %v2844_v32, %v8923_v0  ;;  %v2163_v5 = vpop.f32.mrb[227].mxu0  ;;  %v8936_v31 = vpop.f32.mrb[168].mxu1 }
 0x2d8   :  { %13769 = vst [vmem:[#allocation195_spill] sm:$0xff] %v8936_v31  ;;  %v2560_v32 = vpop.f32.mrb[169].mxu1 }
 0x2d9   :  { %v8938_v5 = vpop.f32.mrb[170].mxu1 }
 0x2da   :  { %13770 = vst [vmem:[#allocation196_spill] sm:$0xff] %v8938_v5  ;;  %v2563_v25 = vpop.f32.mrb[171].mxu1 }
 0x2dc   :  { %v8930_v50 = vpop.f32.mrb[228].mxu0 }
 0x2dd   :  { %13767 = vst [vmem:[#allocation193_spill] sm:$0xff] %v8930_v50  ;;  %v2846_v60 = vadd.f32 %v2845_v44, %v8930_v50  ;;  %v2168_v59 = vpop.f32.mrb[229].mxu0 }
 0x2de   :  { %v8933_v45 = vpop.f32.mrb[230].mxu0 }
 0x2df   :  { %13768 = vst [vmem:[#allocation194_spill] sm:$0xff] %v8933_v45  ;;  %v2847_v6 = vadd.f32 %v2846_v60, %v8933_v45  ;;  %v2171_v35 = vpop.f32.mrb[231].mxu0  ;;  %v8946_v50 = vpop.f32.mrb[172].mxu1 }
 0x2e0   :  { %13773 = vst [vmem:[#allocation199_spill] sm:$0xff] %v8946_v50  ;;  %v2568_v60 = vpop.f32.mrb[173].mxu1 }
 0x2e1   :  { %v8948_v35 = vpop.f32.mrb[174].mxu1 }
 0x2e2   :  { %13774 = vst [vmem:[#allocation200_spill] sm:$0xff] %v8948_v35  ;;  %v2571_v32 = vpop.f32.mrb[175].mxu1 }
 0x2e4   :  { %v8940_v0 = vpop.f32.mrb[232].mxu0 }
 0x2e5   :  { %13771 = vst [vmem:[#allocation197_spill] sm:$0xff] %v8940_v0  ;;  %v2848_v16 = vadd.f32 %v2847_v6, %v8940_v0  ;;  %v2176_v30 = vpop.f32.mrb[233].mxu0 }
 0x2e6   :  { %v8943_v40 = vpop.f32.mrb[234].mxu0 }
 0x2e7   :  { %13772 = vst [vmem:[#allocation198_spill] sm:$0xff] %v8943_v40  ;;  %v2849_v59 = vadd.f32 %v2848_v16, %v8943_v40  ;;  %v2179_v44 = vpop.f32.mrb[235].mxu0  ;;  %v8956_v0 = vpop.f32.mrb[176].mxu1 }
 0x2e8   :  { %13777 = vst [vmem:[#allocation203_spill] sm:$0xff] %v8956_v0  ;;  %v2576_v16 = vpop.f32.mrb[177].mxu1 }
 0x2e9   :  { %v8958_v44 = vpop.f32.mrb[178].mxu1 }
 0x2ea   :  { %13778 = vst [vmem:[#allocation204_spill] sm:$0xff] %v8958_v44  ;;  %v2579_v60 = vpop.f32.mrb[179].mxu1 }
 0x2ec   :  { %v8950_v45 = vpop.f32.mrb[236].mxu0 }
 0x2ed   :  { %13775 = vst [vmem:[#allocation201_spill] sm:$0xff] %v8950_v45  ;;  %v2850_v5 = vadd.f32 %v2849_v59, %v8950_v45  ;;  %v2184_v31 = vpop.f32.mrb[237].mxu0 }
 0x2ee   :  { %v8953_v25 = vpop.f32.mrb[238].mxu0 }
 0x2ef   :  { %13776 = vst [vmem:[#allocation202_spill] sm:$0xff] %v8953_v25  ;;  %v2851_v30 = vadd.f32 %v2850_v5, %v8953_v25  ;;  %v2187_v6 = vpop.f32.mrb[239].mxu0  ;;  %v8966_v45 = vpop.f32.mrb[180].mxu1 }
 0x2f0   :  { %13781 = vst [vmem:[#allocation207_spill] sm:$0xff] %v8966_v45  ;;  %v2584_v5 = vpop.f32.mrb[181].mxu1 }
 0x2f1   :  { %v8968_v6 = vpop.f32.mrb[182].mxu1 }
 0x2f2   :  { %13782 = vst [vmem:[#allocation208_spill] sm:$0xff] %v8968_v6  ;;  %v2587_v16 = vpop.f32.mrb[183].mxu1 }
 0x2f4   :  { %v8960_v40 = vpop.f32.mrb[240].mxu0 }
 0x2f5   :  { %13779 = vst [vmem:[#allocation205_spill] sm:$0xff] %v8960_v40  ;;  %v2852_v35 = vadd.f32 %v2851_v30, %v8960_v40  ;;  %v2192_v50 = vpop.f32.mrb[241].mxu0 }
 0x2f6   :  { %v8963_v32 = vpop.f32.mrb[242].mxu0 }
 0x2f7   :  { %13780 = vst [vmem:[#allocation206_spill] sm:$0xff] %v8963_v32  ;;  %v2853_v31 = vadd.f32 %v2852_v35, %v8963_v32  ;;  %v2195_v59 = vpop.f32.mrb[243].mxu0  ;;  %v8976_v40 = vpop.f32.mrb[184].mxu1 }
 0x2f8   :  { %13785 = vst [vmem:[#allocation211_spill] sm:$0xff] %v8976_v40  ;;  %v2592_v35 = vpop.f32.mrb[185].mxu1 }
 0x2f9   :  { %v8978_v59 = vpop.f32.mrb[186].mxu1 }
 0x2fa   :  { %13786 = vst [vmem:[#allocation212_spill] sm:$0xff] %v8978_v59  ;;  %v2595_v5 = vpop.f32.mrb[187].mxu1 }
 0x2fc   :  { %v8970_v25 = vpop.f32.mrb[244].mxu0 }
 0x2fd   :  { %13783 = vst [vmem:[#allocation209_spill] sm:$0xff] %v8970_v25  ;;  %v2854_v44 = vadd.f32 %v2853_v31, %v8970_v25  ;;  %v2200_v0 = vpop.f32.mrb[245].mxu0 }
 0x2fe   :  { %v8973_v60 = vpop.f32.mrb[246].mxu0 }
 0x2ff   :  { %13784 = vst [vmem:[#allocation210_spill] sm:$0xff] %v8973_v60  ;;  %v2855_v50 = vadd.f32 %v2854_v44, %v8973_v60  ;;  %v2203_v30 = vpop.f32.mrb[247].mxu0  ;;  %v8986_v25 = vpop.f32.mrb[188].mxu1 }
 0x300   :  { %v2600_v44 = vpop.f32.mrb[189].mxu1 }
 0x301   :  { %v8988_v30 = vpop.f32.mrb[190].mxu1 }
 0x302   :  { %13789 = vst [vmem:[#allocation215_spill] sm:$0xff] %v8988_v30  ;;  %v2603_v35 = vpop.f32.mrb[191].mxu1 }
 0x304   :  { %v8980_v32 = vpop.f32.mrb[248].mxu0 }
 0x305   :  { %13787 = vst [vmem:[#allocation213_spill] sm:$0xff] %v8980_v32  ;;  %v2856_v6 = vadd.f32 %v2855_v50, %v8980_v32  ;;  %v2208_v45 = vpop.f32.mrb[249].mxu0 }
 0x306   :  { %v8983_v16 = vpop.f32.mrb[250].mxu0 }
 0x307   :  { %13788 = vst [vmem:[#allocation214_spill] sm:$0xff] %v8983_v16  ;;  %v2857_v0 = vadd.f32 %v2856_v6, %v8983_v16  ;;  %v2211_v31 = vpop.f32.mrb[251].mxu0 }
 0x30a   :  { %v8997_v6 = vpop.f32.mrb[192].mxu1 }
 0x30b   :  { %v2608_v31 = vpop.f32.mrb[193].mxu1 }
 0x30c   :  { %v8990_v60 = vpop.f32.mrb[252].mxu0  ;;  %v9000_v16 = vpop.f32.mrb[194].mxu1 }
 0x30d   :  { %13790 = vst [vmem:[#allocation216_spill] sm:$0xff] %v8990_v60  ;;  %v2858_v59 = vadd.f32 %v2857_v0, %v8990_v60  ;;  %v2216_v40 = vpop.f32.mrb[253].mxu0  ;;  %v2611_v30 = vpop.f32.mrb[195].mxu1 }
 0x30e   :  { %v8993_v5 = vpop.f32.mrb[254].mxu0 }
 0x30f   :  { %v2859_v45 = vadd.f32 %v2858_v59, %v8993_v5  ;;  %v2219_v50 = vpop.f32.mrb[255].mxu0 }
 0x311   :  { %v2860_v32 = vadd.f32 %v2859_v45, %v8171_v37 }
 0x312   :  { %v9005_v60 = vpop.f32.mrb[196].mxu1 }
 0x313   :  { %v2861_v44 = vadd.f32 %v2860_v32, %v8173_v42  ;;  %v2616_v59 = vpop.f32.mrb[197].mxu1 }
 0x314   :  { %v9008_v45 = vpop.f32.mrb[198].mxu1 }
 0x315   :  { %v2862_v35 = vadd.f32 %v2861_v44, %v8193_v2  ;;  %v2619_v37 = vpop.f32.mrb[199].mxu1 }
 0x317   :  { %v2863_v0 = vadd.f32 %v2862_v35, %v8195_v4 }
 0x319   :  { %v2864_v40 = vadd.f32 %v2863_v0, %v8215_v28 }
 0x31a   :  { %v9013_v42 = vpop.f32.mrb[200].mxu1 }
 0x31b   :  { %v2865_v50 = vadd.f32 %v2864_v40, %v8217_v34  ;;  %v2624_v44 = vpop.f32.mrb[201].mxu1 }
 0x31c   :  { %v9016_v0 = vpop.f32.mrb[202].mxu1 }
 0x31d   :  { %v2866_v31 = vadd.f32 %v2865_v50, %v8237_v3  ;;  %v2627_v28 = vpop.f32.mrb[203].mxu1 }
 0x31f   :  { %v2867_v32 = vadd.f32 %v2866_v31, %v8239_v10 }
 0x321   :  { %v2868_v30 = vadd.f32 %v2867_v32, %v8259_v49 }
 0x322   :  { %v9021_v34 = vpop.f32.mrb[204].mxu1 }
 0x323   :  { %v2869_v35 = vadd.f32 %v2868_v30, %v8261_v53  ;;  %v2632_v50 = vpop.f32.mrb[205].mxu1 }
 0x324   :  { %v9024_v32 = vpop.f32.mrb[206].mxu1 }
 0x325   :  { %v2870_v59 = vadd.f32 %v2869_v35, %v8281_v48  ;;  %v2635_v49 = vpop.f32.mrb[207].mxu1 }
 0x327   :  { %v2871_v40 = vadd.f32 %v2870_v59, %v8283_v52 }
 0x329   :  { %v2872_v37 = vadd.f32 %v2871_v40, %v8303_v61 }
 0x32a   :  { %v9029_v53 = vpop.f32.mrb[208].mxu1 }
 0x32b   :  { %v2873_v31 = vadd.f32 %v2872_v37, %v8305_v19  ;;  %v2640_v35 = vpop.f32.mrb[209].mxu1 }
 0x32c   :  { %v9032_v40 = vpop.f32.mrb[210].mxu1 }
 0x32d   :  { %v2874_v44 = vadd.f32 %v2873_v31, %v8325_v15  ;;  %v2643_v61 = vpop.f32.mrb[211].mxu1 }
 0x32f   :  { %v2875_v30 = vadd.f32 %v2874_v44, %v8327_v13  ;;  %v13821_v13 = vld [vmem:[#allocation171_spill] sm:$0xff] }
 0x331   :  { %v2876_v28 = vadd.f32 %v2875_v30, %v8347_v41 }
 0x332   :  { %v9037_v19 = vpop.f32.mrb[212].mxu1 }
 0x333   :  { %v2877_v59 = vadd.f32 %v2876_v28, %v8349_v23  ;;  %v2648_v31 = vpop.f32.mrb[213].mxu1 }
 0x334   :  { %v9040_v30 = vpop.f32.mrb[214].mxu1 }
 0x335   :  { %v2878_v50 = vadd.f32 %v2877_v59, %v8369_v9  ;;  %v2651_v41 = vpop.f32.mrb[215].mxu1  ;;  %v13820_v9 = vld [vmem:[#allocation168_spill] sm:$0xff] }
 0x337   :  { %v2879_v37 = vadd.f32 %v2878_v50, %v8371_v36 }
 0x339   :  { %v2880_v49 = vadd.f32 %v2879_v37, %v8391_v46 }
 0x33a   :  { %v9045_v23 = vpop.f32.mrb[216].mxu1 }
 0x33b   :  { %v2881_v44 = vadd.f32 %v2880_v49, %v8393_v43  ;;  %v2656_v59 = vpop.f32.mrb[217].mxu1 }
 0x33c   :  { %v9048_v37 = vpop.f32.mrb[218].mxu1 }
 0x33d   :  { %v2882_v35 = vadd.f32 %v2881_v44, %v8413_v22  ;;  %v2659_v46 = vpop.f32.mrb[219].mxu1 }
 0x33f   :  { %v2883_v28 = vadd.f32 %v2882_v35, %v8415_v27  ;;  %v13814_v27 = vld [vmem:[#allocation156_spill] sm:$0xff] }
 0x341   :  { %v2884_v61 = vadd.f32 %v2883_v28, %v8435_v7 }
 0x342   :  { %v9053_v43 = vpop.f32.mrb[220].mxu1 }
 0x343   :  { %v2885_v50 = vadd.f32 %v2884_v61, %v8437_v17  ;;  %v2664_v44 = vpop.f32.mrb[221].mxu1 }
 0x344   :  { %v9056_v28 = vpop.f32.mrb[222].mxu1 }
 0x345   :  { %v2886_v31 = vadd.f32 %v2885_v50, %v8457_v54  ;;  %v2667_v7 = vpop.f32.mrb[223].mxu1  ;;  %v13813_v54 = vld [vmem:[#allocation155_spill] sm:$0xff] }
 0x347   :  { %v2887_v49 = vadd.f32 %v2886_v31, %v8459_v33 }
 0x349   :  { %v2888_v41 = vadd.f32 %v2887_v49, %v8479_v39 }
 0x34a   :  { %v9061_v17 = vpop.f32.mrb[224].mxu1 }
 0x34b   :  { %v2889_v35 = vadd.f32 %v2888_v41, %v8481_v56  ;;  %v2672_v50 = vpop.f32.mrb[225].mxu1 }
 0x34c   :  { %v9064_v49 = vpop.f32.mrb[226].mxu1 }
 0x34d   :  { %v2890_v59 = vadd.f32 %v2889_v35, %v8501_v24  ;;  %v2675_v39 = vpop.f32.mrb[227].mxu1  ;;  %v13807_v24 = vld [vmem:[#allocation147_spill] sm:$0xff] }
 0x34f   :  { %v2891_v61 = vadd.f32 %v2890_v59, %v8503_v20 }
 0x351   :  { %v2892_v46 = vadd.f32 %v2891_v61, %v8523_v12 }
 0x352   :  { %v9069_v56 = vpop.f32.mrb[228].mxu1 }
 0x353   :  { %v2893_v31 = vadd.f32 %v2892_v46, %v8525_v58  ;;  %v2680_v35 = vpop.f32.mrb[229].mxu1 }
 0x354   :  { %v9072_v61 = vpop.f32.mrb[230].mxu1 }
 0x355   :  { %v2894_v44 = vadd.f32 %v2893_v31, %v8545_v63  ;;  %v2683_v12 = vpop.f32.mrb[231].mxu1  ;;  %v13803_v63 = vld [vmem:[#allocation139_spill] sm:$0xff] }
 0x357   :  { %v2895_v41 = vadd.f32 %v2894_v44, %v8547_v29 }
 0x359   :  { %v2896_v7 = vadd.f32 %v2895_v41, %v8567_v51 }
 0x35a   :  { %v9077_v58 = vpop.f32.mrb[232].mxu1 }
 0x35b   :  { %v2897_v59 = vadd.f32 %v2896_v7, %v8569_v14  ;;  %v2688_v31 = vpop.f32.mrb[233].mxu1 }
 0x35c   :  { %v9080_v41 = vpop.f32.mrb[234].mxu1 }
 0x35d   :  { %v2898_v50 = vadd.f32 %v2897_v59, %v8589_v38  ;;  %13791 = vst [vmem:[#allocation217_spill] sm:$0xff] %v9080_v41  ;;  %v2691_v51 = vpop.f32.mrb[235].mxu1  ;;  %v13799_v38 = vld [vmem:[#allocation131_spill] sm:$0xff] }
 0x35f   :  { %v2899_v46 = vadd.f32 %v2898_v50, %v8591_v62 }
 0x361   :  { %v2900_v39 = vadd.f32 %v2899_v46, %v8611_v26 }
 0x362   :  { %v9085_v14 = vpop.f32.mrb[236].mxu1 }
 0x363   :  { %v2901_v44 = vadd.f32 %v2900_v39, %v8613_v47  ;;  %13792 = vst [vmem:[#allocation218_spill] sm:$0xff] %v9085_v14  ;;  %v2696_v59 = vpop.f32.mrb[237].mxu1  ;;  %v13794_v47 = vld [vmem:[#allocation123_spill] sm:$0xff] }
 0x364   :  { %v9088_v46 = vpop.f32.mrb[238].mxu1  ;;  %v13797_v59 = vld [vmem:[#allocation127_spill] sm:$0xff] }
 0x365   :  { %v2902_v35 = vadd.f32 %v2901_v44, %v8630_v21  ;;  %13793 = vst [vmem:[#allocation219_spill] sm:$0xff] %v9088_v46  ;;  %v2699_v26 = vpop.f32.mrb[239].mxu1 }
 0x367   :  { %v2903_v7 = vadd.f32 %v2902_v35, %v8632_v11  ;;  %v13796_v35 = vld [vmem:[#allocation124_spill] sm:$0xff] }
 0x369   :  { %v2904_v12 = vadd.f32 %v2903_v7, %v8646_v57 }
 0x36a   :  { %v9093_v62 = vpop.f32.mrb[240].mxu1 }
 0x36b   :  { %v2905_v50 = vadd.f32 %v2904_v12, %v8648_v1  ;;  %13795 = vst [vmem:[#allocation220_spill] sm:$0xff] %v9093_v62  ;;  %v2704_v44 = vpop.f32.mrb[241].mxu1  ;;  %v13798_v12 = vld [vmem:[#allocation128_spill] sm:$0xff] }
 0x36c   :  { %v9096_v7 = vpop.f32.mrb[242].mxu1  ;;  %v13801_v44 = vld [vmem:[#allocation135_spill] sm:$0xff] }
 0x36d   :  { %v2906_v31 = vadd.f32 %v2905_v50, %v8662_v18  ;;  %v2707_v57 = vpop.f32.mrb[243].mxu1 }
 0x36f   :  { %v2907_v39 = vadd.f32 %v2906_v31, %v8664_v55  ;;  %v13800_v31 = vld [vmem:[#allocation132_spill] sm:$0xff] }
 0x371   :  { %v2908_v51 = vadd.f32 %v2907_v39, %v13794_v47 }
 0x372   :  { %v9101_v29 = vpop.f32.mrb[244].mxu1 }
 0x373   :  { %v2909_v11 = vadd.f32 %v2908_v51, %v13796_v35  ;;  %v2712_v50 = vpop.f32.mrb[245].mxu1  ;;  %v13802_v51 = vld [vmem:[#allocation136_spill] sm:$0xff] }
 0x374   :  { %v9104_v39 = vpop.f32.mrb[246].mxu1  ;;  %v13805_v50 = vld [vmem:[#allocation143_spill] sm:$0xff] }
 0x375   :  { %v2910_v21 = vadd.f32 %v2909_v11, %v13797_v59  ;;  %v2715_v47 = vpop.f32.mrb[247].mxu1 }
 0x377   :  { %v2911_v1 = vadd.f32 %v2910_v21, %v13798_v12  ;;  %v13804_v21 = vld [vmem:[#allocation140_spill] sm:$0xff] }
 0x379   :  { %v2912_v26 = vadd.f32 %v2911_v1, %v13799_v38 }
 0x37a   :  { %v9109_v20 = vpop.f32.mrb[248].mxu1 }
 0x37b   :  { %v2913_v55 = vadd.f32 %v2912_v26, %v13800_v31  ;;  %v2720_v11 = vpop.f32.mrb[249].mxu1  ;;  %v13806_v26 = vld [vmem:[#allocation144_spill] sm:$0xff] }
 0x37c   :  { %v9112_v1 = vpop.f32.mrb[250].mxu1  ;;  %v13811_v11 = vld [vmem:[#allocation151_spill] sm:$0xff] }
 0x37d   :  { %v2914_v18 = vadd.f32 %v2913_v55, %v13801_v44  ;;  %v2723_v38 = vpop.f32.mrb[251].mxu1 }
 0x37f   :  { %v2915_v35 = vadd.f32 %v2914_v18, %v13802_v51  ;;  %v13809_v18 = vld [vmem:[#allocation148_spill] sm:$0xff] }
 0x381   :  { %v2916_v57 = vadd.f32 %v2915_v35, %v13803_v63 }
 0x382   :  { %v9117_v33 = vpop.f32.mrb[252].mxu1 }
 0x383   :  { %v2917_v12 = vadd.f32 %v2916_v57, %v13804_v21  ;;  %13808 = vst [vmem:[#allocation221_spill] sm:$0xff] %v9117_v33  ;;  %v2728_v55 = vpop.f32.mrb[253].mxu1  ;;  %v13812_v57 = vld [vmem:[#allocation152_spill] sm:$0xff] }
 0x384   :  { %v9120_v35 = vpop.f32.mrb[254].mxu1  ;;  %v13818_v55 = vld [vmem:[#allocation164_spill] sm:$0xff] }
 0x385   :  { %v2918_v59 = vadd.f32 %v2917_v12, %v13805_v50  ;;  %13810 = vst [vmem:[#allocation222_spill] sm:$0xff] %v9120_v35  ;;  %v2731_v63 = vpop.f32.mrb[255].mxu1  ;;  %v13815_v50 = vld [vmem:[#allocation159_spill] sm:$0xff] }
 0x387   :  { %v2919_v31 = vadd.f32 %v2918_v59, %v13806_v26  ;;  %v13816_v26 = vld [vmem:[#allocation160_spill] sm:$0xff] }
 0x389   :  { %v2920_v47 = vadd.f32 %v2919_v31, %v13807_v24  ;;  %v13817_v24 = vld [vmem:[#allocation163_spill] sm:$0xff] }
 0x38b   :  { %v2921_v51 = vadd.f32 %v2920_v47, %v13809_v18  ;;  %v13819_v47 = vld [vmem:[#allocation167_spill] sm:$0xff] }
 0x38d   :  { %v2922_v44 = vadd.f32 %v2921_v51, %v13811_v11  ;;  %v13822_v11 = vld [vmem:[#allocation172_spill] sm:$0xff] }
 0x38f   :  { %v2923_v21 = vadd.f32 %v2922_v44, %v13812_v57 }
 0x391   :  { %v2924_v38 = vadd.f32 %v2923_v21, %v13813_v54  ;;  %v13823_v54 = vld [vmem:[#allocation176_spill] sm:$0xff] }
 0x393   :  { %v2925_v12 = vadd.f32 %v2924_v38, %v13814_v27  ;;  %v13824_v27 = vld [vmem:[#allocation179_spill] sm:$0xff] }
 0x395   :  { %v2926_v59 = vadd.f32 %v2925_v12, %v13815_v50  ;;  %v13825_v50 = vld [vmem:[#allocation180_spill] sm:$0xff] }
 0x397   :  { %v2927_v31 = vadd.f32 %v2926_v59, %v13816_v26  ;;  %v13826_v26 = vld [vmem:[#allocation183_spill] sm:$0xff] }
 0x399   :  { %v2928_v22 = vadd.f32 %v2927_v31, %v13817_v24  ;;  %v13827_v24 = vld [vmem:[#allocation184_spill] sm:$0xff] }
 0x39b   :  { %v2929_v36 = vadd.f32 %v2928_v22, %v13818_v55  ;;  %v13828_v55 = vld [vmem:[#allocation187_spill] sm:$0xff] }
 0x39d   :  { %v2930_v18 = vadd.f32 %v2929_v36, %v13819_v47  ;;  %v13829_v47 = vld [vmem:[#allocation188_spill] sm:$0xff] }
 0x39f   :  { %v2931_v63 = vadd.f32 %v2930_v18, %v13820_v9  ;;  %v13830_v9 = vld [vmem:[#allocation191_spill] sm:$0xff] }
 0x3a1   :  { %v2932_v51 = vadd.f32 %v2931_v63, %v13821_v13  ;;  %v13831_v13 = vld [vmem:[#allocation192_spill] sm:$0xff] }
 0x3a3   :  { %v2933_v44 = vadd.f32 %v2932_v51, %v13822_v11  ;;  %v13832_v11 = vld [vmem:[#allocation195_spill] sm:$0xff] }
 0x3a5   :  { %v2934_v21 = vadd.f32 %v2933_v44, %v8886_v8  ;;  %v13833_v8 = vld [vmem:[#allocation196_spill] sm:$0xff] }
 0x3a7   :  { %v2935_v38 = vadd.f32 %v2934_v21, %v13823_v54  ;;  %v13834_v54 = vld [vmem:[#allocation199_spill] sm:$0xff] }
 0x3a9   :  { %v2936_v12 = vadd.f32 %v2935_v38, %v13824_v27  ;;  %v13835_v27 = vld [vmem:[#allocation200_spill] sm:$0xff] }
 0x3ab   :  { %v2937_v59 = vadd.f32 %v2936_v12, %v13825_v50  ;;  %v13836_v50 = vld [vmem:[#allocation203_spill] sm:$0xff] }
 0x3ad   :  { %v2938_v31 = vadd.f32 %v2937_v59, %v13826_v26  ;;  %v13837_v26 = vld [vmem:[#allocation204_spill] sm:$0xff] }
 0x3af   :  { %v2939_v22 = vadd.f32 %v2938_v31, %v13827_v24  ;;  %v13838_v24 = vld [vmem:[#allocation207_spill] sm:$0xff] }
 0x3b1   :  { %v2940_v36 = vadd.f32 %v2939_v22, %v13828_v55  ;;  %v13839_v55 = vld [vmem:[#allocation208_spill] sm:$0xff] }
 0x3b3   :  { %v2941_v18 = vadd.f32 %v2940_v36, %v13829_v47  ;;  %v13840_v47 = vld [vmem:[#allocation211_spill] sm:$0xff] }
 0x3b5   :  { %v2942_v63 = vadd.f32 %v2941_v18, %v13830_v9  ;;  %v13841_v9 = vld [vmem:[#allocation212_spill] sm:$0xff] }
 0x3b7   :  { %v2943_v51 = vadd.f32 %v2942_v63, %v13831_v13 }
 0x3b9   :  { %v2944_v44 = vadd.f32 %v2943_v51, %v13832_v11  ;;  %v13842_v11 = vld [vmem:[#allocation215_spill] sm:$0xff] }
 0x3bb   :  { %v2945_v21 = vadd.f32 %v2944_v44, %v13833_v8 }
 0x3bd   :  { %v2946_v38 = vadd.f32 %v2945_v21, %v13834_v54 }
 0x3bf   :  { %v2947_v12 = vadd.f32 %v2946_v38, %v13835_v27 }
 0x3c1   :  { %v2948_v59 = vadd.f32 %v2947_v12, %v13836_v50 }
 0x3c3   :  { %v2949_v31 = vadd.f32 %v2948_v59, %v13837_v26 }
 0x3c5   :  { %v2950_v22 = vadd.f32 %v2949_v31, %v13838_v24 }
 0x3c7   :  { %v2951_v36 = vadd.f32 %v2950_v22, %v13839_v55 }
 0x3c9   :  { %v2952_v18 = vadd.f32 %v2951_v36, %v13840_v47 }
 0x3cb   :  { %v2953_v63 = vadd.f32 %v2952_v18, %v13841_v9 }
 0x3cd   :  { %v2954_v51 = vadd.f32 %v2953_v63, %v8986_v25 }
 0x3cf   :  { %v2955_v44 = vadd.f32 %v2954_v51, %v13842_v11 }
 0x3d1   :  { %v2956_v21 = vadd.f32 %v2955_v44, %v8997_v6 }
 0x3d3   :  { %v2957_v38 = vadd.f32 %v2956_v21, %v9000_v16 }
 0x3d5   :  { %v2958_v12 = vadd.f32 %v2957_v38, %v9005_v60 }
 0x3d7   :  { %v2959_v59 = vadd.f32 %v2958_v12, %v9008_v45 }
 0x3d9   :  { %v2960_v31 = vadd.f32 %v2959_v59, %v9013_v42 }
 0x3db   :  { %v2961_v22 = vadd.f32 %v2960_v31, %v9016_v0 }
 0x3dd   :  { %v2962_v36 = vadd.f32 %v2961_v22, %v9021_v34 }
 0x3df   :  { %v2963_v18 = vadd.f32 %v2962_v36, %v9024_v32 }
 0x3e1   :  { %v2964_v63 = vadd.f32 %v2963_v18, %v9029_v53 }
 0x3e3   :  { %v2965_v51 = vadd.f32 %v2964_v63, %v9032_v40 }
 0x3e5   :  { %v2966_v44 = vadd.f32 %v2965_v51, %v9037_v19 }
 0x3e7   :  { %v2967_v21 = vadd.f32 %v2966_v44, %v9040_v30 }
 0x3e9   :  { %v2968_v38 = vadd.f32 %v2967_v21, %v9045_v23 }
 0x3eb   :  { %v2969_v12 = vadd.f32 %v2968_v38, %v9048_v37 }
 0x3ed   :  { %v2970_v59 = vadd.f32 %v2969_v12, %v9053_v43 }
 0x3ef   :  { %v2971_v31 = vadd.f32 %v2970_v59, %v9056_v28 }
 0x3f1   :  { %v2972_v22 = vadd.f32 %v2971_v31, %v9061_v17 }
 0x3f3   :  { %v2973_v36 = vadd.f32 %v2972_v22, %v9064_v49 }
 0x3f5   :  { %v2974_v18 = vadd.f32 %v2973_v36, %v9069_v56 }
 0x3f7   :  { %v2975_v63 = vadd.f32 %v2974_v18, %v9072_v61 }
 0x3f9   :  { %v2976_v51 = vadd.f32 %v2975_v63, %v9077_v58 }
 0x3fb   :  { %v2977_v44 = vadd.f32 %v2976_v51, %v9080_v41 }
 0x3fd   :  { %v2978_v21 = vadd.f32 %v2977_v44, %v9085_v14 }
 0x3ff   :  { %v2979_v38 = vadd.f32 %v2978_v21, %v9088_v46 }
 0x401   :  { %v2980_v12 = vadd.f32 %v2979_v38, %v9093_v62 }
 0x403   :  { %v2981_v59 = vadd.f32 %v2980_v12, %v9096_v7  ;;  %v13843_v12 = vld [vmem:[#allocation2_spill] sm:$0xff] }
 0x405   :  { %v2982_v31 = vadd.f32 %v2981_v59, %v9101_v29 }
 0x407   :  { %v2983_v22 = vadd.f32 %v2982_v31, %v9104_v39  ;;  %v13845_v31 = vld [vmem:[#allocation3_spill] sm:$0xff] }
 0x409   :  { %v2984_v36 = vadd.f32 %v2983_v22, %v9109_v20 }
 0x40b   :  { %v2985_v18 = vadd.f32 %v2984_v36, %v9112_v1  ;;  %v13847_v36 = vld [vmem:[#allocation4_spill] sm:$0xff] }
 0x40d   :  { %v2986_v63 = vadd.f32 %v2985_v18, %v9117_v33  ;;  %v13857_v33 = vld [vmem:[#allocation9_spill] sm:$0xff] }
 0x40f   :  { %v2987_v51 = vadd.f32 %v2986_v63, %v9120_v35 }
 0x411   :  { %v2988_v41 = vrot.slane %v2987_v51, 4 }
 0x413   :  { %v2989_v44 = vadd.f32 %v2988_v41, %v2987_v51  ;;  %v13851_v51 = vld [vmem:[#allocation6_spill] sm:$0xff] }
 0x415   :  { %v2990_v14 = vrot.slane %v2989_v44, 2 }
 0x417   :  { %v2991_v21 = vadd.f32 %v2990_v14, %v2989_v44 }
 0x419   :  { %v2992_v46 = vrot.slane %v2991_v21, 1 }
 0x41b   :  { %v2993_v38 = vadd.f32 %v2992_v46, %v2991_v21  ;;  %v13849_v46 = vld [vmem:[#allocation5_spill] sm:$0xff] }
 0x41d   :  { %v9188_v62 = vmul.f32 0.00048828125, %v2993_v38 }
 0x41f   :  { %v9192_v59 = vsub.f32 %v13843_v12, %v9188_v62  ;;  %v9196_v22 = vsub.f32 %v13845_v31, %v9188_v62  ;;  %v9200_v18 = vsub.f32 %v13847_v36, %v9188_v62  ;;  %v9208_v63 = vsub.f32 %v13849_v46, %v9188_v62  ;;  %v13853_v12 = vld [vmem:[#allocation7_spill] sm:$0xff] }
 0x420   :  { %v9212_v44 = vsub.f32 %v13851_v51, %v9188_v62  ;;  %v9218_v31 = vsub.f32 %v13853_v12, %v9188_v62  ;;  %v13859_v12 = vld [vmem:[#allocation10_spill] sm:$0xff] }
 0x421   :  { %13844 = vst [vmem:[#allocation152_spill] sm:$0xff] %v9192_v59  ;;  %13846 = vst [vmem:[#allocation192_spill] sm:$0xff] %v9196_v22  ;;  %v3251_v41 = vmul.f32 %v9192_v59, %v9192_v59  ;;  %v3252_v14 = vmul.f32 %v9196_v22, %v9196_v22  ;;  %v3253_v21 = vmul.f32 %v9200_v18, %v9200_v18  ;;  %v13855_v59 = vld [vmem:[#allocation8_spill] sm:$0xff] }
 0x422   :  { %13848 = vst [vmem:[#allocation196_spill] sm:$0xff] %v9200_v18  ;;  %13850 = vst [vmem:[#allocation199_spill] sm:$0xff] %v9208_v63  ;;  %v3254_v36 = vmul.f32 %v9208_v63, %v9208_v63  ;;  %v9224_v46 = vsub.f32 %v13855_v59, %v9188_v62  ;;  %v3255_v51 = vmul.f32 %v9212_v44, %v9212_v44 }
 0x423   :  { %13852 = vst [vmem:[#allocation200_spill] sm:$0xff] %v9212_v44  ;;  %v3507_v38 = vadd.f32 %v3252_v14, %v3251_v41  ;;  %13854 = vst [vmem:[#allocation203_spill] sm:$0xff] %v9218_v31  ;;  %v9230_v18 = vsub.f32 %v13857_v33, %v9188_v62  ;;  %v3256_v41 = vmul.f32 %v9218_v31, %v9218_v31 }
 0x424   :  { %13856 = vst [vmem:[#allocation204_spill] sm:$0xff] %v9224_v46  ;;  %v9236_v63 = vsub.f32 %v13859_v12, %v9188_v62  ;;  %v3257_v59 = vmul.f32 %v9224_v46, %v9224_v46  ;;  %v13865_v12 = vld [vmem:[#allocation13_spill] sm:$0xff] }
 0x425   :  { %v3508_v22 = vadd.f32 %v3507_v38, %v3253_v21  ;;  %13858 = vst [vmem:[#allocation207_spill] sm:$0xff] %v9230_v18  ;;  %v13861_v38 = vld [vmem:[#allocation11_spill] sm:$0xff]  ;;  %v3258_v33 = vmul.f32 %v9230_v18, %v9230_v18  ;;  %v9254_v46 = vsub.f32 %v13865_v12, %v9188_v62  ;;  %v13871_v12 = vld [vmem:[#allocation16_spill] sm:$0xff] }
 0x426   :  { %13860 = vst [vmem:[#allocation208_spill] sm:$0xff] %v9236_v63  ;;  %v9242_v44 = vsub.f32 %v13861_v38, %v9188_v62  ;;  %v13867_v38 = vld [vmem:[#allocation14_spill] sm:$0xff] }
 0x427   :  { %v3509_v35 = vadd.f32 %v3508_v22, %v3254_v36  ;;  %v13863_v36 = vld [vmem:[#allocation12_spill] sm:$0xff]  ;;  %13866 = vst [vmem:[#allocation215_spill] sm:$0xff] %v9254_v46  ;;  %v9260_v18 = vsub.f32 %v13867_v38, %v9188_v62  ;;  %v13873_v38 = vld [vmem:[#allocation17_spill] sm:$0xff] }
 0x428   :  { %13862 = vst [vmem:[#allocation211_spill] sm:$0xff] %v9242_v44  ;;  %v9248_v31 = vsub.f32 %v13863_v36, %v9188_v62  ;;  %v13869_v36 = vld [vmem:[#allocation15_spill] sm:$0xff] }
 0x429   :  { %v3510_v14 = vadd.f32 %v3509_v35, %v3255_v51  ;;  %v3259_v35 = vmul.f32 %v9236_v63, %v9236_v63  ;;  %13868 = vst [vmem:[#allocation2_spill] sm:$0xff] %v9260_v18  ;;  %v9266_v63 = vsub.f32 %v13869_v36, %v9188_v62  ;;  %v13875_v36 = vld [vmem:[#allocation18_spill] sm:$0xff] }
 0x42a   :  { %13864 = vst [vmem:[#allocation212_spill] sm:$0xff] %v9248_v31 }
 0x42b   :  { %v3511_v21 = vadd.f32 %v3510_v14, %v3256_v41  ;;  %v3260_v41 = vmul.f32 %v9242_v44, %v9242_v44  ;;  %13870 = vst [vmem:[#allocation3_spill] sm:$0xff] %v9266_v63  ;;  %v9272_v44 = vsub.f32 %v13871_v12, %v9188_v62  ;;  %v13877_v12 = vld [vmem:[#allocation19_spill] sm:$0xff] }
 0x42d   :  { %v3512_v22 = vadd.f32 %v3511_v21, %v3257_v59  ;;  %v3261_v59 = vmul.f32 %v9248_v31, %v9248_v31  ;;  %13872 = vst [vmem:[#allocation4_spill] sm:$0xff] %v9272_v44  ;;  %v9278_v31 = vsub.f32 %v13873_v38, %v9188_v62  ;;  %v13879_v38 = vld [vmem:[#allocation20_spill] sm:$0xff] }
 0x42f   :  { %v3513_v51 = vadd.f32 %v3512_v22, %v3258_v33  ;;  %v3262_v33 = vmul.f32 %v9254_v46, %v9254_v46  ;;  %13874 = vst [vmem:[#allocation5_spill] sm:$0xff] %v9278_v31  ;;  %v9284_v46 = vsub.f32 %v13875_v36, %v9188_v62  ;;  %v13881_v36 = vld [vmem:[#allocation21_spill] sm:$0xff] }
 0x431   :  { %v3514_v14 = vadd.f32 %v3513_v51, %v3259_v35  ;;  %v3263_v35 = vmul.f32 %v9260_v18, %v9260_v18  ;;  %13876 = vst [vmem:[#allocation6_spill] sm:$0xff] %v9284_v46  ;;  %v9290_v18 = vsub.f32 %v13877_v12, %v9188_v62  ;;  %v13883_v12 = vld [vmem:[#allocation22_spill] sm:$0xff] }
 0x433   :  { %v3515_v21 = vadd.f32 %v3514_v14, %v3260_v41  ;;  %v3264_v41 = vmul.f32 %v9266_v63, %v9266_v63  ;;  %13878 = vst [vmem:[#allocation7_spill] sm:$0xff] %v9290_v18  ;;  %v9296_v63 = vsub.f32 %v13879_v38, %v9188_v62  ;;  %v13885_v38 = vld [vmem:[#allocation23_spill] sm:$0xff] }
 0x435   :  { %v3516_v22 = vadd.f32 %v3515_v21, %v3261_v59  ;;  %v3265_v59 = vmul.f32 %v9272_v44, %v9272_v44  ;;  %13880 = vst [vmem:[#allocation8_spill] sm:$0xff] %v9296_v63  ;;  %v9302_v44 = vsub.f32 %v13881_v36, %v9188_v62  ;;  %v13887_v36 = vld [vmem:[#allocation24_spill] sm:$0xff] }
 0x437   :  { %v3517_v51 = vadd.f32 %v3516_v22, %v3262_v33  ;;  %v3266_v33 = vmul.f32 %v9278_v31, %v9278_v31  ;;  %13882 = vst [vmem:[#allocation9_spill] sm:$0xff] %v9302_v44  ;;  %v9308_v31 = vsub.f32 %v13883_v12, %v9188_v62  ;;  %v13889_v12 = vld [vmem:[#allocation25_spill] sm:$0xff] }
 0x439   :  { %v3518_v14 = vadd.f32 %v3517_v51, %v3263_v35  ;;  %v3267_v35 = vmul.f32 %v9284_v46, %v9284_v46  ;;  %13884 = vst [vmem:[#allocation10_spill] sm:$0xff] %v9308_v31  ;;  %v9314_v46 = vsub.f32 %v13885_v38, %v9188_v62  ;;  %v13891_v38 = vld [vmem:[#allocation26_spill] sm:$0xff] }
 0x43b   :  { %v3519_v21 = vadd.f32 %v3518_v14, %v3264_v41  ;;  %v3268_v41 = vmul.f32 %v9290_v18, %v9290_v18  ;;  %13886 = vst [vmem:[#allocation11_spill] sm:$0xff] %v9314_v46  ;;  %v9320_v18 = vsub.f32 %v13887_v36, %v9188_v62  ;;  %v13893_v36 = vld [vmem:[#allocation27_spill] sm:$0xff] }
 0x43d   :  { %v3520_v22 = vadd.f32 %v3519_v21, %v3265_v59  ;;  %v3269_v59 = vmul.f32 %v9296_v63, %v9296_v63  ;;  %13888 = vst [vmem:[#allocation12_spill] sm:$0xff] %v9320_v18  ;;  %v9326_v63 = vsub.f32 %v13889_v12, %v9188_v62  ;;  %v13895_v12 = vld [vmem:[#allocation28_spill] sm:$0xff] }
 0x43f   :  { %v3521_v51 = vadd.f32 %v3520_v22, %v3266_v33  ;;  %v3270_v33 = vmul.f32 %v9302_v44, %v9302_v44  ;;  %13890 = vst [vmem:[#allocation13_spill] sm:$0xff] %v9326_v63  ;;  %v9332_v44 = vsub.f32 %v13891_v38, %v9188_v62  ;;  %v13897_v38 = vld [vmem:[#allocation29_spill] sm:$0xff] }
 0x441   :  { %v3522_v14 = vadd.f32 %v3521_v51, %v3267_v35  ;;  %v3271_v35 = vmul.f32 %v9308_v31, %v9308_v31  ;;  %13892 = vst [vmem:[#allocation14_spill] sm:$0xff] %v9332_v44  ;;  %v9338_v31 = vsub.f32 %v13893_v36, %v9188_v62  ;;  %v13899_v36 = vld [vmem:[#allocation30_spill] sm:$0xff] }
 0x443   :  { %v3523_v21 = vadd.f32 %v3522_v14, %v3268_v41  ;;  %v3272_v41 = vmul.f32 %v9314_v46, %v9314_v46  ;;  %13894 = vst [vmem:[#allocation15_spill] sm:$0xff] %v9338_v31  ;;  %v9344_v46 = vsub.f32 %v13895_v12, %v9188_v62  ;;  %v13901_v12 = vld [vmem:[#allocation31_spill] sm:$0xff] }
 0x445   :  { %v3524_v22 = vadd.f32 %v3523_v21, %v3269_v59  ;;  %v3273_v59 = vmul.f32 %v9320_v18, %v9320_v18  ;;  %13896 = vst [vmem:[#allocation16_spill] sm:$0xff] %v9344_v46  ;;  %v9350_v18 = vsub.f32 %v13897_v38, %v9188_v62  ;;  %v13903_v38 = vld [vmem:[#allocation32_spill] sm:$0xff] }
 0x447   :  { %v3525_v51 = vadd.f32 %v3524_v22, %v3270_v33  ;;  %v3274_v33 = vmul.f32 %v9326_v63, %v9326_v63  ;;  %13898 = vst [vmem:[#allocation17_spill] sm:$0xff] %v9350_v18  ;;  %v9356_v63 = vsub.f32 %v13899_v36, %v9188_v62  ;;  %v13905_v36 = vld [vmem:[#allocation33_spill] sm:$0xff] }
 0x449   :  { %v3526_v14 = vadd.f32 %v3525_v51, %v3271_v35  ;;  %v3275_v35 = vmul.f32 %v9332_v44, %v9332_v44  ;;  %13900 = vst [vmem:[#allocation18_spill] sm:$0xff] %v9356_v63  ;;  %v9362_v44 = vsub.f32 %v13901_v12, %v9188_v62  ;;  %v13907_v12 = vld [vmem:[#allocation36_spill] sm:$0xff] }
 0x44b   :  { %v3527_v21 = vadd.f32 %v3526_v14, %v3272_v41  ;;  %v3276_v41 = vmul.f32 %v9338_v31, %v9338_v31  ;;  %13902 = vst [vmem:[#allocation19_spill] sm:$0xff] %v9362_v44  ;;  %v9368_v31 = vsub.f32 %v13903_v38, %v9188_v62  ;;  %v13909_v38 = vld [vmem:[#allocation37_spill] sm:$0xff] }
 0x44d   :  { %v3528_v22 = vadd.f32 %v3527_v21, %v3273_v59  ;;  %v3277_v59 = vmul.f32 %v9344_v46, %v9344_v46  ;;  %13904 = vst [vmem:[#allocation20_spill] sm:$0xff] %v9368_v31  ;;  %v9374_v46 = vsub.f32 %v13905_v36, %v9188_v62  ;;  %v13911_v36 = vld [vmem:[#allocation38_spill] sm:$0xff] }
 0x44f   :  { %v3529_v51 = vadd.f32 %v3528_v22, %v3274_v33  ;;  %v3278_v33 = vmul.f32 %v9350_v18, %v9350_v18  ;;  %13906 = vst [vmem:[#allocation21_spill] sm:$0xff] %v9374_v46  ;;  %v9380_v18 = vsub.f32 %v13907_v12, %v9188_v62  ;;  %v13913_v12 = vld [vmem:[#allocation39_spill] sm:$0xff] }
 0x451   :  { %v3530_v14 = vadd.f32 %v3529_v51, %v3275_v35  ;;  %v3279_v35 = vmul.f32 %v9356_v63, %v9356_v63  ;;  %13908 = vst [vmem:[#allocation22_spill] sm:$0xff] %v9380_v18  ;;  %v9386_v63 = vsub.f32 %v13909_v38, %v9188_v62  ;;  %v13915_v38 = vld [vmem:[#allocation42_spill] sm:$0xff] }
 0x453   :  { %v3531_v21 = vadd.f32 %v3530_v14, %v3276_v41  ;;  %v3280_v41 = vmul.f32 %v9362_v44, %v9362_v44  ;;  %13910 = vst [vmem:[#allocation23_spill] sm:$0xff] %v9386_v63  ;;  %v9392_v44 = vsub.f32 %v13911_v36, %v9188_v62  ;;  %v13917_v36 = vld [vmem:[#allocation43_spill] sm:$0xff] }
 0x455   :  { %v3532_v22 = vadd.f32 %v3531_v21, %v3277_v59  ;;  %v3281_v59 = vmul.f32 %v9368_v31, %v9368_v31  ;;  %13912 = vst [vmem:[#allocation24_spill] sm:$0xff] %v9392_v44  ;;  %v9398_v31 = vsub.f32 %v13913_v12, %v9188_v62  ;;  %v13919_v12 = vld [vmem:[#allocation44_spill] sm:$0xff] }
 0x457   :  { %v3533_v51 = vadd.f32 %v3532_v22, %v3278_v33  ;;  %v3282_v33 = vmul.f32 %v9374_v46, %v9374_v46  ;;  %13914 = vst [vmem:[#allocation25_spill] sm:$0xff] %v9398_v31  ;;  %v9404_v46 = vsub.f32 %v13915_v38, %v9188_v62  ;;  %v13921_v38 = vld [vmem:[#allocation45_spill] sm:$0xff] }
 0x459   :  { %v3534_v14 = vadd.f32 %v3533_v51, %v3279_v35  ;;  %v3283_v35 = vmul.f32 %v9380_v18, %v9380_v18  ;;  %13916 = vst [vmem:[#allocation26_spill] sm:$0xff] %v9404_v46  ;;  %v9410_v18 = vsub.f32 %v13917_v36, %v9188_v62  ;;  %v13923_v36 = vld [vmem:[#allocation48_spill] sm:$0xff] }
 0x45b   :  { %v3535_v21 = vadd.f32 %v3534_v14, %v3280_v41  ;;  %v3284_v41 = vmul.f32 %v9386_v63, %v9386_v63  ;;  %13918 = vst [vmem:[#allocation27_spill] sm:$0xff] %v9410_v18  ;;  %v9416_v63 = vsub.f32 %v13919_v12, %v9188_v62  ;;  %v13925_v12 = vld [vmem:[#allocation49_spill] sm:$0xff] }
 0x45d   :  { %v3536_v22 = vadd.f32 %v3535_v21, %v3281_v59  ;;  %v3285_v59 = vmul.f32 %v9392_v44, %v9392_v44  ;;  %13920 = vst [vmem:[#allocation28_spill] sm:$0xff] %v9416_v63  ;;  %v9422_v44 = vsub.f32 %v13921_v38, %v9188_v62  ;;  %v13927_v38 = vld [vmem:[#allocation50_spill] sm:$0xff] }
 0x45f   :  { %v3537_v51 = vadd.f32 %v3536_v22, %v3282_v33  ;;  %v3286_v33 = vmul.f32 %v9398_v31, %v9398_v31  ;;  %13922 = vst [vmem:[#allocation29_spill] sm:$0xff] %v9422_v44  ;;  %v9428_v31 = vsub.f32 %v13923_v36, %v9188_v62  ;;  %v13929_v36 = vld [vmem:[#allocation51_spill] sm:$0xff] }
 0x461   :  { %v3538_v14 = vadd.f32 %v3537_v51, %v3283_v35  ;;  %v3287_v35 = vmul.f32 %v9404_v46, %v9404_v46  ;;  %13924 = vst [vmem:[#allocation30_spill] sm:$0xff] %v9428_v31  ;;  %v9434_v46 = vsub.f32 %v13925_v12, %v9188_v62  ;;  %v13931_v12 = vld [vmem:[#allocation54_spill] sm:$0xff] }
 0x463   :  { %v3539_v21 = vadd.f32 %v3538_v14, %v3284_v41  ;;  %v3288_v41 = vmul.f32 %v9410_v18, %v9410_v18  ;;  %13926 = vst [vmem:[#allocation31_spill] sm:$0xff] %v9434_v46  ;;  %v9440_v18 = vsub.f32 %v13927_v38, %v9188_v62  ;;  %v13933_v38 = vld [vmem:[#allocation55_spill] sm:$0xff] }
 0x465   :  { %v3540_v22 = vadd.f32 %v3539_v21, %v3285_v59  ;;  %v3289_v59 = vmul.f32 %v9416_v63, %v9416_v63  ;;  %13928 = vst [vmem:[#allocation32_spill] sm:$0xff] %v9440_v18  ;;  %v9446_v63 = vsub.f32 %v13929_v36, %v9188_v62  ;;  %v13935_v36 = vld [vmem:[#allocation57_spill] sm:$0xff] }
 0x467   :  { %v3541_v51 = vadd.f32 %v3540_v22, %v3286_v33  ;;  %v3290_v33 = vmul.f32 %v9422_v44, %v9422_v44  ;;  %13930 = vst [vmem:[#allocation33_spill] sm:$0xff] %v9446_v63  ;;  %v9452_v44 = vsub.f32 %v13931_v12, %v9188_v62  ;;  %v13937_v12 = vld [vmem:[#allocation58_spill] sm:$0xff] }
 0x469   :  { %v3542_v14 = vadd.f32 %v3541_v51, %v3287_v35  ;;  %v3291_v35 = vmul.f32 %v9428_v31, %v9428_v31  ;;  %13932 = vst [vmem:[#allocation36_spill] sm:$0xff] %v9452_v44  ;;  %v9458_v31 = vsub.f32 %v13933_v38, %v9188_v62  ;;  %v13939_v38 = vld [vmem:[#allocation61_spill] sm:$0xff] }
 0x46b   :  { %v3543_v21 = vadd.f32 %v3542_v14, %v3288_v41  ;;  %v3292_v41 = vmul.f32 %v9434_v46, %v9434_v46  ;;  %13934 = vst [vmem:[#allocation37_spill] sm:$0xff] %v9458_v31  ;;  %v9464_v46 = vsub.f32 %v13935_v36, %v9188_v62  ;;  %v13941_v36 = vld [vmem:[#allocation62_spill] sm:$0xff] }
 0x46d   :  { %v3544_v22 = vadd.f32 %v3543_v21, %v3289_v59  ;;  %v3293_v59 = vmul.f32 %v9440_v18, %v9440_v18  ;;  %13936 = vst [vmem:[#allocation38_spill] sm:$0xff] %v9464_v46  ;;  %v9470_v18 = vsub.f32 %v13937_v12, %v9188_v62  ;;  %v13943_v12 = vld [vmem:[#allocation65_spill] sm:$0xff] }
 0x46f   :  { %v3545_v51 = vadd.f32 %v3544_v22, %v3290_v33  ;;  %v3294_v33 = vmul.f32 %v9446_v63, %v9446_v63  ;;  %13938 = vst [vmem:[#allocation39_spill] sm:$0xff] %v9470_v18  ;;  %v9476_v63 = vsub.f32 %v13939_v38, %v9188_v62  ;;  %v13945_v38 = vld [vmem:[#allocation66_spill] sm:$0xff] }
 0x471   :  { %v3546_v14 = vadd.f32 %v3545_v51, %v3291_v35  ;;  %v3295_v35 = vmul.f32 %v9452_v44, %v9452_v44  ;;  %13940 = vst [vmem:[#allocation42_spill] sm:$0xff] %v9476_v63  ;;  %v9482_v44 = vsub.f32 %v13941_v36, %v9188_v62  ;;  %v13947_v36 = vld [vmem:[#allocation69_spill] sm:$0xff] }
 0x473   :  { %v3547_v21 = vadd.f32 %v3546_v14, %v3292_v41  ;;  %v3296_v41 = vmul.f32 %v9458_v31, %v9458_v31  ;;  %13942 = vst [vmem:[#allocation43_spill] sm:$0xff] %v9482_v44  ;;  %v9488_v31 = vsub.f32 %v13943_v12, %v9188_v62  ;;  %v13949_v12 = vld [vmem:[#allocation70_spill] sm:$0xff] }
 0x475   :  { %v3548_v22 = vadd.f32 %v3547_v21, %v3293_v59  ;;  %v3297_v59 = vmul.f32 %v9464_v46, %v9464_v46  ;;  %13944 = vst [vmem:[#allocation44_spill] sm:$0xff] %v9488_v31  ;;  %v9494_v46 = vsub.f32 %v13945_v38, %v9188_v62  ;;  %v13951_v38 = vld [vmem:[#allocation73_spill] sm:$0xff] }
 0x477   :  { %v3549_v51 = vadd.f32 %v3548_v22, %v3294_v33  ;;  %v3298_v33 = vmul.f32 %v9470_v18, %v9470_v18  ;;  %13946 = vst [vmem:[#allocation45_spill] sm:$0xff] %v9494_v46  ;;  %v9500_v18 = vsub.f32 %v13947_v36, %v9188_v62  ;;  %v13953_v36 = vld [vmem:[#allocation74_spill] sm:$0xff] }
 0x479   :  { %v3550_v14 = vadd.f32 %v3549_v51, %v3295_v35  ;;  %v3299_v35 = vmul.f32 %v9476_v63, %v9476_v63  ;;  %13948 = vst [vmem:[#allocation48_spill] sm:$0xff] %v9500_v18  ;;  %v9506_v63 = vsub.f32 %v13949_v12, %v9188_v62  ;;  %v13955_v12 = vld [vmem:[#allocation77_spill] sm:$0xff] }
 0x47b   :  { %v3551_v21 = vadd.f32 %v3550_v14, %v3296_v41  ;;  %v3300_v41 = vmul.f32 %v9482_v44, %v9482_v44  ;;  %13950 = vst [vmem:[#allocation49_spill] sm:$0xff] %v9506_v63  ;;  %v9512_v44 = vsub.f32 %v13951_v38, %v9188_v62  ;;  %v13957_v38 = vld [vmem:[#allocation78_spill] sm:$0xff] }
 0x47d   :  { %v3552_v22 = vadd.f32 %v3551_v21, %v3297_v59  ;;  %v3301_v59 = vmul.f32 %v9488_v31, %v9488_v31  ;;  %13952 = vst [vmem:[#allocation50_spill] sm:$0xff] %v9512_v44  ;;  %v9518_v31 = vsub.f32 %v13953_v36, %v9188_v62  ;;  %v13959_v36 = vld [vmem:[#allocation81_spill] sm:$0xff] }
 0x47f   :  { %v3553_v51 = vadd.f32 %v3552_v22, %v3298_v33  ;;  %v3302_v33 = vmul.f32 %v9494_v46, %v9494_v46  ;;  %13954 = vst [vmem:[#allocation51_spill] sm:$0xff] %v9518_v31  ;;  %v9524_v46 = vsub.f32 %v13955_v12, %v9188_v62  ;;  %v13961_v12 = vld [vmem:[#allocation82_spill] sm:$0xff] }
 0x481   :  { %v3554_v14 = vadd.f32 %v3553_v51, %v3299_v35  ;;  %v3303_v35 = vmul.f32 %v9500_v18, %v9500_v18  ;;  %13956 = vst [vmem:[#allocation54_spill] sm:$0xff] %v9524_v46  ;;  %v9530_v18 = vsub.f32 %v13957_v38, %v9188_v62  ;;  %v13963_v38 = vld [vmem:[#allocation85_spill] sm:$0xff] }
 0x483   :  { %v3555_v21 = vadd.f32 %v3554_v14, %v3300_v41  ;;  %v3304_v41 = vmul.f32 %v9506_v63, %v9506_v63  ;;  %13958 = vst [vmem:[#allocation55_spill] sm:$0xff] %v9530_v18  ;;  %v9536_v63 = vsub.f32 %v13959_v36, %v9188_v62  ;;  %v13965_v36 = vld [vmem:[#allocation86_spill] sm:$0xff] }
 0x485   :  { %v3556_v22 = vadd.f32 %v3555_v21, %v3301_v59  ;;  %v3305_v59 = vmul.f32 %v9512_v44, %v9512_v44  ;;  %13960 = vst [vmem:[#allocation57_spill] sm:$0xff] %v9536_v63  ;;  %v9542_v44 = vsub.f32 %v13961_v12, %v9188_v62  ;;  %v13967_v12 = vld [vmem:[#allocation89_spill] sm:$0xff] }
 0x487   :  { %v3557_v51 = vadd.f32 %v3556_v22, %v3302_v33  ;;  %v3306_v33 = vmul.f32 %v9518_v31, %v9518_v31  ;;  %13962 = vst [vmem:[#allocation58_spill] sm:$0xff] %v9542_v44  ;;  %v9548_v31 = vsub.f32 %v13963_v38, %v9188_v62  ;;  %v13969_v38 = vld [vmem:[#allocation90_spill] sm:$0xff] }
 0x489   :  { %v3558_v14 = vadd.f32 %v3557_v51, %v3303_v35  ;;  %v3307_v35 = vmul.f32 %v9524_v46, %v9524_v46  ;;  %13964 = vst [vmem:[#allocation61_spill] sm:$0xff] %v9548_v31  ;;  %v9554_v46 = vsub.f32 %v13965_v36, %v9188_v62  ;;  %v13971_v36 = vld [vmem:[#allocation93_spill] sm:$0xff] }
 0x48b   :  { %v3559_v21 = vadd.f32 %v3558_v14, %v3304_v41  ;;  %v3308_v41 = vmul.f32 %v9530_v18, %v9530_v18  ;;  %13966 = vst [vmem:[#allocation62_spill] sm:$0xff] %v9554_v46  ;;  %v9560_v18 = vsub.f32 %v13967_v12, %v9188_v62  ;;  %v13973_v12 = vld [vmem:[#allocation94_spill] sm:$0xff] }
 0x48d   :  { %v3560_v22 = vadd.f32 %v3559_v21, %v3305_v59  ;;  %v3309_v59 = vmul.f32 %v9536_v63, %v9536_v63  ;;  %13968 = vst [vmem:[#allocation65_spill] sm:$0xff] %v9560_v18  ;;  %v9566_v63 = vsub.f32 %v13969_v38, %v9188_v62  ;;  %v13975_v38 = vld [vmem:[#allocation97_spill] sm:$0xff] }
 0x48f   :  { %v3561_v51 = vadd.f32 %v3560_v22, %v3306_v33  ;;  %v3310_v33 = vmul.f32 %v9542_v44, %v9542_v44  ;;  %13970 = vst [vmem:[#allocation66_spill] sm:$0xff] %v9566_v63  ;;  %v9572_v44 = vsub.f32 %v13971_v36, %v9188_v62  ;;  %v13977_v36 = vld [vmem:[#allocation98_spill] sm:$0xff] }
 0x491   :  { %v3562_v14 = vadd.f32 %v3561_v51, %v3307_v35  ;;  %v3311_v35 = vmul.f32 %v9548_v31, %v9548_v31  ;;  %13972 = vst [vmem:[#allocation69_spill] sm:$0xff] %v9572_v44  ;;  %v9578_v31 = vsub.f32 %v13973_v12, %v9188_v62  ;;  %v13979_v12 = vld [vmem:[#allocation101_spill] sm:$0xff] }
 0x493   :  { %v3563_v21 = vadd.f32 %v3562_v14, %v3308_v41  ;;  %v3312_v41 = vmul.f32 %v9554_v46, %v9554_v46  ;;  %13974 = vst [vmem:[#allocation70_spill] sm:$0xff] %v9578_v31  ;;  %v9584_v46 = vsub.f32 %v13975_v38, %v9188_v62  ;;  %v13981_v38 = vld [vmem:[#allocation102_spill] sm:$0xff] }
 0x495   :  { %v3564_v22 = vadd.f32 %v3563_v21, %v3309_v59  ;;  %v3313_v59 = vmul.f32 %v9560_v18, %v9560_v18  ;;  %13976 = vst [vmem:[#allocation73_spill] sm:$0xff] %v9584_v46  ;;  %v9590_v18 = vsub.f32 %v13977_v36, %v9188_v62  ;;  %v13983_v36 = vld [vmem:[#allocation105_spill] sm:$0xff] }
 0x497   :  { %v3565_v51 = vadd.f32 %v3564_v22, %v3310_v33  ;;  %v3314_v33 = vmul.f32 %v9566_v63, %v9566_v63  ;;  %13978 = vst [vmem:[#allocation74_spill] sm:$0xff] %v9590_v18  ;;  %v9596_v63 = vsub.f32 %v13979_v12, %v9188_v62  ;;  %v13985_v12 = vld [vmem:[#allocation106_spill] sm:$0xff] }
 0x499   :  { %v3566_v14 = vadd.f32 %v3565_v51, %v3311_v35  ;;  %v3315_v35 = vmul.f32 %v9572_v44, %v9572_v44  ;;  %13980 = vst [vmem:[#allocation77_spill] sm:$0xff] %v9596_v63  ;;  %v9602_v44 = vsub.f32 %v13981_v38, %v9188_v62  ;;  %v13987_v38 = vld [vmem:[#allocation109_spill] sm:$0xff] }
 0x49b   :  { %v3567_v21 = vadd.f32 %v3566_v14, %v3312_v41  ;;  %v3316_v41 = vmul.f32 %v9578_v31, %v9578_v31  ;;  %13982 = vst [vmem:[#allocation78_spill] sm:$0xff] %v9602_v44  ;;  %v9608_v31 = vsub.f32 %v13983_v36, %v9188_v62  ;;  %v13989_v36 = vld [vmem:[#allocation110_spill] sm:$0xff] }
 0x49d   :  { %v3568_v22 = vadd.f32 %v3567_v21, %v3313_v59  ;;  %v3317_v59 = vmul.f32 %v9584_v46, %v9584_v46  ;;  %13984 = vst [vmem:[#allocation81_spill] sm:$0xff] %v9608_v31  ;;  %v9614_v46 = vsub.f32 %v13985_v12, %v9188_v62  ;;  %v13991_v12 = vld [vmem:[#allocation113_spill] sm:$0xff] }
 0x49f   :  { %v3569_v51 = vadd.f32 %v3568_v22, %v3314_v33  ;;  %v3318_v33 = vmul.f32 %v9590_v18, %v9590_v18  ;;  %13986 = vst [vmem:[#allocation82_spill] sm:$0xff] %v9614_v46  ;;  %v9620_v18 = vsub.f32 %v13987_v38, %v9188_v62  ;;  %v13993_v38 = vld [vmem:[#allocation114_spill] sm:$0xff] }
 0x4a1   :  { %v3570_v14 = vadd.f32 %v3569_v51, %v3315_v35  ;;  %v3319_v35 = vmul.f32 %v9596_v63, %v9596_v63  ;;  %13988 = vst [vmem:[#allocation85_spill] sm:$0xff] %v9620_v18  ;;  %v9626_v63 = vsub.f32 %v13989_v36, %v9188_v62  ;;  %v13995_v36 = vld [vmem:[#allocation117_spill] sm:$0xff] }
 0x4a3   :  { %v3571_v21 = vadd.f32 %v3570_v14, %v3316_v41  ;;  %v3320_v41 = vmul.f32 %v9602_v44, %v9602_v44  ;;  %13990 = vst [vmem:[#allocation86_spill] sm:$0xff] %v9626_v63  ;;  %v9632_v44 = vsub.f32 %v13991_v12, %v9188_v62  ;;  %v13997_v12 = vld [vmem:[#allocation118_spill] sm:$0xff] }
 0x4a5   :  { %v3572_v22 = vadd.f32 %v3571_v21, %v3317_v59  ;;  %v3321_v59 = vmul.f32 %v9608_v31, %v9608_v31  ;;  %13992 = vst [vmem:[#allocation89_spill] sm:$0xff] %v9632_v44  ;;  %v9638_v31 = vsub.f32 %v13993_v38, %v9188_v62  ;;  %v13999_v38 = vld [vmem:[#allocation121_spill] sm:$0xff] }
 0x4a7   :  { %v3573_v51 = vadd.f32 %v3572_v22, %v3318_v33  ;;  %v3322_v33 = vmul.f32 %v9614_v46, %v9614_v46  ;;  %13994 = vst [vmem:[#allocation90_spill] sm:$0xff] %v9638_v31  ;;  %v9644_v46 = vsub.f32 %v13995_v36, %v9188_v62  ;;  %v14001_v36 = vld [vmem:[#allocation122_spill] sm:$0xff] }
 0x4a9   :  { %v3574_v14 = vadd.f32 %v3573_v51, %v3319_v35  ;;  %v3323_v35 = vmul.f32 %v9620_v18, %v9620_v18  ;;  %13996 = vst [vmem:[#allocation93_spill] sm:$0xff] %v9644_v46  ;;  %v9650_v18 = vsub.f32 %v13997_v12, %v9188_v62  ;;  %v14003_v12 = vld [vmem:[#allocation125_spill] sm:$0xff] }
 0x4ab   :  { %v3575_v21 = vadd.f32 %v3574_v14, %v3320_v41  ;;  %v3324_v41 = vmul.f32 %v9626_v63, %v9626_v63  ;;  %13998 = vst [vmem:[#allocation94_spill] sm:$0xff] %v9650_v18  ;;  %v9656_v63 = vsub.f32 %v13999_v38, %v9188_v62  ;;  %v14005_v38 = vld [vmem:[#allocation126_spill] sm:$0xff] }
 0x4ad   :  { %v3576_v22 = vadd.f32 %v3575_v21, %v3321_v59  ;;  %v3325_v59 = vmul.f32 %v9632_v44, %v9632_v44  ;;  %14000 = vst [vmem:[#allocation97_spill] sm:$0xff] %v9656_v63  ;;  %v9662_v44 = vsub.f32 %v14001_v36, %v9188_v62  ;;  %v14007_v36 = vld [vmem:[#allocation129_spill] sm:$0xff] }
 0x4af   :  { %v3577_v51 = vadd.f32 %v3576_v22, %v3322_v33  ;;  %v3326_v33 = vmul.f32 %v9638_v31, %v9638_v31  ;;  %14002 = vst [vmem:[#allocation98_spill] sm:$0xff] %v9662_v44  ;;  %v9668_v31 = vsub.f32 %v14003_v12, %v9188_v62  ;;  %v14009_v12 = vld [vmem:[#allocation130_spill] sm:$0xff] }
 0x4b1   :  { %v3578_v14 = vadd.f32 %v3577_v51, %v3323_v35  ;;  %v3327_v35 = vmul.f32 %v9644_v46, %v9644_v46  ;;  %14004 = vst [vmem:[#allocation101_spill] sm:$0xff] %v9668_v31  ;;  %v9674_v46 = vsub.f32 %v14005_v38, %v9188_v62  ;;  %v14011_v38 = vld [vmem:[#allocation133_spill] sm:$0xff] }
 0x4b3   :  { %v3579_v21 = vadd.f32 %v3578_v14, %v3324_v41  ;;  %v3328_v41 = vmul.f32 %v9650_v18, %v9650_v18  ;;  %14006 = vst [vmem:[#allocation102_spill] sm:$0xff] %v9674_v46  ;;  %v9680_v18 = vsub.f32 %v14007_v36, %v9188_v62  ;;  %v14013_v36 = vld [vmem:[#allocation134_spill] sm:$0xff] }
 0x4b5   :  { %v3580_v22 = vadd.f32 %v3579_v21, %v3325_v59  ;;  %v3329_v59 = vmul.f32 %v9656_v63, %v9656_v63  ;;  %14008 = vst [vmem:[#allocation105_spill] sm:$0xff] %v9680_v18  ;;  %v9686_v63 = vsub.f32 %v14009_v12, %v9188_v62  ;;  %v14015_v12 = vld [vmem:[#allocation137_spill] sm:$0xff] }
 0x4b7   :  { %v3581_v51 = vadd.f32 %v3580_v22, %v3326_v33  ;;  %v3330_v33 = vmul.f32 %v9662_v44, %v9662_v44  ;;  %14010 = vst [vmem:[#allocation106_spill] sm:$0xff] %v9686_v63  ;;  %v9692_v44 = vsub.f32 %v14011_v38, %v9188_v62  ;;  %v14017_v38 = vld [vmem:[#allocation138_spill] sm:$0xff] }
 0x4b9   :  { %v3582_v14 = vadd.f32 %v3581_v51, %v3327_v35  ;;  %v3331_v35 = vmul.f32 %v9668_v31, %v9668_v31  ;;  %14012 = vst [vmem:[#allocation109_spill] sm:$0xff] %v9692_v44  ;;  %v9698_v31 = vsub.f32 %v14013_v36, %v9188_v62  ;;  %v14019_v36 = vld [vmem:[#allocation141_spill] sm:$0xff] }
 0x4bb   :  { %v3583_v21 = vadd.f32 %v3582_v14, %v3328_v41  ;;  %v3332_v41 = vmul.f32 %v9674_v46, %v9674_v46  ;;  %14014 = vst [vmem:[#allocation110_spill] sm:$0xff] %v9698_v31  ;;  %v9704_v46 = vsub.f32 %v14015_v12, %v9188_v62  ;;  %v14021_v12 = vld [vmem:[#allocation142_spill] sm:$0xff] }
 0x4bd   :  { %v3584_v22 = vadd.f32 %v3583_v21, %v3329_v59  ;;  %v3333_v59 = vmul.f32 %v9680_v18, %v9680_v18  ;;  %14016 = vst [vmem:[#allocation113_spill] sm:$0xff] %v9704_v46  ;;  %v9710_v18 = vsub.f32 %v14017_v38, %v9188_v62  ;;  %v14023_v38 = vld [vmem:[#allocation145_spill] sm:$0xff] }
 0x4bf   :  { %v3585_v51 = vadd.f32 %v3584_v22, %v3330_v33  ;;  %v3334_v33 = vmul.f32 %v9686_v63, %v9686_v63  ;;  %14018 = vst [vmem:[#allocation114_spill] sm:$0xff] %v9710_v18  ;;  %v9716_v63 = vsub.f32 %v14019_v36, %v9188_v62  ;;  %v14025_v36 = vld [vmem:[#allocation146_spill] sm:$0xff] }
 0x4c1   :  { %v3586_v14 = vadd.f32 %v3585_v51, %v3331_v35  ;;  %v3335_v35 = vmul.f32 %v9692_v44, %v9692_v44  ;;  %14020 = vst [vmem:[#allocation117_spill] sm:$0xff] %v9716_v63  ;;  %v9722_v44 = vsub.f32 %v14021_v12, %v9188_v62  ;;  %v14027_v12 = vld [vmem:[#allocation149_spill] sm:$0xff] }
 0x4c3   :  { %v3587_v21 = vadd.f32 %v3586_v14, %v3332_v41  ;;  %v3336_v41 = vmul.f32 %v9698_v31, %v9698_v31  ;;  %14022 = vst [vmem:[#allocation118_spill] sm:$0xff] %v9722_v44  ;;  %v9728_v31 = vsub.f32 %v14023_v38, %v9188_v62  ;;  %v14029_v38 = vld [vmem:[#allocation150_spill] sm:$0xff] }
 0x4c5   :  { %v3588_v22 = vadd.f32 %v3587_v21, %v3333_v59  ;;  %v3337_v59 = vmul.f32 %v9704_v46, %v9704_v46  ;;  %14024 = vst [vmem:[#allocation121_spill] sm:$0xff] %v9728_v31  ;;  %v9734_v46 = vsub.f32 %v14025_v36, %v9188_v62  ;;  %v14031_v36 = vld [vmem:[#allocation153_spill] sm:$0xff] }
 0x4c7   :  { %v3589_v51 = vadd.f32 %v3588_v22, %v3334_v33  ;;  %v3338_v33 = vmul.f32 %v9710_v18, %v9710_v18  ;;  %14026 = vst [vmem:[#allocation122_spill] sm:$0xff] %v9734_v46  ;;  %v9740_v18 = vsub.f32 %v14027_v12, %v9188_v62  ;;  %v14033_v12 = vld [vmem:[#allocation154_spill] sm:$0xff] }
 0x4c9   :  { %v3590_v14 = vadd.f32 %v3589_v51, %v3335_v35  ;;  %v3339_v35 = vmul.f32 %v9716_v63, %v9716_v63  ;;  %14028 = vst [vmem:[#allocation125_spill] sm:$0xff] %v9740_v18  ;;  %v9746_v63 = vsub.f32 %v14029_v38, %v9188_v62  ;;  %v14035_v38 = vld [vmem:[#allocation157_spill] sm:$0xff] }
 0x4cb   :  { %v3591_v21 = vadd.f32 %v3590_v14, %v3336_v41  ;;  %v3340_v41 = vmul.f32 %v9722_v44, %v9722_v44  ;;  %14030 = vst [vmem:[#allocation126_spill] sm:$0xff] %v9746_v63  ;;  %v9752_v44 = vsub.f32 %v14031_v36, %v9188_v62  ;;  %v14037_v36 = vld [vmem:[#allocation158_spill] sm:$0xff] }
 0x4cd   :  { %v3592_v22 = vadd.f32 %v3591_v21, %v3337_v59  ;;  %v3341_v59 = vmul.f32 %v9728_v31, %v9728_v31  ;;  %14032 = vst [vmem:[#allocation129_spill] sm:$0xff] %v9752_v44  ;;  %v9758_v31 = vsub.f32 %v14033_v12, %v9188_v62  ;;  %v14039_v12 = vld [vmem:[#allocation161_spill] sm:$0xff] }
 0x4cf   :  { %v3593_v51 = vadd.f32 %v3592_v22, %v3338_v33  ;;  %v3342_v33 = vmul.f32 %v9734_v46, %v9734_v46  ;;  %14034 = vst [vmem:[#allocation130_spill] sm:$0xff] %v9758_v31  ;;  %v9764_v46 = vsub.f32 %v14035_v38, %v9188_v62  ;;  %v14041_v38 = vld [vmem:[#allocation162_spill] sm:$0xff] }
 0x4d1   :  { %v3594_v14 = vadd.f32 %v3593_v51, %v3339_v35  ;;  %v3343_v35 = vmul.f32 %v9740_v18, %v9740_v18  ;;  %14036 = vst [vmem:[#allocation133_spill] sm:$0xff] %v9764_v46  ;;  %v9770_v18 = vsub.f32 %v14037_v36, %v9188_v62  ;;  %v14043_v36 = vld [vmem:[#allocation165_spill] sm:$0xff] }
 0x4d3   :  { %v3595_v21 = vadd.f32 %v3594_v14, %v3340_v41  ;;  %v3344_v41 = vmul.f32 %v9746_v63, %v9746_v63  ;;  %14038 = vst [vmem:[#allocation134_spill] sm:$0xff] %v9770_v18  ;;  %v9776_v63 = vsub.f32 %v14039_v12, %v9188_v62  ;;  %v14045_v12 = vld [vmem:[#allocation166_spill] sm:$0xff] }
 0x4d5   :  { %v3596_v22 = vadd.f32 %v3595_v21, %v3341_v59  ;;  %v3345_v59 = vmul.f32 %v9752_v44, %v9752_v44  ;;  %14040 = vst [vmem:[#allocation137_spill] sm:$0xff] %v9776_v63  ;;  %v9782_v44 = vsub.f32 %v14041_v38, %v9188_v62  ;;  %v14047_v38 = vld [vmem:[#allocation169_spill] sm:$0xff] }
 0x4d7   :  { %v3597_v51 = vadd.f32 %v3596_v22, %v3342_v33  ;;  %v3346_v33 = vmul.f32 %v9758_v31, %v9758_v31  ;;  %14042 = vst [vmem:[#allocation138_spill] sm:$0xff] %v9782_v44  ;;  %v9788_v31 = vsub.f32 %v14043_v36, %v9188_v62  ;;  %v14049_v36 = vld [vmem:[#allocation170_spill] sm:$0xff] }
 0x4d9   :  { %v3598_v14 = vadd.f32 %v3597_v51, %v3343_v35  ;;  %v3347_v35 = vmul.f32 %v9764_v46, %v9764_v46  ;;  %14044 = vst [vmem:[#allocation141_spill] sm:$0xff] %v9788_v31  ;;  %v9794_v46 = vsub.f32 %v14045_v12, %v9188_v62  ;;  %v14051_v12 = vld [vmem:[#allocation173_spill] sm:$0xff] }
 0x4db   :  { %v3599_v21 = vadd.f32 %v3598_v14, %v3344_v41  ;;  %v3348_v41 = vmul.f32 %v9770_v18, %v9770_v18  ;;  %14046 = vst [vmem:[#allocation142_spill] sm:$0xff] %v9794_v46  ;;  %v9800_v18 = vsub.f32 %v14047_v38, %v9188_v62  ;;  %v14053_v38 = vld [vmem:[#allocation174_spill] sm:$0xff] }
 0x4dd   :  { %v3600_v22 = vadd.f32 %v3599_v21, %v3345_v59  ;;  %v3349_v59 = vmul.f32 %v9776_v63, %v9776_v63  ;;  %14048 = vst [vmem:[#allocation145_spill] sm:$0xff] %v9800_v18  ;;  %v9806_v63 = vsub.f32 %v14049_v36, %v9188_v62  ;;  %v14055_v36 = vld [vmem:[#allocation177_spill] sm:$0xff] }
 0x4df   :  { %v3601_v51 = vadd.f32 %v3600_v22, %v3346_v33  ;;  %v3350_v33 = vmul.f32 %v9782_v44, %v9782_v44  ;;  %14050 = vst [vmem:[#allocation146_spill] sm:$0xff] %v9806_v63  ;;  %v9812_v44 = vsub.f32 %v14051_v12, %v9188_v62  ;;  %v14057_v12 = vld [vmem:[#allocation178_spill] sm:$0xff] }
 0x4e1   :  { %v3602_v14 = vadd.f32 %v3601_v51, %v3347_v35  ;;  %v3351_v35 = vmul.f32 %v9788_v31, %v9788_v31  ;;  %14052 = vst [vmem:[#allocation149_spill] sm:$0xff] %v9812_v44  ;;  %v9818_v31 = vsub.f32 %v14053_v38, %v9188_v62  ;;  %v14059_v38 = vld [vmem:[#allocation181_spill] sm:$0xff] }
 0x4e3   :  { %v3603_v21 = vadd.f32 %v3602_v14, %v3348_v41  ;;  %v3352_v41 = vmul.f32 %v9794_v46, %v9794_v46  ;;  %14054 = vst [vmem:[#allocation150_spill] sm:$0xff] %v9818_v31  ;;  %v9824_v46 = vsub.f32 %v14055_v36, %v9188_v62  ;;  %v14061_v36 = vld [vmem:[#allocation182_spill] sm:$0xff] }
 0x4e5   :  { %v3604_v22 = vadd.f32 %v3603_v21, %v3349_v59  ;;  %v3353_v59 = vmul.f32 %v9800_v18, %v9800_v18  ;;  %14056 = vst [vmem:[#allocation153_spill] sm:$0xff] %v9824_v46  ;;  %v9830_v18 = vsub.f32 %v14057_v12, %v9188_v62  ;;  %v14063_v12 = vld [vmem:[#allocation185_spill] sm:$0xff] }
 0x4e7   :  { %v3605_v51 = vadd.f32 %v3604_v22, %v3350_v33  ;;  %v3354_v33 = vmul.f32 %v9806_v63, %v9806_v63  ;;  %14058 = vst [vmem:[#allocation154_spill] sm:$0xff] %v9830_v18  ;;  %v9836_v63 = vsub.f32 %v14059_v38, %v9188_v62  ;;  %v14065_v38 = vld [vmem:[#allocation186_spill] sm:$0xff] }
 0x4e9   :  { %v3606_v14 = vadd.f32 %v3605_v51, %v3351_v35  ;;  %v3355_v35 = vmul.f32 %v9812_v44, %v9812_v44  ;;  %14060 = vst [vmem:[#allocation157_spill] sm:$0xff] %v9836_v63  ;;  %v9842_v44 = vsub.f32 %v14061_v36, %v9188_v62  ;;  %v14067_v36 = vld [vmem:[#allocation189_spill] sm:$0xff] }
 0x4eb   :  { %v3607_v21 = vadd.f32 %v3606_v14, %v3352_v41  ;;  %v3356_v41 = vmul.f32 %v9818_v31, %v9818_v31  ;;  %14062 = vst [vmem:[#allocation158_spill] sm:$0xff] %v9842_v44  ;;  %v9848_v31 = vsub.f32 %v14063_v12, %v9188_v62  ;;  %v14069_v12 = vld [vmem:[#allocation190_spill] sm:$0xff] }
 0x4ed   :  { %v3608_v22 = vadd.f32 %v3607_v21, %v3353_v59  ;;  %v3357_v59 = vmul.f32 %v9824_v46, %v9824_v46  ;;  %14064 = vst [vmem:[#allocation161_spill] sm:$0xff] %v9848_v31  ;;  %v9854_v46 = vsub.f32 %v14065_v38, %v9188_v62  ;;  %v14071_v38 = vld [vmem:[#allocation193_spill] sm:$0xff] }
 0x4ef   :  { %v3609_v51 = vadd.f32 %v3608_v22, %v3354_v33  ;;  %v3358_v33 = vmul.f32 %v9830_v18, %v9830_v18  ;;  %14066 = vst [vmem:[#allocation162_spill] sm:$0xff] %v9854_v46  ;;  %v9860_v18 = vsub.f32 %v14067_v36, %v9188_v62  ;;  %v14073_v36 = vld [vmem:[#allocation194_spill] sm:$0xff] }
 0x4f1   :  { %v3610_v14 = vadd.f32 %v3609_v51, %v3355_v35  ;;  %v3359_v35 = vmul.f32 %v9836_v63, %v9836_v63  ;;  %14068 = vst [vmem:[#allocation165_spill] sm:$0xff] %v9860_v18  ;;  %v9866_v63 = vsub.f32 %v14069_v12, %v9188_v62  ;;  %v14075_v12 = vld [vmem:[#allocation197_spill] sm:$0xff] }
 0x4f3   :  { %v3611_v21 = vadd.f32 %v3610_v14, %v3356_v41  ;;  %v3360_v41 = vmul.f32 %v9842_v44, %v9842_v44  ;;  %14070 = vst [vmem:[#allocation166_spill] sm:$0xff] %v9866_v63  ;;  %v9872_v44 = vsub.f32 %v14071_v38, %v9188_v62  ;;  %v14077_v38 = vld [vmem:[#allocation198_spill] sm:$0xff] }
 0x4f5   :  { %v3612_v22 = vadd.f32 %v3611_v21, %v3357_v59  ;;  %v3361_v59 = vmul.f32 %v9848_v31, %v9848_v31  ;;  %14072 = vst [vmem:[#allocation169_spill] sm:$0xff] %v9872_v44  ;;  %v9878_v31 = vsub.f32 %v14073_v36, %v9188_v62  ;;  %v14079_v36 = vld [vmem:[#allocation201_spill] sm:$0xff] }
 0x4f7   :  { %v3613_v51 = vadd.f32 %v3612_v22, %v3358_v33  ;;  %v3362_v33 = vmul.f32 %v9854_v46, %v9854_v46  ;;  %14074 = vst [vmem:[#allocation170_spill] sm:$0xff] %v9878_v31  ;;  %v9884_v46 = vsub.f32 %v14075_v12, %v9188_v62  ;;  %v14081_v12 = vld [vmem:[#allocation202_spill] sm:$0xff] }
 0x4f9   :  { %v3614_v14 = vadd.f32 %v3613_v51, %v3359_v35  ;;  %v3363_v35 = vmul.f32 %v9860_v18, %v9860_v18  ;;  %14076 = vst [vmem:[#allocation173_spill] sm:$0xff] %v9884_v46  ;;  %v9890_v18 = vsub.f32 %v14077_v38, %v9188_v62  ;;  %v14083_v38 = vld [vmem:[#allocation205_spill] sm:$0xff] }
 0x4fb   :  { %v3615_v21 = vadd.f32 %v3614_v14, %v3360_v41  ;;  %v3364_v41 = vmul.f32 %v9866_v63, %v9866_v63  ;;  %14078 = vst [vmem:[#allocation174_spill] sm:$0xff] %v9890_v18  ;;  %v9896_v63 = vsub.f32 %v14079_v36, %v9188_v62  ;;  %v14085_v36 = vld [vmem:[#allocation206_spill] sm:$0xff] }
 0x4fd   :  { %v3616_v22 = vadd.f32 %v3615_v21, %v3361_v59  ;;  %v3365_v59 = vmul.f32 %v9872_v44, %v9872_v44  ;;  %14080 = vst [vmem:[#allocation177_spill] sm:$0xff] %v9896_v63  ;;  %v9902_v44 = vsub.f32 %v14081_v12, %v9188_v62  ;;  %v14087_v12 = vld [vmem:[#allocation209_spill] sm:$0xff] }
 0x4ff   :  { %v3617_v51 = vadd.f32 %v3616_v22, %v3362_v33  ;;  %v3366_v33 = vmul.f32 %v9878_v31, %v9878_v31  ;;  %14082 = vst [vmem:[#allocation178_spill] sm:$0xff] %v9902_v44  ;;  %v9908_v31 = vsub.f32 %v14083_v38, %v9188_v62  ;;  %v14088_v38 = vld [vmem:[#allocation210_spill] sm:$0xff] }
 0x501   :  { %v3618_v14 = vadd.f32 %v3617_v51, %v3363_v35  ;;  %v3367_v35 = vmul.f32 %v9884_v46, %v9884_v46  ;;  %14084 = vst [vmem:[#allocation181_spill] sm:$0xff] %v9908_v31  ;;  %v9914_v46 = vsub.f32 %v14085_v36, %v9188_v62  ;;  %v14090_v36 = vld [vmem:[#allocation213_spill] sm:$0xff] }
 0x503   :  { %v3619_v21 = vadd.f32 %v3618_v14, %v3364_v41  ;;  %v3368_v41 = vmul.f32 %v9890_v18, %v9890_v18  ;;  %14086 = vst [vmem:[#allocation182_spill] sm:$0xff] %v9914_v46  ;;  %v9920_v18 = vsub.f32 %v14087_v12, %v9188_v62  ;;  %v14092_v12 = vld [vmem:[#allocation214_spill] sm:$0xff] }
 0x505   :  { %v3620_v22 = vadd.f32 %v3619_v21, %v3365_v59  ;;  %v3369_v59 = vmul.f32 %v9896_v63, %v9896_v63  ;;  %v9926_v63 = vsub.f32 %v14088_v38, %v9188_v62  ;;  %v14093_v38 = vld [vmem:[#allocation216_spill] sm:$0xff] }
 0x507   :  { %v3621_v51 = vadd.f32 %v3620_v22, %v3366_v33  ;;  %v3370_v33 = vmul.f32 %v9902_v44, %v9902_v44  ;;  %14089 = vst [vmem:[#allocation185_spill] sm:$0xff] %v9926_v63  ;;  %v9932_v44 = vsub.f32 %v14090_v36, %v9188_v62  ;;  %v9950_v36 = vsub.f32 %v8993_v5, %v9188_v62 }
 0x509   :  { %v3622_v14 = vadd.f32 %v3621_v51, %v3367_v35  ;;  %v3371_v35 = vmul.f32 %v9908_v31, %v9908_v31  ;;  %14091 = vst [vmem:[#allocation186_spill] sm:$0xff] %v9932_v44  ;;  %v9938_v31 = vsub.f32 %v14092_v12, %v9188_v62  ;;  %14094 = vst [vmem:[#allocation189_spill] sm:$0xff] %v9950_v36  ;;  %v14095_v12 = vld [vmem:[#allocation34_spill] sm:$0xff] }
 0x50a   :  { %v3378_v5 = vmul.f32 %v9950_v36, %v9950_v36 }
 0x50b   :  { %v3623_v21 = vadd.f32 %v3622_v14, %v3368_v41  ;;  %v3372_v41 = vmul.f32 %v9914_v46, %v9914_v46  ;;  %v9944_v46 = vsub.f32 %v14093_v38, %v9188_v62  ;;  %v14097_v38 = vld [vmem:[#allocation35_spill] sm:$0xff] }
 0x50d   :  { %v3624_v22 = vadd.f32 %v3623_v21, %v3369_v59  ;;  %v3373_v59 = vmul.f32 %v9920_v18, %v9920_v18 }
 0x50f   :  { %v3625_v51 = vadd.f32 %v3624_v22, %v3370_v33  ;;  %v3374_v33 = vmul.f32 %v9926_v63, %v9926_v63  ;;  %v9956_v63 = vsub.f32 %v14095_v12, %v9188_v62  ;;  %v9974_v12 = vsub.f32 %v8195_v4, %v9188_v62 }
 0x511   :  { %v3626_v14 = vadd.f32 %v3625_v51, %v3371_v35  ;;  %v3375_v35 = vmul.f32 %v9932_v44, %v9932_v44  ;;  %14096 = vst [vmem:[#allocation190_spill] sm:$0xff] %v9956_v63  ;;  %v9962_v44 = vsub.f32 %v14097_v38, %v9188_v62  ;;  %14098 = vst [vmem:[#allocation193_spill] sm:$0xff] %v9974_v12  ;;  %v14099_v38 = vld [vmem:[#allocation40_spill] sm:$0xff] }
 0x512   :  { %v9980_v36 = vsub.f32 %v14099_v38, %v9188_v62  ;;  %v3382_v4 = vmul.f32 %v9974_v12, %v9974_v12  ;;  %v9998_v38 = vsub.f32 %v8239_v10, %v9188_v62 }
 0x513   :  { %v3627_v21 = vadd.f32 %v3626_v14, %v3372_v41  ;;  %v3376_v41 = vmul.f32 %v9938_v31, %v9938_v31 }
 0x514   :  { %14100 = vst [vmem:[#allocation194_spill] sm:$0xff] %v9980_v36  ;;  %14102 = vst [vmem:[#allocation197_spill] sm:$0xff] %v9998_v38  ;;  %v3386_v10 = vmul.f32 %v9998_v38, %v9998_v38 }
 0x515   :  { %v3628_v22 = vadd.f32 %v3627_v21, %v3373_v59  ;;  %v3377_v59 = vmul.f32 %v9944_v46, %v9944_v46 }
 0x517   :  { %v3629_v51 = vadd.f32 %v3628_v22, %v3374_v33  ;;  %v9968_v22 = vsub.f32 %v8193_v2, %v9188_v62 }
 0x519   :  { %v3630_v14 = vadd.f32 %v3629_v51, %v3375_v35  ;;  %v3379_v35 = vmul.f32 %v9956_v63, %v9956_v63  ;;  %v3381_v2 = vmul.f32 %v9968_v22, %v9968_v22 }
 0x51b   :  { %v3631_v21 = vadd.f32 %v3630_v14, %v3376_v41  ;;  %v3380_v41 = vmul.f32 %v9962_v44, %v9962_v44 }
 0x51d   :  { %v3632_v33 = vadd.f32 %v3631_v21, %v3377_v59  ;;  %v14101_v21 = vld [vmem:[#allocation41_spill] sm:$0xff] }
 0x51e   :  { %v9986_v63 = vsub.f32 %v14101_v21, %v9188_v62  ;;  %v14103_v21 = vld [vmem:[#allocation46_spill] sm:$0xff] }
 0x51f   :  { %v3633_v51 = vadd.f32 %v3632_v33, %v3378_v5  ;;  %v9992_v33 = vsub.f32 %v8237_v3, %v9188_v62  ;;  %v10004_v12 = vsub.f32 %v14103_v21, %v9188_v62  ;;  %v10022_v21 = vsub.f32 %v8283_v52, %v9188_v62 }
 0x521   :  { %v3634_v14 = vadd.f32 %v3633_v51, %v3379_v35  ;;  %v3383_v35 = vmul.f32 %v9980_v36, %v9980_v36  ;;  %14104 = vst [vmem:[#allocation198_spill] sm:$0xff] %v10004_v12  ;;  %v3385_v3 = vmul.f32 %v9992_v33, %v9992_v33  ;;  %14107 = vst [vmem:[#allocation202_spill] sm:$0xff] %v10022_v21 }
 0x522   :  { %v3390_v52 = vmul.f32 %v10022_v21, %v10022_v21 }
 0x523   :  { %v3635_v59 = vadd.f32 %v3634_v14, %v3380_v41  ;;  %v3384_v41 = vmul.f32 %v9986_v63, %v9986_v63 }
 0x525   :  { %v3636_v5 = vadd.f32 %v3635_v59, %v3381_v2  ;;  %v14105_v59 = vld [vmem:[#allocation47_spill] sm:$0xff] }
 0x526   :  { %v10010_v36 = vsub.f32 %v14105_v59, %v9188_v62  ;;  %v14108_v59 = vld [vmem:[#allocation52_spill] sm:$0xff] }
 0x527   :  { %v3637_v51 = vadd.f32 %v3636_v5, %v3382_v4  ;;  %v10016_v5 = vsub.f32 %v8281_v48, %v9188_v62  ;;  %v10028_v38 = vsub.f32 %v14108_v59, %v9188_v62  ;;  %v14113_v59 = vld [vmem:[#allocation56_spill] sm:$0xff] }
 0x529   :  { %v3638_v14 = vadd.f32 %v3637_v51, %v3383_v35  ;;  %14106 = vst [vmem:[#allocation201_spill] sm:$0xff] %v10016_v5  ;;  %v3387_v35 = vmul.f32 %v10004_v12, %v10004_v12  ;;  %14109 = vst [vmem:[#allocation205_spill] sm:$0xff] %v10028_v38  ;;  %v3389_v48 = vmul.f32 %v10016_v5, %v10016_v5 }
 0x52a   :  { %v10046_v5 = vsub.f32 %v14113_v59, %v9188_v62  ;;  %v14119_v59 = vld [vmem:[#allocation63_spill] sm:$0xff] }
 0x52b   :  { %v3639_v2 = vadd.f32 %v3638_v14, %v3384_v41  ;;  %v3388_v41 = vmul.f32 %v10010_v36, %v10010_v36 }
 0x52c   :  { %14114 = vst [vmem:[#allocation210_spill] sm:$0xff] %v10046_v5 }
 0x52d   :  { %v3640_v4 = vadd.f32 %v3639_v2, %v3385_v3  ;;  %v14110_v2 = vld [vmem:[#allocation53_spill] sm:$0xff] }
 0x52e   :  { %v10034_v12 = vsub.f32 %v14110_v2, %v9188_v62  ;;  %v14115_v2 = vld [vmem:[#allocation59_spill] sm:$0xff] }
 0x52f   :  { %v3641_v51 = vadd.f32 %v3640_v4, %v3386_v10  ;;  %v10040_v4 = vsub.f32 %v8325_v15, %v9188_v62  ;;  %v10052_v21 = vsub.f32 %v14115_v2, %v9188_v62  ;;  %v14121_v2 = vld [vmem:[#allocation64_spill] sm:$0xff] }
 0x530   :  { %14111 = vst [vmem:[#allocation206_spill] sm:$0xff] %v10034_v12 }
 0x531   :  { %v3642_v14 = vadd.f32 %v3641_v51, %v3387_v35  ;;  %14112 = vst [vmem:[#allocation209_spill] sm:$0xff] %v10040_v4  ;;  %v3391_v35 = vmul.f32 %v10028_v38, %v10028_v38  ;;  %14116 = vst [vmem:[#allocation213_spill] sm:$0xff] %v10052_v21  ;;  %v3393_v15 = vmul.f32 %v10040_v4, %v10040_v4 }
 0x532   :  { %v10070_v4 = vsub.f32 %v14121_v2, %v9188_v62  ;;  %v14127_v2 = vld [vmem:[#allocation71_spill] sm:$0xff] }
 0x533   :  { %v3643_v3 = vadd.f32 %v3642_v14, %v3388_v41  ;;  %v3392_v41 = vmul.f32 %v10034_v12, %v10034_v12  ;;  %v10064_v12 = vsub.f32 %v14119_v59, %v9188_v62  ;;  %v14125_v59 = vld [vmem:[#allocation68_spill] sm:$0xff] }
 0x534   :  { %14122 = vst [vmem:[#allocation34_spill] sm:$0xff] %v10070_v4 }
 0x535   :  { %v3644_v10 = vadd.f32 %v3643_v3, %v3389_v48  ;;  %v14117_v3 = vld [vmem:[#allocation60_spill] sm:$0xff]  ;;  %14120 = vst [vmem:[#allocation216_spill] sm:$0xff] %v10064_v12 }
 0x536   :  { %v10058_v38 = vsub.f32 %v14117_v3, %v9188_v62  ;;  %v14123_v3 = vld [vmem:[#allocation67_spill] sm:$0xff] }
 0x537   :  { %v3645_v51 = vadd.f32 %v3644_v10, %v3390_v52  ;;  %v3394_v52 = vmul.f32 %v10046_v5, %v10046_v5  ;;  %v10076_v5 = vsub.f32 %v14123_v3, %v9188_v62  ;;  %v14129_v3 = vld [vmem:[#allocation72_spill] sm:$0xff] }
 0x538   :  { %14118 = vst [vmem:[#allocation214_spill] sm:$0xff] %v10058_v38 }
 0x539   :  { %v3646_v14 = vadd.f32 %v3645_v51, %v3391_v35  ;;  %v3395_v35 = vmul.f32 %v10052_v21, %v10052_v21  ;;  %14124 = vst [vmem:[#allocation35_spill] sm:$0xff] %v10076_v5  ;;  %v10082_v21 = vsub.f32 %v14125_v59, %v9188_v62  ;;  %v14131_v59 = vld [vmem:[#allocation75_spill] sm:$0xff] }
 0x53b   :  { %v3647_v48 = vadd.f32 %v3646_v14, %v3392_v41  ;;  %v3396_v41 = vmul.f32 %v10058_v38, %v10058_v38  ;;  %14126 = vst [vmem:[#allocation40_spill] sm:$0xff] %v10082_v21  ;;  %v10088_v38 = vsub.f32 %v14127_v2, %v9188_v62  ;;  %v14133_v2 = vld [vmem:[#allocation76_spill] sm:$0xff] }
 0x53d   :  { %v3648_v10 = vadd.f32 %v3647_v48, %v3393_v15  ;;  %v3397_v15 = vmul.f32 %v10064_v12, %v10064_v12  ;;  %14128 = vst [vmem:[#allocation41_spill] sm:$0xff] %v10088_v38  ;;  %v10094_v12 = vsub.f32 %v14129_v3, %v9188_v62  ;;  %v14135_v3 = vld [vmem:[#allocation79_spill] sm:$0xff] }
 0x53f   :  { %v3649_v51 = vadd.f32 %v3648_v10, %v3394_v52  ;;  %v3398_v52 = vmul.f32 %v10070_v4, %v10070_v4  ;;  %14130 = vst [vmem:[#allocation46_spill] sm:$0xff] %v10094_v12  ;;  %v10100_v4 = vsub.f32 %v14131_v59, %v9188_v62  ;;  %v14137_v59 = vld [vmem:[#allocation80_spill] sm:$0xff] }
 0x541   :  { %v3650_v14 = vadd.f32 %v3649_v51, %v3395_v35  ;;  %v3399_v35 = vmul.f32 %v10076_v5, %v10076_v5  ;;  %14132 = vst [vmem:[#allocation47_spill] sm:$0xff] %v10100_v4  ;;  %v10106_v5 = vsub.f32 %v14133_v2, %v9188_v62  ;;  %v14139_v2 = vld [vmem:[#allocation83_spill] sm:$0xff] }
 0x543   :  { %v3651_v48 = vadd.f32 %v3650_v14, %v3396_v41  ;;  %v3400_v41 = vmul.f32 %v10082_v21, %v10082_v21  ;;  %14134 = vst [vmem:[#allocation52_spill] sm:$0xff] %v10106_v5  ;;  %v10112_v21 = vsub.f32 %v14135_v3, %v9188_v62  ;;  %v14141_v3 = vld [vmem:[#allocation84_spill] sm:$0xff] }
 0x545   :  { %v3652_v10 = vadd.f32 %v3651_v48, %v3397_v15  ;;  %v3401_v15 = vmul.f32 %v10088_v38, %v10088_v38  ;;  %14136 = vst [vmem:[#allocation53_spill] sm:$0xff] %v10112_v21  ;;  %v10118_v38 = vsub.f32 %v14137_v59, %v9188_v62  ;;  %v14143_v59 = vld [vmem:[#allocation87_spill] sm:$0xff] }
 0x547   :  { %v3653_v51 = vadd.f32 %v3652_v10, %v3398_v52  ;;  %v3402_v52 = vmul.f32 %v10094_v12, %v10094_v12  ;;  %14138 = vst [vmem:[#allocation56_spill] sm:$0xff] %v10118_v38  ;;  %v10124_v12 = vsub.f32 %v14139_v2, %v9188_v62  ;;  %v14145_v2 = vld [vmem:[#allocation88_spill] sm:$0xff] }
 0x549   :  { %v3654_v14 = vadd.f32 %v3653_v51, %v3399_v35  ;;  %v3403_v35 = vmul.f32 %v10100_v4, %v10100_v4  ;;  %14140 = vst [vmem:[#allocation59_spill] sm:$0xff] %v10124_v12  ;;  %v10130_v4 = vsub.f32 %v14141_v3, %v9188_v62  ;;  %v14147_v3 = vld [vmem:[#allocation91_spill] sm:$0xff] }
 0x54b   :  { %v3655_v48 = vadd.f32 %v3654_v14, %v3400_v41  ;;  %v3404_v41 = vmul.f32 %v10106_v5, %v10106_v5  ;;  %14142 = vst [vmem:[#allocation60_spill] sm:$0xff] %v10130_v4  ;;  %v10136_v5 = vsub.f32 %v14143_v59, %v9188_v62  ;;  %v14149_v59 = vld [vmem:[#allocation92_spill] sm:$0xff] }
 0x54d   :  { %v3656_v10 = vadd.f32 %v3655_v48, %v3401_v15  ;;  %v3405_v15 = vmul.f32 %v10112_v21, %v10112_v21  ;;  %14144 = vst [vmem:[#allocation63_spill] sm:$0xff] %v10136_v5  ;;  %v10142_v21 = vsub.f32 %v14145_v2, %v9188_v62  ;;  %v14151_v2 = vld [vmem:[#allocation95_spill] sm:$0xff] }
 0x54f   :  { %v3657_v51 = vadd.f32 %v3656_v10, %v3402_v52  ;;  %v3406_v52 = vmul.f32 %v10118_v38, %v10118_v38  ;;  %14146 = vst [vmem:[#allocation64_spill] sm:$0xff] %v10142_v21  ;;  %v10148_v38 = vsub.f32 %v14147_v3, %v9188_v62  ;;  %v14153_v3 = vld [vmem:[#allocation96_spill] sm:$0xff] }
 0x551   :  { %v3658_v14 = vadd.f32 %v3657_v51, %v3403_v35  ;;  %v3407_v35 = vmul.f32 %v10124_v12, %v10124_v12  ;;  %14148 = vst [vmem:[#allocation67_spill] sm:$0xff] %v10148_v38  ;;  %v10154_v12 = vsub.f32 %v14149_v59, %v9188_v62  ;;  %v14155_v59 = vld [vmem:[#allocation99_spill] sm:$0xff] }
 0x553   :  { %v3659_v48 = vadd.f32 %v3658_v14, %v3404_v41  ;;  %v3408_v41 = vmul.f32 %v10130_v4, %v10130_v4  ;;  %14150 = vst [vmem:[#allocation68_spill] sm:$0xff] %v10154_v12  ;;  %v10160_v4 = vsub.f32 %v14151_v2, %v9188_v62  ;;  %v14157_v2 = vld [vmem:[#allocation100_spill] sm:$0xff] }
 0x555   :  { %v3660_v10 = vadd.f32 %v3659_v48, %v3405_v15  ;;  %v3409_v15 = vmul.f32 %v10136_v5, %v10136_v5  ;;  %14152 = vst [vmem:[#allocation71_spill] sm:$0xff] %v10160_v4  ;;  %v10166_v5 = vsub.f32 %v14153_v3, %v9188_v62  ;;  %v14159_v3 = vld [vmem:[#allocation103_spill] sm:$0xff] }
 0x557   :  { %v3661_v51 = vadd.f32 %v3660_v10, %v3406_v52  ;;  %v3410_v52 = vmul.f32 %v10142_v21, %v10142_v21  ;;  %14154 = vst [vmem:[#allocation72_spill] sm:$0xff] %v10166_v5  ;;  %v10172_v21 = vsub.f32 %v14155_v59, %v9188_v62  ;;  %v14161_v59 = vld [vmem:[#allocation104_spill] sm:$0xff] }
 0x559   :  { %v3662_v14 = vadd.f32 %v3661_v51, %v3407_v35  ;;  %v3411_v35 = vmul.f32 %v10148_v38, %v10148_v38  ;;  %14156 = vst [vmem:[#allocation75_spill] sm:$0xff] %v10172_v21  ;;  %v10178_v38 = vsub.f32 %v14157_v2, %v9188_v62  ;;  %v14163_v2 = vld [vmem:[#allocation107_spill] sm:$0xff] }
 0x55b   :  { %v3663_v48 = vadd.f32 %v3662_v14, %v3408_v41  ;;  %v3412_v41 = vmul.f32 %v10154_v12, %v10154_v12  ;;  %14158 = vst [vmem:[#allocation76_spill] sm:$0xff] %v10178_v38  ;;  %v10184_v12 = vsub.f32 %v14159_v3, %v9188_v62  ;;  %v14165_v3 = vld [vmem:[#allocation108_spill] sm:$0xff] }
 0x55d   :  { %v3664_v10 = vadd.f32 %v3663_v48, %v3409_v15  ;;  %v3413_v15 = vmul.f32 %v10160_v4, %v10160_v4  ;;  %14160 = vst [vmem:[#allocation79_spill] sm:$0xff] %v10184_v12  ;;  %v10190_v4 = vsub.f32 %v14161_v59, %v9188_v62  ;;  %v14167_v59 = vld [vmem:[#allocation111_spill] sm:$0xff] }
 0x55f   :  { %v3665_v51 = vadd.f32 %v3664_v10, %v3410_v52  ;;  %v3414_v52 = vmul.f32 %v10166_v5, %v10166_v5  ;;  %14162 = vst [vmem:[#allocation80_spill] sm:$0xff] %v10190_v4  ;;  %v10196_v5 = vsub.f32 %v14163_v2, %v9188_v62  ;;  %v14169_v2 = vld [vmem:[#allocation112_spill] sm:$0xff] }
 0x561   :  { %v3666_v14 = vadd.f32 %v3665_v51, %v3411_v35  ;;  %v3415_v35 = vmul.f32 %v10172_v21, %v10172_v21  ;;  %14164 = vst [vmem:[#allocation83_spill] sm:$0xff] %v10196_v5  ;;  %v10202_v21 = vsub.f32 %v14165_v3, %v9188_v62  ;;  %v14171_v3 = vld [vmem:[#allocation115_spill] sm:$0xff] }
 0x563   :  { %v3667_v48 = vadd.f32 %v3666_v14, %v3412_v41  ;;  %v3416_v41 = vmul.f32 %v10178_v38, %v10178_v38  ;;  %14166 = vst [vmem:[#allocation84_spill] sm:$0xff] %v10202_v21  ;;  %v10208_v38 = vsub.f32 %v14167_v59, %v9188_v62  ;;  %v14173_v59 = vld [vmem:[#allocation116_spill] sm:$0xff] }
 0x565   :  { %v3668_v10 = vadd.f32 %v3667_v48, %v3413_v15  ;;  %v3417_v15 = vmul.f32 %v10184_v12, %v10184_v12  ;;  %14168 = vst [vmem:[#allocation87_spill] sm:$0xff] %v10208_v38  ;;  %v10214_v12 = vsub.f32 %v14169_v2, %v9188_v62  ;;  %v14175_v2 = vld [vmem:[#allocation119_spill] sm:$0xff] }
 0x567   :  { %v3669_v51 = vadd.f32 %v3668_v10, %v3414_v52  ;;  %v3418_v52 = vmul.f32 %v10190_v4, %v10190_v4  ;;  %14170 = vst [vmem:[#allocation88_spill] sm:$0xff] %v10214_v12  ;;  %v10220_v4 = vsub.f32 %v14171_v3, %v9188_v62  ;;  %v14177_v3 = vld [vmem:[#allocation120_spill] sm:$0xff] }
 0x569   :  { %v3670_v14 = vadd.f32 %v3669_v51, %v3415_v35  ;;  %v3419_v35 = vmul.f32 %v10196_v5, %v10196_v5  ;;  %14172 = vst [vmem:[#allocation91_spill] sm:$0xff] %v10220_v4  ;;  %v10226_v5 = vsub.f32 %v14173_v59, %v9188_v62  ;;  %v14179_v59 = vld [vmem:[#allocation123_spill] sm:$0xff] }
 0x56b   :  { %v3671_v48 = vadd.f32 %v3670_v14, %v3416_v41  ;;  %v3420_v41 = vmul.f32 %v10202_v21, %v10202_v21  ;;  %14174 = vst [vmem:[#allocation92_spill] sm:$0xff] %v10226_v5  ;;  %v10232_v21 = vsub.f32 %v14175_v2, %v9188_v62  ;;  %v14181_v2 = vld [vmem:[#allocation124_spill] sm:$0xff] }
 0x56d   :  { %v3672_v10 = vadd.f32 %v3671_v48, %v3417_v15  ;;  %v3421_v15 = vmul.f32 %v10208_v38, %v10208_v38  ;;  %14176 = vst [vmem:[#allocation95_spill] sm:$0xff] %v10232_v21  ;;  %v10238_v38 = vsub.f32 %v14177_v3, %v9188_v62  ;;  %v14183_v3 = vld [vmem:[#allocation127_spill] sm:$0xff] }
 0x56f   :  { %v3673_v51 = vadd.f32 %v3672_v10, %v3418_v52  ;;  %v3422_v52 = vmul.f32 %v10214_v12, %v10214_v12  ;;  %14178 = vst [vmem:[#allocation96_spill] sm:$0xff] %v10238_v38  ;;  %v10244_v12 = vsub.f32 %v14179_v59, %v9188_v62  ;;  %v14185_v59 = vld [vmem:[#allocation128_spill] sm:$0xff] }
 0x571   :  { %v3674_v14 = vadd.f32 %v3673_v51, %v3419_v35  ;;  %v3423_v35 = vmul.f32 %v10220_v4, %v10220_v4  ;;  %14180 = vst [vmem:[#allocation99_spill] sm:$0xff] %v10244_v12  ;;  %v10250_v4 = vsub.f32 %v14181_v2, %v9188_v62  ;;  %v14187_v2 = vld [vmem:[#allocation131_spill] sm:$0xff] }
 0x573   :  { %v3675_v48 = vadd.f32 %v3674_v14, %v3420_v41  ;;  %v3424_v41 = vmul.f32 %v10226_v5, %v10226_v5  ;;  %14182 = vst [vmem:[#allocation100_spill] sm:$0xff] %v10250_v4  ;;  %v10256_v5 = vsub.f32 %v14183_v3, %v9188_v62  ;;  %v14189_v3 = vld [vmem:[#allocation132_spill] sm:$0xff] }
 0x575   :  { %v3676_v10 = vadd.f32 %v3675_v48, %v3421_v15  ;;  %v3425_v15 = vmul.f32 %v10232_v21, %v10232_v21  ;;  %14184 = vst [vmem:[#allocation103_spill] sm:$0xff] %v10256_v5  ;;  %v10262_v21 = vsub.f32 %v14185_v59, %v9188_v62  ;;  %v14191_v59 = vld [vmem:[#allocation135_spill] sm:$0xff] }
 0x577   :  { %v3677_v51 = vadd.f32 %v3676_v10, %v3422_v52  ;;  %v3426_v52 = vmul.f32 %v10238_v38, %v10238_v38  ;;  %14186 = vst [vmem:[#allocation104_spill] sm:$0xff] %v10262_v21  ;;  %v10268_v38 = vsub.f32 %v14187_v2, %v9188_v62  ;;  %v14193_v2 = vld [vmem:[#allocation136_spill] sm:$0xff] }
 0x579   :  { %v3678_v14 = vadd.f32 %v3677_v51, %v3423_v35  ;;  %v3427_v35 = vmul.f32 %v10244_v12, %v10244_v12  ;;  %14188 = vst [vmem:[#allocation107_spill] sm:$0xff] %v10268_v38  ;;  %v10274_v12 = vsub.f32 %v14189_v3, %v9188_v62  ;;  %v14195_v3 = vld [vmem:[#allocation139_spill] sm:$0xff] }
 0x57b   :  { %v3679_v48 = vadd.f32 %v3678_v14, %v3424_v41  ;;  %v3428_v41 = vmul.f32 %v10250_v4, %v10250_v4  ;;  %14190 = vst [vmem:[#allocation108_spill] sm:$0xff] %v10274_v12  ;;  %v10280_v4 = vsub.f32 %v14191_v59, %v9188_v62  ;;  %v14197_v59 = vld [vmem:[#allocation140_spill] sm:$0xff] }
 0x57d   :  { %v3680_v10 = vadd.f32 %v3679_v48, %v3425_v15  ;;  %v3429_v15 = vmul.f32 %v10256_v5, %v10256_v5  ;;  %14192 = vst [vmem:[#allocation111_spill] sm:$0xff] %v10280_v4  ;;  %v10286_v5 = vsub.f32 %v14193_v2, %v9188_v62  ;;  %v14199_v2 = vld [vmem:[#allocation143_spill] sm:$0xff] }
 0x57f   :  { %v3681_v51 = vadd.f32 %v3680_v10, %v3426_v52  ;;  %v3430_v52 = vmul.f32 %v10262_v21, %v10262_v21  ;;  %14194 = vst [vmem:[#allocation112_spill] sm:$0xff] %v10286_v5  ;;  %v10292_v21 = vsub.f32 %v14195_v3, %v9188_v62  ;;  %v14200_v3 = vld [vmem:[#allocation144_spill] sm:$0xff] }
 0x581   :  { %v3682_v14 = vadd.f32 %v3681_v51, %v3427_v35  ;;  %v3431_v35 = vmul.f32 %v10268_v38, %v10268_v38  ;;  %14196 = vst [vmem:[#allocation115_spill] sm:$0xff] %v10292_v21  ;;  %v10298_v38 = vsub.f32 %v14197_v59, %v9188_v62  ;;  %v14202_v59 = vld [vmem:[#allocation147_spill] sm:$0xff] }
 0x583   :  { %v3683_v48 = vadd.f32 %v3682_v14, %v3428_v41  ;;  %v3432_v41 = vmul.f32 %v10274_v12, %v10274_v12  ;;  %14198 = vst [vmem:[#allocation116_spill] sm:$0xff] %v10298_v38  ;;  %v10304_v12 = vsub.f32 %v14199_v2, %v9188_v62  ;;  %v14204_v2 = vld [vmem:[#allocation148_spill] sm:$0xff] }
 0x585   :  { %v3684_v10 = vadd.f32 %v3683_v48, %v3429_v15  ;;  %v3433_v15 = vmul.f32 %v10280_v4, %v10280_v4  ;;  %v10310_v4 = vsub.f32 %v14200_v3, %v9188_v62  ;;  %v14206_v3 = vld [vmem:[#allocation151_spill] sm:$0xff] }
 0x587   :  { %v3685_v51 = vadd.f32 %v3684_v10, %v3430_v52  ;;  %v3434_v52 = vmul.f32 %v10286_v5, %v10286_v5  ;;  %14201 = vst [vmem:[#allocation119_spill] sm:$0xff] %v10310_v4  ;;  %v10316_v5 = vsub.f32 %v14202_v59, %v9188_v62  ;;  %v10334_v59 = vsub.f32 %v13812_v57, %v9188_v62 }
 0x589   :  { %v3686_v14 = vadd.f32 %v3685_v51, %v3431_v35  ;;  %v3435_v35 = vmul.f32 %v10292_v21, %v10292_v21  ;;  %14203 = vst [vmem:[#allocation120_spill] sm:$0xff] %v10316_v5  ;;  %v10322_v21 = vsub.f32 %v14204_v2, %v9188_v62  ;;  %14208 = vst [vmem:[#allocation127_spill] sm:$0xff] %v10334_v59  ;;  %v14209_v2 = vld [vmem:[#allocation155_spill] sm:$0xff] }
 0x58a   :  { %v3442_v57 = vmul.f32 %v10334_v59, %v10334_v59 }
 0x58b   :  { %v3687_v48 = vadd.f32 %v3686_v14, %v3432_v41  ;;  %v3436_v41 = vmul.f32 %v10298_v38, %v10298_v38  ;;  %14205 = vst [vmem:[#allocation123_spill] sm:$0xff] %v10322_v21  ;;  %v10328_v38 = vsub.f32 %v14206_v3, %v9188_v62  ;;  %v14211_v3 = vld [vmem:[#allocation156_spill] sm:$0xff] }
 0x58d   :  { %v3688_v10 = vadd.f32 %v3687_v48, %v3433_v15  ;;  %v3437_v15 = vmul.f32 %v10304_v12, %v10304_v12  ;;  %14207 = vst [vmem:[#allocation124_spill] sm:$0xff] %v10328_v38 }
 0x58f   :  { %v3689_v51 = vadd.f32 %v3688_v10, %v3434_v52  ;;  %v3438_v52 = vmul.f32 %v10310_v4, %v10310_v4  ;;  %v10340_v4 = vsub.f32 %v14209_v2, %v9188_v62  ;;  %v14215_v2 = vld [vmem:[#allocation160_spill] sm:$0xff] }
 0x591   :  { %v3690_v14 = vadd.f32 %v3689_v51, %v3435_v35  ;;  %v3439_v35 = vmul.f32 %v10316_v5, %v10316_v5  ;;  %14210 = vst [vmem:[#allocation128_spill] sm:$0xff] %v10340_v4  ;;  %v10346_v5 = vsub.f32 %v14211_v3, %v9188_v62  ;;  %v14217_v3 = vld [vmem:[#allocation163_spill] sm:$0xff] }
 0x592   :  { %v10364_v59 = vsub.f32 %v14217_v3, %v9188_v62  ;;  %v14223_v3 = vld [vmem:[#allocation168_spill] sm:$0xff] }
 0x593   :  { %v3691_v48 = vadd.f32 %v3690_v14, %v3436_v41  ;;  %v3440_v41 = vmul.f32 %v10322_v21, %v10322_v21  ;;  %14212 = vst [vmem:[#allocation131_spill] sm:$0xff] %v10346_v5 }
 0x594   :  { %14218 = vst [vmem:[#allocation136_spill] sm:$0xff] %v10364_v59 }
 0x595   :  { %v3692_v10 = vadd.f32 %v3691_v48, %v3437_v15  ;;  %v3441_v15 = vmul.f32 %v10328_v38, %v10328_v38  ;;  %v10358_v38 = vsub.f32 %v14215_v2, %v9188_v62  ;;  %v14221_v2 = vld [vmem:[#allocation167_spill] sm:$0xff] }
 0x597   :  { %v3693_v51 = vadd.f32 %v3692_v10, %v3438_v52  ;;  %v14213_v10 = vld [vmem:[#allocation159_spill] sm:$0xff]  ;;  %14216 = vst [vmem:[#allocation135_spill] sm:$0xff] %v10358_v38 }
 0x598   :  { %v10352_v21 = vsub.f32 %v14213_v10, %v9188_v62  ;;  %v14219_v10 = vld [vmem:[#allocation164_spill] sm:$0xff] }
 0x599   :  { %v3694_v14 = vadd.f32 %v3693_v51, %v3439_v35  ;;  %v3443_v35 = vmul.f32 %v10340_v4, %v10340_v4  ;;  %v10370_v4 = vsub.f32 %v14219_v10, %v9188_v62  ;;  %v14225_v10 = vld [vmem:[#allocation171_spill] sm:$0xff] }
 0x59a   :  { %14214 = vst [vmem:[#allocation132_spill] sm:$0xff] %v10352_v21 }
 0x59b   :  { %v3695_v48 = vadd.f32 %v3694_v14, %v3440_v41  ;;  %v3444_v41 = vmul.f32 %v10346_v5, %v10346_v5  ;;  %14220 = vst [vmem:[#allocation139_spill] sm:$0xff] %v10370_v4  ;;  %v10376_v5 = vsub.f32 %v14221_v2, %v9188_v62  ;;  %v14227_v2 = vld [vmem:[#allocation172_spill] sm:$0xff] }
 0x59d   :  { %v3696_v52 = vadd.f32 %v3695_v48, %v3441_v15  ;;  %v3445_v15 = vmul.f32 %v10352_v21, %v10352_v21  ;;  %14222 = vst [vmem:[#allocation140_spill] sm:$0xff] %v10376_v5  ;;  %v10382_v21 = vsub.f32 %v14223_v3, %v9188_v62  ;;  %v14229_v3 = vld [vmem:[#allocation175_spill] sm:$0xff] }
 0x59f   :  { %v3697_v51 = vadd.f32 %v3696_v52, %v3442_v57  ;;  %v3446_v57 = vmul.f32 %v10358_v38, %v10358_v38  ;;  %14224 = vst [vmem:[#allocation143_spill] sm:$0xff] %v10382_v21  ;;  %v10388_v38 = vsub.f32 %v14225_v10, %v9188_v62  ;;  %v14231_v10 = vld [vmem:[#allocation176_spill] sm:$0xff] }
 0x5a1   :  { %v3698_v14 = vadd.f32 %v3697_v51, %v3443_v35  ;;  %v3447_v35 = vmul.f32 %v10364_v59, %v10364_v59  ;;  %14226 = vst [vmem:[#allocation144_spill] sm:$0xff] %v10388_v38  ;;  %v10394_v59 = vsub.f32 %v14227_v2, %v9188_v62  ;;  %v14233_v2 = vld [vmem:[#allocation179_spill] sm:$0xff] }
 0x5a3   :  { %v3699_v48 = vadd.f32 %v3698_v14, %v3444_v41  ;;  %v3448_v41 = vmul.f32 %v10370_v4, %v10370_v4  ;;  %14228 = vst [vmem:[#allocation147_spill] sm:$0xff] %v10394_v59  ;;  %v10400_v4 = vsub.f32 %v14229_v3, %v9188_v62  ;;  %v14235_v3 = vld [vmem:[#allocation180_spill] sm:$0xff] }
 0x5a5   :  { %v3700_v52 = vadd.f32 %v3699_v48, %v3445_v15  ;;  %v3449_v15 = vmul.f32 %v10376_v5, %v10376_v5  ;;  %14230 = vst [vmem:[#allocation148_spill] sm:$0xff] %v10400_v4  ;;  %v10406_v5 = vsub.f32 %v14231_v10, %v9188_v62  ;;  %v14237_v10 = vld [vmem:[#allocation183_spill] sm:$0xff] }
 0x5a7   :  { %v3701_v51 = vadd.f32 %v3700_v52, %v3446_v57  ;;  %v3450_v57 = vmul.f32 %v10382_v21, %v10382_v21  ;;  %14232 = vst [vmem:[#allocation151_spill] sm:$0xff] %v10406_v5  ;;  %v10412_v21 = vsub.f32 %v14233_v2, %v9188_v62  ;;  %v14238_v2 = vld [vmem:[#allocation184_spill] sm:$0xff] }
 0x5a9   :  { %v3702_v14 = vadd.f32 %v3701_v51, %v3447_v35  ;;  %v3451_v35 = vmul.f32 %v10388_v38, %v10388_v38  ;;  %14234 = vst [vmem:[#allocation155_spill] sm:$0xff] %v10412_v21  ;;  %v10418_v38 = vsub.f32 %v14235_v3, %v9188_v62  ;;  %v14240_v3 = vld [vmem:[#allocation187_spill] sm:$0xff] }
 0x5ab   :  { %v3703_v48 = vadd.f32 %v3702_v14, %v3448_v41  ;;  %v3452_v41 = vmul.f32 %v10394_v59, %v10394_v59  ;;  %14236 = vst [vmem:[#allocation156_spill] sm:$0xff] %v10418_v38  ;;  %v10424_v59 = vsub.f32 %v14237_v10, %v9188_v62  ;;  %v14241_v10 = vld [vmem:[#allocation188_spill] sm:$0xff] }
 0x5ad   :  { %v3704_v52 = vadd.f32 %v3703_v48, %v3449_v15  ;;  %v3453_v15 = vmul.f32 %v10400_v4, %v10400_v4  ;;  %v10430_v4 = vsub.f32 %v14238_v2, %v9188_v62  ;;  %v14242_v2 = vld [vmem:[#allocation191_spill] sm:$0xff] }
 0x5af   :  { %v3705_v51 = vadd.f32 %v3704_v52, %v3450_v57  ;;  %v3454_v57 = vmul.f32 %v10406_v5, %v10406_v5  ;;  %14239 = vst [vmem:[#allocation159_spill] sm:$0xff] %v10430_v4  ;;  %v10436_v5 = vsub.f32 %v14240_v3, %v9188_v62  ;;  %v10454_v3 = vsub.f32 %v13831_v13, %v9188_v62 }
 0x5b1   :  { %v3706_v14 = vadd.f32 %v3705_v51, %v3451_v35  ;;  %v3455_v35 = vmul.f32 %v10412_v21, %v10412_v21  ;;  %v10442_v21 = vsub.f32 %v14241_v10, %v9188_v62  ;;  %v14243_v10 = vld [vmem:[#allocation195_spill] sm:$0xff]  ;;  %v3462_v13 = vmul.f32 %v10454_v3, %v10454_v3 }
 0x5b3   :  { %v3707_v48 = vadd.f32 %v3706_v14, %v3452_v41  ;;  %v3456_v41 = vmul.f32 %v10418_v38, %v10418_v38  ;;  %v10448_v38 = vsub.f32 %v14242_v2, %v9188_v62  ;;  %v10466_v2 = vsub.f32 %v13833_v8, %v9188_v62 }
 0x5b5   :  { %v3708_v52 = vadd.f32 %v3707_v48, %v3453_v15  ;;  %v3457_v15 = vmul.f32 %v10424_v59, %v10424_v59  ;;  %v3464_v8 = vmul.f32 %v10466_v2, %v10466_v2 }
 0x5b7   :  { %v3709_v51 = vadd.f32 %v3708_v52, %v3454_v57  ;;  %v3458_v57 = vmul.f32 %v10430_v4, %v10430_v4  ;;  %v10460_v4 = vsub.f32 %v14243_v10, %v9188_v62  ;;  %v10478_v10 = vsub.f32 %v13835_v27, %v9188_v62 }
 0x5b9   :  { %v3710_v14 = vadd.f32 %v3709_v51, %v3455_v35  ;;  %v3459_v35 = vmul.f32 %v10436_v5, %v10436_v5  ;;  %v3466_v27 = vmul.f32 %v10478_v10, %v10478_v10 }
 0x5bb   :  { %v3711_v48 = vadd.f32 %v3710_v14, %v3456_v41  ;;  %v3460_v41 = vmul.f32 %v10442_v21, %v10442_v21 }
 0x5bd   :  { %v3712_v52 = vadd.f32 %v3711_v48, %v3457_v15  ;;  %v3461_v15 = vmul.f32 %v10448_v38, %v10448_v38 }
 0x5bf   :  { %v3713_v51 = vadd.f32 %v3712_v52, %v3458_v57  ;;  %v10472_v52 = vsub.f32 %v13834_v54, %v9188_v62 }
 0x5c1   :  { %v3714_v14 = vadd.f32 %v3713_v51, %v3459_v35  ;;  %v3463_v35 = vmul.f32 %v10460_v4, %v10460_v4  ;;  %v3465_v54 = vmul.f32 %v10472_v52, %v10472_v52 }
 0x5c3   :  { %v3715_v48 = vadd.f32 %v3714_v14, %v3460_v41  ;;  %v10484_v14 = vsub.f32 %v13836_v50, %v9188_v62 }
 0x5c5   :  { %v3716_v57 = vadd.f32 %v3715_v48, %v3461_v15  ;;  %v10490_v48 = vsub.f32 %v13837_v26, %v9188_v62  ;;  %v3467_v50 = vmul.f32 %v10484_v14, %v10484_v14 }
 0x5c7   :  { %v3717_v51 = vadd.f32 %v3716_v57, %v3462_v13  ;;  %v10496_v57 = vsub.f32 %v13838_v24, %v9188_v62  ;;  %v3468_v26 = vmul.f32 %v10490_v48, %v10490_v48 }
 0x5c9   :  { %v3718_v41 = vadd.f32 %v3717_v51, %v3463_v35  ;;  %v10502_v51 = vsub.f32 %v13839_v55, %v9188_v62  ;;  %v3469_v24 = vmul.f32 %v10496_v57, %v10496_v57 }
 0x5cb   :  { %v3719_v15 = vadd.f32 %v3718_v41, %v3464_v8  ;;  %v10508_v41 = vsub.f32 %v13840_v47, %v9188_v62  ;;  %v3470_v55 = vmul.f32 %v10502_v51, %v10502_v51 }
 0x5cd   :  { %v3720_v13 = vadd.f32 %v3719_v15, %v3465_v54  ;;  %v10514_v15 = vsub.f32 %v13841_v9, %v9188_v62  ;;  %v3471_v47 = vmul.f32 %v10508_v41, %v10508_v41 }
 0x5cf   :  { %v3721_v35 = vadd.f32 %v3720_v13, %v3466_v27  ;;  %v10520_v13 = vsub.f32 %v8986_v25, %v9188_v62  ;;  %v3472_v9 = vmul.f32 %v10514_v15, %v10514_v15 }
 0x5d1   :  { %v3722_v8 = vadd.f32 %v3721_v35, %v3467_v50  ;;  %v10526_v35 = vsub.f32 %v13842_v11, %v9188_v62  ;;  %v3473_v25 = vmul.f32 %v10520_v13, %v10520_v13 }
 0x5d3   :  { %v3723_v54 = vadd.f32 %v3722_v8, %v3468_v26  ;;  %v10532_v8 = vsub.f32 %v8997_v6, %v9188_v62  ;;  %v3474_v11 = vmul.f32 %v10526_v35, %v10526_v35 }
 0x5d5   :  { %v3724_v27 = vadd.f32 %v3723_v54, %v3469_v24  ;;  %v10538_v54 = vsub.f32 %v9000_v16, %v9188_v62  ;;  %v3475_v6 = vmul.f32 %v10532_v8, %v10532_v8 }
 0x5d7   :  { %v3725_v50 = vadd.f32 %v3724_v27, %v3470_v55  ;;  %v10544_v27 = vsub.f32 %v9005_v60, %v9188_v62  ;;  %v3476_v16 = vmul.f32 %v10538_v54, %v10538_v54 }
 0x5d9   :  { %v3726_v26 = vadd.f32 %v3725_v50, %v3471_v47  ;;  %v10550_v50 = vsub.f32 %v9008_v45, %v9188_v62  ;;  %v3477_v60 = vmul.f32 %v10544_v27, %v10544_v27 }
 0x5db   :  { %v3727_v24 = vadd.f32 %v3726_v26, %v3472_v9  ;;  %v10556_v26 = vsub.f32 %v9013_v42, %v9188_v62  ;;  %v3478_v45 = vmul.f32 %v10550_v50, %v10550_v50 }
 0x5dd   :  { %v3728_v55 = vadd.f32 %v3727_v24, %v3473_v25  ;;  %v10562_v24 = vsub.f32 %v9016_v0, %v9188_v62  ;;  %v3479_v42 = vmul.f32 %v10556_v26, %v10556_v26 }
 0x5df   :  { %v3729_v47 = vadd.f32 %v3728_v55, %v3474_v11  ;;  %v10568_v55 = vsub.f32 %v9021_v34, %v9188_v62  ;;  %v3480_v0 = vmul.f32 %v10562_v24, %v10562_v24 }
 0x5e1   :  { %v3730_v9 = vadd.f32 %v3729_v47, %v3475_v6  ;;  %v10574_v47 = vsub.f32 %v9024_v32, %v9188_v62  ;;  %v3481_v34 = vmul.f32 %v10568_v55, %v10568_v55 }
 0x5e3   :  { %v3731_v25 = vadd.f32 %v3730_v9, %v3476_v16  ;;  %v10580_v9 = vsub.f32 %v9029_v53, %v9188_v62  ;;  %v3482_v32 = vmul.f32 %v10574_v47, %v10574_v47 }
 0x5e5   :  { %v3732_v11 = vadd.f32 %v3731_v25, %v3477_v60  ;;  %v10586_v25 = vsub.f32 %v9032_v40, %v9188_v62  ;;  %v3483_v53 = vmul.f32 %v10580_v9, %v10580_v9 }
 0x5e7   :  { %v3733_v6 = vadd.f32 %v3732_v11, %v3478_v45  ;;  %v10592_v11 = vsub.f32 %v9037_v19, %v9188_v62  ;;  %v3484_v40 = vmul.f32 %v10586_v25, %v10586_v25 }
 0x5e9   :  { %v3734_v16 = vadd.f32 %v3733_v6, %v3479_v42  ;;  %v10598_v6 = vsub.f32 %v9040_v30, %v9188_v62  ;;  %v3485_v19 = vmul.f32 %v10592_v11, %v10592_v11 }
 0x5eb   :  { %v3735_v60 = vadd.f32 %v3734_v16, %v3480_v0  ;;  %v10604_v16 = vsub.f32 %v9045_v23, %v9188_v62  ;;  %v3486_v30 = vmul.f32 %v10598_v6, %v10598_v6 }
 0x5ed   :  { %v3736_v45 = vadd.f32 %v3735_v60, %v3481_v34  ;;  %v10610_v60 = vsub.f32 %v9048_v37, %v9188_v62  ;;  %v3487_v23 = vmul.f32 %v10604_v16, %v10604_v16 }
 0x5ef   :  { %v3737_v42 = vadd.f32 %v3736_v45, %v3482_v32  ;;  %v10616_v45 = vsub.f32 %v9053_v43, %v9188_v62  ;;  %v3488_v37 = vmul.f32 %v10610_v60, %v10610_v60 }
 0x5f1   :  { %v3738_v0 = vadd.f32 %v3737_v42, %v3483_v53  ;;  %v10622_v42 = vsub.f32 %v9056_v28, %v9188_v62  ;;  %v3489_v43 = vmul.f32 %v10616_v45, %v10616_v45 }
 0x5f3   :  { %v3739_v34 = vadd.f32 %v3738_v0, %v3484_v40  ;;  %v10628_v0 = vsub.f32 %v9061_v17, %v9188_v62  ;;  %v3490_v28 = vmul.f32 %v10622_v42, %v10622_v42 }
 0x5f5   :  { %v3740_v32 = vadd.f32 %v3739_v34, %v3485_v19  ;;  %14244 = vst [vmem:[#allocation160_spill] sm:$0xff] %v10628_v0  ;;  %v10634_v34 = vsub.f32 %v9064_v49, %v9188_v62  ;;  %v3491_v17 = vmul.f32 %v10628_v0, %v10628_v0 }
 0x5f7   :  { %v3741_v53 = vadd.f32 %v3740_v32, %v3486_v30  ;;  %14245 = vst [vmem:[#allocation163_spill] sm:$0xff] %v10634_v34  ;;  %v10640_v32 = vsub.f32 %v9069_v56, %v9188_v62  ;;  %v3492_v49 = vmul.f32 %v10634_v34, %v10634_v34 }
 0x5f9   :  { %v3742_v40 = vadd.f32 %v3741_v53, %v3487_v23  ;;  %14246 = vst [vmem:[#allocation164_spill] sm:$0xff] %v10640_v32  ;;  %v10646_v53 = vsub.f32 %v9072_v61, %v9188_v62  ;;  %v3493_v56 = vmul.f32 %v10640_v32, %v10640_v32 }
 0x5fb   :  { %v3743_v19 = vadd.f32 %v3742_v40, %v3488_v37  ;;  %14247 = vst [vmem:[#allocation167_spill] sm:$0xff] %v10646_v53  ;;  %v10652_v40 = vsub.f32 %v9077_v58, %v9188_v62  ;;  %v3494_v61 = vmul.f32 %v10646_v53, %v10646_v53 }
 0x5fd   :  { %v3744_v30 = vadd.f32 %v3743_v19, %v3489_v43  ;;  %v14248_v19 = vld [vmem:[#allocation217_spill] sm:$0xff]  ;;  %v3495_v58 = vmul.f32 %v10652_v40, %v10652_v40 }
 0x5fe   :  { %v10658_v0 = vsub.f32 %v14248_v19, %v9188_v62  ;;  %v14254_v19 = vld [vmem:[#allocation220_spill] sm:$0xff] }
 0x5ff   :  { %v3745_v23 = vadd.f32 %v3744_v30, %v3490_v28  ;;  %v14250_v30 = vld [vmem:[#allocation218_spill] sm:$0xff]  ;;  %v10676_v53 = vsub.f32 %v14254_v19, %v9188_v62  ;;  %v10694_v19 = vsub.f32 %v9104_v39, %v9188_v62 }
 0x600   :  { %14249 = vst [vmem:[#allocation168_spill] sm:$0xff] %v10658_v0  ;;  %v10664_v34 = vsub.f32 %v14250_v30, %v9188_v62  ;;  %v10682_v30 = vsub.f32 %v9096_v7, %v9188_v62 }
 0x601   :  { %v3746_v37 = vadd.f32 %v3745_v23, %v3491_v17  ;;  %v14252_v23 = vld [vmem:[#allocation219_spill] sm:$0xff]  ;;  %14255 = vst [vmem:[#allocation175_spill] sm:$0xff] %v10676_v53  ;;  %14258 = vst [vmem:[#allocation180_spill] sm:$0xff] %v10694_v19  ;;  %v3502_v39 = vmul.f32 %v10694_v19, %v10694_v19 }
 0x602   :  { %14251 = vst [vmem:[#allocation171_spill] sm:$0xff] %v10664_v34  ;;  %v10670_v32 = vsub.f32 %v14252_v23, %v9188_v62  ;;  %14256 = vst [vmem:[#allocation176_spill] sm:$0xff] %v10682_v30  ;;  %v10688_v23 = vsub.f32 %v9101_v29, %v9188_v62  ;;  %v3500_v7 = vmul.f32 %v10682_v30, %v10682_v30 }
 0x603   :  { %v3747_v43 = vadd.f32 %v3746_v37, %v3492_v49  ;;  %v3496_v49 = vmul.f32 %v10658_v0, %v10658_v0 }
 0x604   :  { %14253 = vst [vmem:[#allocation172_spill] sm:$0xff] %v10670_v32  ;;  %14257 = vst [vmem:[#allocation179_spill] sm:$0xff] %v10688_v23  ;;  %v3501_v29 = vmul.f32 %v10688_v23, %v10688_v23 }
 0x605   :  { %v3748_v28 = vadd.f32 %v3747_v43, %v3493_v56  ;;  %v3497_v56 = vmul.f32 %v10664_v34, %v10664_v34 }
 0x607   :  { %v3749_v17 = vadd.f32 %v3748_v28, %v3494_v61  ;;  %v3498_v61 = vmul.f32 %v10670_v32, %v10670_v32 }
 0x609   :  { %v3750_v37 = vadd.f32 %v3749_v17, %v3495_v58  ;;  %v3499_v58 = vmul.f32 %v10676_v53, %v10676_v53 }
 0x60b   :  { %v3751_v43 = vadd.f32 %v3750_v37, %v3496_v49  ;;  %v10700_v37 = vsub.f32 %v9109_v20, %v9188_v62 }
 0x60d   :  { %v3752_v28 = vadd.f32 %v3751_v43, %v3497_v56  ;;  %14259 = vst [vmem:[#allocation183_spill] sm:$0xff] %v10700_v37  ;;  %v10706_v43 = vsub.f32 %v9112_v1, %v9188_v62  ;;  %v3503_v20 = vmul.f32 %v10700_v37, %v10700_v37 }
 0x60f   :  { %v3753_v17 = vadd.f32 %v3752_v28, %v3498_v61  ;;  %14260 = vst [vmem:[#allocation184_spill] sm:$0xff] %v10706_v43  ;;  %v14261_v28 = vld [vmem:[#allocation221_spill] sm:$0xff]  ;;  %v3504_v1 = vmul.f32 %v10706_v43, %v10706_v43 }
 0x610   :  { %v10712_v30 = vsub.f32 %v14261_v28, %v9188_v62 }
 0x611   :  { %v3754_v49 = vadd.f32 %v3753_v17, %v3499_v58  ;;  %v14262_v17 = vld [vmem:[#allocation222_spill] sm:$0xff] }
 0x612   :  { %v10718_v23 = vsub.f32 %v14262_v17, %v9188_v62  ;;  %v3768_v17 = vmul.f32 0.0, %v9188_v62 }
 0x613   :  { %v3755_v56 = vadd.f32 %v3754_v49, %v3500_v7  ;;  %v3505_v49 = vmul.f32 %v10712_v30, %v10712_v30 }
 0x614   :  { %v3769_v43 = vmul.f32 %v3768_v17, %v9188_v62 }
 0x615   :  { %v3756_v61 = vadd.f32 %v3755_v56, %v3501_v29  ;;  %v3506_v56 = vmul.f32 %v10718_v23, %v10718_v23 }
 0x617   :  { %v3757_v58 = vadd.f32 %v3756_v61, %v3502_v39 }
 0x619   :  { %v3758_v7 = vadd.f32 %v3757_v58, %v3503_v20 }
 0x61b   :  { %v3759_v29 = vadd.f32 %v3758_v7, %v3504_v1  ;;  %v14263_v7 = vld [vmem:[#allocation152_spill] sm:$0xff] }
 0x61d   :  { %v3760_v28 = vadd.f32 %v3759_v29, %v3505_v49  ;;  %v14265_v29 = vld [vmem:[#allocation192_spill] sm:$0xff] }
 0x61f   :  { %v3761_v19 = vadd.f32 %v3760_v28, %v3506_v56  ;;  %v14275_v28 = vld [vmem:[#allocation204_spill] sm:$0xff] }
 0x621   :  { %v3762_v53 = vrot.slane %v3761_v19, 4 }
 0x623   :  { %v3763_v37 = vadd.f32 %v3762_v53, %v3761_v19  ;;  %v14267_v19 = vld [vmem:[#allocation196_spill] sm:$0xff] }
 0x625   :  { %v3764_v39 = vrot.slane %v3763_v37, 2 }
 0x627   :  { %v3765_v61 = vadd.f32 %v3764_v39, %v3763_v37 }
 0x629   :  { %v3766_v32 = vrot.slane %v3765_v61, 1 }
 0x62b   :  { %v3767_v34 = vadd.f32 %v3766_v32, %v3765_v61  ;;  %v14269_v32 = vld [vmem:[#allocation199_spill] sm:$0xff] }
 0x62c   :  { %v14277_v61 = vld [vmem:[#allocation207_spill] sm:$0xff] }
 0x62d   :  { %v3770_v20 = vsub.f32 %v3767_v34, %v3769_v43  ;;  %v14271_v34 = vld [vmem:[#allocation200_spill] sm:$0xff]  ;;  %v14273_v43 = vld [vmem:[#allocation203_spill] sm:$0xff] }
 0x62f   :  { %v3771_v58 = vmul.f32 0.00048828125, %v3770_v20  ;;  %v14279_v20 = vld [vmem:[#allocation208_spill] sm:$0xff] }
 0x631   :  { %v3772_v0 = vadd.f32 1e-05, %v3771_v58 }
 0x633   :  { %7554 = vrsqrt.f32 %v3772_v0 }
 0x63d   :  { %v10728_v1 = vpop.eup %7554 }
 0x63e   :  { %v10732_v49 = vmul.f32 %v10728_v1, %v14263_v7  ;;  %v10736_v53 = vmul.f32 %v10728_v1, %v14265_v29  ;;  %v10740_v37 = vmul.f32 %v10728_v1, %v14267_v19  ;;  %v10744_v62 = vmul.f32 %v10728_v1, %v14269_v32  ;;  %v14281_v7 = vld [vmem:[#allocation211_spill] sm:$0xff]  ;;  %v14283_v19 = vld [vmem:[#allocation212_spill] sm:$0xff] }
 0x63f   :  { %v10748_v0 = vmul.f32 %v10728_v1, %v14271_v34  ;;  %v10752_v56 = vmul.f32 %v10728_v1, %v14273_v43  ;;  %v10756_v39 = vmul.f32 %v10728_v1, %v14275_v28  ;;  %v10760_v17 = vmul.f32 %v10728_v1, %v14277_v61  ;;  %v14285_v34 = vld [vmem:[#allocation215_spill] sm:$0xff]  ;;  %v14287_v28 = vld [vmem:[#allocation2_spill] sm:$0xff] }
 0x640   :  { %14264 = vst [vmem:[#allocation187_spill] sm:$0xff] %v10732_v49  ;;  %14266 = vst [vmem:[#allocation188_spill] sm:$0xff] %v10736_v53  ;;  %v10764_v58 = vmul.f32 %v10728_v1, %v14279_v20  ;;  %v10768_v29 = vmul.f32 %v10728_v1, %v14281_v7  ;;  %v10772_v32 = vmul.f32 %v10728_v1, %v14283_v19 }
 0x641   :  { %14268 = vst [vmem:[#allocation191_spill] sm:$0xff] %v10740_v37  ;;  %14270 = vst [vmem:[#allocation195_spill] sm:$0xff] %v10744_v62  ;;  %v10776_v43 = vmul.f32 %v10728_v1, %v14285_v34  ;;  %v10780_v61 = vmul.f32 %v10728_v1, %v14287_v28 }
 0x642   :  { %14272 = vst [vmem:[#allocation217_spill] sm:$0xff] %v10748_v0  ;;  %14274 = vst [vmem:[#allocation218_spill] sm:$0xff] %v10752_v56 }
 0x643   :  { %14276 = vst [vmem:[#allocation219_spill] sm:$0xff] %v10756_v39  ;;  %14278 = vst [vmem:[#allocation220_spill] sm:$0xff] %v10760_v17  ;;  %v14289_v17 = vld [vmem:[#allocation3_spill] sm:$0xff] }
 0x644   :  { %14280 = vst [vmem:[#allocation221_spill] sm:$0xff] %v10764_v58  ;;  %14282 = vst [vmem:[#allocation222_spill] sm:$0xff] %v10768_v29  ;;  %v10784_v20 = vmul.f32 %v10728_v1, %v14289_v17  ;;  %v14291_v58 = vld [vmem:[#allocation4_spill] sm:$0xff]  ;;  %v14293_v29 = vld [vmem:[#allocation5_spill] sm:$0xff] }
 0x645   :  { %14284 = vst [vmem:[#allocation152_spill] sm:$0xff] %v10772_v32  ;;  %14286 = vst [vmem:[#allocation192_spill] sm:$0xff] %v10776_v43  ;;  %v10788_v7 = vmul.f32 %v10728_v1, %v14291_v58  ;;  %v10792_v19 = vmul.f32 %v10728_v1, %v14293_v29  ;;  %v14295_v32 = vld [vmem:[#allocation6_spill] sm:$0xff]  ;;  %v14297_v43 = vld [vmem:[#allocation7_spill] sm:$0xff] }
 0x646   :  { %14288 = vst [vmem:[#allocation196_spill] sm:$0xff] %v10780_v61  ;;  %14290 = vst [vmem:[#allocation199_spill] sm:$0xff] %v10784_v20  ;;  %v10796_v34 = vmul.f32 %v10728_v1, %v14295_v32  ;;  %v10800_v28 = vmul.f32 %v10728_v1, %v14297_v43  ;;  %v14299_v61 = vld [vmem:[#allocation8_spill] sm:$0xff]  ;;  %v14301_v20 = vld [vmem:[#allocation9_spill] sm:$0xff] }
 0x647   :  { %14292 = vst [vmem:[#allocation200_spill] sm:$0xff] %v10788_v7  ;;  %14294 = vst [vmem:[#allocation203_spill] sm:$0xff] %v10792_v19  ;;  %v10804_v17 = vmul.f32 %v10728_v1, %v14299_v61  ;;  %v10808_v58 = vmul.f32 %v10728_v1, %v14301_v20  ;;  %v14303_v7 = vld [vmem:[#allocation10_spill] sm:$0xff]  ;;  %v14305_v19 = vld [vmem:[#allocation11_spill] sm:$0xff] }
 0x648   :  { %14296 = vst [vmem:[#allocation204_spill] sm:$0xff] %v10796_v34  ;;  %14298 = vst [vmem:[#allocation207_spill] sm:$0xff] %v10800_v28  ;;  %v10812_v29 = vmul.f32 %v10728_v1, %v14303_v7  ;;  %v10816_v32 = vmul.f32 %v10728_v1, %v14305_v19  ;;  %v14307_v34 = vld [vmem:[#allocation12_spill] sm:$0xff]  ;;  %v14309_v28 = vld [vmem:[#allocation13_spill] sm:$0xff] }
 0x649   :  { %14300 = vst [vmem:[#allocation208_spill] sm:$0xff] %v10804_v17  ;;  %14302 = vst [vmem:[#allocation211_spill] sm:$0xff] %v10808_v58  ;;  %v10820_v43 = vmul.f32 %v10728_v1, %v14307_v34  ;;  %v10824_v61 = vmul.f32 %v10728_v1, %v14309_v28  ;;  %v14311_v17 = vld [vmem:[#allocation14_spill] sm:$0xff]  ;;  %v14313_v58 = vld [vmem:[#allocation15_spill] sm:$0xff] }
 0x64a   :  { %14304 = vst [vmem:[#allocation212_spill] sm:$0xff] %v10812_v29  ;;  %14306 = vst [vmem:[#allocation215_spill] sm:$0xff] %v10816_v32  ;;  %v10828_v20 = vmul.f32 %v10728_v1, %v14311_v17  ;;  %v10832_v7 = vmul.f32 %v10728_v1, %v14313_v58  ;;  %v14315_v29 = vld [vmem:[#allocation16_spill] sm:$0xff]  ;;  %v14317_v32 = vld [vmem:[#allocation17_spill] sm:$0xff] }
 0x64b   :  { %14308 = vst [vmem:[#allocation2_spill] sm:$0xff] %v10820_v43  ;;  %14310 = vst [vmem:[#allocation3_spill] sm:$0xff] %v10824_v61  ;;  %v10836_v19 = vmul.f32 %v10728_v1, %v14315_v29  ;;  %v10840_v34 = vmul.f32 %v10728_v1, %v14317_v32  ;;  %v14319_v43 = vld [vmem:[#allocation18_spill] sm:$0xff]  ;;  %v14321_v61 = vld [vmem:[#allocation19_spill] sm:$0xff] }
 0x64c   :  { %14312 = vst [vmem:[#allocation4_spill] sm:$0xff] %v10828_v20  ;;  %14314 = vst [vmem:[#allocation5_spill] sm:$0xff] %v10832_v7  ;;  %v10844_v28 = vmul.f32 %v10728_v1, %v14319_v43  ;;  %v10848_v17 = vmul.f32 %v10728_v1, %v14321_v61  ;;  %v14323_v20 = vld [vmem:[#allocation20_spill] sm:$0xff]  ;;  %v14325_v7 = vld [vmem:[#allocation21_spill] sm:$0xff] }
 0x64d   :  { %14316 = vst [vmem:[#allocation6_spill] sm:$0xff] %v10836_v19  ;;  %14318 = vst [vmem:[#allocation7_spill] sm:$0xff] %v10840_v34  ;;  %v10852_v58 = vmul.f32 %v10728_v1, %v14323_v20  ;;  %v10856_v29 = vmul.f32 %v10728_v1, %v14325_v7  ;;  %v14327_v19 = vld [vmem:[#allocation22_spill] sm:$0xff]  ;;  %v14329_v34 = vld [vmem:[#allocation23_spill] sm:$0xff] }
 0x64e   :  { %14320 = vst [vmem:[#allocation8_spill] sm:$0xff] %v10844_v28  ;;  %14322 = vst [vmem:[#allocation9_spill] sm:$0xff] %v10848_v17  ;;  %v10860_v32 = vmul.f32 %v10728_v1, %v14327_v19  ;;  %v10864_v43 = vmul.f32 %v10728_v1, %v14329_v34  ;;  %v14331_v28 = vld [vmem:[#allocation24_spill] sm:$0xff]  ;;  %v14333_v17 = vld [vmem:[#allocation25_spill] sm:$0xff] }
 0x64f   :  { %14324 = vst [vmem:[#allocation10_spill] sm:$0xff] %v10852_v58  ;;  %14326 = vst [vmem:[#allocation11_spill] sm:$0xff] %v10856_v29  ;;  %v10868_v61 = vmul.f32 %v10728_v1, %v14331_v28  ;;  %v10872_v20 = vmul.f32 %v10728_v1, %v14333_v17  ;;  %v14335_v58 = vld [vmem:[#allocation26_spill] sm:$0xff]  ;;  %v14337_v29 = vld [vmem:[#allocation27_spill] sm:$0xff] }
 0x650   :  { %14328 = vst [vmem:[#allocation12_spill] sm:$0xff] %v10860_v32  ;;  %14330 = vst [vmem:[#allocation13_spill] sm:$0xff] %v10864_v43  ;;  %v10876_v7 = vmul.f32 %v10728_v1, %v14335_v58  ;;  %v10880_v19 = vmul.f32 %v10728_v1, %v14337_v29  ;;  %v14339_v32 = vld [vmem:[#allocation28_spill] sm:$0xff]  ;;  %v14341_v43 = vld [vmem:[#allocation29_spill] sm:$0xff] }
 0x651   :  { %14332 = vst [vmem:[#allocation14_spill] sm:$0xff] %v10868_v61  ;;  %14334 = vst [vmem:[#allocation15_spill] sm:$0xff] %v10872_v20  ;;  %v10884_v34 = vmul.f32 %v10728_v1, %v14339_v32  ;;  %v10888_v28 = vmul.f32 %v10728_v1, %v14341_v43  ;;  %v14343_v61 = vld [vmem:[#allocation30_spill] sm:$0xff]  ;;  %v14345_v20 = vld [vmem:[#allocation31_spill] sm:$0xff] }
 0x652   :  { %14336 = vst [vmem:[#allocation16_spill] sm:$0xff] %v10876_v7  ;;  %14338 = vst [vmem:[#allocation17_spill] sm:$0xff] %v10880_v19  ;;  %v10892_v17 = vmul.f32 %v10728_v1, %v14343_v61  ;;  %v10896_v58 = vmul.f32 %v10728_v1, %v14345_v20  ;;  %v14347_v7 = vld [vmem:[#allocation32_spill] sm:$0xff]  ;;  %v14349_v19 = vld [vmem:[#allocation33_spill] sm:$0xff] }
 0x653   :  { %14340 = vst [vmem:[#allocation18_spill] sm:$0xff] %v10884_v34  ;;  %14342 = vst [vmem:[#allocation19_spill] sm:$0xff] %v10888_v28  ;;  %v10900_v29 = vmul.f32 %v10728_v1, %v14347_v7  ;;  %v10904_v32 = vmul.f32 %v10728_v1, %v14349_v19  ;;  %v14351_v34 = vld [vmem:[#allocation36_spill] sm:$0xff]  ;;  %v14353_v28 = vld [vmem:[#allocation37_spill] sm:$0xff] }
 0x654   :  { %14344 = vst [vmem:[#allocation20_spill] sm:$0xff] %v10892_v17  ;;  %14346 = vst [vmem:[#allocation21_spill] sm:$0xff] %v10896_v58  ;;  %v10908_v43 = vmul.f32 %v10728_v1, %v14351_v34  ;;  %v10912_v61 = vmul.f32 %v10728_v1, %v14353_v28  ;;  %v14355_v17 = vld [vmem:[#allocation38_spill] sm:$0xff]  ;;  %v14357_v58 = vld [vmem:[#allocation39_spill] sm:$0xff] }
 0x655   :  { %14348 = vst [vmem:[#allocation22_spill] sm:$0xff] %v10900_v29  ;;  %14350 = vst [vmem:[#allocation23_spill] sm:$0xff] %v10904_v32  ;;  %v10916_v20 = vmul.f32 %v10728_v1, %v14355_v17  ;;  %v10920_v7 = vmul.f32 %v10728_v1, %v14357_v58  ;;  %v14359_v29 = vld [vmem:[#allocation42_spill] sm:$0xff]  ;;  %v14361_v32 = vld [vmem:[#allocation43_spill] sm:$0xff] }
 0x656   :  { %14352 = vst [vmem:[#allocation24_spill] sm:$0xff] %v10908_v43  ;;  %14354 = vst [vmem:[#allocation25_spill] sm:$0xff] %v10912_v61  ;;  %v10924_v19 = vmul.f32 %v10728_v1, %v14359_v29  ;;  %v10928_v34 = vmul.f32 %v10728_v1, %v14361_v32  ;;  %v14363_v43 = vld [vmem:[#allocation44_spill] sm:$0xff]  ;;  %v14365_v61 = vld [vmem:[#allocation45_spill] sm:$0xff] }
 0x657   :  { %14356 = vst [vmem:[#allocation26_spill] sm:$0xff] %v10916_v20  ;;  %14358 = vst [vmem:[#allocation27_spill] sm:$0xff] %v10920_v7  ;;  %v10932_v28 = vmul.f32 %v10728_v1, %v14363_v43  ;;  %v10936_v17 = vmul.f32 %v10728_v1, %v14365_v61  ;;  %v14367_v20 = vld [vmem:[#allocation48_spill] sm:$0xff]  ;;  %v14369_v7 = vld [vmem:[#allocation49_spill] sm:$0xff] }
 0x658   :  { %14360 = vst [vmem:[#allocation28_spill] sm:$0xff] %v10924_v19  ;;  %14362 = vst [vmem:[#allocation29_spill] sm:$0xff] %v10928_v34  ;;  %v10940_v58 = vmul.f32 %v10728_v1, %v14367_v20  ;;  %v10944_v29 = vmul.f32 %v10728_v1, %v14369_v7  ;;  %v14371_v19 = vld [vmem:[#allocation50_spill] sm:$0xff]  ;;  %v14373_v34 = vld [vmem:[#allocation51_spill] sm:$0xff] }
 0x659   :  { %14364 = vst [vmem:[#allocation30_spill] sm:$0xff] %v10932_v28  ;;  %14366 = vst [vmem:[#allocation31_spill] sm:$0xff] %v10936_v17  ;;  %v10948_v32 = vmul.f32 %v10728_v1, %v14371_v19  ;;  %v10952_v43 = vmul.f32 %v10728_v1, %v14373_v34  ;;  %v14375_v28 = vld [vmem:[#allocation54_spill] sm:$0xff]  ;;  %v14377_v17 = vld [vmem:[#allocation55_spill] sm:$0xff] }
 0x65a   :  { %14368 = vst [vmem:[#allocation32_spill] sm:$0xff] %v10940_v58  ;;  %14370 = vst [vmem:[#allocation33_spill] sm:$0xff] %v10944_v29  ;;  %v10956_v61 = vmul.f32 %v10728_v1, %v14375_v28  ;;  %v10960_v20 = vmul.f32 %v10728_v1, %v14377_v17  ;;  %v14379_v58 = vld [vmem:[#allocation57_spill] sm:$0xff]  ;;  %v14381_v29 = vld [vmem:[#allocation58_spill] sm:$0xff] }
 0x65b   :  { %14372 = vst [vmem:[#allocation36_spill] sm:$0xff] %v10948_v32  ;;  %14374 = vst [vmem:[#allocation37_spill] sm:$0xff] %v10952_v43  ;;  %v10964_v7 = vmul.f32 %v10728_v1, %v14379_v58  ;;  %v10968_v19 = vmul.f32 %v10728_v1, %v14381_v29  ;;  %v14383_v32 = vld [vmem:[#allocation61_spill] sm:$0xff]  ;;  %v14385_v43 = vld [vmem:[#allocation62_spill] sm:$0xff] }
 0x65c   :  { %14376 = vst [vmem:[#allocation38_spill] sm:$0xff] %v10956_v61  ;;  %14378 = vst [vmem:[#allocation39_spill] sm:$0xff] %v10960_v20  ;;  %v10972_v34 = vmul.f32 %v10728_v1, %v14383_v32  ;;  %v10976_v28 = vmul.f32 %v10728_v1, %v14385_v43  ;;  %v14387_v61 = vld [vmem:[#allocation65_spill] sm:$0xff]  ;;  %v14389_v20 = vld [vmem:[#allocation66_spill] sm:$0xff] }
 0x65d   :  { %14380 = vst [vmem:[#allocation42_spill] sm:$0xff] %v10964_v7  ;;  %14382 = vst [vmem:[#allocation43_spill] sm:$0xff] %v10968_v19  ;;  %v10980_v17 = vmul.f32 %v10728_v1, %v14387_v61  ;;  %v10984_v58 = vmul.f32 %v10728_v1, %v14389_v20  ;;  %v14391_v7 = vld [vmem:[#allocation69_spill] sm:$0xff]  ;;  %v14393_v19 = vld [vmem:[#allocation70_spill] sm:$0xff] }
 0x65e   :  { %14384 = vst [vmem:[#allocation44_spill] sm:$0xff] %v10972_v34  ;;  %14386 = vst [vmem:[#allocation45_spill] sm:$0xff] %v10976_v28  ;;  %v10988_v29 = vmul.f32 %v10728_v1, %v14391_v7  ;;  %v10992_v32 = vmul.f32 %v10728_v1, %v14393_v19  ;;  %v14395_v34 = vld [vmem:[#allocation73_spill] sm:$0xff]  ;;  %v14397_v28 = vld [vmem:[#allocation74_spill] sm:$0xff] }
 0x65f   :  { %14388 = vst [vmem:[#allocation48_spill] sm:$0xff] %v10980_v17  ;;  %14390 = vst [vmem:[#allocation49_spill] sm:$0xff] %v10984_v58  ;;  %v10996_v43 = vmul.f32 %v10728_v1, %v14395_v34  ;;  %v11000_v61 = vmul.f32 %v10728_v1, %v14397_v28  ;;  %v14399_v17 = vld [vmem:[#allocation77_spill] sm:$0xff]  ;;  %v14401_v58 = vld [vmem:[#allocation78_spill] sm:$0xff] }
 0x660   :  { %14392 = vst [vmem:[#allocation50_spill] sm:$0xff] %v10988_v29  ;;  %14394 = vst [vmem:[#allocation51_spill] sm:$0xff] %v10992_v32  ;;  %v11004_v20 = vmul.f32 %v10728_v1, %v14399_v17  ;;  %v11008_v7 = vmul.f32 %v10728_v1, %v14401_v58  ;;  %v14403_v29 = vld [vmem:[#allocation81_spill] sm:$0xff]  ;;  %v14405_v32 = vld [vmem:[#allocation82_spill] sm:$0xff] }
 0x661   :  { %14396 = vst [vmem:[#allocation54_spill] sm:$0xff] %v10996_v43  ;;  %14398 = vst [vmem:[#allocation55_spill] sm:$0xff] %v11000_v61  ;;  %v11012_v19 = vmul.f32 %v10728_v1, %v14403_v29  ;;  %v11016_v34 = vmul.f32 %v10728_v1, %v14405_v32  ;;  %v14407_v43 = vld [vmem:[#allocation85_spill] sm:$0xff]  ;;  %v14409_v61 = vld [vmem:[#allocation86_spill] sm:$0xff] }
 0x662   :  { %14400 = vst [vmem:[#allocation57_spill] sm:$0xff] %v11004_v20  ;;  %14402 = vst [vmem:[#allocation58_spill] sm:$0xff] %v11008_v7  ;;  %v11020_v28 = vmul.f32 %v10728_v1, %v14407_v43  ;;  %v11024_v17 = vmul.f32 %v10728_v1, %v14409_v61  ;;  %v14411_v20 = vld [vmem:[#allocation89_spill] sm:$0xff]  ;;  %v14413_v7 = vld [vmem:[#allocation90_spill] sm:$0xff] }
 0x663   :  { %14404 = vst [vmem:[#allocation61_spill] sm:$0xff] %v11012_v19  ;;  %14406 = vst [vmem:[#allocation62_spill] sm:$0xff] %v11016_v34  ;;  %v11028_v58 = vmul.f32 %v10728_v1, %v14411_v20  ;;  %v11032_v29 = vmul.f32 %v10728_v1, %v14413_v7  ;;  %v14415_v19 = vld [vmem:[#allocation93_spill] sm:$0xff]  ;;  %v14417_v34 = vld [vmem:[#allocation94_spill] sm:$0xff] }
 0x664   :  { %14408 = vst [vmem:[#allocation65_spill] sm:$0xff] %v11020_v28  ;;  %14410 = vst [vmem:[#allocation66_spill] sm:$0xff] %v11024_v17  ;;  %v11036_v32 = vmul.f32 %v10728_v1, %v14415_v19  ;;  %v11040_v43 = vmul.f32 %v10728_v1, %v14417_v34  ;;  %v14419_v28 = vld [vmem:[#allocation97_spill] sm:$0xff]  ;;  %v14421_v17 = vld [vmem:[#allocation98_spill] sm:$0xff] }
 0x665   :  { %14412 = vst [vmem:[#allocation69_spill] sm:$0xff] %v11028_v58  ;;  %14414 = vst [vmem:[#allocation70_spill] sm:$0xff] %v11032_v29  ;;  %v11044_v61 = vmul.f32 %v10728_v1, %v14419_v28  ;;  %v11048_v20 = vmul.f32 %v10728_v1, %v14421_v17  ;;  %v14423_v58 = vld [vmem:[#allocation101_spill] sm:$0xff]  ;;  %v14425_v29 = vld [vmem:[#allocation102_spill] sm:$0xff] }
 0x666   :  { %14416 = vst [vmem:[#allocation73_spill] sm:$0xff] %v11036_v32  ;;  %14418 = vst [vmem:[#allocation74_spill] sm:$0xff] %v11040_v43  ;;  %v11052_v7 = vmul.f32 %v10728_v1, %v14423_v58  ;;  %v11056_v19 = vmul.f32 %v10728_v1, %v14425_v29  ;;  %v14427_v32 = vld [vmem:[#allocation105_spill] sm:$0xff]  ;;  %v14429_v43 = vld [vmem:[#allocation106_spill] sm:$0xff] }
 0x667   :  { %14420 = vst [vmem:[#allocation77_spill] sm:$0xff] %v11044_v61  ;;  %14422 = vst [vmem:[#allocation78_spill] sm:$0xff] %v11048_v20  ;;  %v11060_v34 = vmul.f32 %v10728_v1, %v14427_v32  ;;  %v11064_v28 = vmul.f32 %v10728_v1, %v14429_v43  ;;  %v14431_v61 = vld [vmem:[#allocation109_spill] sm:$0xff]  ;;  %v14433_v20 = vld [vmem:[#allocation110_spill] sm:$0xff] }
 0x668   :  { %14424 = vst [vmem:[#allocation81_spill] sm:$0xff] %v11052_v7  ;;  %14426 = vst [vmem:[#allocation82_spill] sm:$0xff] %v11056_v19  ;;  %v11068_v17 = vmul.f32 %v10728_v1, %v14431_v61  ;;  %v11072_v58 = vmul.f32 %v10728_v1, %v14433_v20  ;;  %v14435_v7 = vld [vmem:[#allocation113_spill] sm:$0xff]  ;;  %v14437_v19 = vld [vmem:[#allocation114_spill] sm:$0xff] }
 0x669   :  { %14428 = vst [vmem:[#allocation85_spill] sm:$0xff] %v11060_v34  ;;  %14430 = vst [vmem:[#allocation86_spill] sm:$0xff] %v11064_v28  ;;  %v11076_v29 = vmul.f32 %v10728_v1, %v14435_v7  ;;  %v11080_v32 = vmul.f32 %v10728_v1, %v14437_v19  ;;  %v14439_v34 = vld [vmem:[#allocation117_spill] sm:$0xff]  ;;  %v14441_v28 = vld [vmem:[#allocation118_spill] sm:$0xff] }
 0x66a   :  { %14432 = vst [vmem:[#allocation89_spill] sm:$0xff] %v11068_v17  ;;  %14434 = vst [vmem:[#allocation90_spill] sm:$0xff] %v11072_v58  ;;  %v11084_v43 = vmul.f32 %v10728_v1, %v14439_v34  ;;  %v11088_v61 = vmul.f32 %v10728_v1, %v14441_v28  ;;  %v14443_v17 = vld [vmem:[#allocation121_spill] sm:$0xff]  ;;  %v14445_v58 = vld [vmem:[#allocation122_spill] sm:$0xff] }
 0x66b   :  { %14436 = vst [vmem:[#allocation93_spill] sm:$0xff] %v11076_v29  ;;  %14438 = vst [vmem:[#allocation94_spill] sm:$0xff] %v11080_v32  ;;  %v11092_v20 = vmul.f32 %v10728_v1, %v14443_v17  ;;  %v11096_v7 = vmul.f32 %v10728_v1, %v14445_v58  ;;  %v14447_v29 = vld [vmem:[#allocation125_spill] sm:$0xff]  ;;  %v14449_v32 = vld [vmem:[#allocation126_spill] sm:$0xff] }
 0x66c   :  { %14440 = vst [vmem:[#allocation97_spill] sm:$0xff] %v11084_v43  ;;  %14442 = vst [vmem:[#allocation98_spill] sm:$0xff] %v11088_v61  ;;  %v11100_v19 = vmul.f32 %v10728_v1, %v14447_v29  ;;  %v11104_v34 = vmul.f32 %v10728_v1, %v14449_v32  ;;  %v14451_v43 = vld [vmem:[#allocation129_spill] sm:$0xff]  ;;  %v14453_v61 = vld [vmem:[#allocation130_spill] sm:$0xff] }
 0x66d   :  { %14444 = vst [vmem:[#allocation101_spill] sm:$0xff] %v11092_v20  ;;  %14446 = vst [vmem:[#allocation102_spill] sm:$0xff] %v11096_v7  ;;  %v11108_v28 = vmul.f32 %v10728_v1, %v14451_v43  ;;  %v11112_v17 = vmul.f32 %v10728_v1, %v14453_v61  ;;  %v14455_v20 = vld [vmem:[#allocation133_spill] sm:$0xff]  ;;  %v14457_v7 = vld [vmem:[#allocation134_spill] sm:$0xff] }
 0x66e   :  { %14448 = vst [vmem:[#allocation105_spill] sm:$0xff] %v11100_v19  ;;  %14450 = vst [vmem:[#allocation106_spill] sm:$0xff] %v11104_v34  ;;  %v11116_v58 = vmul.f32 %v10728_v1, %v14455_v20  ;;  %v11120_v29 = vmul.f32 %v10728_v1, %v14457_v7  ;;  %v14459_v19 = vld [vmem:[#allocation137_spill] sm:$0xff]  ;;  %v14461_v34 = vld [vmem:[#allocation138_spill] sm:$0xff] }
 0x66f   :  { %14452 = vst [vmem:[#allocation109_spill] sm:$0xff] %v11108_v28  ;;  %14454 = vst [vmem:[#allocation110_spill] sm:$0xff] %v11112_v17  ;;  %v11124_v32 = vmul.f32 %v10728_v1, %v14459_v19  ;;  %v11128_v43 = vmul.f32 %v10728_v1, %v14461_v34  ;;  %v14463_v28 = vld [vmem:[#allocation141_spill] sm:$0xff]  ;;  %v14465_v17 = vld [vmem:[#allocation142_spill] sm:$0xff] }
 0x670   :  { %14456 = vst [vmem:[#allocation113_spill] sm:$0xff] %v11116_v58  ;;  %14458 = vst [vmem:[#allocation114_spill] sm:$0xff] %v11120_v29  ;;  %v11132_v61 = vmul.f32 %v10728_v1, %v14463_v28  ;;  %v11136_v20 = vmul.f32 %v10728_v1, %v14465_v17  ;;  %v14467_v58 = vld [vmem:[#allocation145_spill] sm:$0xff]  ;;  %v14469_v29 = vld [vmem:[#allocation146_spill] sm:$0xff] }
 0x671   :  { %14460 = vst [vmem:[#allocation117_spill] sm:$0xff] %v11124_v32  ;;  %14462 = vst [vmem:[#allocation118_spill] sm:$0xff] %v11128_v43  ;;  %v11140_v7 = vmul.f32 %v10728_v1, %v14467_v58  ;;  %v11144_v19 = vmul.f32 %v10728_v1, %v14469_v29  ;;  %v14471_v32 = vld [vmem:[#allocation149_spill] sm:$0xff]  ;;  %v14473_v43 = vld [vmem:[#allocation150_spill] sm:$0xff] }
 0x672   :  { %14464 = vst [vmem:[#allocation121_spill] sm:$0xff] %v11132_v61  ;;  %14466 = vst [vmem:[#allocation122_spill] sm:$0xff] %v11136_v20  ;;  %v11148_v34 = vmul.f32 %v10728_v1, %v14471_v32  ;;  %v11152_v28 = vmul.f32 %v10728_v1, %v14473_v43  ;;  %v14475_v61 = vld [vmem:[#allocation153_spill] sm:$0xff]  ;;  %v14477_v20 = vld [vmem:[#allocation154_spill] sm:$0xff] }
 0x673   :  { %14468 = vst [vmem:[#allocation125_spill] sm:$0xff] %v11140_v7  ;;  %14470 = vst [vmem:[#allocation126_spill] sm:$0xff] %v11144_v19  ;;  %v11156_v17 = vmul.f32 %v10728_v1, %v14475_v61  ;;  %v11160_v58 = vmul.f32 %v10728_v1, %v14477_v20  ;;  %v14479_v7 = vld [vmem:[#allocation157_spill] sm:$0xff]  ;;  %v14481_v19 = vld [vmem:[#allocation158_spill] sm:$0xff] }
 0x674   :  { %14472 = vst [vmem:[#allocation129_spill] sm:$0xff] %v11148_v34  ;;  %14474 = vst [vmem:[#allocation130_spill] sm:$0xff] %v11152_v28  ;;  %v11164_v29 = vmul.f32 %v10728_v1, %v14479_v7  ;;  %v11168_v32 = vmul.f32 %v10728_v1, %v14481_v19  ;;  %v14483_v34 = vld [vmem:[#allocation161_spill] sm:$0xff]  ;;  %v14485_v28 = vld [vmem:[#allocation162_spill] sm:$0xff] }
 0x675   :  { %14476 = vst [vmem:[#allocation133_spill] sm:$0xff] %v11156_v17  ;;  %14478 = vst [vmem:[#allocation134_spill] sm:$0xff] %v11160_v58  ;;  %v11172_v43 = vmul.f32 %v10728_v1, %v14483_v34  ;;  %v11176_v61 = vmul.f32 %v10728_v1, %v14485_v28  ;;  %v14487_v17 = vld [vmem:[#allocation165_spill] sm:$0xff]  ;;  %v14489_v58 = vld [vmem:[#allocation166_spill] sm:$0xff] }
 0x676   :  { %14480 = vst [vmem:[#allocation137_spill] sm:$0xff] %v11164_v29  ;;  %14482 = vst [vmem:[#allocation138_spill] sm:$0xff] %v11168_v32  ;;  %v11180_v20 = vmul.f32 %v10728_v1, %v14487_v17  ;;  %v11184_v7 = vmul.f32 %v10728_v1, %v14489_v58  ;;  %v14491_v29 = vld [vmem:[#allocation169_spill] sm:$0xff]  ;;  %v14493_v32 = vld [vmem:[#allocation170_spill] sm:$0xff] }
 0x677   :  { %14484 = vst [vmem:[#allocation141_spill] sm:$0xff] %v11172_v43  ;;  %14486 = vst [vmem:[#allocation142_spill] sm:$0xff] %v11176_v61  ;;  %v11188_v19 = vmul.f32 %v10728_v1, %v14491_v29  ;;  %v11192_v34 = vmul.f32 %v10728_v1, %v14493_v32  ;;  %v14495_v43 = vld [vmem:[#allocation173_spill] sm:$0xff]  ;;  %v14496_v61 = vld [vmem:[#allocation174_spill] sm:$0xff] }
 0x678   :  { %14488 = vst [vmem:[#allocation145_spill] sm:$0xff] %v11180_v20  ;;  %14490 = vst [vmem:[#allocation146_spill] sm:$0xff] %v11184_v7  ;;  %v11196_v28 = vmul.f32 %v10728_v1, %v14495_v43  ;;  %v11200_v17 = vmul.f32 %v10728_v1, %v14496_v61  ;;  %v14498_v20 = vld [vmem:[#allocation177_spill] sm:$0xff]  ;;  %v14500_v7 = vld [vmem:[#allocation178_spill] sm:$0xff]  ;;  %v11220_v61 = vmul.f32 %v10728_v1, %v9920_v18 }
 0x679   :  { %14492 = vst [vmem:[#allocation149_spill] sm:$0xff] %v11188_v19  ;;  %14494 = vst [vmem:[#allocation150_spill] sm:$0xff] %v11192_v34  ;;  %v11204_v58 = vmul.f32 %v10728_v1, %v14498_v20  ;;  %v11208_v29 = vmul.f32 %v10728_v1, %v14500_v7  ;;  %v14502_v19 = vld [vmem:[#allocation181_spill] sm:$0xff]  ;;  %v14503_v34 = vld [vmem:[#allocation182_spill] sm:$0xff] }
 0x67a   :  { %14497 = vst [vmem:[#allocation153_spill] sm:$0xff] %v11200_v17  ;;  %v11212_v32 = vmul.f32 %v10728_v1, %v14502_v19  ;;  %v11216_v43 = vmul.f32 %v10728_v1, %v14503_v34  ;;  %14505 = vst [vmem:[#allocation161_spill] sm:$0xff] %v11220_v61  ;;  %v14506_v17 = vld [vmem:[#allocation185_spill] sm:$0xff]  ;;  %v11232_v19 = vmul.f32 %v10728_v1, %v9938_v31  ;;  %v14514_v61 = vld [vmem:[#allocation190_spill] sm:$0xff] }
 0x67b   :  { %14499 = vst [vmem:[#allocation154_spill] sm:$0xff] %v11204_v58  ;;  %14501 = vst [vmem:[#allocation157_spill] sm:$0xff] %v11208_v29  ;;  %v11224_v20 = vmul.f32 %v10728_v1, %v14506_v17  ;;  %v14508_v58 = vld [vmem:[#allocation186_spill] sm:$0xff]  ;;  %v11236_v34 = vmul.f32 %v10728_v1, %v9944_v46  ;;  %v11244_v17 = vmul.f32 %v10728_v1, %v14514_v61 }
 0x67c   :  { %14504 = vst [vmem:[#allocation158_spill] sm:$0xff] %v11216_v43  ;;  %v11228_v7 = vmul.f32 %v10728_v1, %v14508_v58  ;;  %14510 = vst [vmem:[#allocation166_spill] sm:$0xff] %v11232_v19  ;;  %v14512_v43 = vld [vmem:[#allocation189_spill] sm:$0xff]  ;;  %v11248_v58 = vmul.f32 %v10728_v1, %v9962_v44  ;;  %v11252_v31 = vmul.f32 %v10728_v1, %v9968_v22  ;;  %v14807_v39 = vld [vmem:[#allocation130_spill] sm:$0xff] }
 0x67d   :  { %14507 = vst [vmem:[#allocation162_spill] sm:$0xff] %v11224_v20  ;;  %14511 = vst [vmem:[#allocation169_spill] sm:$0xff] %v11236_v34  ;;  %v11240_v18 = vmul.f32 %v10728_v1, %v14512_v43  ;;  %v14518_v19 = vld [vmem:[#allocation193_spill] sm:$0xff]  ;;  %v14520_v34 = vld [vmem:[#allocation194_spill] sm:$0xff]  ;;  %v11264_v61 = vmul.f32 %v10728_v1, %v9986_v63  ;;  %v11268_v44 = vmul.f32 %v10728_v1, %v9992_v33 }
 0x67e   :  { %14509 = vst [vmem:[#allocation165_spill] sm:$0xff] %v11228_v7  ;;  %14515 = vst [vmem:[#allocation173_spill] sm:$0xff] %v11244_v17  ;;  %v11256_v46 = vmul.f32 %v10728_v1, %v14518_v19  ;;  %v11260_v43 = vmul.f32 %v10728_v1, %v14520_v34  ;;  %v11280_v34 = vmul.f32 %v10728_v1, %v10010_v36 }
 0x67f   :  { %14513 = vst [vmem:[#allocation170_spill] sm:$0xff] %v11240_v18  ;;  %14516 = vst [vmem:[#allocation174_spill] sm:$0xff] %v11248_v58  ;;  %v14524_v58 = vld [vmem:[#allocation197_spill] sm:$0xff]  ;;  %v14815_v62 = vld [vmem:[#allocation146_spill] sm:$0xff] }
 0x680   :  { %14517 = vst [vmem:[#allocation177_spill] sm:$0xff] %v11252_v31  ;;  %14519 = vst [vmem:[#allocation178_spill] sm:$0xff] %v11256_v46  ;;  %v11272_v22 = vmul.f32 %v10728_v1, %v14524_v58  ;;  %v14526_v31 = vld [vmem:[#allocation198_spill] sm:$0xff]  ;;  %v14814_v37 = vld [vmem:[#allocation145_spill] sm:$0xff] }
 0x681   :  { %14521 = vst [vmem:[#allocation181_spill] sm:$0xff] %v11260_v43  ;;  %14522 = vst [vmem:[#allocation182_spill] sm:$0xff] %v11264_v61  ;;  %v11276_v19 = vmul.f32 %v10728_v1, %v14526_v31  ;;  %v14529_v43 = vld [vmem:[#allocation201_spill] sm:$0xff]  ;;  %v14531_v61 = vld [vmem:[#allocation202_spill] sm:$0xff] }
 0x682   :  { %14523 = vst [vmem:[#allocation185_spill] sm:$0xff] %v11268_v44  ;;  %14525 = vst [vmem:[#allocation186_spill] sm:$0xff] %v11272_v22  ;;  %v11284_v63 = vmul.f32 %v10728_v1, %v14529_v43  ;;  %v11288_v33 = vmul.f32 %v10728_v1, %v14531_v61  ;;  %v14533_v44 = vld [vmem:[#allocation205_spill] sm:$0xff]  ;;  %v14535_v22 = vld [vmem:[#allocation206_spill] sm:$0xff] }
 0x683   :  { %14527 = vst [vmem:[#allocation189_spill] sm:$0xff] %v11276_v19  ;;  %14528 = vst [vmem:[#allocation190_spill] sm:$0xff] %v11280_v34  ;;  %v11292_v58 = vmul.f32 %v10728_v1, %v14533_v44  ;;  %v11296_v31 = vmul.f32 %v10728_v1, %v14535_v22  ;;  %v14537_v19 = vld [vmem:[#allocation209_spill] sm:$0xff]  ;;  %v14539_v34 = vld [vmem:[#allocation210_spill] sm:$0xff] }
 0x684   :  { %14530 = vst [vmem:[#allocation193_spill] sm:$0xff] %v11284_v63  ;;  %14532 = vst [vmem:[#allocation194_spill] sm:$0xff] %v11288_v33  ;;  %v11300_v36 = vmul.f32 %v10728_v1, %v14537_v19  ;;  %v11304_v43 = vmul.f32 %v10728_v1, %v14539_v34  ;;  %v14541_v63 = vld [vmem:[#allocation213_spill] sm:$0xff]  ;;  %v14543_v33 = vld [vmem:[#allocation214_spill] sm:$0xff] }
 0x685   :  { %14534 = vst [vmem:[#allocation197_spill] sm:$0xff] %v11292_v58  ;;  %14536 = vst [vmem:[#allocation198_spill] sm:$0xff] %v11296_v31  ;;  %v11308_v61 = vmul.f32 %v10728_v1, %v14541_v63  ;;  %v11312_v44 = vmul.f32 %v10728_v1, %v14543_v33  ;;  %v14545_v58 = vld [vmem:[#allocation216_spill] sm:$0xff]  ;;  %v14547_v31 = vld [vmem:[#allocation34_spill] sm:$0xff] }
 0x686   :  { %14538 = vst [vmem:[#allocation201_spill] sm:$0xff] %v11300_v36  ;;  %14540 = vst [vmem:[#allocation202_spill] sm:$0xff] %v11304_v43  ;;  %v11316_v22 = vmul.f32 %v10728_v1, %v14545_v58  ;;  %v11320_v19 = vmul.f32 %v10728_v1, %v14547_v31  ;;  %v14549_v36 = vld [vmem:[#allocation35_spill] sm:$0xff]  ;;  %v14551_v43 = vld [vmem:[#allocation40_spill] sm:$0xff] }
 0x687   :  { %14542 = vst [vmem:[#allocation205_spill] sm:$0xff] %v11308_v61  ;;  %14544 = vst [vmem:[#allocation206_spill] sm:$0xff] %v11312_v44  ;;  %v11324_v34 = vmul.f32 %v10728_v1, %v14549_v36  ;;  %v11328_v63 = vmul.f32 %v10728_v1, %v14551_v43  ;;  %v14553_v61 = vld [vmem:[#allocation41_spill] sm:$0xff]  ;;  %v14555_v44 = vld [vmem:[#allocation46_spill] sm:$0xff] }
 0x688   :  { %14546 = vst [vmem:[#allocation209_spill] sm:$0xff] %v11316_v22  ;;  %14548 = vst [vmem:[#allocation210_spill] sm:$0xff] %v11320_v19  ;;  %v11332_v33 = vmul.f32 %v10728_v1, %v14553_v61  ;;  %v11336_v58 = vmul.f32 %v10728_v1, %v14555_v44  ;;  %v14557_v22 = vld [vmem:[#allocation47_spill] sm:$0xff]  ;;  %v14559_v19 = vld [vmem:[#allocation52_spill] sm:$0xff] }
 0x689   :  { %14550 = vst [vmem:[#allocation213_spill] sm:$0xff] %v11324_v34  ;;  %14552 = vst [vmem:[#allocation214_spill] sm:$0xff] %v11328_v63  ;;  %v11340_v31 = vmul.f32 %v10728_v1, %v14557_v22  ;;  %v11344_v36 = vmul.f32 %v10728_v1, %v14559_v19  ;;  %v14561_v34 = vld [vmem:[#allocation53_spill] sm:$0xff]  ;;  %v14563_v63 = vld [vmem:[#allocation56_spill] sm:$0xff] }
 0x68a   :  { %14554 = vst [vmem:[#allocation216_spill] sm:$0xff] %v11332_v33  ;;  %14556 = vst [vmem:[#allocation34_spill] sm:$0xff] %v11336_v58  ;;  %v11348_v43 = vmul.f32 %v10728_v1, %v14561_v34  ;;  %v11352_v61 = vmul.f32 %v10728_v1, %v14563_v63  ;;  %v14565_v33 = vld [vmem:[#allocation59_spill] sm:$0xff]  ;;  %v14567_v58 = vld [vmem:[#allocation60_spill] sm:$0xff] }
 0x68b   :  { %14558 = vst [vmem:[#allocation35_spill] sm:$0xff] %v11340_v31  ;;  %14560 = vst [vmem:[#allocation40_spill] sm:$0xff] %v11344_v36  ;;  %v11356_v44 = vmul.f32 %v10728_v1, %v14565_v33  ;;  %v11360_v22 = vmul.f32 %v10728_v1, %v14567_v58  ;;  %v14569_v31 = vld [vmem:[#allocation63_spill] sm:$0xff]  ;;  %v14571_v36 = vld [vmem:[#allocation64_spill] sm:$0xff] }
 0x68c   :  { %14562 = vst [vmem:[#allocation41_spill] sm:$0xff] %v11348_v43  ;;  %14564 = vst [vmem:[#allocation46_spill] sm:$0xff] %v11352_v61  ;;  %v11364_v19 = vmul.f32 %v10728_v1, %v14569_v31  ;;  %v11368_v34 = vmul.f32 %v10728_v1, %v14571_v36  ;;  %v14573_v43 = vld [vmem:[#allocation67_spill] sm:$0xff]  ;;  %v14575_v61 = vld [vmem:[#allocation68_spill] sm:$0xff] }
 0x68d   :  { %14566 = vst [vmem:[#allocation47_spill] sm:$0xff] %v11356_v44  ;;  %14568 = vst [vmem:[#allocation52_spill] sm:$0xff] %v11360_v22  ;;  %v11372_v63 = vmul.f32 %v10728_v1, %v14573_v43  ;;  %v11376_v33 = vmul.f32 %v10728_v1, %v14575_v61  ;;  %v14577_v44 = vld [vmem:[#allocation71_spill] sm:$0xff]  ;;  %v14579_v22 = vld [vmem:[#allocation72_spill] sm:$0xff] }
 0x68e   :  { %14570 = vst [vmem:[#allocation53_spill] sm:$0xff] %v11364_v19  ;;  %14572 = vst [vmem:[#allocation56_spill] sm:$0xff] %v11368_v34  ;;  %v11380_v58 = vmul.f32 %v10728_v1, %v14577_v44  ;;  %v11384_v31 = vmul.f32 %v10728_v1, %v14579_v22  ;;  %v14581_v19 = vld [vmem:[#allocation75_spill] sm:$0xff]  ;;  %v14583_v34 = vld [vmem:[#allocation76_spill] sm:$0xff] }
 0x68f   :  { %14574 = vst [vmem:[#allocation59_spill] sm:$0xff] %v11372_v63  ;;  %14576 = vst [vmem:[#allocation60_spill] sm:$0xff] %v11376_v33  ;;  %v11388_v36 = vmul.f32 %v10728_v1, %v14581_v19  ;;  %v11392_v43 = vmul.f32 %v10728_v1, %v14583_v34  ;;  %v14585_v63 = vld [vmem:[#allocation79_spill] sm:$0xff]  ;;  %v14587_v33 = vld [vmem:[#allocation80_spill] sm:$0xff] }
 0x690   :  { %14578 = vst [vmem:[#allocation63_spill] sm:$0xff] %v11380_v58  ;;  %14580 = vst [vmem:[#allocation64_spill] sm:$0xff] %v11384_v31  ;;  %v11396_v61 = vmul.f32 %v10728_v1, %v14585_v63  ;;  %v11400_v44 = vmul.f32 %v10728_v1, %v14587_v33  ;;  %v14589_v58 = vld [vmem:[#allocation83_spill] sm:$0xff]  ;;  %v14591_v31 = vld [vmem:[#allocation84_spill] sm:$0xff] }
 0x691   :  { %14582 = vst [vmem:[#allocation67_spill] sm:$0xff] %v11388_v36  ;;  %14584 = vst [vmem:[#allocation68_spill] sm:$0xff] %v11392_v43  ;;  %v11404_v22 = vmul.f32 %v10728_v1, %v14589_v58  ;;  %v11408_v19 = vmul.f32 %v10728_v1, %v14591_v31  ;;  %v14593_v36 = vld [vmem:[#allocation87_spill] sm:$0xff]  ;;  %v14595_v43 = vld [vmem:[#allocation88_spill] sm:$0xff] }
 0x692   :  { %14586 = vst [vmem:[#allocation71_spill] sm:$0xff] %v11396_v61  ;;  %14588 = vst [vmem:[#allocation72_spill] sm:$0xff] %v11400_v44  ;;  %v11412_v34 = vmul.f32 %v10728_v1, %v14593_v36  ;;  %v11416_v63 = vmul.f32 %v10728_v1, %v14595_v43  ;;  %v14597_v61 = vld [vmem:[#allocation91_spill] sm:$0xff]  ;;  %v14599_v44 = vld [vmem:[#allocation92_spill] sm:$0xff] }
 0x693   :  { %14590 = vst [vmem:[#allocation75_spill] sm:$0xff] %v11404_v22  ;;  %14592 = vst [vmem:[#allocation76_spill] sm:$0xff] %v11408_v19  ;;  %v11420_v33 = vmul.f32 %v10728_v1, %v14597_v61  ;;  %v11424_v58 = vmul.f32 %v10728_v1, %v14599_v44  ;;  %v14601_v22 = vld [vmem:[#allocation95_spill] sm:$0xff]  ;;  %v14603_v19 = vld [vmem:[#allocation96_spill] sm:$0xff] }
 0x694   :  { %14594 = vst [vmem:[#allocation79_spill] sm:$0xff] %v11412_v34  ;;  %14596 = vst [vmem:[#allocation80_spill] sm:$0xff] %v11416_v63  ;;  %v11428_v31 = vmul.f32 %v10728_v1, %v14601_v22  ;;  %v11432_v36 = vmul.f32 %v10728_v1, %v14603_v19  ;;  %v14605_v34 = vld [vmem:[#allocation99_spill] sm:$0xff]  ;;  %v14607_v63 = vld [vmem:[#allocation100_spill] sm:$0xff] }
 0x695   :  { %14598 = vst [vmem:[#allocation83_spill] sm:$0xff] %v11420_v33  ;;  %14600 = vst [vmem:[#allocation84_spill] sm:$0xff] %v11424_v58  ;;  %v11436_v43 = vmul.f32 %v10728_v1, %v14605_v34  ;;  %v11440_v61 = vmul.f32 %v10728_v1, %v14607_v63  ;;  %v14609_v33 = vld [vmem:[#allocation103_spill] sm:$0xff]  ;;  %v14611_v58 = vld [vmem:[#allocation104_spill] sm:$0xff] }
 0x696   :  { %14602 = vst [vmem:[#allocation87_spill] sm:$0xff] %v11428_v31  ;;  %14604 = vst [vmem:[#allocation88_spill] sm:$0xff] %v11432_v36  ;;  %v11444_v44 = vmul.f32 %v10728_v1, %v14609_v33  ;;  %v11448_v22 = vmul.f32 %v10728_v1, %v14611_v58  ;;  %v14613_v31 = vld [vmem:[#allocation107_spill] sm:$0xff]  ;;  %v14615_v36 = vld [vmem:[#allocation108_spill] sm:$0xff] }
 0x697   :  { %14606 = vst [vmem:[#allocation91_spill] sm:$0xff] %v11436_v43  ;;  %14608 = vst [vmem:[#allocation92_spill] sm:$0xff] %v11440_v61  ;;  %v11452_v19 = vmul.f32 %v10728_v1, %v14613_v31  ;;  %v11456_v34 = vmul.f32 %v10728_v1, %v14615_v36  ;;  %v14617_v43 = vld [vmem:[#allocation111_spill] sm:$0xff]  ;;  %v14619_v61 = vld [vmem:[#allocation112_spill] sm:$0xff]  ;;  %v11476_v36 = vmul.f32 %v10728_v1, %v10304_v12 }
 0x698   :  { %14610 = vst [vmem:[#allocation95_spill] sm:$0xff] %v11444_v44  ;;  %14612 = vst [vmem:[#allocation96_spill] sm:$0xff] %v11448_v22  ;;  %v11460_v63 = vmul.f32 %v10728_v1, %v14617_v43  ;;  %v11464_v33 = vmul.f32 %v10728_v1, %v14619_v61  ;;  %v14621_v44 = vld [vmem:[#allocation115_spill] sm:$0xff]  ;;  %v14623_v22 = vld [vmem:[#allocation116_spill] sm:$0xff] }
 0x699   :  { %14614 = vst [vmem:[#allocation99_spill] sm:$0xff] %v11452_v19  ;;  %14616 = vst [vmem:[#allocation100_spill] sm:$0xff] %v11456_v34  ;;  %v11468_v58 = vmul.f32 %v10728_v1, %v14621_v44  ;;  %v11472_v31 = vmul.f32 %v10728_v1, %v14623_v22  ;;  %v14626_v34 = vld [vmem:[#allocation119_spill] sm:$0xff] }
 0x69a   :  { %14618 = vst [vmem:[#allocation103_spill] sm:$0xff] %v11460_v63  ;;  %14620 = vst [vmem:[#allocation104_spill] sm:$0xff] %v11464_v33  ;;  %v11480_v43 = vmul.f32 %v10728_v1, %v14626_v34  ;;  %v14628_v63 = vld [vmem:[#allocation120_spill] sm:$0xff]  ;;  %v14630_v33 = vld [vmem:[#allocation123_spill] sm:$0xff] }
 0x69b   :  { %14622 = vst [vmem:[#allocation107_spill] sm:$0xff] %v11468_v58  ;;  %14624 = vst [vmem:[#allocation108_spill] sm:$0xff] %v11472_v31  ;;  %v11484_v61 = vmul.f32 %v10728_v1, %v14628_v63  ;;  %v11488_v44 = vmul.f32 %v10728_v1, %v14630_v33  ;;  %v14632_v58 = vld [vmem:[#allocation124_spill] sm:$0xff]  ;;  %v14634_v31 = vld [vmem:[#allocation127_spill] sm:$0xff] }
 0x69c   :  { %14625 = vst [vmem:[#allocation111_spill] sm:$0xff] %v11476_v36  ;;  %14627 = vst [vmem:[#allocation112_spill] sm:$0xff] %v11480_v43  ;;  %v11492_v22 = vmul.f32 %v10728_v1, %v14632_v58  ;;  %v11496_v12 = vmul.f32 %v10728_v1, %v14634_v31  ;;  %v14636_v36 = vld [vmem:[#allocation128_spill] sm:$0xff]  ;;  %v14638_v43 = vld [vmem:[#allocation131_spill] sm:$0xff] }
 0x69d   :  { %14629 = vst [vmem:[#allocation115_spill] sm:$0xff] %v11484_v61  ;;  %14631 = vst [vmem:[#allocation116_spill] sm:$0xff] %v11488_v44  ;;  %v11500_v34 = vmul.f32 %v10728_v1, %v14636_v36  ;;  %v11504_v63 = vmul.f32 %v10728_v1, %v14638_v43  ;;  %v14640_v61 = vld [vmem:[#allocation132_spill] sm:$0xff]  ;;  %v14642_v44 = vld [vmem:[#allocation135_spill] sm:$0xff] }
 0x69e   :  { %14633 = vst [vmem:[#allocation119_spill] sm:$0xff] %v11492_v22  ;;  %14635 = vst [vmem:[#allocation120_spill] sm:$0xff] %v11496_v12  ;;  %v11508_v33 = vmul.f32 %v10728_v1, %v14640_v61  ;;  %v11512_v58 = vmul.f32 %v10728_v1, %v14642_v44  ;;  %v14644_v22 = vld [vmem:[#allocation136_spill] sm:$0xff]  ;;  %v14646_v12 = vld [vmem:[#allocation139_spill] sm:$0xff] }
 0x69f   :  { %14637 = vst [vmem:[#allocation123_spill] sm:$0xff] %v11500_v34  ;;  %14639 = vst [vmem:[#allocation124_spill] sm:$0xff] %v11504_v63  ;;  %v11516_v31 = vmul.f32 %v10728_v1, %v14644_v22  ;;  %v11520_v36 = vmul.f32 %v10728_v1, %v14646_v12  ;;  %v14648_v34 = vld [vmem:[#allocation140_spill] sm:$0xff]  ;;  %v14650_v63 = vld [vmem:[#allocation143_spill] sm:$0xff] }
 0x6a0   :  { %14641 = vst [vmem:[#allocation127_spill] sm:$0xff] %v11508_v33  ;;  %14643 = vst [vmem:[#allocation128_spill] sm:$0xff] %v11512_v58  ;;  %v11524_v43 = vmul.f32 %v10728_v1, %v14648_v34  ;;  %v11528_v61 = vmul.f32 %v10728_v1, %v14650_v63  ;;  %v14652_v33 = vld [vmem:[#allocation144_spill] sm:$0xff]  ;;  %v14653_v58 = vld [vmem:[#allocation147_spill] sm:$0xff] }
 0x6a1   :  { %14645 = vst [vmem:[#allocation131_spill] sm:$0xff] %v11516_v31  ;;  %14647 = vst [vmem:[#allocation132_spill] sm:$0xff] %v11520_v36  ;;  %v11532_v44 = vmul.f32 %v10728_v1, %v14652_v33  ;;  %v11536_v22 = vmul.f32 %v10728_v1, %v14653_v58  ;;  %v14655_v31 = vld [vmem:[#allocation148_spill] sm:$0xff]  ;;  %v14656_v36 = vld [vmem:[#allocation151_spill] sm:$0xff]  ;;  %v11556_v58 = vmul.f32 %v10728_v1, %v10424_v59 }
 0x6a2   :  { %14649 = vst [vmem:[#allocation135_spill] sm:$0xff] %v11524_v43  ;;  %14651 = vst [vmem:[#allocation136_spill] sm:$0xff] %v11528_v61  ;;  %v11540_v12 = vmul.f32 %v10728_v1, %v14655_v31  ;;  %v11544_v34 = vmul.f32 %v10728_v1, %v14656_v36  ;;  %v14657_v43 = vld [vmem:[#allocation155_spill] sm:$0xff]  ;;  %v14658_v61 = vld [vmem:[#allocation156_spill] sm:$0xff]  ;;  %v11564_v36 = vmul.f32 %v10728_v1, %v10436_v5 }
 0x6a3   :  { %14654 = vst [vmem:[#allocation139_spill] sm:$0xff] %v11536_v22  ;;  %v11548_v63 = vmul.f32 %v10728_v1, %v14657_v43  ;;  %v11552_v33 = vmul.f32 %v10728_v1, %v14658_v61  ;;  %v14659_v22 = vld [vmem:[#allocation159_spill] sm:$0xff]  ;;  %v11568_v43 = vmul.f32 %v10728_v1, %v10442_v21  ;;  %v11572_v61 = vmul.f32 %v10728_v1, %v10448_v38  ;;  %v14863_v0 = vld [vmem:[#allocation76_spill] sm:$0xff] }
 0x6a4   :  { %v11560_v31 = vmul.f32 %v10728_v1, %v14659_v22  ;;  %v11576_v59 = vmul.f32 %v10728_v1, %v10454_v3  ;;  %v11580_v22 = vmul.f32 %v10728_v1, %v10460_v4  ;;  %v11584_v5 = vmul.f32 %v10728_v1, %v10466_v2  ;;  %v14882_v20 = vld [vmem:[#allocation116_spill] sm:$0xff] }
 0x6a5   :  { %v11588_v21 = vmul.f32 %v10728_v1, %v10472_v52  ;;  %v11592_v38 = vmul.f32 %v10728_v1, %v10478_v10  ;;  %v11596_v3 = vmul.f32 %v10728_v1, %v10484_v14  ;;  %v11600_v4 = vmul.f32 %v10728_v1, %v10490_v48  ;;  %v14884_v19 = vld [vmem:[#allocation120_spill] sm:$0xff] }
 0x6a6   :  { %v11604_v2 = vmul.f32 %v10728_v1, %v10496_v57  ;;  %v11608_v52 = vmul.f32 %v10728_v1, %v10502_v51  ;;  %v11612_v10 = vmul.f32 %v10728_v1, %v10508_v41  ;;  %v11616_v14 = vmul.f32 %v10728_v1, %v10514_v15  ;;  %v14885_v56 = vld [vmem:[#allocation123_spill] sm:$0xff]  ;;  %v14886_v18 = vld [vmem:[#allocation124_spill] sm:$0xff] }
 0x6a7   :  { %v11620_v48 = vmul.f32 %v10728_v1, %v10520_v13  ;;  %v11624_v57 = vmul.f32 %v10728_v1, %v10526_v35  ;;  %v11628_v51 = vmul.f32 %v10728_v1, %v10532_v8  ;;  %v11632_v41 = vmul.f32 %v10728_v1, %v10538_v54  ;;  %v14887_v17 = vld [vmem:[#allocation127_spill] sm:$0xff] }
 0x6a8   :  { %14660 = vst [vmem:[#allocation140_spill] sm:$0xff] %v11612_v10  ;;  %14661 = vst [vmem:[#allocation143_spill] sm:$0xff] %v11616_v14  ;;  %v11636_v15 = vmul.f32 %v10728_v1, %v10544_v27  ;;  %v11640_v13 = vmul.f32 %v10728_v1, %v10550_v50  ;;  %v11644_v35 = vmul.f32 %v10728_v1, %v10556_v26  ;;  %v14889_v29 = vld [vmem:[#allocation131_spill] sm:$0xff]  ;;  %v14890_v46 = vld [vmem:[#allocation132_spill] sm:$0xff] }
 0x6a9   :  { %14662 = vst [vmem:[#allocation144_spill] sm:$0xff] %v11620_v48  ;;  %14663 = vst [vmem:[#allocation147_spill] sm:$0xff] %v11624_v57  ;;  %v11648_v8 = vmul.f32 %v10728_v1, %v10562_v24  ;;  %v11652_v54 = vmul.f32 %v10728_v1, %v10568_v55  ;;  %v11656_v27 = vmul.f32 %v10728_v1, %v10574_v47  ;;  %v14891_v49 = vld [vmem:[#allocation135_spill] sm:$0xff]  ;;  %v14892_v53 = vld [vmem:[#allocation136_spill] sm:$0xff] }
 0x6aa   :  { %14664 = vst [vmem:[#allocation148_spill] sm:$0xff] %v11628_v51  ;;  %14665 = vst [vmem:[#allocation151_spill] sm:$0xff] %v11632_v41  ;;  %v11660_v50 = vmul.f32 %v10728_v1, %v10580_v9  ;;  %v11664_v26 = vmul.f32 %v10728_v1, %v10586_v25  ;;  %v11668_v24 = vmul.f32 %v10728_v1, %v10592_v11  ;;  %v14893_v7 = vld [vmem:[#allocation139_spill] sm:$0xff]  ;;  %v14917_v51 = vld [vmem:[#allocation188_spill] sm:$0xff] }
 0x6ab   :  { %14666 = vst [vmem:[#allocation155_spill] sm:$0xff] %v11636_v15  ;;  %14667 = vst [vmem:[#allocation156_spill] sm:$0xff] %v11640_v13  ;;  %v11672_v55 = vmul.f32 %v10728_v1, %v10598_v6  ;;  %v11676_v47 = vmul.f32 %v10728_v1, %v10604_v16  ;;  %v11680_v9 = vmul.f32 %v10728_v1, %v10610_v60  ;;  %v14915_v57 = vld [vmem:[#allocation187_spill] sm:$0xff]  ;;  %v14933_v13 = vld [vmem:[#allocation222_spill] sm:$0xff] }
 0x6ac   :  { %14668 = vst [vmem:[#allocation159_spill] sm:$0xff] %v11644_v35  ;;  %14669 = vst [vmem:[#allocation223_spill] sm:$0xff] %v11648_v8  ;;  %v11684_v25 = vmul.f32 %v10728_v1, %v10616_v45  ;;  %v11688_v11 = vmul.f32 %v10728_v1, %v10622_v42  ;;  %v11708_v42 = vmul.f32 %v10728_v1, %v10652_v40  ;;  %v14923_v35 = vld [vmem:[#allocation217_spill] sm:$0xff]  ;;  %v14925_v8 = vld [vmem:[#allocation218_spill] sm:$0xff] }
 0x6ad   :  { %14670 = vst [vmem:[#allocation224_spill] sm:$0xff] %v11652_v54  ;;  %14671 = vst [vmem:[#allocation225_spill] sm:$0xff] %v11656_v27  ;;  %v14937_v48 = vld [vmem:[#allocation192_spill] sm:$0xff]  ;;  %v14941_v14 = vld [vmem:[#allocation199_spill] sm:$0xff] }
 0x6ae   :  { %14672 = vst [vmem:[#allocation226_spill] sm:$0xff] %v11660_v50  ;;  %14673 = vst [vmem:[#allocation227_spill] sm:$0xff] %v11664_v26  ;;  %v14931_v26 = vld [vmem:[#allocation221_spill] sm:$0xff]  ;;  %v14945_v10 = vld [vmem:[#allocation203_spill] sm:$0xff] }
 0x6af   :  { %14674 = vst [vmem:[#allocation228_spill] sm:$0xff] %v11668_v24  ;;  %14675 = vst [vmem:[#allocation229_spill] sm:$0xff] %v11672_v55  ;;  %v14680_v24 = vld [vmem:[#allocation160_spill] sm:$0xff]  ;;  %v14682_v55 = vld [vmem:[#allocation163_spill] sm:$0xff] }
 0x6b0   :  { %14676 = vst [vmem:[#allocation230_spill] sm:$0xff] %v11676_v47  ;;  %14677 = vst [vmem:[#allocation231_spill] sm:$0xff] %v11680_v9  ;;  %v11692_v6 = vmul.f32 %v10728_v1, %v14680_v24  ;;  %v11696_v16 = vmul.f32 %v10728_v1, %v14682_v55  ;;  %v14684_v47 = vld [vmem:[#allocation164_spill] sm:$0xff]  ;;  %v14686_v9 = vld [vmem:[#allocation167_spill] sm:$0xff] }
 0x6b1   :  { %14678 = vst [vmem:[#allocation232_spill] sm:$0xff] %v11684_v25  ;;  %14679 = vst [vmem:[#allocation233_spill] sm:$0xff] %v11688_v11  ;;  %v11700_v60 = vmul.f32 %v10728_v1, %v14684_v47  ;;  %v11704_v45 = vmul.f32 %v10728_v1, %v14686_v9  ;;  %v14689_v11 = vld [vmem:[#allocation168_spill] sm:$0xff] }
 0x6b2   :  { %14681 = vst [vmem:[#allocation160_spill] sm:$0xff] %v11692_v6  ;;  %14683 = vst [vmem:[#allocation163_spill] sm:$0xff] %v11696_v16  ;;  %v11712_v24 = vmul.f32 %v10728_v1, %v14689_v11  ;;  %v14691_v6 = vld [vmem:[#allocation171_spill] sm:$0xff]  ;;  %v14693_v16 = vld [vmem:[#allocation172_spill] sm:$0xff] }
 0x6b3   :  { %14685 = vst [vmem:[#allocation164_spill] sm:$0xff] %v11700_v60  ;;  %14687 = vst [vmem:[#allocation167_spill] sm:$0xff] %v11704_v45  ;;  %v11716_v55 = vmul.f32 %v10728_v1, %v14691_v6  ;;  %v11720_v47 = vmul.f32 %v10728_v1, %v14693_v16  ;;  %v14695_v60 = vld [vmem:[#allocation175_spill] sm:$0xff]  ;;  %v14697_v45 = vld [vmem:[#allocation176_spill] sm:$0xff] }
 0x6b4   :  { %14688 = vst [vmem:[#allocation234_spill] sm:$0xff] %v11708_v42  ;;  %14690 = vst [vmem:[#allocation168_spill] sm:$0xff] %v11712_v24  ;;  %v11724_v9 = vmul.f32 %v10728_v1, %v14695_v60  ;;  %v11728_v40 = vmul.f32 %v10728_v1, %v14697_v45  ;;  %v14699_v42 = vld [vmem:[#allocation179_spill] sm:$0xff]  ;;  %v14701_v24 = vld [vmem:[#allocation180_spill] sm:$0xff]  ;;  %v11748_v45 = vmul.f32 %v10728_v1, %v10712_v30 }
 0x6b5   :  { %14692 = vst [vmem:[#allocation171_spill] sm:$0xff] %v11716_v55  ;;  %14694 = vst [vmem:[#allocation172_spill] sm:$0xff] %v11720_v47  ;;  %v11732_v11 = vmul.f32 %v10728_v1, %v14699_v42  ;;  %v11736_v6 = vmul.f32 %v10728_v1, %v14701_v24  ;;  %v14703_v55 = vld [vmem:[#allocation183_spill] sm:$0xff]  ;;  %v14705_v47 = vld [vmem:[#allocation184_spill] sm:$0xff]  ;;  %v11752_v42 = vmul.f32 %v10728_v1, %v10718_v23  ;;  %v14924_v24 = vmax.f32 %v14923_v35, 0.0 }
 0x6b6   :  { %14696 = vst [vmem:[#allocation175_spill] sm:$0xff] %v11724_v9  ;;  %14698 = vst [vmem:[#allocation176_spill] sm:$0xff] %v11728_v40  ;;  %v11740_v16 = vmul.f32 %v10728_v1, %v14703_v55  ;;  %v11744_v60 = vmul.f32 %v10728_v1, %v14705_v47  ;;  %v14810_v23 = vld [vmem:[#allocation137_spill] sm:$0xff]  ;;  %v14888_v40 = vld [vmem:[#allocation128_spill] sm:$0xff] }
 0x6b7   :  { %14700 = vst [vmem:[#allocation179_spill] sm:$0xff] %v11732_v11  ;;  %14702 = vst [vmem:[#allocation180_spill] sm:$0xff] %v11736_v6  ;;  %v14818_v30 = vld [vmem:[#allocation153_spill] sm:$0xff]  ;;  %v14919_v9 = vld [vmem:[#allocation191_spill] sm:$0xff]  ;;  %v14926_v6 = vmax.f32 %v14925_v8, 0.0  ;;  %v14942_v8 = vmax.f32 %v14941_v14, 0.0 }
 0x6b8   :  { %14704 = vst [vmem:[#allocation183_spill] sm:$0xff] %v11740_v16  ;;  %14706 = vst [vmem:[#allocation184_spill] sm:$0xff] %v11744_v60  ;;  %v14916_v60 = vmax.f32 %v14915_v57, 0.0  ;;  %v14920_v15 = vmax.f32 %v14919_v9, 0.0  ;;  %v14921_v1 = vld [vmem:[#allocation195_spill] sm:$0xff]  ;;  %v14929_v16 = vld [vmem:[#allocation220_spill] sm:$0xff] }
 0x6b9   :  { %14707 = vst [vmem:[#allocation235_spill] sm:$0xff] %v11748_v45  ;;  %14708 = vst [vmem:[#allocation236_spill] sm:$0xff] %v11752_v42  ;;  %v14811_v42 = vld [vmem:[#allocation138_spill] sm:$0xff]  ;;  %v14918_v45 = vmax.f32 %v14917_v51, 0.0  ;;  %v14922_v25 = vmax.f32 %v14921_v1, 0.0  ;;  %v6367_v54 = vpack.c.bf16 %v14926_v6, %v14924_v24  ;;  %v14927_v55 = vld [vmem:[#allocation219_spill] sm:$0xff] }
 0x6ba   :  { %v14928_v27 = vmax.f32 %v14927_v55, 0.0  ;;  %v14930_v50 = vmax.f32 %v14929_v16, 0.0  ;;  %v14932_v57 = vmax.f32 %v14931_v26, 0.0  ;;  %v14934_v51 = vmax.f32 %v14933_v13, 0.0  ;;  %v14943_v24 = vld [vmem:[#allocation200_spill] sm:$0xff] }
 0x6bb   :  { %v6357_v41 = vpack.c.bf16 %v14918_v45, %v14916_v60  ;;  %v6362_v11 = vpack.c.bf16 %v14922_v25, %v14920_v15  ;;  %v14935_v45 = vld [vmem:[#allocation152_spill] sm:$0xff]  ;;  %v14938_v1 = vmax.f32 %v14937_v48, 0.0  ;;  %v14944_v55 = vmax.f32 %v14943_v24, 0.0  ;;  %6995 = vst [vmem:[%s12908_s2 + $0x10] sm:$0xff] %v6367_v54   ;;  %v14959_v54 = vld [vmem:[#allocation2_spill] sm:$0xff]  ;;  %v14961_v24 = vld [vmem:[#allocation3_spill] sm:$0xff] }
 0x6bc   :  { %v6372_v47 = vpack.c.bf16 %v14930_v50, %v14928_v27  ;;  %v6377_v60 = vpack.c.bf16 %v14934_v51, %v14932_v57  ;;  %v14936_v9 = vmax.f32 %v14935_v45, 0.0  ;;  %v14939_v25 = vld [vmem:[#allocation196_spill] sm:$0xff]  ;;  %v14946_v16 = vmax.f32 %v14945_v10, 0.0  ;;  %v14949_v10 = vld [vmem:[#allocation207_spill] sm:$0xff] }
 0x6bd   :  { %v14940_v35 = vmax.f32 %v14939_v25, 0.0  ;;  %6358 = vst [vmem:[%s12908_s2] sm:$0xff] %v6357_v41   ;;  %6994 = vst [vmem:[%s12908_s2 + $0x8] sm:$0xff] %v6362_v11   ;;  %v14947_v14 = vld [vmem:[#allocation204_spill] sm:$0xff]  ;;  %v14950_v13 = vmax.f32 %v14949_v10, 0.0  ;;  %v14953_v41 = vld [vmem:[#allocation211_spill] sm:$0xff] }
 0x6be   :  { %v6382_v15 = vpack.c.bf16 %v14938_v1, %v14936_v9  ;;  %v6392_v27 = vpack.c.bf16 %v14946_v16, %v14944_v55  ;;  %6996 = vst [vmem:[%s12908_s2 + $0x18] sm:$0xff] %v6372_v47   ;;  %v14948_v48 = vmax.f32 %v14947_v14, 0.0  ;;  %v14951_v26 = vld [vmem:[#allocation208_spill] sm:$0xff]  ;;  %v14954_v51 = vmax.f32 %v14953_v41, 0.0  ;;  %v14957_v1 = vld [vmem:[#allocation215_spill] sm:$0xff]  ;;  %6997 = vst [vmem:[%s12908_s2 + $0x20] sm:$0xff] %v6377_v60  }
 0x6bf   :  { %v6387_v6 = vpack.c.bf16 %v14942_v8, %v14940_v35  ;;  %v14952_v57 = vmax.f32 %v14951_v26, 0.0  ;;  %v14955_v9 = vld [vmem:[#allocation212_spill] sm:$0xff]  ;;  %v14958_v25 = vmax.f32 %v14957_v1, 0.0  ;;  %v14960_v8 = vmax.f32 %v14959_v54, 0.0  ;;  %v14967_v26 = vld [vmem:[#allocation6_spill] sm:$0xff]  ;;  %v14969_v60 = vld [vmem:[#allocation7_spill] sm:$0xff] }
 0x6c0   :  { %v6397_v50 = vpack.c.bf16 %v14950_v13, %v14948_v48  ;;  %v14956_v11 = vmax.f32 %v14955_v9, 0.0  ;;  %v14962_v55 = vmax.f32 %v14961_v24, 0.0  ;;  %6998 = vst [vmem:[%s12908_s2 + $0x28] sm:$0xff] %v6382_v15   ;;  %7000 = vst [vmem:[%s12908_s2 + $0x38] sm:$0xff] %v6392_v27   ;;  %v14963_v16 = vld [vmem:[#allocation4_spill] sm:$0xff]  ;;  %v14965_v48 = vld [vmem:[#allocation5_spill] sm:$0xff] }
 0x6c1   :  { %v6402_v45 = vpack.c.bf16 %v14954_v51, %v14952_v57  ;;  %6999 = vst [vmem:[%s12908_s2 + $0x30] sm:$0xff] %v6387_v6   ;;  %v14964_v14 = vmax.f32 %v14963_v16, 0.0  ;;  %v14966_v10 = vmax.f32 %v14965_v48, 0.0  ;;  %v14968_v57 = vmax.f32 %v14967_v26, 0.0  ;;  %v14971_v9 = vld [vmem:[#allocation8_spill] sm:$0xff]  ;;  %v14975_v6 = vld [vmem:[#allocation10_spill] sm:$0xff] }
 0x6c2   :  { %v6407_v35 = vpack.c.bf16 %v14958_v25, %v14956_v11  ;;  %v6412_v47 = vpack.c.bf16 %v14962_v55, %v14960_v8  ;;  %v14970_v41 = vmax.f32 %v14969_v60, 0.0  ;;  %v14972_v15 = vmax.f32 %v14971_v9, 0.0  ;;  %v14973_v11 = vld [vmem:[#allocation9_spill] sm:$0xff]  ;;  %v14977_v8 = vld [vmem:[#allocation11_spill] sm:$0xff]  ;;  %7001 = vst [vmem:[%s12908_s2 + $0x40] sm:$0xff] %v6397_v50   ;;  %v14979_v55 = vld [vmem:[#allocation12_spill] sm:$0xff] }
 0x6c3   :  { %v6417_v13 = vpack.c.bf16 %v14966_v10, %v14964_v14  ;;  %v14974_v1 = vmax.f32 %v14973_v11, 0.0  ;;  %v14976_v54 = vmax.f32 %v14975_v6, 0.0  ;;  %v14978_v24 = vmax.f32 %v14977_v8, 0.0  ;;  %7002 = vst [vmem:[%s12908_s2 + $0x48] sm:$0xff] %v6402_v45   ;;  %v14981_v14 = vld [vmem:[#allocation13_spill] sm:$0xff]  ;;  %v14983_v26 = vld [vmem:[#allocation14_spill] sm:$0xff] }
 0x6c4   :  { %v6422_v51 = vpack.c.bf16 %v14970_v41, %v14968_v57  ;;  %7003 = vst [vmem:[%s12908_s2 + $0x50] sm:$0xff] %v6407_v35   ;;  %7004 = vst [vmem:[%s12908_s2 + $0x58] sm:$0xff] %v6412_v47   ;;  %v14980_v16 = vmax.f32 %v14979_v55, 0.0  ;;  %v14982_v48 = vmax.f32 %v14981_v14, 0.0  ;;  %v14984_v57 = vmax.f32 %v14983_v26, 0.0  ;;  %v14985_v50 = vld [vmem:[#allocation15_spill] sm:$0xff] }
 0x6c5   :  { %v6427_v25 = vpack.c.bf16 %v14974_v1, %v14972_v15  ;;  %v6432_v27 = vpack.c.bf16 %v14978_v24, %v14976_v54  ;;  %v14986_v60 = vmax.f32 %v14985_v50, 0.0  ;;  %v14987_v9 = vld [vmem:[#allocation16_spill] sm:$0xff]  ;;  %v14989_v15 = vld [vmem:[#allocation17_spill] sm:$0xff]  ;;  %v14991_v35 = vld [vmem:[#allocation18_spill] sm:$0xff]  ;;  %7005 = vst [vmem:[%s12908_s2 + $0x60] sm:$0xff] %v6417_v13  }
 0x6c6   :  { %v6437_v10 = vpack.c.bf16 %v14982_v48, %v14980_v16  ;;  %v14988_v45 = vmax.f32 %v14987_v9, 0.0  ;;  %v14990_v11 = vmax.f32 %v14989_v15, 0.0  ;;  %v14992_v6 = vmax.f32 %v14991_v35, 0.0  ;;  %v14993_v54 = vld [vmem:[#allocation19_spill] sm:$0xff]  ;;  %7006 = vst [vmem:[%s12908_s2 + $0x68] sm:$0xff] %v6422_v51   ;;  %v14995_v24 = vld [vmem:[#allocation20_spill] sm:$0xff] }
 0x6c7   :  { %v6442_v41 = vpack.c.bf16 %v14986_v60, %v14984_v57  ;;  %v14994_v8 = vmax.f32 %v14993_v54, 0.0  ;;  %7007 = vst [vmem:[%s12908_s2 + $0x70] sm:$0xff] %v6427_v25   ;;  %7008 = vst [vmem:[%s12908_s2 + $0x78] sm:$0xff] %v6432_v27   ;;  %v14996_v55 = vmax.f32 %v14995_v24, 0.0  ;;  %v14997_v16 = vld [vmem:[#allocation21_spill] sm:$0xff]  ;;  %v14999_v26 = vld [vmem:[#allocation22_spill] sm:$0xff] }
 0x6c8   :  { %v6447_v1 = vpack.c.bf16 %v14990_v11, %v14988_v45  ;;  %v14998_v14 = vmax.f32 %v14997_v16, 0.0  ;;  %v15000_v57 = vmax.f32 %v14999_v26, 0.0  ;;  %v15001_v13 = vld [vmem:[#allocation23_spill] sm:$0xff]  ;;  %v15003_v9 = vld [vmem:[#allocation24_spill] sm:$0xff]  ;;  %v15005_v45 = vld [vmem:[#allocation25_spill] sm:$0xff]  ;;  %7009 = vst [vmem:[%s12908_s2 + $0x80] sm:$0xff] %v6437_v10  }
 0x6c9   :  { %v6452_v47 = vpack.c.bf16 %v14994_v8, %v14992_v6  ;;  %v15002_v50 = vmax.f32 %v15001_v13, 0.0  ;;  %v15004_v51 = vmax.f32 %v15003_v9, 0.0  ;;  %v15006_v15 = vmax.f32 %v15005_v45, 0.0  ;;  %v15007_v25 = vld [vmem:[#allocation26_spill] sm:$0xff]  ;;  %v15009_v6 = vld [vmem:[#allocation27_spill] sm:$0xff]  ;;  %7010 = vst [vmem:[%s12908_s2 + $0x88] sm:$0xff] %v6442_v41  }
 0x6ca   :  { %v6457_v48 = vpack.c.bf16 %v14998_v14, %v14996_v55  ;;  %v15008_v35 = vmax.f32 %v15007_v25, 0.0  ;;  %v15010_v54 = vmax.f32 %v15009_v6, 0.0  ;;  %7011 = vst [vmem:[%s12908_s2 + $0x90] sm:$0xff] %v6447_v1   ;;  %v15011_v8 = vld [vmem:[#allocation28_spill] sm:$0xff]  ;;  %v15013_v55 = vld [vmem:[#allocation29_spill] sm:$0xff]  ;;  %v15015_v26 = vld [vmem:[#allocation30_spill] sm:$0xff] }
 0x6cb   :  { %v6462_v60 = vpack.c.bf16 %v15002_v50, %v15000_v57  ;;  %v6467_v11 = vpack.c.bf16 %v15006_v15, %v15004_v51  ;;  %7012 = vst [vmem:[%s12908_s2 + $0x98] sm:$0xff] %v6452_v47   ;;  %v15012_v24 = vmax.f32 %v15011_v8, 0.0  ;;  %v15014_v16 = vmax.f32 %v15013_v55, 0.0  ;;  %v15017_v10 = vld [vmem:[#allocation31_spill] sm:$0xff]  ;;  %v15019_v9 = vld [vmem:[#allocation32_spill] sm:$0xff]  ;;  %v15021_v51 = vld [vmem:[#allocation33_spill] sm:$0xff] }
 0x6cc   :  { %v6472_v27 = vpack.c.bf16 %v15010_v54, %v15008_v35  ;;  %v15016_v57 = vmax.f32 %v15015_v26, 0.0  ;;  %v15018_v13 = vmax.f32 %v15017_v10, 0.0  ;;  %v15020_v41 = vmax.f32 %v15019_v9, 0.0  ;;  %v15023_v1 = vld [vmem:[#allocation36_spill] sm:$0xff]  ;;  %v15025_v35 = vld [vmem:[#allocation37_spill] sm:$0xff]  ;;  %7013 = vst [vmem:[%s12908_s2 + $0xa0] sm:$0xff] %v6457_v48  }
 0x6cd   :  { %v6477_v14 = vpack.c.bf16 %v15014_v16, %v15012_v24  ;;  %v15022_v45 = vmax.f32 %v15021_v51, 0.0  ;;  %v15024_v25 = vmax.f32 %v15023_v1, 0.0  ;;  %v15026_v6 = vmax.f32 %v15025_v35, 0.0  ;;  %7014 = vst [vmem:[%s12908_s2 + $0xa8] sm:$0xff] %v6462_v60   ;;  %7015 = vst [vmem:[%s12908_s2 + $0xb0] sm:$0xff] %v6467_v11   ;;  %v15027_v54 = vld [vmem:[#allocation38_spill] sm:$0xff] }
 0x6ce   :  { %v6482_v50 = vpack.c.bf16 %v15018_v13, %v15016_v57  ;;  %7016 = vst [vmem:[%s12908_s2 + $0xb8] sm:$0xff] %v6472_v27   ;;  %v15028_v8 = vmax.f32 %v15027_v54, 0.0  ;;  %v15029_v24 = vld [vmem:[#allocation39_spill] sm:$0xff]  ;;  %v15031_v26 = vld [vmem:[#allocation42_spill] sm:$0xff]  ;;  %v15035_v9 = vld [vmem:[#allocation44_spill] sm:$0xff] }
 0x6cf   :  { %v6487_v15 = vpack.c.bf16 %v15022_v45, %v15020_v41  ;;  %v6492_v47 = vpack.c.bf16 %v15026_v6, %v15024_v25  ;;  %v15030_v55 = vmax.f32 %v15029_v24, 0.0  ;;  %v15032_v57 = vmax.f32 %v15031_v26, 0.0  ;;  %v15033_v48 = vld [vmem:[#allocation43_spill] sm:$0xff]  ;;  %v15037_v41 = vld [vmem:[#allocation45_spill] sm:$0xff]  ;;  %v15039_v11 = vld [vmem:[#allocation48_spill] sm:$0xff]  ;;  %7017 = vst [vmem:[%s12908_s2 + $0xc0] sm:$0xff] %v6477_v14  }
 0x6d0   :  { %v15034_v10 = vmax.f32 %v15033_v48, 0.0  ;;  %v15036_v60 = vmax.f32 %v15035_v9, 0.0  ;;  %v15038_v51 = vmax.f32 %v15037_v41, 0.0  ;;  %v15040_v1 = vmax.f32 %v15039_v11, 0.0  ;;  %v15041_v25 = vld [vmem:[#allocation49_spill] sm:$0xff]  ;;  %7018 = vst [vmem:[%s12908_s2 + $0xc8] sm:$0xff] %v6482_v50  }
 0x6d1   :  { %v6497_v16 = vpack.c.bf16 %v15030_v55, %v15028_v8  ;;  %v15042_v35 = vmax.f32 %v15041_v25, 0.0  ;;  %7019 = vst [vmem:[%s12908_s2 + $0xd0] sm:$0xff] %v6487_v15   ;;  %7020 = vst [vmem:[%s12908_s2 + $0xd8] sm:$0xff] %v6492_v47   ;;  %v15043_v6 = vld [vmem:[#allocation50_spill] sm:$0xff]  ;;  %v15045_v8 = vld [vmem:[#allocation51_spill] sm:$0xff] }
 0x6d2   :  { %v6502_v13 = vpack.c.bf16 %v15034_v10, %v15032_v57  ;;  %v6507_v45 = vpack.c.bf16 %v15038_v51, %v15036_v60  ;;  %v15044_v54 = vmax.f32 %v15043_v6, 0.0  ;;  %v15046_v24 = vmax.f32 %v15045_v8, 0.0  ;;  %v15047_v26 = vld [vmem:[#allocation54_spill] sm:$0xff]  ;;  %v15049_v14 = vld [vmem:[#allocation55_spill] sm:$0xff]  ;;  %v15051_v9 = vld [vmem:[#allocation57_spill] sm:$0xff] }
 0x6d3   :  { %v6512_v27 = vpack.c.bf16 %v15042_v35, %v15040_v1  ;;  %v15048_v57 = vmax.f32 %v15047_v26, 0.0  ;;  %v15050_v48 = vmax.f32 %v15049_v14, 0.0  ;;  %v15052_v50 = vmax.f32 %v15051_v9, 0.0  ;;  %v15053_v60 = vld [vmem:[#allocation58_spill] sm:$0xff]  ;;  %v15055_v15 = vld [vmem:[#allocation61_spill] sm:$0xff]  ;;  %7021 = vst [vmem:[%s12908_s2 + $0xe0] sm:$0xff] %v6497_v16  }
 0x6d4   :  { %v6517_v55 = vpack.c.bf16 %v15046_v24, %v15044_v54  ;;  %v15054_v41 = vmax.f32 %v15053_v60, 0.0  ;;  %v15056_v11 = vmax.f32 %v15055_v15, 0.0  ;;  %v15057_v1 = vld [vmem:[#allocation62_spill] sm:$0xff]  ;;  %7022 = vst [vmem:[%s12908_s2 + $0xe8] sm:$0xff] %v6502_v13   ;;  %7023 = vst [vmem:[%s12908_s2 + $0xf0] sm:$0xff] %v6507_v45   ;;  %v15059_v35 = vld [vmem:[#allocation65_spill] sm:$0xff] }
 0x6d5   :  { %v6522_v10 = vpack.c.bf16 %v15050_v48, %v15048_v57  ;;  %v15058_v25 = vmax.f32 %v15057_v1, 0.0  ;;  %7024 = vst [vmem:[%s12908_s2 + $0xf8] sm:$0xff] %v6512_v27   ;;  %v15060_v6 = vmax.f32 %v15059_v35, 0.0  ;;  %v15061_v54 = vld [vmem:[#allocation66_spill] sm:$0xff]  ;;  %v15063_v26 = vld [vmem:[#allocation69_spill] sm:$0xff] }
 0x6d6   :  { %v6527_v51 = vpack.c.bf16 %v15054_v41, %v15052_v50  ;;  %v15062_v8 = vmax.f32 %v15061_v54, 0.0  ;;  %v15064_v57 = vmax.f32 %v15063_v26, 0.0  ;;  %v15065_v16 = vld [vmem:[#allocation70_spill] sm:$0xff]  ;;  %v15067_v9 = vld [vmem:[#allocation73_spill] sm:$0xff]  ;;  %7025 = vst [vmem:[%s12908_s2 + $0x100] sm:$0xff] %v6517_v55  }
 0x6d7   :  { %v6532_v47 = vpack.c.bf16 %v15058_v25, %v15056_v11  ;;  %v15066_v14 = vmax.f32 %v15065_v16, 0.0  ;;  %v15068_v13 = vmax.f32 %v15067_v9, 0.0  ;;  %v15069_v50 = vld [vmem:[#allocation74_spill] sm:$0xff]  ;;  %v15071_v45 = vld [vmem:[#allocation77_spill] sm:$0xff]  ;;  %7026 = vst [vmem:[%s12908_s2 + $0x108] sm:$0xff] %v6522_v10  }
 0x6d8   :  { %v6537_v24 = vpack.c.bf16 %v15062_v8, %v15060_v6  ;;  %v15070_v60 = vmax.f32 %v15069_v50, 0.0  ;;  %v15072_v15 = vmax.f32 %v15071_v45, 0.0  ;;  %v15073_v11 = vld [vmem:[#allocation78_spill] sm:$0xff]  ;;  %7027 = vst [vmem:[%s12908_s2 + $0x110] sm:$0xff] %v6527_v51   ;;  %v15075_v25 = vld [vmem:[#allocation81_spill] sm:$0xff] }
 0x6d9   :  { %v6542_v48 = vpack.c.bf16 %v15066_v14, %v15064_v57  ;;  %v15074_v1 = vmax.f32 %v15073_v11, 0.0  ;;  %7028 = vst [vmem:[%s12908_s2 + $0x118] sm:$0xff] %v6532_v47   ;;  %v15076_v35 = vmax.f32 %v15075_v25, 0.0  ;;  %v15077_v6 = vld [vmem:[#allocation82_spill] sm:$0xff]  ;;  %v15079_v26 = vld [vmem:[#allocation85_spill] sm:$0xff] }
 0x6da   :  { %v6547_v41 = vpack.c.bf16 %v15070_v60, %v15068_v13  ;;  %v15078_v54 = vmax.f32 %v15077_v6, 0.0  ;;  %v15080_v57 = vmax.f32 %v15079_v26, 0.0  ;;  %v15081_v55 = vld [vmem:[#allocation86_spill] sm:$0xff]  ;;  %v15083_v9 = vld [vmem:[#allocation89_spill] sm:$0xff]  ;;  %7029 = vst [vmem:[%s12908_s2 + $0x120] sm:$0xff] %v6537_v24  }
 0x6db   :  { %v6552_v27 = vpack.c.bf16 %v15074_v1, %v15072_v15  ;;  %v15082_v16 = vmax.f32 %v15081_v55, 0.0  ;;  %v15084_v10 = vmax.f32 %v15083_v9, 0.0  ;;  %v15085_v13 = vld [vmem:[#allocation90_spill] sm:$0xff]  ;;  %v15087_v51 = vld [vmem:[#allocation93_spill] sm:$0xff]  ;;  %7030 = vst [vmem:[%s12908_s2 + $0x128] sm:$0xff] %v6542_v48  }
 0x6dc   :  { %v6557_v8 = vpack.c.bf16 %v15078_v54, %v15076_v35  ;;  %v15086_v50 = vmax.f32 %v15085_v13, 0.0  ;;  %v15088_v45 = vmax.f32 %v15087_v51, 0.0  ;;  %v15089_v15 = vld [vmem:[#allocation94_spill] sm:$0xff]  ;;  %7031 = vst [vmem:[%s12908_s2 + $0x130] sm:$0xff] %v6547_v41   ;;  %v15091_v1 = vld [vmem:[#allocation97_spill] sm:$0xff] }
 0x6dd   :  { %v6562_v14 = vpack.c.bf16 %v15082_v16, %v15080_v57  ;;  %v15090_v11 = vmax.f32 %v15089_v15, 0.0  ;;  %7032 = vst [vmem:[%s12908_s2 + $0x138] sm:$0xff] %v6552_v27   ;;  %v15092_v25 = vmax.f32 %v15091_v1, 0.0  ;;  %v15093_v35 = vld [vmem:[#allocation98_spill] sm:$0xff]  ;;  %v15095_v26 = vld [vmem:[#allocation101_spill] sm:$0xff] }
 0x6de   :  { %v6567_v60 = vpack.c.bf16 %v15086_v50, %v15084_v10  ;;  %v15094_v6 = vmax.f32 %v15093_v35, 0.0  ;;  %v15096_v57 = vmax.f32 %v15095_v26, 0.0  ;;  %v15097_v24 = vld [vmem:[#allocation102_spill] sm:$0xff]  ;;  %v15099_v9 = vld [vmem:[#allocation105_spill] sm:$0xff]  ;;  %7033 = vst [vmem:[%s12908_s2 + $0x140] sm:$0xff] %v6557_v8  }
 0x6df   :  { %v6572_v47 = vpack.c.bf16 %v15090_v11, %v15088_v45  ;;  %v15098_v55 = vmax.f32 %v15097_v24, 0.0  ;;  %v15100_v48 = vmax.f32 %v15099_v9, 0.0  ;;  %v15101_v10 = vld [vmem:[#allocation106_spill] sm:$0xff]  ;;  %v15103_v41 = vld [vmem:[#allocation109_spill] sm:$0xff]  ;;  %7034 = vst [vmem:[%s12908_s2 + $0x148] sm:$0xff] %v6562_v14  }
 0x6e0   :  { %v6577_v54 = vpack.c.bf16 %v15094_v6, %v15092_v25  ;;  %v15102_v13 = vmax.f32 %v15101_v10, 0.0  ;;  %v15104_v51 = vmax.f32 %v15103_v41, 0.0  ;;  %v15105_v45 = vld [vmem:[#allocation110_spill] sm:$0xff]  ;;  %7035 = vst [vmem:[%s12908_s2 + $0x150] sm:$0xff] %v6567_v60   ;;  %v15107_v11 = vld [vmem:[#allocation113_spill] sm:$0xff] }
 0x6e1   :  { %v6582_v16 = vpack.c.bf16 %v15098_v55, %v15096_v57  ;;  %v15106_v15 = vmax.f32 %v15105_v45, 0.0  ;;  %7036 = vst [vmem:[%s12908_s2 + $0x158] sm:$0xff] %v6572_v47   ;;  %v15108_v1 = vmax.f32 %v15107_v11, 0.0  ;;  %v15109_v25 = vld [vmem:[#allocation114_spill] sm:$0xff]  ;;  %v15111_v26 = vld [vmem:[#allocation117_spill] sm:$0xff] }
 0x6e2   :  { %v6587_v50 = vpack.c.bf16 %v15102_v13, %v15100_v48  ;;  %v15110_v35 = vmax.f32 %v15109_v25, 0.0  ;;  %v15112_v57 = vmax.f32 %v15111_v26, 0.0  ;;  %v15113_v8 = vld [vmem:[#allocation118_spill] sm:$0xff]  ;;  %v15115_v9 = vld [vmem:[#allocation121_spill] sm:$0xff]  ;;  %7037 = vst [vmem:[%s12908_s2 + $0x160] sm:$0xff] %v6577_v54  }
 0x6e3   :  { %v6592_v27 = vpack.c.bf16 %v15106_v15, %v15104_v51  ;;  %v15114_v24 = vmax.f32 %v15113_v8, 0.0  ;;  %v15116_v14 = vmax.f32 %v15115_v9, 0.0  ;;  %v15117_v48 = vld [vmem:[#allocation122_spill] sm:$0xff]  ;;  %v15119_v60 = vld [vmem:[#allocation125_spill] sm:$0xff]  ;;  %7038 = vst [vmem:[%s12908_s2 + $0x168] sm:$0xff] %v6582_v16   ;;  %v15130_v16 = vmax.f32 %v14810_v23, 0.0 }
 0x6e4   :  { %v6597_v6 = vpack.c.bf16 %v15110_v35, %v15108_v1  ;;  %v15118_v10 = vmax.f32 %v15117_v48, 0.0  ;;  %v15120_v41 = vmax.f32 %v15119_v60, 0.0  ;;  %v15121_v51 = vld [vmem:[#allocation126_spill] sm:$0xff]  ;;  %7039 = vst [vmem:[%s12908_s2 + $0x170] sm:$0xff] %v6587_v50   ;;  %v15123_v15 = vld [vmem:[#allocation129_spill] sm:$0xff]  ;;  %v15125_v1 = vmax.f32 %v14807_v39, 0.0 }
 0x6e5   :  { %v6602_v55 = vpack.c.bf16 %v15114_v24, %v15112_v57  ;;  %v15122_v45 = vmax.f32 %v15121_v51, 0.0  ;;  %7040 = vst [vmem:[%s12908_s2 + $0x178] sm:$0xff] %v6592_v27   ;;  %v15124_v11 = vmax.f32 %v15123_v15, 0.0  ;;  %v15126_v35 = vld [vmem:[#allocation133_spill] sm:$0xff]  ;;  %v15128_v54 = vld [vmem:[#allocation134_spill] sm:$0xff]  ;;  %v15131_v24 = vmax.f32 %v14811_v42, 0.0 }
 0x6e6   :  { %v6607_v13 = vpack.c.bf16 %v15118_v10, %v15116_v14  ;;  %v15127_v26 = vmax.f32 %v15126_v35, 0.0  ;;  %v15129_v57 = vmax.f32 %v15128_v54, 0.0  ;;  %v15132_v50 = vld [vmem:[#allocation141_spill] sm:$0xff]  ;;  %v15134_v48 = vld [vmem:[#allocation142_spill] sm:$0xff]  ;;  %7041 = vst [vmem:[%s12908_s2 + $0x180] sm:$0xff] %v6597_v6   ;;  %v15136_v39 = vmax.f32 %v14814_v37, 0.0 }
 0x6e7   :  { %v6612_v47 = vpack.c.bf16 %v15122_v45, %v15120_v41  ;;  %v6617_v25 = vpack.c.bf16 %v15125_v1, %v15124_v11  ;;  %v6627_v9 = vpack.c.bf16 %v15131_v24, %v15130_v16  ;;  %v15133_v14 = vmax.f32 %v15132_v50, 0.0  ;;  %7042 = vst [vmem:[%s12908_s2 + $0x188] sm:$0xff] %v6602_v55   ;;  %v15138_v60 = vld [vmem:[#allocation149_spill] sm:$0xff]  ;;  %v15140_v6 = vld [vmem:[#allocation150_spill] sm:$0xff] }
 0x6e8   :  { %v6622_v8 = vpack.c.bf16 %v15129_v57, %v15127_v26  ;;  %v15135_v10 = vmax.f32 %v15134_v48, 0.0  ;;  %7043 = vst [vmem:[%s12908_s2 + $0x190] sm:$0xff] %v6607_v13   ;;  %v15137_v42 = vmax.f32 %v14815_v62, 0.0  ;;  %v15139_v41 = vmax.f32 %v15138_v60, 0.0  ;;  %v15144_v13 = vld [vmem:[#allocation154_spill] sm:$0xff]  ;;  %v15146_v35 = vld [vmem:[#allocation157_spill] sm:$0xff] }
 0x6e9   :  { %7044 = vst [vmem:[%s12908_s2 + $0x198] sm:$0xff] %v6612_v47   ;;  %v15141_v51 = vmax.f32 %v15140_v6, 0.0  ;;  %v15142_v55 = vmax.f32 %v11196_v28, 0.0  ;;  %v15143_v15 = vmax.f32 %v14818_v30, 0.0  ;;  %v15145_v1 = vmax.f32 %v15144_v13, 0.0  ;;  %7045 = vst [vmem:[%s12908_s2 + $0x1a0] sm:$0xff] %v6617_v25  }
 0x6ea   :  { %v6632_v27 = vpack.c.bf16 %v15135_v10, %v15133_v14  ;;  %v6637_v23 = vpack.c.bf16 %v15137_v42, %v15136_v39  ;;  %v15147_v26 = vmax.f32 %v15146_v35, 0.0  ;;  %7046 = vst [vmem:[%s12908_s2 + $0x1a8] sm:$0xff] %v6622_v8   ;;  %7047 = vst [vmem:[%s12908_s2 + $0x1b0] sm:$0xff] %v6627_v9   ;;  %v15148_v37 = vmax.f32 %v11212_v32, 0.0  ;;  %v15149_v62 = vld [vmem:[#allocation158_spill] sm:$0xff]  ;;  %v15151_v54 = vld [vmem:[#allocation161_spill] sm:$0xff] }
 0x6eb   :  { %v6642_v45 = vpack.c.bf16 %v15141_v51, %v15139_v41  ;;  %v6647_v11 = vpack.c.bf16 %v15143_v15, %v15142_v55  ;;  %v15150_v28 = vmax.f32 %v15149_v62, 0.0  ;;  %v15152_v57 = vmax.f32 %v15151_v54, 0.0  ;;  %v15153_v25 = vld [vmem:[#allocation162_spill] sm:$0xff]  ;;  %v15155_v50 = vld [vmem:[#allocation165_spill] sm:$0xff] }
 0x6ec   :  { %v6652_v47 = vpack.c.bf16 %v15147_v26, %v15145_v1  ;;  %7048 = vst [vmem:[%s12908_s2 + $0x1b8] sm:$0xff] %v6632_v27   ;;  %v15154_v16 = vmax.f32 %v15153_v25, 0.0  ;;  %v15156_v8 = vmax.f32 %v15155_v50, 0.0  ;;  %v15157_v14 = vld [vmem:[#allocation166_spill] sm:$0xff]  ;;  %v15159_v9 = vld [vmem:[#allocation169_spill] sm:$0xff]  ;;  %7049 = vst [vmem:[%s12908_s2 + $0x1c0] sm:$0xff] %v6637_v23  }
 0x6ed   :  { %v6657_v30 = vpack.c.bf16 %v15150_v28, %v15148_v37  ;;  %v15158_v48 = vmax.f32 %v15157_v14, 0.0  ;;  %v15160_v39 = vmax.f32 %v15159_v9, 0.0  ;;  %v15161_v42 = vld [vmem:[#allocation170_spill] sm:$0xff]  ;;  %7050 = vst [vmem:[%s12908_s2 + $0x1c8] sm:$0xff] %v6642_v45   ;;  %7051 = vst [vmem:[%s12908_s2 + $0x1d0] sm:$0xff] %v6647_v11   ;;  %v15163_v32 = vld [vmem:[#allocation173_spill] sm:$0xff] }
 0x6ee   :  { %v6662_v24 = vpack.c.bf16 %v15154_v16, %v15152_v57  ;;  %v15162_v60 = vmax.f32 %v15161_v42, 0.0  ;;  %7052 = vst [vmem:[%s12908_s2 + $0x1d8] sm:$0xff] %v6652_v47   ;;  %v15164_v41 = vmax.f32 %v15163_v32, 0.0  ;;  %v15165_v6 = vld [vmem:[#allocation174_spill] sm:$0xff]  ;;  %v15167_v15 = vld [vmem:[#allocation177_spill] sm:$0xff] }
 0x6ef   :  { %v6667_v10 = vpack.c.bf16 %v15158_v48, %v15156_v8  ;;  %v15166_v51 = vmax.f32 %v15165_v6, 0.0  ;;  %v15168_v13 = vmax.f32 %v15167_v15, 0.0  ;;  %v15169_v23 = vld [vmem:[#allocation178_spill] sm:$0xff]  ;;  %v15171_v26 = vld [vmem:[#allocation181_spill] sm:$0xff]  ;;  %7053 = vst [vmem:[%s12908_s2 + $0x1e0] sm:$0xff] %v6657_v30  }
 0x6f0   :  { %v6672_v27 = vpack.c.bf16 %v15162_v60, %v15160_v39  ;;  %v15170_v1 = vmax.f32 %v15169_v23, 0.0  ;;  %v15172_v45 = vmax.f32 %v15171_v26, 0.0  ;;  %v15173_v37 = vld [vmem:[#allocation182_spill] sm:$0xff]  ;;  %v15175_v11 = vld [vmem:[#allocation185_spill] sm:$0xff]  ;;  %7054 = vst [vmem:[%s12908_s2 + $0x1e8] sm:$0xff] %v6662_v24  }
 0x6f1   :  { %v6677_v55 = vpack.c.bf16 %v15166_v51, %v15164_v41  ;;  %v15174_v62 = vmax.f32 %v15173_v37, 0.0  ;;  %v15176_v54 = vmax.f32 %v15175_v11, 0.0  ;;  %v15177_v57 = vld [vmem:[#allocation186_spill] sm:$0xff]  ;;  %7055 = vst [vmem:[%s12908_s2 + $0x1f0] sm:$0xff] %v6667_v10   ;;  %v15179_v16 = vld [vmem:[#allocation189_spill] sm:$0xff] }
 0x6f2   :  { %v6682_v35 = vpack.c.bf16 %v15170_v1, %v15168_v13  ;;  %v15178_v25 = vmax.f32 %v15177_v57, 0.0  ;;  %7056 = vst [vmem:[%s12908_s2 + $0x1f8] sm:$0xff] %v6672_v27   ;;  %v15180_v50 = vmax.f32 %v15179_v16, 0.0  ;;  %v15181_v8 = vld [vmem:[#allocation190_spill] sm:$0xff]  ;;  %v15183_v9 = vld [vmem:[#allocation193_spill] sm:$0xff] }
 0x6f3   :  { %v6687_v28 = vpack.c.bf16 %v15174_v62, %v15172_v45  ;;  %v15182_v14 = vmax.f32 %v15181_v8, 0.0  ;;  %v15184_v39 = vmax.f32 %v15183_v9, 0.0  ;;  %v15185_v30 = vld [vmem:[#allocation194_spill] sm:$0xff]  ;;  %v15187_v32 = vld [vmem:[#allocation197_spill] sm:$0xff]  ;;  %7057 = vst [vmem:[%s12908_s2 + $0x200] sm:$0xff] %v6677_v55  }
 0x6f4   :  { %v6692_v47 = vpack.c.bf16 %v15178_v25, %v15176_v54  ;;  %v15186_v42 = vmax.f32 %v15185_v30, 0.0  ;;  %v15188_v24 = vmax.f32 %v15187_v32, 0.0  ;;  %v15189_v41 = vld [vmem:[#allocation198_spill] sm:$0xff]  ;;  %v15191_v10 = vld [vmem:[#allocation201_spill] sm:$0xff]  ;;  %7058 = vst [vmem:[%s12908_s2 + $0x208] sm:$0xff] %v6682_v35  }
 0x6f5   :  { %v6697_v48 = vpack.c.bf16 %v15182_v14, %v15180_v50  ;;  %v15190_v6 = vmax.f32 %v15189_v41, 0.0  ;;  %v15192_v15 = vmax.f32 %v15191_v10, 0.0  ;;  %v15193_v13 = vld [vmem:[#allocation202_spill] sm:$0xff]  ;;  %7059 = vst [vmem:[%s12908_s2 + $0x210] sm:$0xff] %v6687_v28   ;;  %v15195_v1 = vld [vmem:[#allocation205_spill] sm:$0xff]  ;;  %v15207_v28 = vld [vmem:[#allocation216_spill] sm:$0xff] }
 0x6f6   :  { %v6702_v60 = vpack.c.bf16 %v15186_v42, %v15184_v39  ;;  %v15194_v23 = vmax.f32 %v15193_v13, 0.0  ;;  %7060 = vst [vmem:[%s12908_s2 + $0x218] sm:$0xff] %v6692_v47   ;;  %v15196_v26 = vmax.f32 %v15195_v1, 0.0  ;;  %v15197_v45 = vld [vmem:[#allocation206_spill] sm:$0xff]  ;;  %v15199_v11 = vld [vmem:[#allocation209_spill] sm:$0xff]  ;;  %v15208_v9 = vmax.f32 %v15207_v28, 0.0 }
 0x6f7   :  { %v6707_v51 = vpack.c.bf16 %v15190_v6, %v15188_v24  ;;  %v15198_v37 = vmax.f32 %v15197_v45, 0.0  ;;  %v15200_v54 = vmax.f32 %v15199_v11, 0.0  ;;  %v15201_v55 = vld [vmem:[#allocation210_spill] sm:$0xff]  ;;  %v15203_v16 = vld [vmem:[#allocation213_spill] sm:$0xff]  ;;  %7061 = vst [vmem:[%s12908_s2 + $0x220] sm:$0xff] %v6697_v48   ;;  %v15211_v42 = vld [vmem:[#allocation35_spill] sm:$0xff] }
 0x6f8   :  { %v6712_v27 = vpack.c.bf16 %v15194_v23, %v15192_v15  ;;  %v15202_v57 = vmax.f32 %v15201_v55, 0.0  ;;  %v15204_v35 = vmax.f32 %v15203_v16, 0.0  ;;  %v15205_v50 = vld [vmem:[#allocation214_spill] sm:$0xff]  ;;  %7062 = vst [vmem:[%s12908_s2 + $0x228] sm:$0xff] %v6702_v60   ;;  %v15212_v32 = vmax.f32 %v15211_v42, 0.0  ;;  %v15213_v24 = vld [vmem:[#allocation40_spill] sm:$0xff] }
 0x6f9   :  { %v6717_v62 = vpack.c.bf16 %v15198_v37, %v15196_v26  ;;  %v15206_v8 = vmax.f32 %v15205_v50, 0.0  ;;  %v15209_v39 = vld [vmem:[#allocation34_spill] sm:$0xff]  ;;  %7063 = vst [vmem:[%s12908_s2 + $0x230] sm:$0xff] %v6707_v51   ;;  %v15214_v41 = vmax.f32 %v15213_v24, 0.0  ;;  %v15215_v10 = vld [vmem:[#allocation41_spill] sm:$0xff]  ;;  %v15219_v1 = vld [vmem:[#allocation47_spill] sm:$0xff] }
 0x6fa   :  { %v6722_v25 = vpack.c.bf16 %v15202_v57, %v15200_v54  ;;  %v15210_v30 = vmax.f32 %v15209_v39, 0.0  ;;  %7064 = vst [vmem:[%s12908_s2 + $0x238] sm:$0xff] %v6712_v27   ;;  %v15216_v15 = vmax.f32 %v15215_v10, 0.0  ;;  %v15217_v48 = vld [vmem:[#allocation46_spill] sm:$0xff]  ;;  %v15220_v60 = vmax.f32 %v15219_v1, 0.0  ;;  %v15221_v26 = vld [vmem:[#allocation52_spill] sm:$0xff] }
 0x6fb   :  { %v6727_v14 = vpack.c.bf16 %v15206_v8, %v15204_v35  ;;  %v6737_v6 = vpack.c.bf16 %v15214_v41, %v15212_v32  ;;  %v15218_v13 = vmax.f32 %v15217_v48, 0.0  ;;  %v15222_v45 = vmax.f32 %v15221_v26, 0.0  ;;  %v15223_v51 = vld [vmem:[#allocation53_spill] sm:$0xff]  ;;  %v15225_v54 = vld [vmem:[#allocation56_spill] sm:$0xff]  ;;  %7065 = vst [vmem:[%s12908_s2 + $0x240] sm:$0xff] %v6717_v62   ;;  %v15227_v57 = vld [vmem:[#allocation59_spill] sm:$0xff] }
 0x6fc   :  { %v6732_v47 = vpack.c.bf16 %v15210_v30, %v15208_v9  ;;  %v15224_v11 = vmax.f32 %v15223_v51, 0.0  ;;  %v15226_v55 = vmax.f32 %v15225_v54, 0.0  ;;  %7066 = vst [vmem:[%s12908_s2 + $0x248] sm:$0xff] %v6722_v25   ;;  %v15228_v16 = vmax.f32 %v15227_v57, 0.0  ;;  %v15229_v35 = vld [vmem:[#allocation60_spill] sm:$0xff]  ;;  %v15231_v28 = vld [vmem:[#allocation63_spill] sm:$0xff] }
 0x6fd   :  { %v6742_v23 = vpack.c.bf16 %v15218_v13, %v15216_v15  ;;  %v6747_v37 = vpack.c.bf16 %v15222_v45, %v15220_v60  ;;  %7067 = vst [vmem:[%s12908_s2 + $0x250] sm:$0xff] %v6727_v14   ;;  %v15230_v50 = vmax.f32 %v15229_v35, 0.0  ;;  %v15232_v9 = vmax.f32 %v15231_v28, 0.0  ;;  %v15233_v62 = vld [vmem:[#allocation64_spill] sm:$0xff]  ;;  %v15235_v42 = vld [vmem:[#allocation67_spill] sm:$0xff]  ;;  %7069 = vst [vmem:[%s12908_s2 + $0x260] sm:$0xff] %v6737_v6  }
 0x6fe   :  { %v6752_v27 = vpack.c.bf16 %v15226_v55, %v15224_v11  ;;  %7068 = vst [vmem:[%s12908_s2 + $0x258] sm:$0xff] %v6732_v47   ;;  %v15234_v39 = vmax.f32 %v15233_v62, 0.0  ;;  %v15236_v25 = vmax.f32 %v15235_v42, 0.0  ;;  %v15237_v32 = vld [vmem:[#allocation68_spill] sm:$0xff]  ;;  %v15239_v14 = vld [vmem:[#allocation71_spill] sm:$0xff]  ;;  %v15245_v60 = vmax.f32 %v14863_v0, 0.0 }
 0x6ff   :  { %v6757_v8 = vpack.c.bf16 %v15230_v50, %v15228_v16  ;;  %v15238_v24 = vmax.f32 %v15237_v32, 0.0  ;;  %v15240_v10 = vmax.f32 %v15239_v14, 0.0  ;;  %v15241_v15 = vld [vmem:[#allocation72_spill] sm:$0xff]  ;;  %7070 = vst [vmem:[%s12908_s2 + $0x268] sm:$0xff] %v6742_v23   ;;  %7071 = vst [vmem:[%s12908_s2 + $0x270] sm:$0xff] %v6747_v37   ;;  %v15243_v13 = vld [vmem:[#allocation75_spill] sm:$0xff] }
 0x700   :  { %v6762_v30 = vpack.c.bf16 %v15234_v39, %v15232_v9  ;;  %v15242_v48 = vmax.f32 %v15241_v15, 0.0  ;;  %7072 = vst [vmem:[%s12908_s2 + $0x278] sm:$0xff] %v6752_v27   ;;  %v15244_v1 = vmax.f32 %v15243_v13, 0.0  ;;  %v15246_v45 = vld [vmem:[#allocation79_spill] sm:$0xff]  ;;  %v15248_v6 = vld [vmem:[#allocation80_spill] sm:$0xff] }
 0x701   :  { %v6767_v41 = vpack.c.bf16 %v15238_v24, %v15236_v25  ;;  %v15247_v51 = vmax.f32 %v15246_v45, 0.0  ;;  %v15249_v11 = vmax.f32 %v15248_v6, 0.0  ;;  %v15250_v55 = vld [vmem:[#allocation83_spill] sm:$0xff]  ;;  %v15252_v57 = vld [vmem:[#allocation84_spill] sm:$0xff]  ;;  %7073 = vst [vmem:[%s12908_s2 + $0x280] sm:$0xff] %v6757_v8  }
 0x702   :  { %v6772_v47 = vpack.c.bf16 %v15242_v48, %v15240_v10  ;;  %v6777_v26 = vpack.c.bf16 %v15245_v60, %v15244_v1  ;;  %v15251_v23 = vmax.f32 %v15250_v55, 0.0  ;;  %v15253_v16 = vmax.f32 %v15252_v57, 0.0  ;;  %v15254_v37 = vld [vmem:[#allocation87_spill] sm:$0xff]  ;;  %v15256_v28 = vld [vmem:[#allocation88_spill] sm:$0xff]  ;;  %7074 = vst [vmem:[%s12908_s2 + $0x288] sm:$0xff] %v6762_v30  }
 0x703   :  { %v6782_v54 = vpack.c.bf16 %v15249_v11, %v15247_v51  ;;  %v15255_v50 = vmax.f32 %v15254_v37, 0.0  ;;  %v15257_v9 = vmax.f32 %v15256_v28, 0.0  ;;  %7075 = vst [vmem:[%s12908_s2 + $0x290] sm:$0xff] %v6767_v41   ;;  %v15258_v0 = vld [vmem:[#allocation91_spill] sm:$0xff]  ;;  %v15260_v39 = vld [vmem:[#allocation92_spill] sm:$0xff] }
 0x704   :  { %v6787_v35 = vpack.c.bf16 %v15253_v16, %v15251_v23  ;;  %7076 = vst [vmem:[%s12908_s2 + $0x298] sm:$0xff] %v6772_v47   ;;  %v15259_v62 = vmax.f32 %v15258_v0, 0.0  ;;  %v15261_v42 = vmax.f32 %v15260_v39, 0.0  ;;  %v15262_v32 = vld [vmem:[#allocation95_spill] sm:$0xff]  ;;  %v15264_v8 = vld [vmem:[#allocation96_spill] sm:$0xff]  ;;  %7077 = vst [vmem:[%s12908_s2 + $0x2a0] sm:$0xff] %v6777_v26  }
 0x705   :  { %v6792_v27 = vpack.c.bf16 %v15257_v9, %v15255_v50  ;;  %v15263_v24 = vmax.f32 %v15262_v32, 0.0  ;;  %v15265_v14 = vmax.f32 %v15264_v8, 0.0  ;;  %v15266_v15 = vld [vmem:[#allocation99_spill] sm:$0xff]  ;;  %v15268_v48 = vld [vmem:[#allocation100_spill] sm:$0xff]  ;;  %7078 = vst [vmem:[%s12908_s2 + $0x2a8] sm:$0xff] %v6782_v54   ;;  %v15284_v0 = vmax.f32 %v14882_v20, 0.0 }
 0x706   :  { %v6797_v25 = vpack.c.bf16 %v15261_v42, %v15259_v62  ;;  %v15267_v30 = vmax.f32 %v15266_v15, 0.0  ;;  %v15269_v13 = vmax.f32 %v15268_v48, 0.0  ;;  %v15270_v41 = vld [vmem:[#allocation103_spill] sm:$0xff]  ;;  %v15272_v45 = vld [vmem:[#allocation104_spill] sm:$0xff]  ;;  %7079 = vst [vmem:[%s12908_s2 + $0x2b0] sm:$0xff] %v6787_v35   ;;  %v15287_v42 = vmax.f32 %v14884_v19, 0.0 }
 0x707   :  { %v6802_v10 = vpack.c.bf16 %v15265_v14, %v15263_v24  ;;  %v15271_v60 = vmax.f32 %v15270_v41, 0.0  ;;  %v15273_v51 = vmax.f32 %v15272_v45, 0.0  ;;  %7080 = vst [vmem:[%s12908_s2 + $0x2b8] sm:$0xff] %v6792_v27   ;;  %v15274_v6 = vld [vmem:[#allocation107_spill] sm:$0xff]  ;;  %v15276_v55 = vld [vmem:[#allocation108_spill] sm:$0xff]  ;;  %v15288_v20 = vmax.f32 %v14885_v56, 0.0 }
 0x708   :  { %v6807_v1 = vpack.c.bf16 %v15269_v13, %v15267_v30  ;;  %v15275_v11 = vmax.f32 %v15274_v6, 0.0  ;;  %v15277_v23 = vmax.f32 %v15276_v55, 0.0  ;;  %v15278_v16 = vld [vmem:[#allocation111_spill] sm:$0xff]  ;;  %v15280_v26 = vld [vmem:[#allocation112_spill] sm:$0xff]  ;;  %7081 = vst [vmem:[%s12908_s2 + $0x2c0] sm:$0xff] %v6797_v25   ;;  %v15289_v19 = vmax.f32 %v14886_v18, 0.0 }
 0x709   :  { %v6812_v47 = vpack.c.bf16 %v15273_v51, %v15271_v60  ;;  %v15279_v37 = vmax.f32 %v15278_v16, 0.0  ;;  %v15281_v50 = vmax.f32 %v15280_v26, 0.0  ;;  %v15282_v9 = vld [vmem:[#allocation115_spill] sm:$0xff]  ;;  %7082 = vst [vmem:[%s12908_s2 + $0x2c8] sm:$0xff] %v6802_v10   ;;  %v15290_v24 = vmax.f32 %v14887_v17, 0.0  ;;  %v15320_v16 = vld [vmem:[#allocation144_spill] sm:$0xff] }
 0x70a   :  { %v6817_v57 = vpack.c.bf16 %v15277_v23, %v15275_v11  ;;  %v15283_v54 = vmax.f32 %v15282_v9, 0.0  ;;  %v15285_v35 = vld [vmem:[#allocation119_spill] sm:$0xff]  ;;  %7083 = vst [vmem:[%s12908_s2 + $0x2d0] sm:$0xff] %v6807_v1   ;;  %v6837_v32 = vpack.c.bf16 %v15289_v19, %v15288_v20  ;;  %v15291_v25 = vmax.f32 %v14888_v40, 0.0 }
 0x70b   :  { %v6822_v28 = vpack.c.bf16 %v15281_v50, %v15279_v37  ;;  %v15286_v39 = vmax.f32 %v15285_v35, 0.0  ;;  %7084 = vst [vmem:[%s12908_s2 + $0x2d8] sm:$0xff] %v6812_v47   ;;  %v15292_v14 = vmax.f32 %v14889_v29, 0.0  ;;  %v15293_v10 = vmax.f32 %v14890_v46, 0.0  ;;  %v15318_v55 = vld [vmem:[#allocation143_spill] sm:$0xff] }
 0x70c   :  { %v6827_v62 = vpack.c.bf16 %v15284_v0, %v15283_v54  ;;  %v6842_v8 = vpack.c.bf16 %v15291_v25, %v15290_v24  ;;  %v15294_v30 = vmax.f32 %v14891_v49, 0.0  ;;  %v15295_v48 = vmax.f32 %v14892_v53, 0.0  ;;  %7085 = vst [vmem:[%s12908_s2 + $0x2e0] sm:$0xff] %v6817_v57   ;;  %7089 = vst [vmem:[%s12908_s2 + $0x300] sm:$0xff] %v6837_v32   ;;  %v15322_v26 = vld [vmem:[#allocation147_spill] sm:$0xff]  ;;  %v15336_v24 = vld [vmem:[#allocation224_spill] sm:$0xff] }
 0x70d   :  { %v6832_v27 = vpack.c.bf16 %v15287_v42, %v15286_v39  ;;  %v6847_v15 = vpack.c.bf16 %v15293_v10, %v15292_v14  ;;  %7086 = vst [vmem:[%s12908_s2 + $0x2e8] sm:$0xff] %v6822_v28   ;;  %v15296_v49 = vmax.f32 %v11532_v44, 0.0  ;;  %v15297_v53 = vmax.f32 %v14893_v7, 0.0  ;;  %v15328_v54 = vld [vmem:[#allocation155_spill] sm:$0xff] }
 0x70e   :  { %v6852_v13 = vpack.c.bf16 %v15295_v48, %v15294_v30  ;;  %7087 = vst [vmem:[%s12908_s2 + $0x2f0] sm:$0xff] %v6827_v62   ;;  %v15298_v29 = vmax.f32 %v11540_v12, 0.0  ;;  %v15299_v18 = vmax.f32 %v11544_v34, 0.0  ;;  %v15300_v46 = vmax.f32 %v11548_v63, 0.0  ;;  %7090 = vst [vmem:[%s12908_s2 + $0x308] sm:$0xff] %v6842_v8   ;;  %v15330_v62 = vld [vmem:[#allocation156_spill] sm:$0xff] }
 0x70f   :  { %7088 = vst [vmem:[%s12908_s2 + $0x2f8] sm:$0xff] %v6832_v27   ;;  %v6857_v56 = vpack.c.bf16 %v15297_v53, %v15296_v49  ;;  %v15301_v40 = vmax.f32 %v11552_v33, 0.0  ;;  %v15302_v41 = vmax.f32 %v11556_v58, 0.0  ;;  %v15303_v60 = vmax.f32 %v11560_v31, 0.0  ;;  %7091 = vst [vmem:[%s12908_s2 + $0x310] sm:$0xff] %v6847_v15   ;;  %v15332_v42 = vld [vmem:[#allocation159_spill] sm:$0xff] }
 0x710   :  { %v6862_v17 = vpack.c.bf16 %v15299_v18, %v15298_v29  ;;  %7092 = vst [vmem:[%s12908_s2 + $0x318] sm:$0xff] %v6852_v13   ;;  %v15304_v7 = vmax.f32 %v11564_v36, 0.0  ;;  %v15305_v44 = vmax.f32 %v11568_v43, 0.0  ;;  %v15306_v34 = vmax.f32 %v11572_v61, 0.0  ;;  %v15334_v20 = vld [vmem:[#allocation223_spill] sm:$0xff]  ;;  %v15338_v8 = vld [vmem:[#allocation225_spill] sm:$0xff] }
 0x711   :  { %v6867_v1 = vpack.c.bf16 %v15301_v40, %v15300_v46  ;;  %v6872_v45 = vpack.c.bf16 %v15303_v60, %v15302_v41  ;;  %v15307_v63 = vmax.f32 %v11576_v59, 0.0  ;;  %v15308_v58 = vmax.f32 %v11580_v22, 0.0  ;;  %7093 = vst [vmem:[%s12908_s2 + $0x320] sm:$0xff] %v6857_v56   ;;  %v15340_v15 = vld [vmem:[#allocation226_spill] sm:$0xff]  ;;  %v15342_v48 = vld [vmem:[#allocation227_spill] sm:$0xff]  ;;  %v15344_v53 = vld [vmem:[#allocation228_spill] sm:$0xff] }
 0x712   :  { %v6877_v12 = vpack.c.bf16 %v15305_v44, %v15304_v7  ;;  %v15309_v31 = vmax.f32 %v11584_v5, 0.0  ;;  %v15310_v47 = vmax.f32 %v11588_v21, 0.0  ;;  %v15311_v6 = vmax.f32 %v11592_v38, 0.0  ;;  %7094 = vst [vmem:[%s12908_s2 + $0x328] sm:$0xff] %v6862_v17   ;;  %v15316_v21 = vld [vmem:[#allocation140_spill] sm:$0xff]  ;;  %v15346_v29 = vld [vmem:[#allocation229_spill] sm:$0xff] }
 0x713   :  { %v6882_v33 = vpack.c.bf16 %v15307_v63, %v15306_v34  ;;  %7095 = vst [vmem:[%s12908_s2 + $0x330] sm:$0xff] %v6867_v1   ;;  %7096 = vst [vmem:[%s12908_s2 + $0x338] sm:$0xff] %v6872_v45   ;;  %v15312_v36 = vmax.f32 %v11596_v3, 0.0  ;;  %v15313_v43 = vmax.f32 %v11600_v4, 0.0  ;;  %v15314_v59 = vmax.f32 %v11604_v2, 0.0  ;;  %v15324_v3 = vld [vmem:[#allocation148_spill] sm:$0xff] }
 0x714   :  { %v6887_v51 = vpack.c.bf16 %v15309_v31, %v15308_v58  ;;  %v6892_v11 = vpack.c.bf16 %v15311_v6, %v15310_v47  ;;  %v15315_v22 = vmax.f32 %v11608_v52, 0.0  ;;  %v15317_v38 = vmax.f32 %v15316_v21, 0.0  ;;  %7097 = vst [vmem:[%s12908_s2 + $0x340] sm:$0xff] %v6877_v12   ;;  %v15326_v2 = vld [vmem:[#allocation151_spill] sm:$0xff]  ;;  %v15348_v46 = vld [vmem:[#allocation230_spill] sm:$0xff]  ;;  %v15352_v45 = vld [vmem:[#allocation232_spill] sm:$0xff] }
 0x715   :  { %v6897_v61 = vpack.c.bf16 %v15313_v43, %v15312_v36  ;;  %v15319_v23 = vmax.f32 %v15318_v55, 0.0  ;;  %v15321_v37 = vmax.f32 %v15320_v16, 0.0  ;;  %v15323_v50 = vmax.f32 %v15322_v26, 0.0  ;;  %7098 = vst [vmem:[%s12908_s2 + $0x348] sm:$0xff] %v6882_v33   ;;  %v15350_v1 = vld [vmem:[#allocation231_spill] sm:$0xff]  ;;  %v15354_v44 = vld [vmem:[#allocation233_spill] sm:$0xff] }
 0x716   :  { %v6902_v5 = vpack.c.bf16 %v15315_v22, %v15314_v59  ;;  %7099 = vst [vmem:[%s12908_s2 + $0x350] sm:$0xff] %v6887_v51   ;;  %7100 = vst [vmem:[%s12908_s2 + $0x358] sm:$0xff] %v6892_v11   ;;  %v15325_v4 = vmax.f32 %v15324_v3, 0.0  ;;  %v15327_v52 = vmax.f32 %v15326_v2, 0.0  ;;  %v15329_v0 = vmax.f32 %v15328_v54, 0.0  ;;  %v15356_v63 = vld [vmem:[#allocation160_spill] sm:$0xff] }
 0x717   :  { %v6907_v57 = vpack.c.bf16 %v15319_v23, %v15317_v38  ;;  %v6912_v28 = vpack.c.bf16 %v15323_v50, %v15321_v37  ;;  %v15331_v35 = vmax.f32 %v15330_v62, 0.0  ;;  %v15333_v27 = vmax.f32 %v15332_v42, 0.0  ;;  %7101 = vst [vmem:[%s12908_s2 + $0x360] sm:$0xff] %v6897_v61   ;;  %v15358_v58 = vld [vmem:[#allocation163_spill] sm:$0xff]  ;;  %v15360_v47 = vld [vmem:[#allocation164_spill] sm:$0xff]  ;;  %v15364_v61 = vld [vmem:[#allocation234_spill] sm:$0xff] }
 0x718   :  { %v6917_v9 = vpack.c.bf16 %v15327_v52, %v15325_v4  ;;  %v15335_v19 = vmax.f32 %v15334_v20, 0.0  ;;  %v15337_v25 = vmax.f32 %v15336_v24, 0.0  ;;  %v15339_v14 = vmax.f32 %v15338_v8, 0.0  ;;  %7102 = vst [vmem:[%s12908_s2 + $0x368] sm:$0xff] %v6902_v5   ;;  %v15362_v11 = vld [vmem:[#allocation167_spill] sm:$0xff]  ;;  %v15366_v22 = vld [vmem:[#allocation168_spill] sm:$0xff] }
 0x719   :  { %v6922_v39 = vpack.c.bf16 %v15331_v35, %v15329_v0  ;;  %7103 = vst [vmem:[%s12908_s2 + $0x370] sm:$0xff] %v6907_v57   ;;  %7104 = vst [vmem:[%s12908_s2 + $0x378] sm:$0xff] %v6912_v28   ;;  %v15341_v30 = vmax.f32 %v15340_v15, 0.0  ;;  %v15343_v13 = vmax.f32 %v15342_v48, 0.0  ;;  %v15345_v56 = vmax.f32 %v15344_v53, 0.0  ;;  %v15368_v38 = vld [vmem:[#allocation171_spill] sm:$0xff] }
 0x71a   :  { %v6927_v32 = vpack.c.bf16 %v15335_v19, %v15333_v27  ;;  %v6932_v10 = vpack.c.bf16 %v15339_v14, %v15337_v25  ;;  %v15347_v18 = vmax.f32 %v15346_v29, 0.0  ;;  %v15349_v40 = vmax.f32 %v15348_v46, 0.0  ;;  %7105 = vst [vmem:[%s12908_s2 + $0x380] sm:$0xff] %v6917_v9   ;;  %v15370_v23 = vld [vmem:[#allocation172_spill] sm:$0xff]  ;;  %v15372_v37 = vld [vmem:[#allocation175_spill] sm:$0xff] }
 0x71b   :  { %v6937_v49 = vpack.c.bf16 %v15343_v13, %v15341_v30  ;;  %v15351_v41 = vmax.f32 %v15350_v1, 0.0  ;;  %v15353_v7 = vmax.f32 %v15352_v45, 0.0  ;;  %v15355_v12 = vmax.f32 %v15354_v44, 0.0  ;;  %7106 = vst [vmem:[%s12908_s2 + $0x388] sm:$0xff] %v6922_v39   ;;  %v15374_v50 = vld [vmem:[#allocation176_spill] sm:$0xff]  ;;  %v15376_v4 = vld [vmem:[#allocation179_spill] sm:$0xff] }
 0x71c   :  { %v6942_v17 = vpack.c.bf16 %v15347_v18, %v15345_v56  ;;  %7107 = vst [vmem:[%s12908_s2 + $0x390] sm:$0xff] %v6927_v32   ;;  %7108 = vst [vmem:[%s12908_s2 + $0x398] sm:$0xff] %v6932_v10   ;;  %v15357_v33 = vmax.f32 %v15356_v63, 0.0  ;;  %v15359_v31 = vmax.f32 %v15358_v58, 0.0  ;;  %v15361_v6 = vmax.f32 %v15360_v47, 0.0  ;;  %v15378_v52 = vld [vmem:[#allocation180_spill] sm:$0xff] }
 0x71d   :  { %v6947_v60 = vpack.c.bf16 %v15351_v41, %v15349_v40  ;;  %v6952_v34 = vpack.c.bf16 %v15355_v12, %v15353_v7  ;;  %v15363_v36 = vmax.f32 %v15362_v11, 0.0  ;;  %v15365_v59 = vmax.f32 %v15364_v61, 0.0  ;;  %7109 = vst [vmem:[%s12908_s2 + $0x3a0] sm:$0xff] %v6937_v49   ;;  %v15380_v0 = vld [vmem:[#allocation183_spill] sm:$0xff]  ;;  %v15382_v35 = vld [vmem:[#allocation184_spill] sm:$0xff] }
 0x71e   :  { %v6957_v51 = vpack.c.bf16 %v15359_v31, %v15357_v33  ;;  %v15367_v5 = vmax.f32 %v15366_v22, 0.0  ;;  %v15369_v55 = vmax.f32 %v15368_v38, 0.0  ;;  %v15371_v57 = vmax.f32 %v15370_v23, 0.0  ;;  %7110 = vst [vmem:[%s12908_s2 + $0x3a8] sm:$0xff] %v6942_v17   ;;  %v15384_v27 = vld [vmem:[#allocation235_spill] sm:$0xff]  ;;  %v15386_v19 = vld [vmem:[#allocation236_spill] sm:$0xff] }
 0x71f   :  { %v6962_v43 = vpack.c.bf16 %v15363_v36, %v15361_v6  ;;  %7111 = vst [vmem:[%s12908_s2 + $0x3b0] sm:$0xff] %v6947_v60   ;;  %7112 = vst [vmem:[%s12908_s2 + $0x3b8] sm:$0xff] %v6952_v34   ;;  %v15373_v26 = vmax.f32 %v15372_v37, 0.0  ;;  %v15375_v28 = vmax.f32 %v15374_v50, 0.0  ;;  %v15377_v2 = vmax.f32 %v15376_v4, 0.0 }
 0x720   :  { %v6967_v21 = vpack.c.bf16 %v15367_v5, %v15365_v59  ;;  %v6972_v16 = vpack.c.bf16 %v15371_v57, %v15369_v55  ;;  %v15379_v9 = vmax.f32 %v15378_v52, 0.0  ;;  %v15381_v62 = vmax.f32 %v15380_v0, 0.0  ;;  %7113 = vst [vmem:[%s12908_s2 + $0x3c0] sm:$0xff] %v6957_v51  }
 0x721   :  { %v6977_v3 = vpack.c.bf16 %v15375_v28, %v15373_v26  ;;  %v15383_v39 = vmax.f32 %v15382_v35, 0.0  ;;  %v15385_v20 = vmax.f32 %v15384_v27, 0.0  ;;  %v15387_v32 = vmax.f32 %v15386_v19, 0.0  ;;  %7114 = vst [vmem:[%s12908_s2 + $0x3c8] sm:$0xff] %v6962_v43  }
 0x722   :  { %v6982_v54 = vpack.c.bf16 %v15379_v9, %v15377_v2  ;;  %7115 = vst [vmem:[%s12908_s2 + $0x3d0] sm:$0xff] %v6967_v21   ;;  %7116 = vst [vmem:[%s12908_s2 + $0x3d8] sm:$0xff] %v6972_v16  }
 0x723   :  { %v6987_v42 = vpack.c.bf16 %v15383_v39, %v15381_v62  ;;  %v6992_v24 = vpack.c.bf16 %v15387_v32, %v15385_v20  ;;  %7117 = vst [vmem:[%s12908_s2 + $0x3e0] sm:$0xff] %v6977_v3  }
 0x724   :  { %7118 = vst [vmem:[%s12908_s2 + $0x3e8] sm:$0xff] %v6982_v54  }
 0x725   :  { %7119 = vst [vmem:[%s12908_s2 + $0x3f0] sm:$0xff] %v6987_v42   ;;  %7120 = vst [vmem:[%s12908_s2 + $0x3f8] sm:$0xff] %v6992_v24  }

// kernel: _lambda_.9
= control target key start
LH: loop header
LB: loop body
LE: loop exit
PB: predicated region body
PF: predicated region fallthrough
CT: control target
= control target key end

     0   :  { %s1851_s9 = smov 0   ;;  %s1853_s10 = smov 0   ;;  %s2332_s0 = inlined_call_operand.vmem [shape: bf16[8,128], index: 0, kind: input, shape index: {}]   ;;  %s2333_s1 = inlined_call_operand.vmem [shape: bf16[128,8192], index: 1, kind: input, shape index: {}]   ;;  %s2334_s2 = inlined_call_operand.vmem [shape: f32[8,8192], index: 2, kind: output, shape index: {}]  }
   0x1   :  { %s1855_s11 = smov 0  }
   0x2 LB: > { %s1612_s12 = sadd.s32 4294967295, %s1833_s11   ;;  %s1868_s13 = sadd.s32 1, %s1833_s11   ;;  %s1833_s11 = sphi %s1855_s11, %s2337_s11   ;;  %s1829_s10 = sphi %s1853_s10, %s2336_s10   ;;  %s1825_s9 = sphi %s1851_s9, %s2335_s9  }
   0x3   : > { %s37_s14 = ssub.s32 %s1833_s11, %s1868_s13  ;;  %s40_s15 = sadd.s32 1, %s1829_s10 }
   0x4   : > { %p38_p0 = scmp.eq.s32.totalorder %s37_s14, 0  ;;  %p47_p1 = scmp.ne.s32.totalorder %s1829_s10, %s1825_s9 }
   0x5   : > { %p48_p2 = scmp.eq.s32.totalorder %s1833_s11, 0  ;;  %p1615_p4 = scmp.ge.s32.totalorder %s1833_s11, 4 }
   0x6   : > { %s1877_s16 = scalar_select %p38_p0, %s1829_s10, %s40_s15  }
   0x7   : > { %p49_p3 = por %p48_p2, %p47_p1  ;;  %102 = sbr.rel (%p1615_p4) target bundleno = 82 (0x52), region = 20 }
   0xe   : > { %105 = sbr.rel (!%p49_p3) target bundleno = 82 (0x52), region = 24  ;;  %s107_s17 = sand.u32 (%p49_p3), 1, %s1829_s10  }
   0xf   : > { %s1753_s18 = sshll.u32 (%p49_p3), %s1833_s11, 6  ;;  %s1616_s19 = sshll.u32 (%p49_p3), %s107_s17, 10 }
  0x10   : > { %s1885_s22 = scalar_lea.vmem (%p49_p3), %s2333_s1, %s1753_s18  ;;  %s1890_s23 = scalar_lea.vmem (%p49_p3), [#allocation2], %s1616_s19 }
  0x11   : > { %v125_v0 = vld [vmem:[%s1885_s22] sm:$0xff] (%p49_p3)  ;;  %v127_v1 = vld [vmem:[%s1885_s22 + $0x8] sm:$0xff] (%p49_p3)  ;;  %v129_v2 = vld [vmem:[%s1885_s22 + $0x10] sm:$0xff] (%p49_p3) }
  0x12   : > { %126 = vst [vmem:[%s1890_s23] sm:$0xff] (%p49_p3), %v125_v0  ;;  %128 = vst [vmem:[%s1890_s23 + $0x8] sm:$0xff] (%p49_p3), %v127_v1  ;;  %v131_v3 = vld [vmem:[%s1885_s22 + $0x18] sm:$0xff] (%p49_p3)  ;;  %v133_v4 = vld [vmem:[%s1885_s22 + $0x20] sm:$0xff] (%p49_p3) }
  0x13   : > { %130 = vst [vmem:[%s1890_s23 + $0x10] sm:$0xff] (%p49_p3), %v129_v2  ;;  %v135_v5 = vld [vmem:[%s1885_s22 + $0x28] sm:$0xff] (%p49_p3)  ;;  %132 = vst [vmem:[%s1890_s23 + $0x18] sm:$0xff] (%p49_p3), %v131_v3  ;;  %v137_v6 = vld [vmem:[%s1885_s22 + $0x30] sm:$0xff] (%p49_p3) }
  0x14   : > { %134 = vst [vmem:[%s1890_s23 + $0x20] sm:$0xff] (%p49_p3), %v133_v4  ;;  %136 = vst [vmem:[%s1890_s23 + $0x28] sm:$0xff] (%p49_p3), %v135_v5  ;;  %v139_v7 = vld [vmem:[%s1885_s22 + $0x38] sm:$0xff] (%p49_p3)  ;;  %v141_v8 = vld [vmem:[%s1885_s22 + $0x100] sm:$0xff] (%p49_p3) }
  0x15   : > { %138 = vst [vmem:[%s1890_s23 + $0x30] sm:$0xff] %v137_v6  ;;  %140 = vst [vmem:[%s1890_s23 + $0x38] sm:$0xff] %v139_v7  ;;  %v143_v9 = vld [vmem:[%s1885_s22 + $0x108] sm:$0xff]  ;;  %v145_v10 = vld [vmem:[%s1885_s22 + $0x110] sm:$0xff] }
  0x16   : > { %142 = vst [vmem:[%s1890_s23 + $0x40] sm:$0xff] %v141_v8  ;;  %v147_v11 = vld [vmem:[%s1885_s22 + $0x118] sm:$0xff]  ;;  %144 = vst [vmem:[%s1890_s23 + $0x48] sm:$0xff] %v143_v9  ;;  %v149_v12 = vld [vmem:[%s1885_s22 + $0x120] sm:$0xff] }
  0x17   : > { %146 = vst [vmem:[%s1890_s23 + $0x50] sm:$0xff] %v145_v10  ;;  %148 = vst [vmem:[%s1890_s23 + $0x58] sm:$0xff] %v147_v11  ;;  %v151_v13 = vld [vmem:[%s1885_s22 + $0x128] sm:$0xff]  ;;  %v153_v14 = vld [vmem:[%s1885_s22 + $0x130] sm:$0xff] }
  0x18   : > { %150 = vst [vmem:[%s1890_s23 + $0x60] sm:$0xff] %v149_v12  ;;  %152 = vst [vmem:[%s1890_s23 + $0x68] sm:$0xff] %v151_v13  ;;  %v155_v15 = vld [vmem:[%s1885_s22 + $0x138] sm:$0xff]  ;;  %v157_v16 = vld [vmem:[%s1885_s22 + $0x200] sm:$0xff] }
  0x19   : > { %154 = vst [vmem:[%s1890_s23 + $0x70] sm:$0xff] %v153_v14  ;;  %v159_v17 = vld [vmem:[%s1885_s22 + $0x208] sm:$0xff]  ;;  %156 = vst [vmem:[%s1890_s23 + $0x78] sm:$0xff] %v155_v15  ;;  %v161_v18 = vld [vmem:[%s1885_s22 + $0x210] sm:$0xff] }
  0x1a   : > { %158 = vst [vmem:[%s1890_s23 + $0x80] sm:$0xff] %v157_v16  ;;  %160 = vst [vmem:[%s1890_s23 + $0x88] sm:$0xff] %v159_v17  ;;  %v163_v19 = vld [vmem:[%s1885_s22 + $0x218] sm:$0xff]  ;;  %v165_v20 = vld [vmem:[%s1885_s22 + $0x220] sm:$0xff] }
  0x1b   : > { %162 = vst [vmem:[%s1890_s23 + $0x90] sm:$0xff] %v161_v18  ;;  %164 = vst [vmem:[%s1890_s23 + $0x98] sm:$0xff] %v163_v19  ;;  %v167_v21 = vld [vmem:[%s1885_s22 + $0x228] sm:$0xff]  ;;  %v169_v22 = vld [vmem:[%s1885_s22 + $0x230] sm:$0xff] }
  0x1c   : > { %166 = vst [vmem:[%s1890_s23 + $0xa0] sm:$0xff] %v165_v20  ;;  %v171_v23 = vld [vmem:[%s1885_s22 + $0x238] sm:$0xff]  ;;  %168 = vst [vmem:[%s1890_s23 + $0xa8] sm:$0xff] %v167_v21  ;;  %v173_v24 = vld [vmem:[%s1885_s22 + $0x300] sm:$0xff] }
  0x1d   : > { %170 = vst [vmem:[%s1890_s23 + $0xb0] sm:$0xff] %v169_v22  ;;  %172 = vst [vmem:[%s1890_s23 + $0xb8] sm:$0xff] %v171_v23  ;;  %v175_v25 = vld [vmem:[%s1885_s22 + $0x308] sm:$0xff]  ;;  %v177_v26 = vld [vmem:[%s1885_s22 + $0x310] sm:$0xff] }
  0x1e   : > { %174 = vst [vmem:[%s1890_s23 + $0xc0] sm:$0xff] %v173_v24  ;;  %176 = vst [vmem:[%s1890_s23 + $0xc8] sm:$0xff] %v175_v25  ;;  %v179_v27 = vld [vmem:[%s1885_s22 + $0x318] sm:$0xff]  ;;  %v181_v28 = vld [vmem:[%s1885_s22 + $0x320] sm:$0xff] }
  0x1f   : > { %178 = vst [vmem:[%s1890_s23 + $0xd0] sm:$0xff] %v177_v26  ;;  %v183_v29 = vld [vmem:[%s1885_s22 + $0x328] sm:$0xff]  ;;  %180 = vst [vmem:[%s1890_s23 + $0xd8] sm:$0xff] %v179_v27  ;;  %v185_v30 = vld [vmem:[%s1885_s22 + $0x330] sm:$0xff] }
  0x20   : > { %182 = vst [vmem:[%s1890_s23 + $0xe0] sm:$0xff] %v181_v28  ;;  %184 = vst [vmem:[%s1890_s23 + $0xe8] sm:$0xff] %v183_v29  ;;  %v187_v31 = vld [vmem:[%s1885_s22 + $0x338] sm:$0xff]  ;;  %v189_v32 = vld [vmem:[%s1885_s22 + $0x400] sm:$0xff] }
  0x21   : > { %186 = vst [vmem:[%s1890_s23 + $0xf0] sm:$0xff] %v185_v30  ;;  %188 = vst [vmem:[%s1890_s23 + $0xf8] sm:$0xff] %v187_v31  ;;  %v191_v33 = vld [vmem:[%s1885_s22 + $0x408] sm:$0xff]  ;;  %v193_v34 = vld [vmem:[%s1885_s22 + $0x410] sm:$0xff] }
  0x22   : > { %190 = vst [vmem:[%s1890_s23 + $0x100] sm:$0xff] %v189_v32  ;;  %v195_v35 = vld [vmem:[%s1885_s22 + $0x418] sm:$0xff]  ;;  %192 = vst [vmem:[%s1890_s23 + $0x108] sm:$0xff] %v191_v33  ;;  %v197_v36 = vld [vmem:[%s1885_s22 + $0x420] sm:$0xff] }
  0x23   : > { %194 = vst [vmem:[%s1890_s23 + $0x110] sm:$0xff] %v193_v34  ;;  %196 = vst [vmem:[%s1890_s23 + $0x118] sm:$0xff] %v195_v35  ;;  %v199_v37 = vld [vmem:[%s1885_s22 + $0x428] sm:$0xff]  ;;  %v201_v38 = vld [vmem:[%s1885_s22 + $0x430] sm:$0xff] }
  0x24   : > { %198 = vst [vmem:[%s1890_s23 + $0x120] sm:$0xff] %v197_v36  ;;  %200 = vst [vmem:[%s1890_s23 + $0x128] sm:$0xff] %v199_v37  ;;  %v203_v39 = vld [vmem:[%s1885_s22 + $0x438] sm:$0xff]  ;;  %v205_v40 = vld [vmem:[%s1885_s22 + $0x500] sm:$0xff] }
  0x25   : > { %202 = vst [vmem:[%s1890_s23 + $0x130] sm:$0xff] %v201_v38  ;;  %v207_v41 = vld [vmem:[%s1885_s22 + $0x508] sm:$0xff]  ;;  %204 = vst [vmem:[%s1890_s23 + $0x138] sm:$0xff] %v203_v39  ;;  %v209_v42 = vld [vmem:[%s1885_s22 + $0x510] sm:$0xff] }
  0x26   : > { %206 = vst [vmem:[%s1890_s23 + $0x140] sm:$0xff] %v205_v40  ;;  %208 = vst [vmem:[%s1890_s23 + $0x148] sm:$0xff] %v207_v41  ;;  %v211_v43 = vld [vmem:[%s1885_s22 + $0x518] sm:$0xff]  ;;  %v213_v44 = vld [vmem:[%s1885_s22 + $0x520] sm:$0xff] }
  0x27   : > { %210 = vst [vmem:[%s1890_s23 + $0x150] sm:$0xff] %v209_v42  ;;  %212 = vst [vmem:[%s1890_s23 + $0x158] sm:$0xff] %v211_v43  ;;  %v215_v45 = vld [vmem:[%s1885_s22 + $0x528] sm:$0xff]  ;;  %v217_v46 = vld [vmem:[%s1885_s22 + $0x530] sm:$0xff] }
  0x28   : > { %214 = vst [vmem:[%s1890_s23 + $0x160] sm:$0xff] %v213_v44  ;;  %v219_v47 = vld [vmem:[%s1885_s22 + $0x538] sm:$0xff]  ;;  %216 = vst [vmem:[%s1890_s23 + $0x168] sm:$0xff] %v215_v45  ;;  %v221_v48 = vld [vmem:[%s1885_s22 + $0x600] sm:$0xff] }
  0x29   : > { %218 = vst [vmem:[%s1890_s23 + $0x170] sm:$0xff] %v217_v46  ;;  %220 = vst [vmem:[%s1890_s23 + $0x178] sm:$0xff] %v219_v47  ;;  %v223_v49 = vld [vmem:[%s1885_s22 + $0x608] sm:$0xff]  ;;  %v225_v50 = vld [vmem:[%s1885_s22 + $0x610] sm:$0xff] }
  0x2a   : > { %222 = vst [vmem:[%s1890_s23 + $0x180] sm:$0xff] %v221_v48  ;;  %224 = vst [vmem:[%s1890_s23 + $0x188] sm:$0xff] %v223_v49  ;;  %v227_v51 = vld [vmem:[%s1885_s22 + $0x618] sm:$0xff]  ;;  %v229_v52 = vld [vmem:[%s1885_s22 + $0x620] sm:$0xff] }
  0x2b   : > { %226 = vst [vmem:[%s1890_s23 + $0x190] sm:$0xff] %v225_v50  ;;  %v231_v53 = vld [vmem:[%s1885_s22 + $0x628] sm:$0xff]  ;;  %228 = vst [vmem:[%s1890_s23 + $0x198] sm:$0xff] %v227_v51  ;;  %v233_v54 = vld [vmem:[%s1885_s22 + $0x630] sm:$0xff] }
  0x2c   : > { %230 = vst [vmem:[%s1890_s23 + $0x1a0] sm:$0xff] %v229_v52  ;;  %232 = vst [vmem:[%s1890_s23 + $0x1a8] sm:$0xff] %v231_v53  ;;  %v235_v55 = vld [vmem:[%s1885_s22 + $0x638] sm:$0xff]  ;;  %v237_v56 = vld [vmem:[%s1885_s22 + $0x700] sm:$0xff] }
  0x2d   : > { %234 = vst [vmem:[%s1890_s23 + $0x1b0] sm:$0xff] %v233_v54  ;;  %236 = vst [vmem:[%s1890_s23 + $0x1b8] sm:$0xff] %v235_v55  ;;  %v239_v57 = vld [vmem:[%s1885_s22 + $0x708] sm:$0xff]  ;;  %v241_v58 = vld [vmem:[%s1885_s22 + $0x710] sm:$0xff] }
  0x2e   : > { %238 = vst [vmem:[%s1890_s23 + $0x1c0] sm:$0xff] %v237_v56  ;;  %v243_v59 = vld [vmem:[%s1885_s22 + $0x718] sm:$0xff]  ;;  %240 = vst [vmem:[%s1890_s23 + $0x1c8] sm:$0xff] %v239_v57  ;;  %v245_v60 = vld [vmem:[%s1885_s22 + $0x720] sm:$0xff] }
  0x2f   : > { %242 = vst [vmem:[%s1890_s23 + $0x1d0] sm:$0xff] %v241_v58  ;;  %244 = vst [vmem:[%s1890_s23 + $0x1d8] sm:$0xff] %v243_v59  ;;  %v247_v61 = vld [vmem:[%s1885_s22 + $0x728] sm:$0xff]  ;;  %v249_v62 = vld [vmem:[%s1885_s22 + $0x730] sm:$0xff] }
  0x30   : > { %246 = vst [vmem:[%s1890_s23 + $0x1e0] sm:$0xff] %v245_v60  ;;  %248 = vst [vmem:[%s1890_s23 + $0x1e8] sm:$0xff] %v247_v61  ;;  %v251_v63 = vld [vmem:[%s1885_s22 + $0x738] sm:$0xff]  ;;  %v253_v0 = vld [vmem:[%s1885_s22 + $0x800] sm:$0xff] }
  0x31   : > { %250 = vst [vmem:[%s1890_s23 + $0x1f0] sm:$0xff] %v249_v62  ;;  %v255_v1 = vld [vmem:[%s1885_s22 + $0x808] sm:$0xff]  ;;  %252 = vst [vmem:[%s1890_s23 + $0x1f8] sm:$0xff] %v251_v63  ;;  %v257_v2 = vld [vmem:[%s1885_s22 + $0x810] sm:$0xff] }
  0x32   : > { %254 = vst [vmem:[%s1890_s23 + $0x200] sm:$0xff] %v253_v0  ;;  %256 = vst [vmem:[%s1890_s23 + $0x208] sm:$0xff] %v255_v1  ;;  %v259_v3 = vld [vmem:[%s1885_s22 + $0x818] sm:$0xff]  ;;  %v261_v4 = vld [vmem:[%s1885_s22 + $0x820] sm:$0xff] }
  0x33   : > { %258 = vst [vmem:[%s1890_s23 + $0x210] sm:$0xff] %v257_v2  ;;  %260 = vst [vmem:[%s1890_s23 + $0x218] sm:$0xff] %v259_v3  ;;  %v263_v5 = vld [vmem:[%s1885_s22 + $0x828] sm:$0xff]  ;;  %v265_v6 = vld [vmem:[%s1885_s22 + $0x830] sm:$0xff] }
  0x34   : > { %262 = vst [vmem:[%s1890_s23 + $0x220] sm:$0xff] %v261_v4  ;;  %v267_v7 = vld [vmem:[%s1885_s22 + $0x838] sm:$0xff]  ;;  %264 = vst [vmem:[%s1890_s23 + $0x228] sm:$0xff] %v263_v5  ;;  %v269_v8 = vld [vmem:[%s1885_s22 + $0x900] sm:$0xff] }
  0x35   : > { %266 = vst [vmem:[%s1890_s23 + $0x230] sm:$0xff] %v265_v6  ;;  %268 = vst [vmem:[%s1890_s23 + $0x238] sm:$0xff] %v267_v7  ;;  %v271_v9 = vld [vmem:[%s1885_s22 + $0x908] sm:$0xff]  ;;  %v273_v10 = vld [vmem:[%s1885_s22 + $0x910] sm:$0xff] }
  0x36   : > { %270 = vst [vmem:[%s1890_s23 + $0x240] sm:$0xff] %v269_v8  ;;  %272 = vst [vmem:[%s1890_s23 + $0x248] sm:$0xff] %v271_v9  ;;  %v275_v11 = vld [vmem:[%s1885_s22 + $0x918] sm:$0xff]  ;;  %v277_v12 = vld [vmem:[%s1885_s22 + $0x920] sm:$0xff] }
  0x37   : > { %274 = vst [vmem:[%s1890_s23 + $0x250] sm:$0xff] %v273_v10  ;;  %v279_v13 = vld [vmem:[%s1885_s22 + $0x928] sm:$0xff]  ;;  %276 = vst [vmem:[%s1890_s23 + $0x258] sm:$0xff] %v275_v11  ;;  %v281_v14 = vld [vmem:[%s1885_s22 + $0x930] sm:$0xff] }
  0x38   : > { %278 = vst [vmem:[%s1890_s23 + $0x260] sm:$0xff] %v277_v12  ;;  %280 = vst [vmem:[%s1890_s23 + $0x268] sm:$0xff] %v279_v13  ;;  %v283_v15 = vld [vmem:[%s1885_s22 + $0x938] sm:$0xff]  ;;  %v285_v16 = vld [vmem:[%s1885_s22 + $0xa00] sm:$0xff] }
  0x39   : > { %282 = vst [vmem:[%s1890_s23 + $0x270] sm:$0xff] %v281_v14  ;;  %284 = vst [vmem:[%s1890_s23 + $0x278] sm:$0xff] %v283_v15  ;;  %v287_v17 = vld [vmem:[%s1885_s22 + $0xa08] sm:$0xff]  ;;  %v289_v18 = vld [vmem:[%s1885_s22 + $0xa10] sm:$0xff] }
  0x3a   : > { %286 = vst [vmem:[%s1890_s23 + $0x280] sm:$0xff] %v285_v16  ;;  %v291_v19 = vld [vmem:[%s1885_s22 + $0xa18] sm:$0xff]  ;;  %288 = vst [vmem:[%s1890_s23 + $0x288] sm:$0xff] %v287_v17  ;;  %v293_v20 = vld [vmem:[%s1885_s22 + $0xa20] sm:$0xff] }
  0x3b   : > { %290 = vst [vmem:[%s1890_s23 + $0x290] sm:$0xff] %v289_v18  ;;  %292 = vst [vmem:[%s1890_s23 + $0x298] sm:$0xff] %v291_v19  ;;  %v295_v21 = vld [vmem:[%s1885_s22 + $0xa28] sm:$0xff]  ;;  %v297_v22 = vld [vmem:[%s1885_s22 + $0xa30] sm:$0xff] }
  0x3c   : > { %294 = vst [vmem:[%s1890_s23 + $0x2a0] sm:$0xff] %v293_v20  ;;  %296 = vst [vmem:[%s1890_s23 + $0x2a8] sm:$0xff] %v295_v21  ;;  %v299_v23 = vld [vmem:[%s1885_s22 + $0xa38] sm:$0xff]  ;;  %v301_v24 = vld [vmem:[%s1885_s22 + $0xb00] sm:$0xff] }
  0x3d   : > { %298 = vst [vmem:[%s1890_s23 + $0x2b0] sm:$0xff] %v297_v22  ;;  %v303_v25 = vld [vmem:[%s1885_s22 + $0xb08] sm:$0xff]  ;;  %300 = vst [vmem:[%s1890_s23 + $0x2b8] sm:$0xff] %v299_v23  ;;  %v305_v26 = vld [vmem:[%s1885_s22 + $0xb10] sm:$0xff] }
  0x3e   : > { %302 = vst [vmem:[%s1890_s23 + $0x2c0] sm:$0xff] %v301_v24  ;;  %304 = vst [vmem:[%s1890_s23 + $0x2c8] sm:$0xff] %v303_v25  ;;  %v307_v27 = vld [vmem:[%s1885_s22 + $0xb18] sm:$0xff]  ;;  %v309_v28 = vld [vmem:[%s1885_s22 + $0xb20] sm:$0xff] }
  0x3f   : > { %306 = vst [vmem:[%s1890_s23 + $0x2d0] sm:$0xff] %v305_v26  ;;  %308 = vst [vmem:[%s1890_s23 + $0x2d8] sm:$0xff] %v307_v27  ;;  %v311_v29 = vld [vmem:[%s1885_s22 + $0xb28] sm:$0xff]  ;;  %v313_v30 = vld [vmem:[%s1885_s22 + $0xb30] sm:$0xff] }
  0x40   : > { %310 = vst [vmem:[%s1890_s23 + $0x2e0] sm:$0xff] %v309_v28  ;;  %v315_v31 = vld [vmem:[%s1885_s22 + $0xb38] sm:$0xff]  ;;  %312 = vst [vmem:[%s1890_s23 + $0x2e8] sm:$0xff] %v311_v29  ;;  %v317_v32 = vld [vmem:[%s1885_s22 + $0xc00] sm:$0xff] }
  0x41   : > { %314 = vst [vmem:[%s1890_s23 + $0x2f0] sm:$0xff] %v313_v30  ;;  %316 = vst [vmem:[%s1890_s23 + $0x2f8] sm:$0xff] %v315_v31  ;;  %v319_v33 = vld [vmem:[%s1885_s22 + $0xc08] sm:$0xff]  ;;  %v321_v34 = vld [vmem:[%s1885_s22 + $0xc10] sm:$0xff] }
  0x42   : > { %318 = vst [vmem:[%s1890_s23 + $0x300] sm:$0xff] %v317_v32  ;;  %320 = vst [vmem:[%s1890_s23 + $0x308] sm:$0xff] %v319_v33  ;;  %v323_v35 = vld [vmem:[%s1885_s22 + $0xc18] sm:$0xff]  ;;  %v325_v36 = vld [vmem:[%s1885_s22 + $0xc20] sm:$0xff] }
  0x43   : > { %322 = vst [vmem:[%s1890_s23 + $0x310] sm:$0xff] %v321_v34  ;;  %v327_v37 = vld [vmem:[%s1885_s22 + $0xc28] sm:$0xff]  ;;  %324 = vst [vmem:[%s1890_s23 + $0x318] sm:$0xff] %v323_v35  ;;  %v329_v38 = vld [vmem:[%s1885_s22 + $0xc30] sm:$0xff] }
  0x44   : > { %326 = vst [vmem:[%s1890_s23 + $0x320] sm:$0xff] %v325_v36  ;;  %328 = vst [vmem:[%s1890_s23 + $0x328] sm:$0xff] %v327_v37  ;;  %v331_v39 = vld [vmem:[%s1885_s22 + $0xc38] sm:$0xff]  ;;  %v333_v40 = vld [vmem:[%s1885_s22 + $0xd00] sm:$0xff] }
  0x45   : > { %330 = vst [vmem:[%s1890_s23 + $0x330] sm:$0xff] %v329_v38  ;;  %332 = vst [vmem:[%s1890_s23 + $0x338] sm:$0xff] %v331_v39  ;;  %v335_v41 = vld [vmem:[%s1885_s22 + $0xd08] sm:$0xff]  ;;  %v337_v42 = vld [vmem:[%s1885_s22 + $0xd10] sm:$0xff] }
  0x46   : > { %334 = vst [vmem:[%s1890_s23 + $0x340] sm:$0xff] %v333_v40  ;;  %v339_v43 = vld [vmem:[%s1885_s22 + $0xd18] sm:$0xff]  ;;  %336 = vst [vmem:[%s1890_s23 + $0x348] sm:$0xff] %v335_v41  ;;  %v341_v44 = vld [vmem:[%s1885_s22 + $0xd20] sm:$0xff] }
  0x47   : > { %338 = vst [vmem:[%s1890_s23 + $0x350] sm:$0xff] %v337_v42  ;;  %340 = vst [vmem:[%s1890_s23 + $0x358] sm:$0xff] %v339_v43  ;;  %v343_v45 = vld [vmem:[%s1885_s22 + $0xd28] sm:$0xff]  ;;  %v345_v46 = vld [vmem:[%s1885_s22 + $0xd30] sm:$0xff] }
  0x48   : > { %342 = vst [vmem:[%s1890_s23 + $0x360] sm:$0xff] %v341_v44  ;;  %344 = vst [vmem:[%s1890_s23 + $0x368] sm:$0xff] %v343_v45  ;;  %v347_v47 = vld [vmem:[%s1885_s22 + $0xd38] sm:$0xff]  ;;  %v349_v48 = vld [vmem:[%s1885_s22 + $0xe00] sm:$0xff] }
  0x49   : > { %346 = vst [vmem:[%s1890_s23 + $0x370] sm:$0xff] %v345_v46  ;;  %v351_v49 = vld [vmem:[%s1885_s22 + $0xe08] sm:$0xff]  ;;  %348 = vst [vmem:[%s1890_s23 + $0x378] sm:$0xff] %v347_v47  ;;  %v353_v50 = vld [vmem:[%s1885_s22 + $0xe10] sm:$0xff] }
  0x4a   : > { %350 = vst [vmem:[%s1890_s23 + $0x380] sm:$0xff] %v349_v48  ;;  %352 = vst [vmem:[%s1890_s23 + $0x388] sm:$0xff] %v351_v49  ;;  %v355_v51 = vld [vmem:[%s1885_s22 + $0xe18] sm:$0xff]  ;;  %v357_v52 = vld [vmem:[%s1885_s22 + $0xe20] sm:$0xff] }
  0x4b   : > { %354 = vst [vmem:[%s1890_s23 + $0x390] sm:$0xff] %v353_v50  ;;  %356 = vst [vmem:[%s1890_s23 + $0x398] sm:$0xff] %v355_v51  ;;  %v359_v53 = vld [vmem:[%s1885_s22 + $0xe28] sm:$0xff]  ;;  %v361_v54 = vld [vmem:[%s1885_s22 + $0xe30] sm:$0xff] }
  0x4c   : > { %358 = vst [vmem:[%s1890_s23 + $0x3a0] sm:$0xff] %v357_v52  ;;  %v363_v55 = vld [vmem:[%s1885_s22 + $0xe38] sm:$0xff]  ;;  %360 = vst [vmem:[%s1890_s23 + $0x3a8] sm:$0xff] %v359_v53  ;;  %v365_v56 = vld [vmem:[%s1885_s22 + $0xf00] sm:$0xff] }
  0x4d   : > { %362 = vst [vmem:[%s1890_s23 + $0x3b0] sm:$0xff] %v361_v54  ;;  %364 = vst [vmem:[%s1890_s23 + $0x3b8] sm:$0xff] %v363_v55  ;;  %v367_v57 = vld [vmem:[%s1885_s22 + $0xf08] sm:$0xff]  ;;  %v369_v58 = vld [vmem:[%s1885_s22 + $0xf10] sm:$0xff] }
  0x4e   : > { %366 = vst [vmem:[%s1890_s23 + $0x3c0] sm:$0xff] %v365_v56  ;;  %368 = vst [vmem:[%s1890_s23 + $0x3c8] sm:$0xff] %v367_v57  ;;  %v371_v59 = vld [vmem:[%s1885_s22 + $0xf18] sm:$0xff]  ;;  %v373_v60 = vld [vmem:[%s1885_s22 + $0xf20] sm:$0xff] }
  0x4f   : > { %370 = vst [vmem:[%s1890_s23 + $0x3d0] sm:$0xff] %v369_v58  ;;  %v375_v61 = vld [vmem:[%s1885_s22 + $0xf28] sm:$0xff]  ;;  %372 = vst [vmem:[%s1890_s23 + $0x3d8] sm:$0xff] %v371_v59  ;;  %v377_v62 = vld [vmem:[%s1885_s22 + $0xf30] sm:$0xff] }
  0x50   : > { %374 = vst [vmem:[%s1890_s23 + $0x3e0] sm:$0xff] %v373_v60  ;;  %376 = vst [vmem:[%s1890_s23 + $0x3e8] sm:$0xff] %v375_v61  ;;  %v379_v63 = vld [vmem:[%s1885_s22 + $0xf38] sm:$0xff] }
  0x51   : > { %378 = vst [vmem:[%s1890_s23 + $0x3f0] sm:$0xff] %v377_v62  ;;  %380 = vst [vmem:[%s1890_s23 + $0x3f8] sm:$0xff] %v379_v63 }
  0x52 PF: > { %p1619_p5 = scmp.ge.s32.totalorder %s1833_s11, 1  ;;  %p385_p6 = scmp.lt.s32.totalorder %s1833_s11, 5 }
  0x54   : > { %p386_p7 = pnand %p1619_p5, %p385_p6 }
  0x55   : > { %s392_s24 = sand.u32 (!%p386_p7), 1, %s1825_s9   ;;  %v1835_v0 = vmov (!%p386_p7), 0   ;;  %s1621_s29 = sshll.u32 (!%p386_p7), %s1612_s12, 4 }
  0x56   : > { %389 = sbr.rel (%p386_p7) target bundleno = 447 (0x1bf), region = 47  ;;  %s1620_s25 = sshll.u32 (!%p386_p7), %s392_s24, 10  ;;  %1222 = vmatprep.mubr.bf16.mxu0 (!%p386_p7), %v1835_v0  ;;  %1263 = vmatprep.mubr.bf16.mxu1 (!%p386_p7), %v1835_v0 }
  0x57   : > { %s2150_s26 = scalar_lea.vmem (!%p386_p7), [#allocation2], %s1620_s25  ;;  %p415_p8 = scmp.lt.s32.totalorder (!%p386_p7), %s1621_s29, 63 }
  0x58   : > { %v422_v1 = vld [vmem:[%s2150_s26] sm:$0xff] (!%p386_p7)  ;;  %v423_v3 = vld [vmem:[%s2150_s26 + $0x8] sm:$0xff] (!%p386_p7)  ;;  %v424_v63 = vld [vmem:[%s2150_s26 + $0x10] sm:$0xff] (!%p386_p7) }
  0x59   : > { %v430_v2 = vld [vmem:[%s2150_s26 + $0x40] sm:$0xff] (!%p386_p7)  ;;  %v431_v5 = vld [vmem:[%s2150_s26 + $0x48] sm:$0xff] (!%p386_p7) }
  0x5a   : > { %v1624_v4 = vcombine.high (!%p386_p7), %v422_v1, %v430_v2  ;;  %v1623_v6 = vcombine.low (!%p386_p7), %v422_v1, %v430_v2  ;;  %v438_v7 = vld [vmem:[%s2150_s26 + $0x80] sm:$0xff] (!%p386_p7)  ;;  %v1626_v9 = vcombine.high (!%p386_p7), %v423_v3, %v431_v5  ;;  %v1625_v10 = vcombine.low (!%p386_p7), %v423_v3, %v431_v5  ;;  %v439_v12 = vld [vmem:[%s2150_s26 + $0x88] sm:$0xff] (!%p386_p7)  ;;  %v432_v1 = vld [vmem:[%s2150_s26 + $0x50] sm:$0xff] (!%p386_p7) }
  0x5b   : > { %v446_v8 = vld [vmem:[%s2150_s26 + $0xc0] sm:$0xff] (!%p386_p7)  ;;  %v447_v13 = vld [vmem:[%s2150_s26 + $0xc8] sm:$0xff] (!%p386_p7)  ;;  %v425_v2 = vld [vmem:[%s2150_s26 + $0x18] sm:$0xff] (!%p386_p7) }
  0x5c   : > { %v1640_v11 = vcombine.high (!%p386_p7), %v438_v7, %v446_v8  ;;  %v454_v14 = vld [vmem:[%s2150_s26 + $0x100] sm:$0xff] (!%p386_p7)  ;;  %1190 = vmatprep.subr.bf16.mxu0 (!%p386_p7), %v1624_v4  ;;  %v1642_v15 = vcombine.high (!%p386_p7), %v439_v12, %v447_v13  ;;  %v455_v17 = vld [vmem:[%s2150_s26 + $0x108] sm:$0xff] (!%p386_p7)  ;;  %1231 = vmatprep.subr.bf16.mxu1 (!%p386_p7), %v1626_v9  ;;  %v1639_v19 = vcombine.low (!%p386_p7), %v438_v7, %v446_v8  ;;  %v433_v3 = vld [vmem:[%s2150_s26 + $0x58] sm:$0xff] (!%p386_p7) }
  0x5d   : > { %v462_v16 = vld [vmem:[%s2150_s26 + $0x140] sm:$0xff]  ;;  %v463_v18 = vld [vmem:[%s2150_s26 + $0x148] sm:$0xff]  ;;  %1191 = vmatpush1.bf16.msra.mxu0 %v1623_v6  ;;  %1232 = vmatpush1.bf16.msra.mxu1 %v1625_v10  ;;  %v1641_v20 = vcombine.low %v439_v12, %v447_v13  ;;  %v1628_v6 = vcombine.high %v424_v63, %v432_v1  ;;  %v1630_v7 = vcombine.high %v425_v2, %v433_v3  ;;  %v440_v8 = vld [vmem:[%s2150_s26 + $0x90] sm:$0xff]  ;;  %s2339_s29 = smov (!%p415_p8, %s1621_s29), 63 }
  0x5e   : > { %1192 = vmatprep.subr.bf16.mxu0 %v1640_v11  ;;  %v1656_v21 = vcombine.high %v454_v14, %v462_v16  ;;  %1233 = vmatprep.subr.bf16.mxu1 %v1642_v15  ;;  %v1658_v22 = vcombine.high %v455_v17, %v463_v18  ;;  %v470_v23 = vld [vmem:[%s2150_s26 + $0x180] sm:$0xff]  ;;  %v471_v25 = vld [vmem:[%s2150_s26 + $0x188] sm:$0xff]  ;;  %v1655_v27 = vcombine.low %v454_v14, %v462_v16  ;;  %v448_v9 = vld [vmem:[%s2150_s26 + $0xd0] sm:$0xff]  ;;  %s1622_s30 = sshll.u32 %s2339_s29, 3 }
  0x5f   : > { %v478_v24 = vld [vmem:[%s2150_s26 + $0x1c0] sm:$0xff]  ;;  %v479_v26 = vld [vmem:[%s2150_s26 + $0x1c8] sm:$0xff]  ;;  %v1657_v28 = vcombine.low %v455_v17, %v463_v18  ;;  %v441_v10 = vld [vmem:[%s2150_s26 + $0x98] sm:$0xff]  ;;  %v1627_v13 = vcombine.low %v424_v63, %v432_v1  ;;  %v1629_v14 = vcombine.low %v425_v2, %v433_v3  ;;  %v1644_v15 = vcombine.high %v440_v8, %v448_v9  ;;  %s2304_s5 = scalar_lea.vmem %s2334_s2, %s1622_s30 }
  0x60   : > { %v1672_v29 = vcombine.high %v470_v23, %v478_v24  ;;  %v1674_v30 = vcombine.high %v471_v25, %v479_v26  ;;  %v486_v31 = vld [vmem:[%s2150_s26 + $0x200] sm:$0xff]  ;;  %v487_v33 = vld [vmem:[%s2150_s26 + $0x208] sm:$0xff]  ;;  %v1671_v35 = vcombine.low %v470_v23, %v478_v24  ;;  %v1673_v36 = vcombine.low %v471_v25, %v479_v26  ;;  %v449_v11 = vld [vmem:[%s2150_s26 + $0xd8] sm:$0xff] }
  0x61   : > { %1193 = vmatpush1.bf16.msra.mxu0 %v1639_v19  ;;  %1234 = vmatpush1.bf16.msra.mxu1 %v1641_v20  ;;  %v494_v32 = vld [vmem:[%s2150_s26 + $0x240] sm:$0xff]  ;;  %v495_v34 = vld [vmem:[%s2150_s26 + $0x248] sm:$0xff]  ;;  %v1646_v16 = vcombine.high %v441_v10, %v449_v11  ;;  %v456_v17 = vld [vmem:[%s2150_s26 + $0x110] sm:$0xff] }
  0x62   : > { %1194 = vmatprep.subr.bf16.mxu0 %v1656_v21  ;;  %1235 = vmatprep.subr.bf16.mxu1 %v1658_v22  ;;  %v1688_v37 = vcombine.high %v486_v31, %v494_v32  ;;  %v1690_v38 = vcombine.high %v487_v33, %v495_v34  ;;  %v502_v39 = vld [vmem:[%s2150_s26 + $0x280] sm:$0xff]  ;;  %v503_v41 = vld [vmem:[%s2150_s26 + $0x288] sm:$0xff]  ;;  %v1687_v43 = vcombine.low %v486_v31, %v494_v32  ;;  %v464_v18 = vld [vmem:[%s2150_s26 + $0x150] sm:$0xff] }
  0x63   : > { %v510_v40 = vld [vmem:[%s2150_s26 + $0x2c0] sm:$0xff]  ;;  %v511_v42 = vld [vmem:[%s2150_s26 + $0x2c8] sm:$0xff]  ;;  %v1689_v44 = vcombine.low %v487_v33, %v495_v34  ;;  %v457_v19 = vld [vmem:[%s2150_s26 + $0x118] sm:$0xff]  ;;  %v1643_v21 = vcombine.low %v440_v8, %v448_v9  ;;  %v1645_v22 = vcombine.low %v441_v10, %v449_v11  ;;  %v1660_v23 = vcombine.high %v456_v17, %v464_v18 }
  0x64   : > { %v1704_v45 = vcombine.high %v502_v39, %v510_v40  ;;  %v1706_v46 = vcombine.high %v503_v41, %v511_v42  ;;  %v518_v47 = vld [vmem:[%s2150_s26 + $0x300] sm:$0xff]  ;;  %v519_v49 = vld [vmem:[%s2150_s26 + $0x308] sm:$0xff]  ;;  %v1703_v51 = vcombine.low %v502_v39, %v510_v40  ;;  %v1705_v52 = vcombine.low %v503_v41, %v511_v42  ;;  %v465_v20 = vld [vmem:[%s2150_s26 + $0x158] sm:$0xff] }
  0x65   : > { %1195 = vmatpush1.bf16.msra.mxu0 %v1655_v27  ;;  %1236 = vmatpush1.bf16.msra.mxu1 %v1657_v28  ;;  %v526_v48 = vld [vmem:[%s2150_s26 + $0x340] sm:$0xff]  ;;  %v527_v50 = vld [vmem:[%s2150_s26 + $0x348] sm:$0xff]  ;;  %v1662_v24 = vcombine.high %v457_v19, %v465_v20  ;;  %v472_v25 = vld [vmem:[%s2150_s26 + $0x190] sm:$0xff] }
  0x66   : > { %1196 = vmatprep.subr.bf16.mxu0 %v1672_v29  ;;  %1237 = vmatprep.subr.bf16.mxu1 %v1674_v30  ;;  %v1720_v53 = vcombine.high %v518_v47, %v526_v48  ;;  %v1722_v54 = vcombine.high %v519_v49, %v527_v50  ;;  %v534_v55 = vld [vmem:[%s2150_s26 + $0x380] sm:$0xff]  ;;  %v535_v57 = vld [vmem:[%s2150_s26 + $0x388] sm:$0xff]  ;;  %v1719_v59 = vcombine.low %v518_v47, %v526_v48  ;;  %v480_v26 = vld [vmem:[%s2150_s26 + $0x1d0] sm:$0xff] }
  0x67   : > { %v542_v56 = vld [vmem:[%s2150_s26 + $0x3c0] sm:$0xff]  ;;  %v543_v58 = vld [vmem:[%s2150_s26 + $0x3c8] sm:$0xff]  ;;  %v1721_v60 = vcombine.low %v519_v49, %v527_v50  ;;  %v473_v27 = vld [vmem:[%s2150_s26 + $0x198] sm:$0xff]  ;;  %v1659_v29 = vcombine.low %v456_v17, %v464_v18  ;;  %v1661_v30 = vcombine.low %v457_v19, %v465_v20  ;;  %v1676_v31 = vcombine.high %v472_v25, %v480_v26 }
  0x68   : > { %v1736_v61 = vcombine.high %v534_v55, %v542_v56  ;;  %v1738_v62 = vcombine.high %v535_v57, %v543_v58  ;;  %v1735_v4 = vcombine.low %v534_v55, %v542_v56  ;;  %v1737_v5 = vcombine.low %v535_v57, %v543_v58  ;;  %v2195_v12 = vld [vmem:[%s2332_s0] sm:$0xf]  ;;  %v481_v28 = vld [vmem:[%s2150_s26 + $0x1d8] sm:$0xff]  ;;  %v488_v33 = vld [vmem:[%s2150_s26 + $0x210] sm:$0xff] }
  0x69   : > { %1197 = vmatpush1.bf16.msra.mxu0 %v1671_v35  ;;  %1238 = vmatpush1.bf16.msra.mxu1 %v1673_v36  ;;  %v1678_v32 = vcombine.high %v473_v27, %v481_v28  ;;  %v496_v34 = vld [vmem:[%s2150_s26 + $0x250] sm:$0xff]  ;;  %v489_v35 = vld [vmem:[%s2150_s26 + $0x218] sm:$0xff]  ;;  %v426_v2 = vld [vmem:[%s2150_s26 + $0x20] sm:$0xff] }
  0x6a   : > { %1198 = vmatprep.subr.bf16.mxu0 %v1688_v37  ;;  %1239 = vmatprep.subr.bf16.mxu1 %v1690_v38  ;;  %v497_v36 = vld [vmem:[%s2150_s26 + $0x258] sm:$0xff]  ;;  %v1675_v37 = vcombine.low %v472_v25, %v480_v26  ;;  %v1677_v38 = vcombine.low %v473_v27, %v481_v28  ;;  %v1692_v39 = vcombine.high %v488_v33, %v496_v34  ;;  %v504_v41 = vld [vmem:[%s2150_s26 + $0x290] sm:$0xff]  ;;  %v434_v3 = vld [vmem:[%s2150_s26 + $0x60] sm:$0xff] }
  0x6b   : > { %v1694_v40 = vcombine.high %v489_v35, %v497_v36  ;;  %v512_v42 = vld [vmem:[%s2150_s26 + $0x2d0] sm:$0xff]  ;;  %v1632_v8 = vcombine.high %v426_v2, %v434_v3  ;;  %v442_v10 = vld [vmem:[%s2150_s26 + $0xa0] sm:$0xff] }
  0x6c   : > { %v1708_v47 = vcombine.high %v504_v41, %v512_v42  ;;  %v520_v49 = vld [vmem:[%s2150_s26 + $0x310] sm:$0xff]  ;;  %v450_v11 = vld [vmem:[%s2150_s26 + $0xe0] sm:$0xff] }
  0x6d   : > { %1199 = vmatpush1.bf16.msra.mxu0 %v1687_v43  ;;  %1240 = vmatpush1.bf16.msra.mxu1 %v1689_v44  ;;  %v505_v43 = vld [vmem:[%s2150_s26 + $0x298] sm:$0xff]  ;;  %v528_v50 = vld [vmem:[%s2150_s26 + $0x350] sm:$0xff]  ;;  %v1648_v17 = vcombine.high %v442_v10, %v450_v11  ;;  %v458_v19 = vld [vmem:[%s2150_s26 + $0x120] sm:$0xff] }
  0x6e   : > { %1200 = vmatprep.subr.bf16.mxu0 %v1704_v45  ;;  %1241 = vmatprep.subr.bf16.mxu1 %v1706_v46  ;;  %v513_v44 = vld [vmem:[%s2150_s26 + $0x2d8] sm:$0xff]  ;;  %v1691_v45 = vcombine.low %v488_v33, %v496_v34  ;;  %v1693_v46 = vcombine.low %v489_v35, %v497_v36  ;;  %v1724_v55 = vcombine.high %v520_v49, %v528_v50  ;;  %v536_v57 = vld [vmem:[%s2150_s26 + $0x390] sm:$0xff]  ;;  %v466_v20 = vld [vmem:[%s2150_s26 + $0x160] sm:$0xff] }
  0x6f   : > { %v1710_v48 = vcombine.high %v505_v43, %v513_v44  ;;  %v544_v58 = vld [vmem:[%s2150_s26 + $0x3d0] sm:$0xff]  ;;  %v1664_v25 = vcombine.high %v458_v19, %v466_v20  ;;  %v474_v27 = vld [vmem:[%s2150_s26 + $0x1a0] sm:$0xff] }
  0x70   : > { %v1740_v63 = vcombine.high %v536_v57, %v544_v58  ;;  %v482_v28 = vld [vmem:[%s2150_s26 + $0x1e0] sm:$0xff] }
  0x71   : > { %1201 = vmatpush1.bf16.msra.mxu0 %v1703_v51  ;;  %1242 = vmatpush1.bf16.msra.mxu1 %v1705_v52  ;;  %v521_v51 = vld [vmem:[%s2150_s26 + $0x318] sm:$0xff]  ;;  %v1680_v33 = vcombine.high %v474_v27, %v482_v28  ;;  %v490_v35 = vld [vmem:[%s2150_s26 + $0x220] sm:$0xff] }
  0x72   : > { %1202 = vmatprep.subr.bf16.mxu0 %v1720_v53  ;;  %1243 = vmatprep.subr.bf16.mxu1 %v1722_v54  ;;  %v529_v52 = vld [vmem:[%s2150_s26 + $0x358] sm:$0xff]  ;;  %v1707_v53 = vcombine.low %v504_v41, %v512_v42  ;;  %v1709_v54 = vcombine.low %v505_v43, %v513_v44  ;;  %v498_v36 = vld [vmem:[%s2150_s26 + $0x260] sm:$0xff] }
  0x73   : > { %v1726_v56 = vcombine.high %v521_v51, %v529_v52  ;;  %v1696_v41 = vcombine.high %v490_v35, %v498_v36  ;;  %v506_v43 = vld [vmem:[%s2150_s26 + $0x2a0] sm:$0xff] }
  0x74   : > { %v514_v44 = vld [vmem:[%s2150_s26 + $0x2e0] sm:$0xff] }
  0x75   : > { %1203 = vmatpush1.bf16.msra.mxu0 %v1719_v59  ;;  %1244 = vmatpush1.bf16.msra.mxu1 %v1721_v60  ;;  %v537_v59 = vld [vmem:[%s2150_s26 + $0x398] sm:$0xff] }
  0x76   : > { %1204 = vmatprep.subr.bf16.mxu0 %v1736_v61  ;;  %1245 = vmatprep.subr.bf16.mxu1 %v1738_v62  ;;  %v545_v60 = vld [vmem:[%s2150_s26 + $0x3d8] sm:$0xff]  ;;  %v1723_v61 = vcombine.low %v520_v49, %v528_v50  ;;  %v1725_v62 = vcombine.low %v521_v51, %v529_v52  ;;  %v1712_v49 = vcombine.high %v506_v43, %v514_v44  ;;  %v522_v51 = vld [vmem:[%s2150_s26 + $0x320] sm:$0xff] }
  0x77   : > { %v1742_v1 = vcombine.high %v537_v59, %v545_v60  ;;  %v530_v52 = vld [vmem:[%s2150_s26 + $0x360] sm:$0xff] }
  0x79   : > { %1205 = vmatpush1.bf16.msra.mxu0 %v1735_v4  ;;  %1246 = vmatpush1.bf16.msra.mxu1 %v1737_v5  ;;  %v427_v4 = vld [vmem:[%s2150_s26 + $0x28] sm:$0xff] }
  0x7a   : > { %1272 = vmatprep.subr.bf16.mxu0 %v1628_v6  ;;  %1313 = vmatprep.subr.bf16.mxu1 %v1630_v7  ;;  %v435_v5 = vld [vmem:[%s2150_s26 + $0x68] sm:$0xff]  ;;  %v1739_v6 = vcombine.low %v536_v57, %v544_v58  ;;  %v1741_v7 = vcombine.low %v537_v59, %v545_v60  ;;  %v1728_v57 = vcombine.high %v522_v51, %v530_v52  ;;  %v538_v59 = vld [vmem:[%s2150_s26 + $0x3a0] sm:$0xff] }
  0x7b   : > { %v1634_v9 = vcombine.high %v427_v4, %v435_v5  ;;  %v546_v60 = vld [vmem:[%s2150_s26 + $0x3e0] sm:$0xff] }
  0x7c   : > { %1223 = vmatmul.mubr.bf16.vlgmr.msra.gmra.mrb[0].mxu0 %v2195_v12  ;;  %1264 = vmatmul.mubr.bf16.vlgmr.msra.gmra.mrb[0].mxu1 %v2195_v12 }
  0x7d   : > { %1273 = vmatpush1.bf16.msra.mxu0 %v1627_v13  ;;  %1314 = vmatpush1.bf16.msra.mxu1 %v1629_v14  ;;  %v443_v13 = vld [vmem:[%s2150_s26 + $0xa8] sm:$0xff] }
  0x7e   : > { %1274 = vmatprep.subr.bf16.mxu0 %v1644_v15  ;;  %1315 = vmatprep.subr.bf16.mxu1 %v1646_v16  ;;  %v451_v14 = vld [vmem:[%s2150_s26 + $0xe8] sm:$0xff]  ;;  %v1631_v15 = vcombine.low %v426_v2, %v434_v3  ;;  %v1633_v16 = vcombine.low %v427_v4, %v435_v5  ;;  %v1744_v2 = vcombine.high %v538_v59, %v546_v60  ;;  %v428_v4 = vld [vmem:[%s2150_s26 + $0x30] sm:$0xff] }
  0x7f   : > { %1304 = vmatprep.mubr.bf16.mxu0 %v1835_v0  ;;  %1345 = vmatprep.mubr.bf16.mxu1 %v1835_v0  ;;  %v1650_v18 = vcombine.high %v443_v13, %v451_v14  ;;  %v436_v5 = vld [vmem:[%s2150_s26 + $0x70] sm:$0xff] }
  0x81   : > { %1275 = vmatpush1.bf16.msra.mxu0 %v1643_v21  ;;  %1316 = vmatpush1.bf16.msra.mxu1 %v1645_v22  ;;  %v459_v21 = vld [vmem:[%s2150_s26 + $0x128] sm:$0xff] }
  0x82   : > { %1276 = vmatprep.subr.bf16.mxu0 %v1660_v23  ;;  %1317 = vmatprep.subr.bf16.mxu1 %v1662_v24  ;;  %v467_v22 = vld [vmem:[%s2150_s26 + $0x168] sm:$0xff]  ;;  %v1647_v23 = vcombine.low %v442_v10, %v450_v11  ;;  %v1649_v24 = vcombine.low %v443_v13, %v451_v14  ;;  %v1636_v10 = vcombine.high %v428_v4, %v436_v5  ;;  %v444_v13 = vld [vmem:[%s2150_s26 + $0xb0] sm:$0xff] }
  0x83   : > { %v1666_v26 = vcombine.high %v459_v21, %v467_v22  ;;  %v452_v14 = vld [vmem:[%s2150_s26 + $0xf0] sm:$0xff] }
  0x85   : > { %1277 = vmatpush1.bf16.msra.mxu0 %v1659_v29  ;;  %1318 = vmatpush1.bf16.msra.mxu1 %v1661_v30  ;;  %v475_v29 = vld [vmem:[%s2150_s26 + $0x1a8] sm:$0xff] }
  0x86   : > { %1278 = vmatprep.subr.bf16.mxu0 %v1676_v31  ;;  %1319 = vmatprep.subr.bf16.mxu1 %v1678_v32  ;;  %v483_v30 = vld [vmem:[%s2150_s26 + $0x1e8] sm:$0xff]  ;;  %v1663_v31 = vcombine.low %v458_v19, %v466_v20  ;;  %v1665_v32 = vcombine.low %v459_v21, %v467_v22  ;;  %v1652_v19 = vcombine.high %v444_v13, %v452_v14  ;;  %v460_v21 = vld [vmem:[%s2150_s26 + $0x130] sm:$0xff] }
  0x87   : > { %v1682_v34 = vcombine.high %v475_v29, %v483_v30  ;;  %v468_v22 = vld [vmem:[%s2150_s26 + $0x170] sm:$0xff] }
  0x89   : > { %1279 = vmatpush1.bf16.msra.mxu0 %v1675_v37  ;;  %1320 = vmatpush1.bf16.msra.mxu1 %v1677_v38  ;;  %v491_v37 = vld [vmem:[%s2150_s26 + $0x228] sm:$0xff] }
  0x8a   : > { %1280 = vmatprep.subr.bf16.mxu0 %v1692_v39  ;;  %1321 = vmatprep.subr.bf16.mxu1 %v1694_v40  ;;  %v499_v38 = vld [vmem:[%s2150_s26 + $0x268] sm:$0xff]  ;;  %v1679_v39 = vcombine.low %v474_v27, %v482_v28  ;;  %v1681_v40 = vcombine.low %v475_v29, %v483_v30  ;;  %v1668_v27 = vcombine.high %v460_v21, %v468_v22  ;;  %v476_v29 = vld [vmem:[%s2150_s26 + $0x1b0] sm:$0xff] }
  0x8b   : > { %v1698_v42 = vcombine.high %v491_v37, %v499_v38  ;;  %v484_v30 = vld [vmem:[%s2150_s26 + $0x1f0] sm:$0xff] }
  0x8d   : > { %1281 = vmatpush1.bf16.msra.mxu0 %v1691_v45  ;;  %1322 = vmatpush1.bf16.msra.mxu1 %v1693_v46  ;;  %v507_v45 = vld [vmem:[%s2150_s26 + $0x2a8] sm:$0xff] }
  0x8e   : > { %1282 = vmatprep.subr.bf16.mxu0 %v1708_v47  ;;  %1323 = vmatprep.subr.bf16.mxu1 %v1710_v48  ;;  %v515_v46 = vld [vmem:[%s2150_s26 + $0x2e8] sm:$0xff]  ;;  %v1695_v47 = vcombine.low %v490_v35, %v498_v36  ;;  %v1697_v48 = vcombine.low %v491_v37, %v499_v38  ;;  %v1684_v35 = vcombine.high %v476_v29, %v484_v30  ;;  %v492_v37 = vld [vmem:[%s2150_s26 + $0x230] sm:$0xff] }
  0x8f   : > { %v1714_v50 = vcombine.high %v507_v45, %v515_v46  ;;  %v500_v38 = vld [vmem:[%s2150_s26 + $0x270] sm:$0xff] }
  0x91   : > { %1283 = vmatpush1.bf16.msra.mxu0 %v1707_v53  ;;  %1324 = vmatpush1.bf16.msra.mxu1 %v1709_v54  ;;  %v523_v53 = vld [vmem:[%s2150_s26 + $0x328] sm:$0xff] }
  0x92   : > { %1284 = vmatprep.subr.bf16.mxu0 %v1724_v55  ;;  %1325 = vmatprep.subr.bf16.mxu1 %v1726_v56  ;;  %v531_v54 = vld [vmem:[%s2150_s26 + $0x368] sm:$0xff]  ;;  %v1711_v55 = vcombine.low %v506_v43, %v514_v44  ;;  %v1713_v56 = vcombine.low %v507_v45, %v515_v46  ;;  %v508_v44 = vld [vmem:[%s2150_s26 + $0x2b0] sm:$0xff]  ;;  %v509_v46 = vld [vmem:[%s2150_s26 + $0x2b8] sm:$0xff] }
  0x93   : > { %v1730_v58 = vcombine.high %v523_v53, %v531_v54  ;;  %v516_v45 = vld [vmem:[%s2150_s26 + $0x2f0] sm:$0xff] }
  0x95   : > { %1285 = vmatpush1.bf16.msra.mxu0 %v1723_v61  ;;  %1326 = vmatpush1.bf16.msra.mxu1 %v1725_v62  ;;  %v539_v61 = vld [vmem:[%s2150_s26 + $0x3a8] sm:$0xff] }
  0x96   : > { %1286 = vmatprep.subr.bf16.mxu0 %v1740_v63  ;;  %1327 = vmatprep.subr.bf16.mxu1 %v1742_v1  ;;  %v547_v62 = vld [vmem:[%s2150_s26 + $0x3e8] sm:$0xff]  ;;  %v1727_v63 = vcombine.low %v522_v51, %v530_v52  ;;  %v1729_v1 = vcombine.low %v523_v53, %v531_v54  ;;  %v524_v52 = vld [vmem:[%s2150_s26 + $0x330] sm:$0xff]  ;;  %v525_v54 = vld [vmem:[%s2150_s26 + $0x338] sm:$0xff] }
  0x97   : > { %v1746_v3 = vcombine.high %v539_v61, %v547_v62  ;;  %v532_v53 = vld [vmem:[%s2150_s26 + $0x370] sm:$0xff] }
  0x99   : > { %1287 = vmatpush1.bf16.msra.mxu0 %v1739_v6  ;;  %1328 = vmatpush1.bf16.msra.mxu1 %v1741_v7  ;;  %v429_v6 = vld [vmem:[%s2150_s26 + $0x38] sm:$0xff] }
  0x9a   : > { %1354 = vmatprep.subr.bf16.mxu0 %v1632_v8  ;;  %1395 = vmatprep.subr.bf16.mxu1 %v1634_v9  ;;  %v437_v7 = vld [vmem:[%s2150_s26 + $0x78] sm:$0xff]  ;;  %v1743_v8 = vcombine.low %v538_v59, %v546_v60  ;;  %v1745_v9 = vcombine.low %v539_v61, %v547_v62  ;;  %v540_v60 = vld [vmem:[%s2150_s26 + $0x3b0] sm:$0xff] }
  0x9b   : > { %v1638_v11 = vcombine.high %v429_v6, %v437_v7  ;;  %v548_v61 = vld [vmem:[%s2150_s26 + $0x3f0] sm:$0xff]  ;;  %v541_v62 = vld [vmem:[%s2150_s26 + $0x3b8] sm:$0xff] }
  0x9c   : > { %1305 = vmatmul.mubr.bf16.vlgmr.msra.gmra.mrb[4].mxu0 %v2195_v12  ;;  %1346 = vmatmul.mubr.bf16.vlgmr.msra.gmra.mrb[4].mxu1 %v2195_v12 }
  0x9d   : > { %1355 = vmatpush1.bf16.msra.mxu0 %v1631_v15  ;;  %1396 = vmatpush1.bf16.msra.mxu1 %v1633_v16  ;;  %v445_v15 = vld [vmem:[%s2150_s26 + $0xb8] sm:$0xff] }
  0x9e   : > { %1356 = vmatprep.subr.bf16.mxu0 %v1648_v17  ;;  %1397 = vmatprep.subr.bf16.mxu1 %v1650_v18  ;;  %v453_v16 = vld [vmem:[%s2150_s26 + $0xf8] sm:$0xff]  ;;  %v1635_v17 = vcombine.low %v428_v4, %v436_v5  ;;  %v1637_v18 = vcombine.low %v429_v6, %v437_v7  ;;  %v1747_v5 = vcombine.low %v540_v60, %v548_v61 }
  0x9f   : > { %1386 = vmatprep.mubr.bf16.mxu0 %v1835_v0  ;;  %1427 = vmatprep.mubr.bf16.mxu1 %v1835_v0  ;;  %v1654_v20 = vcombine.high %v445_v15, %v453_v16 }
  0xa1   : > { %1357 = vmatpush1.bf16.msra.mxu0 %v1647_v23  ;;  %1398 = vmatpush1.bf16.msra.mxu1 %v1649_v24  ;;  %v461_v23 = vld [vmem:[%s2150_s26 + $0x138] sm:$0xff] }
  0xa2   : > { %1358 = vmatprep.subr.bf16.mxu0 %v1664_v25  ;;  %1399 = vmatprep.subr.bf16.mxu1 %v1666_v26  ;;  %v469_v24 = vld [vmem:[%s2150_s26 + $0x178] sm:$0xff]  ;;  %v1651_v25 = vcombine.low %v444_v13, %v452_v14  ;;  %v1653_v26 = vcombine.low %v445_v15, %v453_v16 }
  0xa3   : > { %v1670_v28 = vcombine.high %v461_v23, %v469_v24 }
  0xa5   : > { %1359 = vmatpush1.bf16.msra.mxu0 %v1663_v31  ;;  %1400 = vmatpush1.bf16.msra.mxu1 %v1665_v32  ;;  %v477_v31 = vld [vmem:[%s2150_s26 + $0x1b8] sm:$0xff] }
  0xa6   : > { %1360 = vmatprep.subr.bf16.mxu0 %v1680_v33  ;;  %1401 = vmatprep.subr.bf16.mxu1 %v1682_v34  ;;  %v485_v32 = vld [vmem:[%s2150_s26 + $0x1f8] sm:$0xff]  ;;  %v1667_v33 = vcombine.low %v460_v21, %v468_v22  ;;  %v1669_v34 = vcombine.low %v461_v23, %v469_v24 }
  0xa7   : > { %v1686_v36 = vcombine.high %v477_v31, %v485_v32 }
  0xa9   : > { %1361 = vmatpush1.bf16.msra.mxu0 %v1679_v39  ;;  %1402 = vmatpush1.bf16.msra.mxu1 %v1681_v40  ;;  %v493_v39 = vld [vmem:[%s2150_s26 + $0x238] sm:$0xff] }
  0xaa   : > { %1362 = vmatprep.subr.bf16.mxu0 %v1696_v41  ;;  %1403 = vmatprep.subr.bf16.mxu1 %v1698_v42  ;;  %v501_v40 = vld [vmem:[%s2150_s26 + $0x278] sm:$0xff]  ;;  %v1683_v41 = vcombine.low %v476_v29, %v484_v30  ;;  %v1700_v42 = vcombine.high %v492_v37, %v500_v38 }
  0xab   : > { %v1702_v43 = vcombine.high %v493_v39, %v501_v40 }
  0xad   : > { %1363 = vmatpush1.bf16.msra.mxu0 %v1695_v47  ;;  %1404 = vmatpush1.bf16.msra.mxu1 %v1697_v48  ;;  %v517_v47 = vld [vmem:[%s2150_s26 + $0x2f8] sm:$0xff]  ;;  %v1699_v48 = vcombine.low %v492_v37, %v500_v38 }
  0xae   : > { %1364 = vmatprep.subr.bf16.mxu0 %v1712_v49  ;;  %1405 = vmatprep.subr.bf16.mxu1 %v1714_v50  ;;  %v1701_v49 = vcombine.low %v493_v39, %v501_v40  ;;  %v1716_v50 = vcombine.high %v508_v44, %v516_v45  ;;  %v1718_v51 = vcombine.high %v509_v46, %v517_v47 }
  0xb1   : > { %1365 = vmatpush1.bf16.msra.mxu0 %v1711_v55  ;;  %1406 = vmatpush1.bf16.msra.mxu1 %v1713_v56  ;;  %v533_v55 = vld [vmem:[%s2150_s26 + $0x378] sm:$0xff]  ;;  %v1715_v56 = vcombine.low %v508_v44, %v516_v45 }
  0xb2   : > { %1366 = vmatprep.subr.bf16.mxu0 %v1728_v57  ;;  %1407 = vmatprep.subr.bf16.mxu1 %v1730_v58  ;;  %v1717_v57 = vcombine.low %v509_v46, %v517_v47  ;;  %v1732_v58 = vcombine.high %v524_v52, %v532_v53  ;;  %v1734_v59 = vcombine.high %v525_v54, %v533_v55 }
  0xb5   : > { %1367 = vmatpush1.bf16.msra.mxu0 %v1727_v63  ;;  %1408 = vmatpush1.bf16.msra.mxu1 %v1729_v1  ;;  %v549_v63 = vld [vmem:[%s2150_s26 + $0x3f8] sm:$0xff]  ;;  %v1731_v1 = vcombine.low %v524_v52, %v532_v53 }
  0xb6   : > { %1368 = vmatprep.subr.bf16.mxu0 %v1744_v2  ;;  %1409 = vmatprep.subr.bf16.mxu1 %v1746_v3  ;;  %v1733_v2 = vcombine.low %v525_v54, %v533_v55  ;;  %v1748_v3 = vcombine.high %v540_v60, %v548_v61  ;;  %v1750_v4 = vcombine.high %v541_v62, %v549_v63 }
  0xb7   : > { %v1749_v6 = vcombine.low %v541_v62, %v549_v63 }
  0xb9   : > { %1369 = vmatpush1.bf16.msra.mxu0 %v1743_v8  ;;  %1410 = vmatpush1.bf16.msra.mxu1 %v1745_v9 }
  0xba   : > { %1436 = vmatprep.subr.bf16.mxu0 %v1636_v10  ;;  %1477 = vmatprep.subr.bf16.mxu1 %v1638_v11 }
  0xbc   : > { %1387 = vmatmul.mubr.bf16.vlgmr.msra.gmra.mrb[8].mxu0 %v2195_v12  ;;  %1428 = vmatmul.mubr.bf16.vlgmr.msra.gmra.mrb[8].mxu1 %v2195_v12 }
  0xbd   : > { %1437 = vmatpush1.bf16.msra.mxu0 %v1635_v17  ;;  %1478 = vmatpush1.bf16.msra.mxu1 %v1637_v18 }
  0xbe   : > { %1438 = vmatprep.subr.bf16.mxu0 %v1652_v19  ;;  %1479 = vmatprep.subr.bf16.mxu1 %v1654_v20 }
  0xbf   : > { %1468 = vmatprep.mubr.bf16.mxu0 %v1835_v0  ;;  %1509 = vmatprep.mubr.bf16.mxu1 %v1835_v0  ;;  %v1685_v0 = vcombine.low %v477_v31, %v485_v32 }
  0xc1   : > { %1439 = vmatpush1.bf16.msra.mxu0 %v1651_v25  ;;  %1480 = vmatpush1.bf16.msra.mxu1 %v1653_v26 }
  0xc2   : > { %1440 = vmatprep.subr.bf16.mxu0 %v1668_v27  ;;  %1481 = vmatprep.subr.bf16.mxu1 %v1670_v28 }
  0xc5   : > { %1441 = vmatpush1.bf16.msra.mxu0 %v1667_v33  ;;  %1482 = vmatpush1.bf16.msra.mxu1 %v1669_v34 }
  0xc6   : > { %1442 = vmatprep.subr.bf16.mxu0 %v1684_v35  ;;  %1483 = vmatprep.subr.bf16.mxu1 %v1686_v36 }
  0xc9   : > { %1443 = vmatpush1.bf16.msra.mxu0 %v1683_v41  ;;  %1484 = vmatpush1.bf16.msra.mxu1 %v1685_v0 }
  0xca   : > { %1444 = vmatprep.subr.bf16.mxu0 %v1700_v42  ;;  %1485 = vmatprep.subr.bf16.mxu1 %v1702_v43 }
  0xcd   : > { %1445 = vmatpush1.bf16.msra.mxu0 %v1699_v48  ;;  %1486 = vmatpush1.bf16.msra.mxu1 %v1701_v49 }
  0xce   : > { %1446 = vmatprep.subr.bf16.mxu0 %v1716_v50  ;;  %1487 = vmatprep.subr.bf16.mxu1 %v1718_v51 }
  0xd1   : > { %1447 = vmatpush1.bf16.msra.mxu0 %v1715_v56  ;;  %1488 = vmatpush1.bf16.msra.mxu1 %v1717_v57 }
  0xd2   : > { %1448 = vmatprep.subr.bf16.mxu0 %v1732_v58  ;;  %1489 = vmatprep.subr.bf16.mxu1 %v1734_v59 }
  0xd5   : > { %1449 = vmatpush1.bf16.msra.mxu0 %v1731_v1  ;;  %1490 = vmatpush1.bf16.msra.mxu1 %v1733_v2 }
  0xd6   : > { %1450 = vmatprep.subr.bf16.mxu0 %v1748_v3  ;;  %1491 = vmatprep.subr.bf16.mxu1 %v1750_v4 }
  0xd9   : > { %1451 = vmatpush1.bf16.msra.mxu0 %v1747_v5  ;;  %1492 = vmatpush1.bf16.msra.mxu1 %v1749_v6 }
  0xdc   : > { %1469 = vmatmul.mubr.bf16.vlgmr.msra.gmra.mrb[12].mxu0 %v2195_v12  ;;  %1510 = vmatmul.mubr.bf16.vlgmr.msra.gmra.mrb[12].mxu1 %v2195_v12 }
 0x14f   : > { %v1224_v7 = vpop.f32.mrb[0].mxu0  ;;  %v1265_v8 = vpop.f32.mrb[0].mxu1 }
 0x150   : > { %1779 = vtanh.f32 %v1224_v7  ;;  %v1226_v9 = vpop.f32.mrb[1].mxu0  ;;  %v1267_v10 = vpop.f32.mrb[1].mxu1 }
 0x151   : > { %1781 = vtanh.f32 %v1265_v8  ;;  %v1228_v11 = vpop.f32.mrb[2].mxu0  ;;  %v1269_v13 = vpop.f32.mrb[2].mxu1 }
 0x152   : > { %1783 = vtanh.f32 %v1226_v9  ;;  %v1229_v14 = vpop.f32.mrb[3].mxu0  ;;  %v1270_v15 = vpop.f32.mrb[3].mxu1 }
 0x153   : > { %1785 = vtanh.f32 %v1267_v10 }
 0x15a   : > { %v1780_v12 = vpop.eup %1779 }
 0x15b   : > { %v1782_v16 = vpop.eup %1781  ;;  %1534 = vst [vmem:[%s2304_s5] sm:$0xff] %v1780_v12 }
 0x15c   : > { %v1784_v17 = vpop.eup %1783  ;;  %1536 = vst [vmem:[%s2304_s5 + $0x10] sm:$0xff] %v1782_v16 }
 0x15d   : > { %v1786_v18 = vpop.eup %1785  ;;  %1535 = vst [vmem:[%s2304_s5 + $0x8] sm:$0xff] %v1784_v17 }
 0x15e   : > { %1537 = vst [vmem:[%s2304_s5 + $0x18] sm:$0xff] %v1786_v18 }
 0x16f   : > { %v1306_v19 = vpop.f32.mrb[4].mxu0  ;;  %v1347_v20 = vpop.f32.mrb[4].mxu1 }
 0x170   : > { %1787 = vtanh.f32 %v1306_v19  ;;  %v1308_v21 = vpop.f32.mrb[5].mxu0  ;;  %v1349_v22 = vpop.f32.mrb[5].mxu1 }
 0x171   : > { %1789 = vtanh.f32 %v1347_v20  ;;  %v1310_v23 = vpop.f32.mrb[6].mxu0  ;;  %v1351_v24 = vpop.f32.mrb[6].mxu1 }
 0x172   : > { %1791 = vtanh.f32 %v1308_v21  ;;  %v1311_v25 = vpop.f32.mrb[7].mxu0  ;;  %v1352_v26 = vpop.f32.mrb[7].mxu1 }
 0x173   : > { %1793 = vtanh.f32 %v1349_v22 }
 0x17a   : > { %v1788_v27 = vpop.eup %1787 }
 0x17b   : > { %v1790_v28 = vpop.eup %1789  ;;  %1538 = vst [vmem:[%s2304_s5 + $0x20] sm:$0xff] %v1788_v27 }
 0x17c   : > { %v1792_v29 = vpop.eup %1791  ;;  %1540 = vst [vmem:[%s2304_s5 + $0x30] sm:$0xff] %v1790_v28 }
 0x17d   : > { %v1794_v30 = vpop.eup %1793  ;;  %1539 = vst [vmem:[%s2304_s5 + $0x28] sm:$0xff] %v1792_v29 }
 0x17e   : > { %1541 = vst [vmem:[%s2304_s5 + $0x38] sm:$0xff] %v1794_v30 }
 0x18f   : > { %v1388_v31 = vpop.f32.mrb[8].mxu0  ;;  %v1429_v32 = vpop.f32.mrb[8].mxu1 }
 0x190   : > { %1795 = vtanh.f32 %v1388_v31  ;;  %v1390_v33 = vpop.f32.mrb[9].mxu0  ;;  %v1431_v34 = vpop.f32.mrb[9].mxu1 }
 0x191   : > { %1797 = vtanh.f32 %v1429_v32  ;;  %v1392_v35 = vpop.f32.mrb[10].mxu0  ;;  %v1433_v36 = vpop.f32.mrb[10].mxu1 }
 0x192   : > { %1799 = vtanh.f32 %v1390_v33  ;;  %v1393_v37 = vpop.f32.mrb[11].mxu0  ;;  %v1434_v38 = vpop.f32.mrb[11].mxu1 }
 0x193   : > { %1801 = vtanh.f32 %v1431_v34 }
 0x19a   : > { %v1796_v39 = vpop.eup %1795 }
 0x19b   : > { %v1798_v40 = vpop.eup %1797  ;;  %1542 = vst [vmem:[%s2304_s5 + $0x40] sm:$0xff] %v1796_v39 }
 0x19c   : > { %v1800_v41 = vpop.eup %1799  ;;  %1544 = vst [vmem:[%s2304_s5 + $0x50] sm:$0xff] %v1798_v40 }
 0x19d   : > { %v1802_v0 = vpop.eup %1801  ;;  %1543 = vst [vmem:[%s2304_s5 + $0x48] sm:$0xff] %v1800_v41 }
 0x19e   : > { %1545 = vst [vmem:[%s2304_s5 + $0x58] sm:$0xff] %v1802_v0 }
 0x1af   : > { %v1470_v42 = vpop.f32.mrb[12].mxu0  ;;  %v1511_v43 = vpop.f32.mrb[12].mxu1 }
 0x1b0   : > { %1803 = vtanh.f32 %v1470_v42  ;;  %v1472_v44 = vpop.f32.mrb[13].mxu0  ;;  %v1513_v45 = vpop.f32.mrb[13].mxu1 }
 0x1b1   : > { %1805 = vtanh.f32 %v1511_v43  ;;  %v1474_v46 = vpop.f32.mrb[14].mxu0  ;;  %v1515_v47 = vpop.f32.mrb[14].mxu1 }
 0x1b2   : > { %1807 = vtanh.f32 %v1472_v44  ;;  %v1475_v48 = vpop.f32.mrb[15].mxu0  ;;  %v1516_v49 = vpop.f32.mrb[15].mxu1 }
 0x1b3   : > { %1809 = vtanh.f32 %v1513_v45 }
 0x1ba   : > { %v1804_v50 = vpop.eup %1803 }
 0x1bb   : > { %v1806_v51 = vpop.eup %1805  ;;  %1546 = vst [vmem:[%s2304_s5 + $0x60] sm:$0xff] %v1804_v50 }
 0x1bc   : > { %v1808_v52 = vpop.eup %1807  ;;  %1548 = vst [vmem:[%s2304_s5 + $0x70] sm:$0xff] %v1806_v51 }
 0x1bd   : > { %v1810_v53 = vpop.eup %1809  ;;  %1547 = vst [vmem:[%s2304_s5 + $0x68] sm:$0xff] %v1808_v52 }
 0x1be   : > { %1549 = vst [vmem:[%s2304_s5 + $0x78] sm:$0xff] %v1810_v53 }
 0x1bf PF: > { %p9_p9 = scmp.ge.s32.totalorder %s1868_s13, 6   ;;  %s2335_s9 = smov %s1829_s10 }
 0x1c0   : > { %s2336_s10 = smov %s1877_s16  ;;  %s2337_s11 = smov %s1868_s13 }
 0x1c1   :  { %11 = sbr.rel (!%p9_p9) target bundleno = 2 (0x2), region = 86 }

</bundles_post_ra>
